<compile_context>
chip_gen: v7x
topology: tpu7x:2x2x1
jax: 0.10.0
libtpu: 0.0.40
codegen_flags: <defaults>
</compile_context>

<pallas_src>
import functools

import jax
import jax.numpy as jnp
from jax import lax
from jax.experimental import pallas as pl
from jax.experimental.pallas import tpu as pltpu


def _spatial_atten_kernel(lo_ref, hi_ref, w1_ref, b1_ref, w2_ref,
                          outx_ref, outatt_ref, *, mask_edges):
    # lo_ref  : (C_in, TH, Wo)  padded-x rows [t*TH, (t+1)*TH)            (VMEM)
    # hi_ref  : (C_in, 8,  Wo)  padded-x rows [(t+1)*TH, (t+1)*TH+8)      (VMEM)
    # w1_ref  : (C_out*C_in*9,) conv1 weights, BN scale folded in         (SMEM)
    # b1_ref  : (C_out,)        folded BN bias                            (SMEM)
    # w2_ref  : (C_out*C_out,)  1x1 conv2 weights                         (SMEM)
    # outx_ref, outatt_ref : (C_in, TH, Wo)
    C_in, TH, Wo = lo_ref.shape
    C_out = b1_ref.shape[0]
    groups = C_in // C_out          # 4 for the module's expand(...,3,4,...)
    per_o = C_in * 9

    # hoisted masks (built once per grid step)
    row_idx = lax.broadcasted_iota(jnp.int32, (TH, Wo), 0)
    keep_rolled_row = row_idx < (TH - 1)
    if mask_edges:                  # only needed when W is a multiple of 128
        col_idx = lax.broadcasted_iota(jnp.int32, (TH, Wo), 1)
        not_first_col = col_idx > 0
        not_last_col = col_idx < (Wo - 1)

    def shift_rows_up(plane, fill_row):
        # out row r = plane row r+1 for r < TH-1, last row = fill_row (XLU roll)
        rolled = pltpu.roll(plane, shift=TH - 1, axis=0)
        return jnp.where(keep_rolled_row, rolled, fill_row)

    def tap_left(plane):            # kw = 0 : col j -> plane col j-1
        t = pltpu.roll(plane, shift=1, axis=1)
        if mask_edges:
            t = jnp.where(not_first_col, t, 0.0)
        return t

    def tap_right(plane):           # kw = 2 : col j -> plane col j+1
        t = pltpu.roll(plane, shift=Wo - 1, axis=1)
        if mask_edges:
            t = jnp.where(not_last_col, t, 0.0)
        return t

    # conv1 accumulators (values, not refs), initialised with folded BN bias
    accs = [jnp.full((TH, Wo), b1_ref[o], jnp.float32) for o in range(C_out)]

    for i in range(C_in):
        lo = lo_ref[i]                         # window rows [0, TH)   -> kh = 0
        h0 = hi_ref[i, 0:1, :]                 # window row TH
        h1 = hi_ref[i, 1:2, :]                 # window row TH+1
        t1 = shift_rows_up(lo, h0)             # kh = 1 tap
        t2 = shift_rows_up(t1, h1)             # kh = 2 tap
        taps = []
        for tv in (lo, t1, t2):                # kh-major, kw-minor ordering
            taps.extend((tap_left(tv), tv, tap_right(tv)))
        # fused 9-tap weighted sum per output channel; one acc RMW per (i, o)
        for o in range(C_out):
            base = o * per_o + i * 9
            c = taps[0] * w1_ref[base]
            for k in range(1, 9):
                c = c + taps[k] * w1_ref[base + k]
            accs[o] = accs[o] + c

    # conv1 BN(folded) + ReLU
    y1 = [jnp.maximum(a, 0.0) for a in accs]

    # conv2 (1x1) + ReLU + sigmoid  -> C_out attention maps
    atts = []
    for o in range(C_out):
        a2 = y1[0] * w2_ref[o * C_out]
        for i2 in range(1, C_out):
            a2 = a2 + y1[i2] * w2_ref[o * C_out + i2]
        atts.append(jax.nn.sigmoid(jnp.maximum(a2, 0.0)))

    # (att + 1) computed once per map; residual re-read from resident refs
    aps = [a + 1.0 for a in atts]
    for c in range(C_in):
        g = c // groups
        resid = shift_rows_up(lo_ref[c], hi_ref[c, 0:1, :])
        outatt_ref[c] = atts[g]
        outx_ref[c] = resid * aps[g]


def _round_up(v, m):
    return (v + m - 1) // m * m


@functools.partial(jax.jit, static_argnames=("row_tile",))
def spatial_atten(x, w1, bn_gamma, bn_beta, bn_mean, bn_var, w2, *,
                  row_tile=None):
    """x: (B, 12, H, W) f32.  Returns (x_out, spatial_att), both (B, 12, H, W)."""
    B, C_in, H, W = x.shape
    C_out = w1.shape[0]
    assert C_in == 4 * C_out, "module's expand(...,3,4,...) implies C_in == 4*C_out"
    eps = 1e-5

    # fold eval-mode BatchNorm into conv1 weights / bias
    # TODO(synk): PyTorch training-mode BN (batch statistics) is not reproduced.
    scale = bn_gamma / jnp.sqrt(bn_var + eps)                      # (C_out,)
    b1 = (bn_beta - bn_mean * scale).astype(jnp.float32)           # (C_out,)
    w1s = (w1 * scale[:, None, None, None]).reshape(-1).astype(jnp.float32)
    w2f = w2.reshape(-1).astype(jnp.float32)

    # lane-dense width; row tile sized so the double-buffered working set stays
    # well under v7x's 64 MiB VMEM while amortising the 8-row halo stream.
    Wo = _round_up(W, 128)
    if row_tile is None:
        target = 65536                              # f32 elems per (TH, Wo) slab
        row_tile = max(8, min(256, (target // Wo) // 8 * 8))
    TH = min(int(row_tile), _round_up(H, 8))
    TH = max(8, (TH // 8) * 8)
    H_eff = _round_up(H, TH)
    Hp = H_eff + 8                                  # +1 top halo, rest bottom fill
    nT = H_eff // TH

    # padded x (single pre-pass): row 0 = top halo (zeros), rows [1, H+1) = data,
    # rest zeros; cols [0, W) = data, rest zeros.
    x_pad = jnp.pad(x.astype(jnp.float32),
                    ((0, 0), (0, 0), (1, Hp - H - 1), (0, Wo - W)))

    out_shape = (
        jax.ShapeDtypeStruct((B, C_in, H_eff, Wo), jnp.float32),
        jax.ShapeDtypeStruct((B, C_in, H_eff, Wo), jnp.float32),
    )

    th8 = TH // 8
    grid_spec = pltpu.PrefetchScalarGridSpec(
        num_scalar_prefetch=0,
        grid=(B, nT),
        in_specs=[
            # main row tile (padded rows [t*TH, (t+1)*TH))
            pl.BlockSpec((None, C_in, TH, Wo), lambda b, t: (b, 0, t, 0)),
            # 8-row block just below it (supplies the 2-row vertical halo)
            pl.BlockSpec((None, C_in, 8, Wo),
                         lambda b, t: (b, 0, (t + 1) * th8, 0)),
            # scalar conv parameters in SMEM
            pl.BlockSpec(memory_space=pltpu.MemorySpace.SMEM),
            pl.BlockSpec(memory_space=pltpu.MemorySpace.SMEM),
            pl.BlockSpec(memory_space=pltpu.MemorySpace.SMEM),
        ],
        out_specs=[
            pl.BlockSpec((None, C_in, TH, Wo), lambda b, t: (b, 0, t, 0)),
            pl.BlockSpec((None, C_in, TH, Wo), lambda b, t: (b, 0, t, 0)),
        ],
    )

    # double-buffered blocks + headroom for in-kernel temporaries
    blk = C_in * TH * Wo * 4
    halo = C_in * 8 * Wo * 4
    vmem_need = 2 * (3 * blk + halo) + 32 * TH * Wo * 4 + (1 << 20)
    vmem_limit = int(min(max(vmem_need, 32 * 1024 * 1024), 56 * 1024 * 1024))

    kernel = functools.partial(_spatial_atten_kernel, mask_edges=(Wo == W))

    out_x, out_att = pl.pallas_call(
        kernel,
        out_shape=out_shape,
        grid_spec=grid_spec,
        compiler_params=pltpu.CompilerParams(
            dimension_semantics=("parallel", "parallel"),
            vmem_limit_bytes=vmem_limit),
    )(x_pad, x_pad, w1s, b1, w2f)

    # skip the extra HBM crop pass whenever no padding was added
    if H_eff == H and Wo == W:
        return out_x, out_att
    return out_x[:, :, :H, :W], out_att[:, :, :H, :W]


def _reference(x, w1, bn_gamma, bn_beta, bn_mean, bn_var, w2):
    """Pure-JAX reference (mirrors the PyTorch forward, eval-mode BN)."""
    eps = 1e-5
    y1 = lax.conv_general_dilated(
        x, w1, window_strides=(1, 1), padding="SAME",
        dimension_numbers=("NCHW", "OIHW", "NCHW"),
        precision=lax.Precision.HIGHEST)
    scale = bn_gamma / jnp.sqrt(bn_var + eps)
    bias = bn_beta - bn_mean * scale
    y1 = jnp.maximum(y1 * scale[None, :, None, None] + bias[None, :, None, None], 0.0)
    w2_4d = w2.reshape(w2.shape[0], w2.shape[1], 1, 1)
    y2 = lax.conv_general_dilated(
        y1, w2_4d, window_strides=(1, 1), padding="VALID",
        dimension_numbers=("NCHW", "OIHW", "NCHW"),
        precision=lax.Precision.HIGHEST)
    y2 = jnp.maximum(y2, 0.0)
    att3 = jax.nn.sigmoid(y2)                       # (B, 3, H, W)
    att12 = jnp.repeat(att3, 4, axis=1)             # (B, 12, H, W)
    return x * att12 + x, att12


if __name__ == "__main__":
    key = jax.random.PRNGKey(0)
    k_x, k_w1, k_g, k_b, k_m, k_v, k_w2, k_x2, k_x3 = jax.random.split(key, 9)

    B, C_in, C_out = 2, 12, 3

    # conv1: (out=3, in=12, 3, 3), bias=False
    w1 = jax.random.normal(k_w1, (C_out, C_in, 3, 3), jnp.float32) * 0.1
    # BatchNorm2d(3) parameters (eval-mode / running stats)
    bn_gamma = 1.0 + 0.1 * jax.random.normal(k_g, (C_out,), jnp.float32)
    bn_beta = 0.1 * jax.random.normal(k_b, (C_out,), jnp.float32)
    bn_mean = 0.1 * jax.random.normal(k_m, (C_out,), jnp.float32)
    bn_var = jnp.abs(jax.random.normal(k_v, (C_out,), jnp.float32)) + 0.5
    # conv2: 1x1, (3, 3), bias=False
    w2 = jax.random.normal(k_w2, (C_out, C_out), jnp.float32) * 0.1

    # case 1: small square image, auto row tile (single tile)
    x = jax.random.normal(k_x, (B, C_in, 16, 16), jnp.float32)
    out_x, out_att = spatial_atten(x, w1, bn_gamma, bn_beta, bn_mean, bn_var, w2)
    jax.block_until_ready((out_x, out_att))
    ref_x, ref_att = _reference(x, w1, bn_gamma, bn_beta, bn_mean, bn_var, w2)
    assert jnp.allclose(out_x, ref_x, atol=1e-4, rtol=1e-4), "x_out mismatch (case 1)"
    assert jnp.allclose(out_att, ref_att, atol=1e-4, rtol=1e-4), "spatial_att mismatch (case 1)"

    # case 2: non-square, H/W not tile-aligned, forced multi-row-tile path
    x2 = jax.random.normal(k_x2, (B, C_in, 20, 27), jnp.float32)
    out_x2, out_att2 = spatial_atten(x2, w1, bn_gamma, bn_beta, bn_mean, bn_var,
                                     w2, row_tile=8)
    jax.block_until_ready((out_x2, out_att2))
    ref_x2, ref_att2 = _reference(x2, w1, bn_gamma, bn_beta, bn_mean, bn_var, w2)
    assert jnp.allclose(out_x2, ref_x2, atol=1e-4, rtol=1e-4), "x_out mismatch (case 2)"
    assert jnp.allclose(out_att2, ref_att2, atol=1e-4, rtol=1e-4), "spatial_att mismatch (case 2)"

    # case 3: W multiple of 128 -> exercises the lane-wrap edge mask and the
    # crop-free return path
    x3 = jax.random.normal(k_x3, (1, C_in, 16, 128), jnp.float32)
    out_x3, out_att3 = spatial_atten(x3, w1, bn_gamma, bn_beta, bn_mean, bn_var, w2)
    jax.block_until_ready((out_x3, out_att3))
    ref_x3, ref_att3 = _reference(x3, w1, bn_gamma, bn_beta, bn_mean, bn_var, w2)
    assert jnp.allclose(out_x3, ref_x3, atol=1e-4, rtol=1e-4), "x_out mismatch (case 3)"
    assert jnp.allclose(out_att3, ref_att3, atol=1e-4, rtol=1e-4), "spatial_att mismatch (case 3)"

    print("KERNEL_OK")
</pallas_src>

<mosaic_0001>
module attributes {stable_mosaic.version = 11 : i64} {
  func.func @_spatial_atten_kernel(%arg0: i32, %arg1: i32, %arg2: memref<1x12x16x128xf32, #tpu.memory_space<vmem>>, %arg3: memref<1x12x8x128xf32, #tpu.memory_space<vmem>>, %arg4: memref<324xf32, #tpu.memory_space<smem>>, %arg5: memref<3xf32, #tpu.memory_space<smem>>, %arg6: memref<9xf32, #tpu.memory_space<smem>>, %arg7: memref<1x12x16x128xf32, #tpu.memory_space<vmem>>, %arg8: memref<1x12x16x128xf32, #tpu.memory_space<vmem>>) attributes {dimension_semantics = [#tpu.dimension_semantics<parallel>, #tpu.dimension_semantics<parallel>], iteration_bounds = array<i64: 2, 1>, scalar_prefetch = 0 : i64, scratch_operands = 0 : i64, tpu.core_type = #tpu.core_type<tc>, window_params = [{transform_indices = @transform_0, window_bounds = array<i64: 1, 12, 16, 128>}, {transform_indices = @transform_1, window_bounds = array<i64: 1, 12, 8, 128>}, {transform_indices = @transform_2, window_bounds = array<i64: 324>}, {transform_indices = @transform_3, window_bounds = array<i64: 3>}, {transform_indices = @transform_4, window_bounds = array<i64: 9>}, {transform_indices = @transform_5, window_bounds = array<i64: 1, 12, 16, 128>}, {transform_indices = @transform_6, window_bounds = array<i64: 1, 12, 16, 128>}]} {
    %0 = tpu.iota {dimensions = array<i32: 0>} : vector<16x128xi32>
    %c15_i32 = arith.constant 15 : i32
    %1 = vector.broadcast %c15_i32 : i32 to vector<16x128xi32>
    %2 = arith.cmpi slt, %0, %1 : vector<16x128xi32>
    %c0 = arith.constant 0 : index
    %3 = memref.load %arg5[%c0] : memref<3xf32, #tpu.memory_space<smem>>
    %4 = vector.broadcast %3 : f32 to vector<16x128xf32>
    %c1 = arith.constant 1 : index
    %5 = memref.load %arg5[%c1] : memref<3xf32, #tpu.memory_space<smem>>
    %6 = vector.broadcast %5 : f32 to vector<16x128xf32>
    %c2 = arith.constant 2 : index
    %7 = memref.load %arg5[%c2] : memref<3xf32, #tpu.memory_space<smem>>
    %8 = vector.broadcast %7 : f32 to vector<16x128xf32>
    %c0_0 = arith.constant 0 : index
    %c0_1 = arith.constant 0 : index
    %c0_2 = arith.constant 0 : index
    %c0_3 = arith.constant 0 : index
    %9 = vector.load %arg2[%c0_0, %c0_1, %c0_2, %c0_3] : memref<1x12x16x128xf32, #tpu.memory_space<vmem>>, vector<1x1x16x128xf32>
    %10 = vector.shape_cast %9 : vector<1x1x16x128xf32> to vector<16x128xf32>
    %c0_4 = arith.constant 0 : index
    %c0_5 = arith.constant 0 : index
    %c0_6 = arith.constant 0 : index
    %c0_7 = arith.constant 0 : index
    %11 = vector.load %arg3[%c0_4, %c0_5, %c0_6, %c0_7] : memref<1x12x8x128xf32, #tpu.memory_space<vmem>>, vector<1x1x1x128xf32>
    %12 = vector.shape_cast %11 : vector<1x1x1x128xf32> to vector<1x128xf32>
    %c0_8 = arith.constant 0 : index
    %c0_9 = arith.constant 0 : index
    %c1_10 = arith.constant 1 : index
    %c0_11 = arith.constant 0 : index
    %13 = vector.load %arg3[%c0_8, %c0_9, %c1_10, %c0_11] : memref<1x12x8x128xf32, #tpu.memory_space<vmem>>, vector<1x1x1x128xf32>
    %14 = vector.shape_cast %13 : vector<1x1x1x128xf32> to vector<1x128xf32>
    %c15_i32_12 = arith.constant 15 : i32
    %15 = tpu.dynamic_rotate %10 by %c15_i32_12 dim 0 : vector<16x128xf32>, i32 -> vector<16x128xf32>
    %16 = vector.shape_cast %12 : vector<1x128xf32> to vector<1x128xf32>
    %17 = vector.broadcast %16 : vector<1x128xf32> to vector<16x128xf32>
    %18 = arith.select %2, %15, %17 : vector<16x128xi1>, vector<16x128xf32>
    %c15_i32_13 = arith.constant 15 : i32
    %19 = tpu.dynamic_rotate %18 by %c15_i32_13 dim 0 : vector<16x128xf32>, i32 -> vector<16x128xf32>
    %20 = vector.shape_cast %14 : vector<1x128xf32> to vector<1x128xf32>
    %21 = vector.broadcast %20 : vector<1x128xf32> to vector<16x128xf32>
    %22 = arith.select %2, %19, %21 : vector<16x128xi1>, vector<16x128xf32>
    %c1_i32 = arith.constant 1 : i32
    %23 = tpu.dynamic_rotate %10 by %c1_i32 dim 1 : vector<16x128xf32>, i32 -> vector<16x128xf32>
    %c127_i32 = arith.constant 127 : i32
    %24 = tpu.dynamic_rotate %10 by %c127_i32 dim 1 : vector<16x128xf32>, i32 -> vector<16x128xf32>
    %c1_i32_14 = arith.constant 1 : i32
    %25 = tpu.dynamic_rotate %18 by %c1_i32_14 dim 1 : vector<16x128xf32>, i32 -> vector<16x128xf32>
    %c127_i32_15 = arith.constant 127 : i32
    %26 = tpu.dynamic_rotate %18 by %c127_i32_15 dim 1 : vector<16x128xf32>, i32 -> vector<16x128xf32>
    %c1_i32_16 = arith.constant 1 : i32
    %27 = tpu.dynamic_rotate %22 by %c1_i32_16 dim 1 : vector<16x128xf32>, i32 -> vector<16x128xf32>
    %c127_i32_17 = arith.constant 127 : i32
    %28 = tpu.dynamic_rotate %22 by %c127_i32_17 dim 1 : vector<16x128xf32>, i32 -> vector<16x128xf32>
    %c0_18 = arith.constant 0 : index
    %29 = memref.load %arg4[%c0_18] : memref<324xf32, #tpu.memory_space<smem>>
    %30 = vector.broadcast %29 : f32 to vector<16x128xf32>
    %31 = arith.mulf %23, %30 : vector<16x128xf32>
    %c1_19 = arith.constant 1 : index
    %32 = memref.load %arg4[%c1_19] : memref<324xf32, #tpu.memory_space<smem>>
    %33 = vector.broadcast %32 : f32 to vector<16x128xf32>
    %34 = arith.mulf %10, %33 : vector<16x128xf32>
    %35 = arith.addf %31, %34 : vector<16x128xf32>
    %c2_20 = arith.constant 2 : index
    %36 = memref.load %arg4[%c2_20] : memref<324xf32, #tpu.memory_space<smem>>
    %37 = vector.broadcast %36 : f32 to vector<16x128xf32>
    %38 = arith.mulf %24, %37 : vector<16x128xf32>
    %39 = arith.addf %35, %38 : vector<16x128xf32>
    %c3 = arith.constant 3 : index
    %40 = memref.load %arg4[%c3] : memref<324xf32, #tpu.memory_space<smem>>
    %41 = vector.broadcast %40 : f32 to vector<16x128xf32>
    %42 = arith.mulf %25, %41 : vector<16x128xf32>
    %43 = arith.addf %39, %42 : vector<16x128xf32>
    %c4 = arith.constant 4 : index
    %44 = memref.load %arg4[%c4] : memref<324xf32, #tpu.memory_space<smem>>
    %45 = vector.broadcast %44 : f32 to vector<16x128xf32>
    %46 = arith.mulf %18, %45 : vector<16x128xf32>
    %47 = arith.addf %43, %46 : vector<16x128xf32>
    %c5 = arith.constant 5 : index
    %48 = memref.load %arg4[%c5] : memref<324xf32, #tpu.memory_space<smem>>
    %49 = vector.broadcast %48 : f32 to vector<16x128xf32>
    %50 = arith.mulf %26, %49 : vector<16x128xf32>
    %51 = arith.addf %47, %50 : vector<16x128xf32>
    %c6 = arith.constant 6 : index
    %52 = memref.load %arg4[%c6] : memref<324xf32, #tpu.memory_space<smem>>
    %53 = vector.broadcast %52 : f32 to vector<16x128xf32>
    %54 = arith.mulf %27, %53 : vector<16x128xf32>
    %55 = arith.addf %51, %54 : vector<16x128xf32>
    %c7 = arith.constant 7 : index
    %56 = memref.load %arg4[%c7] : memref<324xf32, #tpu.memory_space<smem>>
    %57 = vector.broadcast %56 : f32 to vector<16x128xf32>
    %58 = arith.mulf %22, %57 : vector<16x128xf32>
    %59 = arith.addf %55, %58 : vector<16x128xf32>
    %c8 = arith.constant 8 : index
    %60 = memref.load %arg4[%c8] : memref<324xf32, #tpu.memory_space<smem>>
    %61 = vector.broadcast %60 : f32 to vector<16x128xf32>
    %62 = arith.mulf %28, %61 : vector<16x128xf32>
    %63 = arith.addf %59, %62 : vector<16x128xf32>
    %64 = arith.addf %4, %63 : vector<16x128xf32>
    %c108 = arith.constant 108 : index
    %65 = memref.load %arg4[%c108] : memref<324xf32, #tpu.memory_space<smem>>
    %66 = vector.broadcast %65 : f32 to vector<16x128xf32>
    %67 = arith.mulf %23, %66 : vector<16x128xf32>
    %c109 = arith.constant 109 : index
    %68 = memref.load %arg4[%c109] : memref<324xf32, #tpu.memory_space<smem>>
    %69 = vector.broadcast %68 : f32 to vector<16x128xf32>
    %70 = arith.mulf %10, %69 : vector<16x128xf32>
    %71 = arith.addf %67, %70 : vector<16x128xf32>
    %c110 = arith.constant 110 : index
    %72 = memref.load %arg4[%c110] : memref<324xf32, #tpu.memory_space<smem>>
    %73 = vector.broadcast %72 : f32 to vector<16x128xf32>
    %74 = arith.mulf %24, %73 : vector<16x128xf32>
    %75 = arith.addf %71, %74 : vector<16x128xf32>
    %c111 = arith.constant 111 : index
    %76 = memref.load %arg4[%c111] : memref<324xf32, #tpu.memory_space<smem>>
    %77 = vector.broadcast %76 : f32 to vector<16x128xf32>
    %78 = arith.mulf %25, %77 : vector<16x128xf32>
    %79 = arith.addf %75, %78 : vector<16x128xf32>
    %c112 = arith.constant 112 : index
    %80 = memref.load %arg4[%c112] : memref<324xf32, #tpu.memory_space<smem>>
    %81 = vector.broadcast %80 : f32 to vector<16x128xf32>
    %82 = arith.mulf %18, %81 : vector<16x128xf32>
    %83 = arith.addf %79, %82 : vector<16x128xf32>
    %c113 = arith.constant 113 : index
    %84 = memref.load %arg4[%c113] : memref<324xf32, #tpu.memory_space<smem>>
    %85 = vector.broadcast %84 : f32 to vector<16x128xf32>
    %86 = arith.mulf %26, %85 : vector<16x128xf32>
    %87 = arith.addf %83, %86 : vector<16x128xf32>
    %c114 = arith.constant 114 : index
    %88 = memref.load %arg4[%c114] : memref<324xf32, #tpu.memory_space<smem>>
    %89 = vector.broadcast %88 : f32 to vector<16x128xf32>
    %90 = arith.mulf %27, %89 : vector<16x128xf32>
    %91 = arith.addf %87, %90 : vector<16x128xf32>
    %c115 = arith.constant 115 : index
    %92 = memref.load %arg4[%c115] : memref<324xf32, #tpu.memory_space<smem>>
    %93 = vector.broadcast %92 : f32 to vector<16x128xf32>
    %94 = arith.mulf %22, %93 : vector<16x128xf32>
    %95 = arith.addf %91, %94 : vector<16x128xf32>
    %c116 = arith.constant 116 : index
    %96 = memref.load %arg4[%c116] : memref<324xf32, #tpu.memory_space<smem>>
    %97 = vector.broadcast %96 : f32 to vector<16x128xf32>
    %98 = arith.mulf %28, %97 : vector<16x128xf32>
    %99 = arith.addf %95, %98 : vector<16x128xf32>
    %100 = arith.addf %6, %99 : vector<16x128xf32>
    %c216 = arith.constant 216 : index
    %101 = memref.load %arg4[%c216] : memref<324xf32, #tpu.memory_space<smem>>
    %102 = vector.broadcast %101 : f32 to vector<16x128xf32>
    %103 = arith.mulf %23, %102 : vector<16x128xf32>
    %c217 = arith.constant 217 : index
    %104 = memref.load %arg4[%c217] : memref<324xf32, #tpu.memory_space<smem>>
    %105 = vector.broadcast %104 : f32 to vector<16x128xf32>
    %106 = arith.mulf %10, %105 : vector<16x128xf32>
    %107 = arith.addf %103, %106 : vector<16x128xf32>
    %c218 = arith.constant 218 : index
    %108 = memref.load %arg4[%c218] : memref<324xf32, #tpu.memory_space<smem>>
    %109 = vector.broadcast %108 : f32 to vector<16x128xf32>
    %110 = arith.mulf %24, %109 : vector<16x128xf32>
    %111 = arith.addf %107, %110 : vector<16x128xf32>
    %c219 = arith.constant 219 : index
    %112 = memref.load %arg4[%c219] : memref<324xf32, #tpu.memory_space<smem>>
    %113 = vector.broadcast %112 : f32 to vector<16x128xf32>
    %114 = arith.mulf %25, %113 : vector<16x128xf32>
    %115 = arith.addf %111, %114 : vector<16x128xf32>
    %c220 = arith.constant 220 : index
    %116 = memref.load %arg4[%c220] : memref<324xf32, #tpu.memory_space<smem>>
    %117 = vector.broadcast %116 : f32 to vector<16x128xf32>
    %118 = arith.mulf %18, %117 : vector<16x128xf32>
    %119 = arith.addf %115, %118 : vector<16x128xf32>
    %c221 = arith.constant 221 : index
    %120 = memref.load %arg4[%c221] : memref<324xf32, #tpu.memory_space<smem>>
    %121 = vector.broadcast %120 : f32 to vector<16x128xf32>
    %122 = arith.mulf %26, %121 : vector<16x128xf32>
    %123 = arith.addf %119, %122 : vector<16x128xf32>
    %c222 = arith.constant 222 : index
    %124 = memref.load %arg4[%c222] : memref<324xf32, #tpu.memory_space<smem>>
    %125 = vector.broadcast %124 : f32 to vector<16x128xf32>
    %126 = arith.mulf %27, %125 : vector<16x128xf32>
    %127 = arith.addf %123, %126 : vector<16x128xf32>
    %c223 = arith.constant 223 : index
    %128 = memref.load %arg4[%c223] : memref<324xf32, #tpu.memory_space<smem>>
    %129 = vector.broadcast %128 : f32 to vector<16x128xf32>
    %130 = arith.mulf %22, %129 : vector<16x128xf32>
    %131 = arith.addf %127, %130 : vector<16x128xf32>
    %c224 = arith.constant 224 : index
    %132 = memref.load %arg4[%c224] : memref<324xf32, #tpu.memory_space<smem>>
    %133 = vector.broadcast %132 : f32 to vector<16x128xf32>
    %134 = arith.mulf %28, %133 : vector<16x128xf32>
    %135 = arith.addf %131, %134 : vector<16x128xf32>
    %136 = arith.addf %8, %135 : vector<16x128xf32>
    %c0_21 = arith.constant 0 : index
    %c1_22 = arith.constant 1 : index
    %c0_23 = arith.constant 0 : index
    %c0_24 = arith.constant 0 : index
    %137 = vector.load %arg2[%c0_21, %c1_22, %c0_23, %c0_24] : memref<1x12x16x128xf32, #tpu.memory_space<vmem>>, vector<1x1x16x128xf32>
    %138 = vector.shape_cast %137 : vector<1x1x16x128xf32> to vector<16x128xf32>
    %c0_25 = arith.constant 0 : index
    %c1_26 = arith.constant 1 : index
    %c0_27 = arith.constant 0 : index
    %c0_28 = arith.constant 0 : index
    %139 = vector.load %arg3[%c0_25, %c1_26, %c0_27, %c0_28] : memref<1x12x8x128xf32, #tpu.memory_space<vmem>>, vector<1x1x1x128xf32>
    %140 = vector.shape_cast %139 : vector<1x1x1x128xf32> to vector<1x128xf32>
    %c0_29 = arith.constant 0 : index
    %c1_30 = arith.constant 1 : index
    %c1_31 = arith.constant 1 : index
    %c0_32 = arith.constant 0 : index
    %141 = vector.load %arg3[%c0_29, %c1_30, %c1_31, %c0_32] : memref<1x12x8x128xf32, #tpu.memory_space<vmem>>, vector<1x1x1x128xf32>
    %142 = vector.shape_cast %141 : vector<1x1x1x128xf32> to vector<1x128xf32>
    %c15_i32_33 = arith.constant 15 : i32
    %143 = tpu.dynamic_rotate %138 by %c15_i32_33 dim 0 : vector<16x128xf32>, i32 -> vector<16x128xf32>
    %144 = vector.shape_cast %140 : vector<1x128xf32> to vector<1x128xf32>
    %145 = vector.broadcast %144 : vector<1x128xf32> to vector<16x128xf32>
    %146 = arith.select %2, %143, %145 : vector<16x128xi1>, vector<16x128xf32>
    %c15_i32_34 = arith.constant 15 : i32
    %147 = tpu.dynamic_rotate %146 by %c15_i32_34 dim 0 : vector<16x128xf32>, i32 -> vector<16x128xf32>
    %148 = vector.shape_cast %142 : vector<1x128xf32> to vector<1x128xf32>
    %149 = vector.broadcast %148 : vector<1x128xf32> to vector<16x128xf32>
    %150 = arith.select %2, %147, %149 : vector<16x128xi1>, vector<16x128xf32>
    %c1_i32_35 = arith.constant 1 : i32
    %151 = tpu.dynamic_rotate %138 by %c1_i32_35 dim 1 : vector<16x128xf32>, i32 -> vector<16x128xf32>
    %c127_i32_36 = arith.constant 127 : i32
    %152 = tpu.dynamic_rotate %138 by %c127_i32_36 dim 1 : vector<16x128xf32>, i32 -> vector<16x128xf32>
    %c1_i32_37 = arith.constant 1 : i32
    %153 = tpu.dynamic_rotate %146 by %c1_i32_37 dim 1 : vector<16x128xf32>, i32 -> vector<16x128xf32>
    %c127_i32_38 = arith.constant 127 : i32
    %154 = tpu.dynamic_rotate %146 by %c127_i32_38 dim 1 : vector<16x128xf32>, i32 -> vector<16x128xf32>
    %c1_i32_39 = arith.constant 1 : i32
    %155 = tpu.dynamic_rotate %150 by %c1_i32_39 dim 1 : vector<16x128xf32>, i32 -> vector<16x128xf32>
    %c127_i32_40 = arith.constant 127 : i32
    %156 = tpu.dynamic_rotate %150 by %c127_i32_40 dim 1 : vector<16x128xf32>, i32 -> vector<16x128xf32>
    %c9 = arith.constant 9 : index
    %157 = memref.load %arg4[%c9] : memref<324xf32, #tpu.memory_space<smem>>
    %158 = vector.broadcast %157 : f32 to vector<16x128xf32>
    %159 = arith.mulf %151, %158 : vector<16x128xf32>
    %c10 = arith.constant 10 : index
    %160 = memref.load %arg4[%c10] : memref<324xf32, #tpu.memory_space<smem>>
    %161 = vector.broadcast %160 : f32 to vector<16x128xf32>
    %162 = arith.mulf %138, %161 : vector<16x128xf32>
    %163 = arith.addf %159, %162 : vector<16x128xf32>
    %c11 = arith.constant 11 : index
    %164 = memref.load %arg4[%c11] : memref<324xf32, #tpu.memory_space<smem>>
    %165 = vector.broadcast %164 : f32 to vector<16x128xf32>
    %166 = arith.mulf %152, %165 : vector<16x128xf32>
    %167 = arith.addf %163, %166 : vector<16x128xf32>
    %c12 = arith.constant 12 : index
    %168 = memref.load %arg4[%c12] : memref<324xf32, #tpu.memory_space<smem>>
    %169 = vector.broadcast %168 : f32 to vector<16x128xf32>
    %170 = arith.mulf %153, %169 : vector<16x128xf32>
    %171 = arith.addf %167, %170 : vector<16x128xf32>
    %c13 = arith.constant 13 : index
    %172 = memref.load %arg4[%c13] : memref<324xf32, #tpu.memory_space<smem>>
    %173 = vector.broadcast %172 : f32 to vector<16x128xf32>
    %174 = arith.mulf %146, %173 : vector<16x128xf32>
    %175 = arith.addf %171, %174 : vector<16x128xf32>
    %c14 = arith.constant 14 : index
    %176 = memref.load %arg4[%c14] : memref<324xf32, #tpu.memory_space<smem>>
    %177 = vector.broadcast %176 : f32 to vector<16x128xf32>
    %178 = arith.mulf %154, %177 : vector<16x128xf32>
    %179 = arith.addf %175, %178 : vector<16x128xf32>
    %c15 = arith.constant 15 : index
    %180 = memref.load %arg4[%c15] : memref<324xf32, #tpu.memory_space<smem>>
    %181 = vector.broadcast %180 : f32 to vector<16x128xf32>
    %182 = arith.mulf %155, %181 : vector<16x128xf32>
    %183 = arith.addf %179, %182 : vector<16x128xf32>
    %c16 = arith.constant 16 : index
    %184 = memref.load %arg4[%c16] : memref<324xf32, #tpu.memory_space<smem>>
    %185 = vector.broadcast %184 : f32 to vector<16x128xf32>
    %186 = arith.mulf %150, %185 : vector<16x128xf32>
    %187 = arith.addf %183, %186 : vector<16x128xf32>
    %c17 = arith.constant 17 : index
    %188 = memref.load %arg4[%c17] : memref<324xf32, #tpu.memory_space<smem>>
    %189 = vector.broadcast %188 : f32 to vector<16x128xf32>
    %190 = arith.mulf %156, %189 : vector<16x128xf32>
    %191 = arith.addf %187, %190 : vector<16x128xf32>
    %192 = arith.addf %64, %191 : vector<16x128xf32>
    %c117 = arith.constant 117 : index
    %193 = memref.load %arg4[%c117] : memref<324xf32, #tpu.memory_space<smem>>
    %194 = vector.broadcast %193 : f32 to vector<16x128xf32>
    %195 = arith.mulf %151, %194 : vector<16x128xf32>
    %c118 = arith.constant 118 : index
    %196 = memref.load %arg4[%c118] : memref<324xf32, #tpu.memory_space<smem>>
    %197 = vector.broadcast %196 : f32 to vector<16x128xf32>
    %198 = arith.mulf %138, %197 : vector<16x128xf32>
    %199 = arith.addf %195, %198 : vector<16x128xf32>
    %c119 = arith.constant 119 : index
    %200 = memref.load %arg4[%c119] : memref<324xf32, #tpu.memory_space<smem>>
    %201 = vector.broadcast %200 : f32 to vector<16x128xf32>
    %202 = arith.mulf %152, %201 : vector<16x128xf32>
    %203 = arith.addf %199, %202 : vector<16x128xf32>
    %c120 = arith.constant 120 : index
    %204 = memref.load %arg4[%c120] : memref<324xf32, #tpu.memory_space<smem>>
    %205 = vector.broadcast %204 : f32 to vector<16x128xf32>
    %206 = arith.mulf %153, %205 : vector<16x128xf32>
    %207 = arith.addf %203, %206 : vector<16x128xf32>
    %c121 = arith.constant 121 : index
    %208 = memref.load %arg4[%c121] : memref<324xf32, #tpu.memory_space<smem>>
    %209 = vector.broadcast %208 : f32 to vector<16x128xf32>
    %210 = arith.mulf %146, %209 : vector<16x128xf32>
    %211 = arith.addf %207, %210 : vector<16x128xf32>
    %c122 = arith.constant 122 : index
    %212 = memref.load %arg4[%c122] : memref<324xf32, #tpu.memory_space<smem>>
    %213 = vector.broadcast %212 : f32 to vector<16x128xf32>
    %214 = arith.mulf %154, %213 : vector<16x128xf32>
    %215 = arith.addf %211, %214 : vector<16x128xf32>
    %c123 = arith.constant 123 : index
    %216 = memref.load %arg4[%c123] : memref<324xf32, #tpu.memory_space<smem>>
    %217 = vector.broadcast %216 : f32 to vector<16x128xf32>
    %218 = arith.mulf %155, %217 : vector<16x128xf32>
    %219 = arith.addf %215, %218 : vector<16x128xf32>
    %c124 = arith.constant 124 : index
    %220 = memref.load %arg4[%c124] : memref<324xf32, #tpu.memory_space<smem>>
    %221 = vector.broadcast %220 : f32 to vector<16x128xf32>
    %222 = arith.mulf %150, %221 : vector<16x128xf32>
    %223 = arith.addf %219, %222 : vector<16x128xf32>
    %c125 = arith.constant 125 : index
    %224 = memref.load %arg4[%c125] : memref<324xf32, #tpu.memory_space<smem>>
    %225 = vector.broadcast %224 : f32 to vector<16x128xf32>
    %226 = arith.mulf %156, %225 : vector<16x128xf32>
    %227 = arith.addf %223, %226 : vector<16x128xf32>
    %228 = arith.addf %100, %227 : vector<16x128xf32>
    %c225 = arith.constant 225 : index
    %229 = memref.load %arg4[%c225] : memref<324xf32, #tpu.memory_space<smem>>
    %230 = vector.broadcast %229 : f32 to vector<16x128xf32>
    %231 = arith.mulf %151, %230 : vector<16x128xf32>
    %c226 = arith.constant 226 : index
    %232 = memref.load %arg4[%c226] : memref<324xf32, #tpu.memory_space<smem>>
    %233 = vector.broadcast %232 : f32 to vector<16x128xf32>
    %234 = arith.mulf %138, %233 : vector<16x128xf32>
    %235 = arith.addf %231, %234 : vector<16x128xf32>
    %c227 = arith.constant 227 : index
    %236 = memref.load %arg4[%c227] : memref<324xf32, #tpu.memory_space<smem>>
    %237 = vector.broadcast %236 : f32 to vector<16x128xf32>
    %238 = arith.mulf %152, %237 : vector<16x128xf32>
    %239 = arith.addf %235, %238 : vector<16x128xf32>
    %c228 = arith.constant 228 : index
    %240 = memref.load %arg4[%c228] : memref<324xf32, #tpu.memory_space<smem>>
    %241 = vector.broadcast %240 : f32 to vector<16x128xf32>
    %242 = arith.mulf %153, %241 : vector<16x128xf32>
    %243 = arith.addf %239, %242 : vector<16x128xf32>
    %c229 = arith.constant 229 : index
    %244 = memref.load %arg4[%c229] : memref<324xf32, #tpu.memory_space<smem>>
    %245 = vector.broadcast %244 : f32 to vector<16x128xf32>
    %246 = arith.mulf %146, %245 : vector<16x128xf32>
    %247 = arith.addf %243, %246 : vector<16x128xf32>
    %c230 = arith.constant 230 : index
    %248 = memref.load %arg4[%c230] : memref<324xf32, #tpu.memory_space<smem>>
    %249 = vector.broadcast %248 : f32 to vector<16x128xf32>
    %250 = arith.mulf %154, %249 : vector<16x128xf32>
    %251 = arith.addf %247, %250 : vector<16x128xf32>
    %c231 = arith.constant 231 : index
    %252 = memref.load %arg4[%c231] : memref<324xf32, #tpu.memory_space<smem>>
    %253 = vector.broadcast %252 : f32 to vector<16x128xf32>
    %254 = arith.mulf %155, %253 : vector<16x128xf32>
    %255 = arith.addf %251, %254 : vector<16x128xf32>
    %c232 = arith.constant 232 : index
    %256 = memref.load %arg4[%c232] : memref<324xf32, #tpu.memory_space<smem>>
    %257 = vector.broadcast %256 : f32 to vector<16x128xf32>
    %258 = arith.mulf %150, %257 : vector<16x128xf32>
    %259 = arith.addf %255, %258 : vector<16x128xf32>
    %c233 = arith.constant 233 : index
    %260 = memref.load %arg4[%c233] : memref<324xf32, #tpu.memory_space<smem>>
    %261 = vector.broadcast %260 : f32 to vector<16x128xf32>
    %262 = arith.mulf %156, %261 : vector<16x128xf32>
    %263 = arith.addf %259, %262 : vector<16x128xf32>
    %264 = arith.addf %136, %263 : vector<16x128xf32>
    %c0_41 = arith.constant 0 : index
    %c2_42 = arith.constant 2 : index
    %c0_43 = arith.constant 0 : index
    %c0_44 = arith.constant 0 : index
    %265 = vector.load %arg2[%c0_41, %c2_42, %c0_43, %c0_44] : memref<1x12x16x128xf32, #tpu.memory_space<vmem>>, vector<1x1x16x128xf32>
    %266 = vector.shape_cast %265 : vector<1x1x16x128xf32> to vector<16x128xf32>
    %c0_45 = arith.constant 0 : index
    %c2_46 = arith.constant 2 : index
    %c0_47 = arith.constant 0 : index
    %c0_48 = arith.constant 0 : index
    %267 = vector.load %arg3[%c0_45, %c2_46, %c0_47, %c0_48] : memref<1x12x8x128xf32, #tpu.memory_space<vmem>>, vector<1x1x1x128xf32>
    %268 = vector.shape_cast %267 : vector<1x1x1x128xf32> to vector<1x128xf32>
    %c0_49 = arith.constant 0 : index
    %c2_50 = arith.constant 2 : index
    %c1_51 = arith.constant 1 : index
    %c0_52 = arith.constant 0 : index
    %269 = vector.load %arg3[%c0_49, %c2_50, %c1_51, %c0_52] : memref<1x12x8x128xf32, #tpu.memory_space<vmem>>, vector<1x1x1x128xf32>
    %270 = vector.shape_cast %269 : vector<1x1x1x128xf32> to vector<1x128xf32>
    %c15_i32_53 = arith.constant 15 : i32
    %271 = tpu.dynamic_rotate %266 by %c15_i32_53 dim 0 : vector<16x128xf32>, i32 -> vector<16x128xf32>
    %272 = vector.shape_cast %268 : vector<1x128xf32> to vector<1x128xf32>
    %273 = vector.broadcast %272 : vector<1x128xf32> to vector<16x128xf32>
    %274 = arith.select %2, %271, %273 : vector<16x128xi1>, vector<16x128xf32>
    %c15_i32_54 = arith.constant 15 : i32
    %275 = tpu.dynamic_rotate %274 by %c15_i32_54 dim 0 : vector<16x128xf32>, i32 -> vector<16x128xf32>
    %276 = vector.shape_cast %270 : vector<1x128xf32> to vector<1x128xf32>
    %277 = vector.broadcast %276 : vector<1x128xf32> to vector<16x128xf32>
    %278 = arith.select %2, %275, %277 : vector<16x128xi1>, vector<16x128xf32>
    %c1_i32_55 = arith.constant 1 : i32
    %279 = tpu.dynamic_rotate %266 by %c1_i32_55 dim 1 : vector<16x128xf32>, i32 -> vector<16x128xf32>
    %c127_i32_56 = arith.constant 127 : i32
    %280 = tpu.dynamic_rotate %266 by %c127_i32_56 dim 1 : vector<16x128xf32>, i32 -> vector<16x128xf32>
    %c1_i32_57 = arith.constant 1 : i32
    %281 = tpu.dynamic_rotate %274 by %c1_i32_57 dim 1 : vector<16x128xf32>, i32 -> vector<16x128xf32>
    %c127_i32_58 = arith.constant 127 : i32
    %282 = tpu.dynamic_rotate %274 by %c127_i32_58 dim 1 : vector<16x128xf32>, i32 -> vector<16x128xf32>
    %c1_i32_59 = arith.constant 1 : i32
    %283 = tpu.dynamic_rotate %278 by %c1_i32_59 dim 1 : vector<16x128xf32>, i32 -> vector<16x128xf32>
    %c127_i32_60 = arith.constant 127 : i32
    %284 = tpu.dynamic_rotate %278 by %c127_i32_60 dim 1 : vector<16x128xf32>, i32 -> vector<16x128xf32>
    %c18 = arith.constant 18 : index
    %285 = memref.load %arg4[%c18] : memref<324xf32, #tpu.memory_space<smem>>
    %286 = vector.broadcast %285 : f32 to vector<16x128xf32>
    %287 = arith.mulf %279, %286 : vector<16x128xf32>
    %c19 = arith.constant 19 : index
    %288 = memref.load %arg4[%c19] : memref<324xf32, #tpu.memory_space<smem>>
    %289 = vector.broadcast %288 : f32 to vector<16x128xf32>
    %290 = arith.mulf %266, %289 : vector<16x128xf32>
    %291 = arith.addf %287, %290 : vector<16x128xf32>
    %c20 = arith.constant 20 : index
    %292 = memref.load %arg4[%c20] : memref<324xf32, #tpu.memory_space<smem>>
    %293 = vector.broadcast %292 : f32 to vector<16x128xf32>
    %294 = arith.mulf %280, %293 : vector<16x128xf32>
    %295 = arith.addf %291, %294 : vector<16x128xf32>
    %c21 = arith.constant 21 : index
    %296 = memref.load %arg4[%c21] : memref<324xf32, #tpu.memory_space<smem>>
    %297 = vector.broadcast %296 : f32 to vector<16x128xf32>
    %298 = arith.mulf %281, %297 : vector<16x128xf32>
    %299 = arith.addf %295, %298 : vector<16x128xf32>
    %c22 = arith.constant 22 : index
    %300 = memref.load %arg4[%c22] : memref<324xf32, #tpu.memory_space<smem>>
    %301 = vector.broadcast %300 : f32 to vector<16x128xf32>
    %302 = arith.mulf %274, %301 : vector<16x128xf32>
    %303 = arith.addf %299, %302 : vector<16x128xf32>
    %c23 = arith.constant 23 : index
    %304 = memref.load %arg4[%c23] : memref<324xf32, #tpu.memory_space<smem>>
    %305 = vector.broadcast %304 : f32 to vector<16x128xf32>
    %306 = arith.mulf %282, %305 : vector<16x128xf32>
    %307 = arith.addf %303, %306 : vector<16x128xf32>
    %c24 = arith.constant 24 : index
    %308 = memref.load %arg4[%c24] : memref<324xf32, #tpu.memory_space<smem>>
    %309 = vector.broadcast %308 : f32 to vector<16x128xf32>
    %310 = arith.mulf %283, %309 : vector<16x128xf32>
    %311 = arith.addf %307, %310 : vector<16x128xf32>
    %c25 = arith.constant 25 : index
    %312 = memref.load %arg4[%c25] : memref<324xf32, #tpu.memory_space<smem>>
    %313 = vector.broadcast %312 : f32 to vector<16x128xf32>
    %314 = arith.mulf %278, %313 : vector<16x128xf32>
    %315 = arith.addf %311, %314 : vector<16x128xf32>
    %c26 = arith.constant 26 : index
    %316 = memref.load %arg4[%c26] : memref<324xf32, #tpu.memory_space<smem>>
    %317 = vector.broadcast %316 : f32 to vector<16x128xf32>
    %318 = arith.mulf %284, %317 : vector<16x128xf32>
    %319 = arith.addf %315, %318 : vector<16x128xf32>
    %320 = arith.addf %192, %319 : vector<16x128xf32>
    %c126 = arith.constant 126 : index
    %321 = memref.load %arg4[%c126] : memref<324xf32, #tpu.memory_space<smem>>
    %322 = vector.broadcast %321 : f32 to vector<16x128xf32>
    %323 = arith.mulf %279, %322 : vector<16x128xf32>
    %c127 = arith.constant 127 : index
    %324 = memref.load %arg4[%c127] : memref<324xf32, #tpu.memory_space<smem>>
    %325 = vector.broadcast %324 : f32 to vector<16x128xf32>
    %326 = arith.mulf %266, %325 : vector<16x128xf32>
    %327 = arith.addf %323, %326 : vector<16x128xf32>
    %c128 = arith.constant 128 : index
    %328 = memref.load %arg4[%c128] : memref<324xf32, #tpu.memory_space<smem>>
    %329 = vector.broadcast %328 : f32 to vector<16x128xf32>
    %330 = arith.mulf %280, %329 : vector<16x128xf32>
    %331 = arith.addf %327, %330 : vector<16x128xf32>
    %c129 = arith.constant 129 : index
    %332 = memref.load %arg4[%c129] : memref<324xf32, #tpu.memory_space<smem>>
    %333 = vector.broadcast %332 : f32 to vector<16x128xf32>
    %334 = arith.mulf %281, %333 : vector<16x128xf32>
    %335 = arith.addf %331, %334 : vector<16x128xf32>
    %c130 = arith.constant 130 : index
    %336 = memref.load %arg4[%c130] : memref<324xf32, #tpu.memory_space<smem>>
    %337 = vector.broadcast %336 : f32 to vector<16x128xf32>
    %338 = arith.mulf %274, %337 : vector<16x128xf32>
    %339 = arith.addf %335, %338 : vector<16x128xf32>
    %c131 = arith.constant 131 : index
    %340 = memref.load %arg4[%c131] : memref<324xf32, #tpu.memory_space<smem>>
    %341 = vector.broadcast %340 : f32 to vector<16x128xf32>
    %342 = arith.mulf %282, %341 : vector<16x128xf32>
    %343 = arith.addf %339, %342 : vector<16x128xf32>
    %c132 = arith.constant 132 : index
    %344 = memref.load %arg4[%c132] : memref<324xf32, #tpu.memory_space<smem>>
    %345 = vector.broadcast %344 : f32 to vector<16x128xf32>
    %346 = arith.mulf %283, %345 : vector<16x128xf32>
    %347 = arith.addf %343, %346 : vector<16x128xf32>
    %c133 = arith.constant 133 : index
    %348 = memref.load %arg4[%c133] : memref<324xf32, #tpu.memory_space<smem>>
    %349 = vector.broadcast %348 : f32 to vector<16x128xf32>
    %350 = arith.mulf %278, %349 : vector<16x128xf32>
    %351 = arith.addf %347, %350 : vector<16x128xf32>
    %c134 = arith.constant 134 : index
    %352 = memref.load %arg4[%c134] : memref<324xf32, #tpu.memory_space<smem>>
    %353 = vector.broadcast %352 : f32 to vector<16x128xf32>
    %354 = arith.mulf %284, %353 : vector<16x128xf32>
    %355 = arith.addf %351, %354 : vector<16x128xf32>
    %356 = arith.addf %228, %355 : vector<16x128xf32>
    %c234 = arith.constant 234 : index
    %357 = memref.load %arg4[%c234] : memref<324xf32, #tpu.memory_space<smem>>
    %358 = vector.broadcast %357 : f32 to vector<16x128xf32>
    %359 = arith.mulf %279, %358 : vector<16x128xf32>
    %c235 = arith.constant 235 : index
    %360 = memref.load %arg4[%c235] : memref<324xf32, #tpu.memory_space<smem>>
    %361 = vector.broadcast %360 : f32 to vector<16x128xf32>
    %362 = arith.mulf %266, %361 : vector<16x128xf32>
    %363 = arith.addf %359, %362 : vector<16x128xf32>
    %c236 = arith.constant 236 : index
    %364 = memref.load %arg4[%c236] : memref<324xf32, #tpu.memory_space<smem>>
    %365 = vector.broadcast %364 : f32 to vector<16x128xf32>
    %366 = arith.mulf %280, %365 : vector<16x128xf32>
    %367 = arith.addf %363, %366 : vector<16x128xf32>
    %c237 = arith.constant 237 : index
    %368 = memref.load %arg4[%c237] : memref<324xf32, #tpu.memory_space<smem>>
    %369 = vector.broadcast %368 : f32 to vector<16x128xf32>
    %370 = arith.mulf %281, %369 : vector<16x128xf32>
    %371 = arith.addf %367, %370 : vector<16x128xf32>
    %c238 = arith.constant 238 : index
    %372 = memref.load %arg4[%c238] : memref<324xf32, #tpu.memory_space<smem>>
    %373 = vector.broadcast %372 : f32 to vector<16x128xf32>
    %374 = arith.mulf %274, %373 : vector<16x128xf32>
    %375 = arith.addf %371, %374 : vector<16x128xf32>
    %c239 = arith.constant 239 : index
    %376 = memref.load %arg4[%c239] : memref<324xf32, #tpu.memory_space<smem>>
    %377 = vector.broadcast %376 : f32 to vector<16x128xf32>
    %378 = arith.mulf %282, %377 : vector<16x128xf32>
    %379 = arith.addf %375, %378 : vector<16x128xf32>
    %c240 = arith.constant 240 : index
    %380 = memref.load %arg4[%c240] : memref<324xf32, #tpu.memory_space<smem>>
    %381 = vector.broadcast %380 : f32 to vector<16x128xf32>
    %382 = arith.mulf %283, %381 : vector<16x128xf32>
    %383 = arith.addf %379, %382 : vector<16x128xf32>
    %c241 = arith.constant 241 : index
    %384 = memref.load %arg4[%c241] : memref<324xf32, #tpu.memory_space<smem>>
    %385 = vector.broadcast %384 : f32 to vector<16x128xf32>
    %386 = arith.mulf %278, %385 : vector<16x128xf32>
    %387 = arith.addf %383, %386 : vector<16x128xf32>
    %c242 = arith.constant 242 : index
    %388 = memref.load %arg4[%c242] : memref<324xf32, #tpu.memory_space<smem>>
    %389 = vector.broadcast %388 : f32 to vector<16x128xf32>
    %390 = arith.mulf %284, %389 : vector<16x128xf32>
    %391 = arith.addf %387, %390 : vector<16x128xf32>
    %392 = arith.addf %264, %391 : vector<16x128xf32>
    %c0_61 = arith.constant 0 : index
    %c3_62 = arith.constant 3 : index
    %c0_63 = arith.constant 0 : index
    %c0_64 = arith.constant 0 : index
    %393 = vector.load %arg2[%c0_61, %c3_62, %c0_63, %c0_64] : memref<1x12x16x128xf32, #tpu.memory_space<vmem>>, vector<1x1x16x128xf32>
    %394 = vector.shape_cast %393 : vector<1x1x16x128xf32> to vector<16x128xf32>
    %c0_65 = arith.constant 0 : index
    %c3_66 = arith.constant 3 : index
    %c0_67 = arith.constant 0 : index
    %c0_68 = arith.constant 0 : index
    %395 = vector.load %arg3[%c0_65, %c3_66, %c0_67, %c0_68] : memref<1x12x8x128xf32, #tpu.memory_space<vmem>>, vector<1x1x1x128xf32>
    %396 = vector.shape_cast %395 : vector<1x1x1x128xf32> to vector<1x128xf32>
    %c0_69 = arith.constant 0 : index
    %c3_70 = arith.constant 3 : index
    %c1_71 = arith.constant 1 : index
    %c0_72 = arith.constant 0 : index
    %397 = vector.load %arg3[%c0_69, %c3_70, %c1_71, %c0_72] : memref<1x12x8x128xf32, #tpu.memory_space<vmem>>, vector<1x1x1x128xf32>
    %398 = vector.shape_cast %397 : vector<1x1x1x128xf32> to vector<1x128xf32>
    %c15_i32_73 = arith.constant 15 : i32
    %399 = tpu.dynamic_rotate %394 by %c15_i32_73 dim 0 : vector<16x128xf32>, i32 -> vector<16x128xf32>
    %400 = vector.shape_cast %396 : vector<1x128xf32> to vector<1x128xf32>
    %401 = vector.broadcast %400 : vector<1x128xf32> to vector<16x128xf32>
    %402 = arith.select %2, %399, %401 : vector<16x128xi1>, vector<16x128xf32>
    %c15_i32_74 = arith.constant 15 : i32
    %403 = tpu.dynamic_rotate %402 by %c15_i32_74 dim 0 : vector<16x128xf32>, i32 -> vector<16x128xf32>
    %404 = vector.shape_cast %398 : vector<1x128xf32> to vector<1x128xf32>
    %405 = vector.broadcast %404 : vector<1x128xf32> to vector<16x128xf32>
    %406 = arith.select %2, %403, %405 : vector<16x128xi1>, vector<16x128xf32>
    %c1_i32_75 = arith.constant 1 : i32
    %407 = tpu.dynamic_rotate %394 by %c1_i32_75 dim 1 : vector<16x128xf32>, i32 -> vector<16x128xf32>
    %c127_i32_76 = arith.constant 127 : i32
    %408 = tpu.dynamic_rotate %394 by %c127_i32_76 dim 1 : vector<16x128xf32>, i32 -> vector<16x128xf32>
    %c1_i32_77 = arith.constant 1 : i32
    %409 = tpu.dynamic_rotate %402 by %c1_i32_77 dim 1 : vector<16x128xf32>, i32 -> vector<16x128xf32>
    %c127_i32_78 = arith.constant 127 : i32
    %410 = tpu.dynamic_rotate %402 by %c127_i32_78 dim 1 : vector<16x128xf32>, i32 -> vector<16x128xf32>
    %c1_i32_79 = arith.constant 1 : i32
    %411 = tpu.dynamic_rotate %406 by %c1_i32_79 dim 1 : vector<16x128xf32>, i32 -> vector<16x128xf32>
    %c127_i32_80 = arith.constant 127 : i32
    %412 = tpu.dynamic_rotate %406 by %c127_i32_80 dim 1 : vector<16x128xf32>, i32 -> vector<16x128xf32>
    %c27 = arith.constant 27 : index
    %413 = memref.load %arg4[%c27] : memref<324xf32, #tpu.memory_space<smem>>
    %414 = vector.broadcast %413 : f32 to vector<16x128xf32>
    %415 = arith.mulf %407, %414 : vector<16x128xf32>
    %c28 = arith.constant 28 : index
    %416 = memref.load %arg4[%c28] : memref<324xf32, #tpu.memory_space<smem>>
    %417 = vector.broadcast %416 : f32 to vector<16x128xf32>
    %418 = arith.mulf %394, %417 : vector<16x128xf32>
    %419 = arith.addf %415, %418 : vector<16x128xf32>
    %c29 = arith.constant 29 : index
    %420 = memref.load %arg4[%c29] : memref<324xf32, #tpu.memory_space<smem>>
    %421 = vector.broadcast %420 : f32 to vector<16x128xf32>
    %422 = arith.mulf %408, %421 : vector<16x128xf32>
    %423 = arith.addf %419, %422 : vector<16x128xf32>
    %c30 = arith.constant 30 : index
    %424 = memref.load %arg4[%c30] : memref<324xf32, #tpu.memory_space<smem>>
    %425 = vector.broadcast %424 : f32 to vector<16x128xf32>
    %426 = arith.mulf %409, %425 : vector<16x128xf32>
    %427 = arith.addf %423, %426 : vector<16x128xf32>
    %c31 = arith.constant 31 : index
    %428 = memref.load %arg4[%c31] : memref<324xf32, #tpu.memory_space<smem>>
    %429 = vector.broadcast %428 : f32 to vector<16x128xf32>
    %430 = arith.mulf %402, %429 : vector<16x128xf32>
    %431 = arith.addf %427, %430 : vector<16x128xf32>
    %c32 = arith.constant 32 : index
    %432 = memref.load %arg4[%c32] : memref<324xf32, #tpu.memory_space<smem>>
    %433 = vector.broadcast %432 : f32 to vector<16x128xf32>
    %434 = arith.mulf %410, %433 : vector<16x128xf32>
    %435 = arith.addf %431, %434 : vector<16x128xf32>
    %c33 = arith.constant 33 : index
    %436 = memref.load %arg4[%c33] : memref<324xf32, #tpu.memory_space<smem>>
    %437 = vector.broadcast %436 : f32 to vector<16x128xf32>
    %438 = arith.mulf %411, %437 : vector<16x128xf32>
    %439 = arith.addf %435, %438 : vector<16x128xf32>
    %c34 = arith.constant 34 : index
    %440 = memref.load %arg4[%c34] : memref<324xf32, #tpu.memory_space<smem>>
    %441 = vector.broadcast %440 : f32 to vector<16x128xf32>
    %442 = arith.mulf %406, %441 : vector<16x128xf32>
    %443 = arith.addf %439, %442 : vector<16x128xf32>
    %c35 = arith.constant 35 : index
    %444 = memref.load %arg4[%c35] : memref<324xf32, #tpu.memory_space<smem>>
    %445 = vector.broadcast %444 : f32 to vector<16x128xf32>
    %446 = arith.mulf %412, %445 : vector<16x128xf32>
    %447 = arith.addf %443, %446 : vector<16x128xf32>
    %448 = arith.addf %320, %447 : vector<16x128xf32>
    %c135 = arith.constant 135 : index
    %449 = memref.load %arg4[%c135] : memref<324xf32, #tpu.memory_space<smem>>
    %450 = vector.broadcast %449 : f32 to vector<16x128xf32>
    %451 = arith.mulf %407, %450 : vector<16x128xf32>
    %c136 = arith.constant 136 : index
    %452 = memref.load %arg4[%c136] : memref<324xf32, #tpu.memory_space<smem>>
    %453 = vector.broadcast %452 : f32 to vector<16x128xf32>
    %454 = arith.mulf %394, %453 : vector<16x128xf32>
    %455 = arith.addf %451, %454 : vector<16x128xf32>
    %c137 = arith.constant 137 : index
    %456 = memref.load %arg4[%c137] : memref<324xf32, #tpu.memory_space<smem>>
    %457 = vector.broadcast %456 : f32 to vector<16x128xf32>
    %458 = arith.mulf %408, %457 : vector<16x128xf32>
    %459 = arith.addf %455, %458 : vector<16x128xf32>
    %c138 = arith.constant 138 : index
    %460 = memref.load %arg4[%c138] : memref<324xf32, #tpu.memory_space<smem>>
    %461 = vector.broadcast %460 : f32 to vector<16x128xf32>
    %462 = arith.mulf %409, %461 : vector<16x128xf32>
    %463 = arith.addf %459, %462 : vector<16x128xf32>
    %c139 = arith.constant 139 : index
    %464 = memref.load %arg4[%c139] : memref<324xf32, #tpu.memory_space<smem>>
    %465 = vector.broadcast %464 : f32 to vector<16x128xf32>
    %466 = arith.mulf %402, %465 : vector<16x128xf32>
    %467 = arith.addf %463, %466 : vector<16x128xf32>
    %c140 = arith.constant 140 : index
    %468 = memref.load %arg4[%c140] : memref<324xf32, #tpu.memory_space<smem>>
    %469 = vector.broadcast %468 : f32 to vector<16x128xf32>
    %470 = arith.mulf %410, %469 : vector<16x128xf32>
    %471 = arith.addf %467, %470 : vector<16x128xf32>
    %c141 = arith.constant 141 : index
    %472 = memref.load %arg4[%c141] : memref<324xf32, #tpu.memory_space<smem>>
    %473 = vector.broadcast %472 : f32 to vector<16x128xf32>
    %474 = arith.mulf %411, %473 : vector<16x128xf32>
    %475 = arith.addf %471, %474 : vector<16x128xf32>
    %c142 = arith.constant 142 : index
    %476 = memref.load %arg4[%c142] : memref<324xf32, #tpu.memory_space<smem>>
    %477 = vector.broadcast %476 : f32 to vector<16x128xf32>
    %478 = arith.mulf %406, %477 : vector<16x128xf32>
    %479 = arith.addf %475, %478 : vector<16x128xf32>
    %c143 = arith.constant 143 : index
    %480 = memref.load %arg4[%c143] : memref<324xf32, #tpu.memory_space<smem>>
    %481 = vector.broadcast %480 : f32 to vector<16x128xf32>
    %482 = arith.mulf %412, %481 : vector<16x128xf32>
    %483 = arith.addf %479, %482 : vector<16x128xf32>
    %484 = arith.addf %356, %483 : vector<16x128xf32>
    %c243 = arith.constant 243 : index
    %485 = memref.load %arg4[%c243] : memref<324xf32, #tpu.memory_space<smem>>
    %486 = vector.broadcast %485 : f32 to vector<16x128xf32>
    %487 = arith.mulf %407, %486 : vector<16x128xf32>
    %c244 = arith.constant 244 : index
    %488 = memref.load %arg4[%c244] : memref<324xf32, #tpu.memory_space<smem>>
    %489 = vector.broadcast %488 : f32 to vector<16x128xf32>
    %490 = arith.mulf %394, %489 : vector<16x128xf32>
    %491 = arith.addf %487, %490 : vector<16x128xf32>
    %c245 = arith.constant 245 : index
    %492 = memref.load %arg4[%c245] : memref<324xf32, #tpu.memory_space<smem>>
    %493 = vector.broadcast %492 : f32 to vector<16x128xf32>
    %494 = arith.mulf %408, %493 : vector<16x128xf32>
    %495 = arith.addf %491, %494 : vector<16x128xf32>
    %c246 = arith.constant 246 : index
    %496 = memref.load %arg4[%c246] : memref<324xf32, #tpu.memory_space<smem>>
    %497 = vector.broadcast %496 : f32 to vector<16x128xf32>
    %498 = arith.mulf %409, %497 : vector<16x128xf32>
    %499 = arith.addf %495, %498 : vector<16x128xf32>
    %c247 = arith.constant 247 : index
    %500 = memref.load %arg4[%c247] : memref<324xf32, #tpu.memory_space<smem>>
    %501 = vector.broadcast %500 : f32 to vector<16x128xf32>
    %502 = arith.mulf %402, %501 : vector<16x128xf32>
    %503 = arith.addf %499, %502 : vector<16x128xf32>
    %c248 = arith.constant 248 : index
    %504 = memref.load %arg4[%c248] : memref<324xf32, #tpu.memory_space<smem>>
    %505 = vector.broadcast %504 : f32 to vector<16x128xf32>
    %506 = arith.mulf %410, %505 : vector<16x128xf32>
    %507 = arith.addf %503, %506 : vector<16x128xf32>
    %c249 = arith.constant 249 : index
    %508 = memref.load %arg4[%c249] : memref<324xf32, #tpu.memory_space<smem>>
    %509 = vector.broadcast %508 : f32 to vector<16x128xf32>
    %510 = arith.mulf %411, %509 : vector<16x128xf32>
    %511 = arith.addf %507, %510 : vector<16x128xf32>
    %c250 = arith.constant 250 : index
    %512 = memref.load %arg4[%c250] : memref<324xf32, #tpu.memory_space<smem>>
    %513 = vector.broadcast %512 : f32 to vector<16x128xf32>
    %514 = arith.mulf %406, %513 : vector<16x128xf32>
    %515 = arith.addf %511, %514 : vector<16x128xf32>
    %c251 = arith.constant 251 : index
    %516 = memref.load %arg4[%c251] : memref<324xf32, #tpu.memory_space<smem>>
    %517 = vector.broadcast %516 : f32 to vector<16x128xf32>
    %518 = arith.mulf %412, %517 : vector<16x128xf32>
    %519 = arith.addf %515, %518 : vector<16x128xf32>
    %520 = arith.addf %392, %519 : vector<16x128xf32>
    %c0_81 = arith.constant 0 : index
    %c4_82 = arith.constant 4 : index
    %c0_83 = arith.constant 0 : index
    %c0_84 = arith.constant 0 : index
    %521 = vector.load %arg2[%c0_81, %c4_82, %c0_83, %c0_84] : memref<1x12x16x128xf32, #tpu.memory_space<vmem>>, vector<1x1x16x128xf32>
    %522 = vector.shape_cast %521 : vector<1x1x16x128xf32> to vector<16x128xf32>
    %c0_85 = arith.constant 0 : index
    %c4_86 = arith.constant 4 : index
    %c0_87 = arith.constant 0 : index
    %c0_88 = arith.constant 0 : index
    %523 = vector.load %arg3[%c0_85, %c4_86, %c0_87, %c0_88] : memref<1x12x8x128xf32, #tpu.memory_space<vmem>>, vector<1x1x1x128xf32>
    %524 = vector.shape_cast %523 : vector<1x1x1x128xf32> to vector<1x128xf32>
    %c0_89 = arith.constant 0 : index
    %c4_90 = arith.constant 4 : index
    %c1_91 = arith.constant 1 : index
    %c0_92 = arith.constant 0 : index
    %525 = vector.load %arg3[%c0_89, %c4_90, %c1_91, %c0_92] : memref<1x12x8x128xf32, #tpu.memory_space<vmem>>, vector<1x1x1x128xf32>
    %526 = vector.shape_cast %525 : vector<1x1x1x128xf32> to vector<1x128xf32>
    %c15_i32_93 = arith.constant 15 : i32
    %527 = tpu.dynamic_rotate %522 by %c15_i32_93 dim 0 : vector<16x128xf32>, i32 -> vector<16x128xf32>
    %528 = vector.shape_cast %524 : vector<1x128xf32> to vector<1x128xf32>
    %529 = vector.broadcast %528 : vector<1x128xf32> to vector<16x128xf32>
    %530 = arith.select %2, %527, %529 : vector<16x128xi1>, vector<16x128xf32>
    %c15_i32_94 = arith.constant 15 : i32
    %531 = tpu.dynamic_rotate %530 by %c15_i32_94 dim 0 : vector<16x128xf32>, i32 -> vector<16x128xf32>
    %532 = vector.shape_cast %526 : vector<1x128xf32> to vector<1x128xf32>
    %533 = vector.broadcast %532 : vector<1x128xf32> to vector<16x128xf32>
    %534 = arith.select %2, %531, %533 : vector<16x128xi1>, vector<16x128xf32>
    %c1_i32_95 = arith.constant 1 : i32
    %535 = tpu.dynamic_rotate %522 by %c1_i32_95 dim 1 : vector<16x128xf32>, i32 -> vector<16x128xf32>
    %c127_i32_96 = arith.constant 127 : i32
    %536 = tpu.dynamic_rotate %522 by %c127_i32_96 dim 1 : vector<16x128xf32>, i32 -> vector<16x128xf32>
    %c1_i32_97 = arith.constant 1 : i32
    %537 = tpu.dynamic_rotate %530 by %c1_i32_97 dim 1 : vector<16x128xf32>, i32 -> vector<16x128xf32>
    %c127_i32_98 = arith.constant 127 : i32
    %538 = tpu.dynamic_rotate %530 by %c127_i32_98 dim 1 : vector<16x128xf32>, i32 -> vector<16x128xf32>
    %c1_i32_99 = arith.constant 1 : i32
    %539 = tpu.dynamic_rotate %534 by %c1_i32_99 dim 1 : vector<16x128xf32>, i32 -> vector<16x128xf32>
    %c127_i32_100 = arith.constant 127 : i32
    %540 = tpu.dynamic_rotate %534 by %c127_i32_100 dim 1 : vector<16x128xf32>, i32 -> vector<16x128xf32>
    %c36 = arith.constant 36 : index
    %541 = memref.load %arg4[%c36] : memref<324xf32, #tpu.memory_space<smem>>
    %542 = vector.broadcast %541 : f32 to vector<16x128xf32>
    %543 = arith.mulf %535, %542 : vector<16x128xf32>
    %c37 = arith.constant 37 : index
    %544 = memref.load %arg4[%c37] : memref<324xf32, #tpu.memory_space<smem>>
    %545 = vector.broadcast %544 : f32 to vector<16x128xf32>
    %546 = arith.mulf %522, %545 : vector<16x128xf32>
    %547 = arith.addf %543, %546 : vector<16x128xf32>
    %c38 = arith.constant 38 : index
    %548 = memref.load %arg4[%c38] : memref<324xf32, #tpu.memory_space<smem>>
    %549 = vector.broadcast %548 : f32 to vector<16x128xf32>
    %550 = arith.mulf %536, %549 : vector<16x128xf32>
    %551 = arith.addf %547, %550 : vector<16x128xf32>
    %c39 = arith.constant 39 : index
    %552 = memref.load %arg4[%c39] : memref<324xf32, #tpu.memory_space<smem>>
    %553 = vector.broadcast %552 : f32 to vector<16x128xf32>
    %554 = arith.mulf %537, %553 : vector<16x128xf32>
    %555 = arith.addf %551, %554 : vector<16x128xf32>
    %c40 = arith.constant 40 : index
    %556 = memref.load %arg4[%c40] : memref<324xf32, #tpu.memory_space<smem>>
    %557 = vector.broadcast %556 : f32 to vector<16x128xf32>
    %558 = arith.mulf %530, %557 : vector<16x128xf32>
    %559 = arith.addf %555, %558 : vector<16x128xf32>
    %c41 = arith.constant 41 : index
    %560 = memref.load %arg4[%c41] : memref<324xf32, #tpu.memory_space<smem>>
    %561 = vector.broadcast %560 : f32 to vector<16x128xf32>
    %562 = arith.mulf %538, %561 : vector<16x128xf32>
    %563 = arith.addf %559, %562 : vector<16x128xf32>
    %c42 = arith.constant 42 : index
    %564 = memref.load %arg4[%c42] : memref<324xf32, #tpu.memory_space<smem>>
    %565 = vector.broadcast %564 : f32 to vector<16x128xf32>
    %566 = arith.mulf %539, %565 : vector<16x128xf32>
    %567 = arith.addf %563, %566 : vector<16x128xf32>
    %c43 = arith.constant 43 : index
    %568 = memref.load %arg4[%c43] : memref<324xf32, #tpu.memory_space<smem>>
    %569 = vector.broadcast %568 : f32 to vector<16x128xf32>
    %570 = arith.mulf %534, %569 : vector<16x128xf32>
    %571 = arith.addf %567, %570 : vector<16x128xf32>
    %c44 = arith.constant 44 : index
    %572 = memref.load %arg4[%c44] : memref<324xf32, #tpu.memory_space<smem>>
    %573 = vector.broadcast %572 : f32 to vector<16x128xf32>
    %574 = arith.mulf %540, %573 : vector<16x128xf32>
    %575 = arith.addf %571, %574 : vector<16x128xf32>
    %576 = arith.addf %448, %575 : vector<16x128xf32>
    %c144 = arith.constant 144 : index
    %577 = memref.load %arg4[%c144] : memref<324xf32, #tpu.memory_space<smem>>
    %578 = vector.broadcast %577 : f32 to vector<16x128xf32>
    %579 = arith.mulf %535, %578 : vector<16x128xf32>
    %c145 = arith.constant 145 : index
    %580 = memref.load %arg4[%c145] : memref<324xf32, #tpu.memory_space<smem>>
    %581 = vector.broadcast %580 : f32 to vector<16x128xf32>
    %582 = arith.mulf %522, %581 : vector<16x128xf32>
    %583 = arith.addf %579, %582 : vector<16x128xf32>
    %c146 = arith.constant 146 : index
    %584 = memref.load %arg4[%c146] : memref<324xf32, #tpu.memory_space<smem>>
    %585 = vector.broadcast %584 : f32 to vector<16x128xf32>
    %586 = arith.mulf %536, %585 : vector<16x128xf32>
    %587 = arith.addf %583, %586 : vector<16x128xf32>
    %c147 = arith.constant 147 : index
    %588 = memref.load %arg4[%c147] : memref<324xf32, #tpu.memory_space<smem>>
    %589 = vector.broadcast %588 : f32 to vector<16x128xf32>
    %590 = arith.mulf %537, %589 : vector<16x128xf32>
    %591 = arith.addf %587, %590 : vector<16x128xf32>
    %c148 = arith.constant 148 : index
    %592 = memref.load %arg4[%c148] : memref<324xf32, #tpu.memory_space<smem>>
    %593 = vector.broadcast %592 : f32 to vector<16x128xf32>
    %594 = arith.mulf %530, %593 : vector<16x128xf32>
    %595 = arith.addf %591, %594 : vector<16x128xf32>
    %c149 = arith.constant 149 : index
    %596 = memref.load %arg4[%c149] : memref<324xf32, #tpu.memory_space<smem>>
    %597 = vector.broadcast %596 : f32 to vector<16x128xf32>
    %598 = arith.mulf %538, %597 : vector<16x128xf32>
    %599 = arith.addf %595, %598 : vector<16x128xf32>
    %c150 = arith.constant 150 : index
    %600 = memref.load %arg4[%c150] : memref<324xf32, #tpu.memory_space<smem>>
    %601 = vector.broadcast %600 : f32 to vector<16x128xf32>
    %602 = arith.mulf %539, %601 : vector<16x128xf32>
    %603 = arith.addf %599, %602 : vector<16x128xf32>
    %c151 = arith.constant 151 : index
    %604 = memref.load %arg4[%c151] : memref<324xf32, #tpu.memory_space<smem>>
    %605 = vector.broadcast %604 : f32 to vector<16x128xf32>
    %606 = arith.mulf %534, %605 : vector<16x128xf32>
    %607 = arith.addf %603, %606 : vector<16x128xf32>
    %c152 = arith.constant 152 : index
    %608 = memref.load %arg4[%c152] : memref<324xf32, #tpu.memory_space<smem>>
    %609 = vector.broadcast %608 : f32 to vector<16x128xf32>
    %610 = arith.mulf %540, %609 : vector<16x128xf32>
    %611 = arith.addf %607, %610 : vector<16x128xf32>
    %612 = arith.addf %484, %611 : vector<16x128xf32>
    %c252 = arith.constant 252 : index
    %613 = memref.load %arg4[%c252] : memref<324xf32, #tpu.memory_space<smem>>
    %614 = vector.broadcast %613 : f32 to vector<16x128xf32>
    %615 = arith.mulf %535, %614 : vector<16x128xf32>
    %c253 = arith.constant 253 : index
    %616 = memref.load %arg4[%c253] : memref<324xf32, #tpu.memory_space<smem>>
    %617 = vector.broadcast %616 : f32 to vector<16x128xf32>
    %618 = arith.mulf %522, %617 : vector<16x128xf32>
    %619 = arith.addf %615, %618 : vector<16x128xf32>
    %c254 = arith.constant 254 : index
    %620 = memref.load %arg4[%c254] : memref<324xf32, #tpu.memory_space<smem>>
    %621 = vector.broadcast %620 : f32 to vector<16x128xf32>
    %622 = arith.mulf %536, %621 : vector<16x128xf32>
    %623 = arith.addf %619, %622 : vector<16x128xf32>
    %c255 = arith.constant 255 : index
    %624 = memref.load %arg4[%c255] : memref<324xf32, #tpu.memory_space<smem>>
    %625 = vector.broadcast %624 : f32 to vector<16x128xf32>
    %626 = arith.mulf %537, %625 : vector<16x128xf32>
    %627 = arith.addf %623, %626 : vector<16x128xf32>
    %c256 = arith.constant 256 : index
    %628 = memref.load %arg4[%c256] : memref<324xf32, #tpu.memory_space<smem>>
    %629 = vector.broadcast %628 : f32 to vector<16x128xf32>
    %630 = arith.mulf %530, %629 : vector<16x128xf32>
    %631 = arith.addf %627, %630 : vector<16x128xf32>
    %c257 = arith.constant 257 : index
    %632 = memref.load %arg4[%c257] : memref<324xf32, #tpu.memory_space<smem>>
    %633 = vector.broadcast %632 : f32 to vector<16x128xf32>
    %634 = arith.mulf %538, %633 : vector<16x128xf32>
    %635 = arith.addf %631, %634 : vector<16x128xf32>
    %c258 = arith.constant 258 : index
    %636 = memref.load %arg4[%c258] : memref<324xf32, #tpu.memory_space<smem>>
    %637 = vector.broadcast %636 : f32 to vector<16x128xf32>
    %638 = arith.mulf %539, %637 : vector<16x128xf32>
    %639 = arith.addf %635, %638 : vector<16x128xf32>
    %c259 = arith.constant 259 : index
    %640 = memref.load %arg4[%c259] : memref<324xf32, #tpu.memory_space<smem>>
    %641 = vector.broadcast %640 : f32 to vector<16x128xf32>
    %642 = arith.mulf %534, %641 : vector<16x128xf32>
    %643 = arith.addf %639, %642 : vector<16x128xf32>
    %c260 = arith.constant 260 : index
    %644 = memref.load %arg4[%c260] : memref<324xf32, #tpu.memory_space<smem>>
    %645 = vector.broadcast %644 : f32 to vector<16x128xf32>
    %646 = arith.mulf %540, %645 : vector<16x128xf32>
    %647 = arith.addf %643, %646 : vector<16x128xf32>
    %648 = arith.addf %520, %647 : vector<16x128xf32>
    %c0_101 = arith.constant 0 : index
    %c5_102 = arith.constant 5 : index
    %c0_103 = arith.constant 0 : index
    %c0_104 = arith.constant 0 : index
    %649 = vector.load %arg2[%c0_101, %c5_102, %c0_103, %c0_104] : memref<1x12x16x128xf32, #tpu.memory_space<vmem>>, vector<1x1x16x128xf32>
    %650 = vector.shape_cast %649 : vector<1x1x16x128xf32> to vector<16x128xf32>
    %c0_105 = arith.constant 0 : index
    %c5_106 = arith.constant 5 : index
    %c0_107 = arith.constant 0 : index
    %c0_108 = arith.constant 0 : index
    %651 = vector.load %arg3[%c0_105, %c5_106, %c0_107, %c0_108] : memref<1x12x8x128xf32, #tpu.memory_space<vmem>>, vector<1x1x1x128xf32>
    %652 = vector.shape_cast %651 : vector<1x1x1x128xf32> to vector<1x128xf32>
    %c0_109 = arith.constant 0 : index
    %c5_110 = arith.constant 5 : index
    %c1_111 = arith.constant 1 : index
    %c0_112 = arith.constant 0 : index
    %653 = vector.load %arg3[%c0_109, %c5_110, %c1_111, %c0_112] : memref<1x12x8x128xf32, #tpu.memory_space<vmem>>, vector<1x1x1x128xf32>
    %654 = vector.shape_cast %653 : vector<1x1x1x128xf32> to vector<1x128xf32>
    %c15_i32_113 = arith.constant 15 : i32
    %655 = tpu.dynamic_rotate %650 by %c15_i32_113 dim 0 : vector<16x128xf32>, i32 -> vector<16x128xf32>
    %656 = vector.shape_cast %652 : vector<1x128xf32> to vector<1x128xf32>
    %657 = vector.broadcast %656 : vector<1x128xf32> to vector<16x128xf32>
    %658 = arith.select %2, %655, %657 : vector<16x128xi1>, vector<16x128xf32>
    %c15_i32_114 = arith.constant 15 : i32
    %659 = tpu.dynamic_rotate %658 by %c15_i32_114 dim 0 : vector<16x128xf32>, i32 -> vector<16x128xf32>
    %660 = vector.shape_cast %654 : vector<1x128xf32> to vector<1x128xf32>
    %661 = vector.broadcast %660 : vector<1x128xf32> to vector<16x128xf32>
    %662 = arith.select %2, %659, %661 : vector<16x128xi1>, vector<16x128xf32>
    %c1_i32_115 = arith.constant 1 : i32
    %663 = tpu.dynamic_rotate %650 by %c1_i32_115 dim 1 : vector<16x128xf32>, i32 -> vector<16x128xf32>
    %c127_i32_116 = arith.constant 127 : i32
    %664 = tpu.dynamic_rotate %650 by %c127_i32_116 dim 1 : vector<16x128xf32>, i32 -> vector<16x128xf32>
    %c1_i32_117 = arith.constant 1 : i32
    %665 = tpu.dynamic_rotate %658 by %c1_i32_117 dim 1 : vector<16x128xf32>, i32 -> vector<16x128xf32>
    %c127_i32_118 = arith.constant 127 : i32
    %666 = tpu.dynamic_rotate %658 by %c127_i32_118 dim 1 : vector<16x128xf32>, i32 -> vector<16x128xf32>
    %c1_i32_119 = arith.constant 1 : i32
    %667 = tpu.dynamic_rotate %662 by %c1_i32_119 dim 1 : vector<16x128xf32>, i32 -> vector<16x128xf32>
    %c127_i32_120 = arith.constant 127 : i32
    %668 = tpu.dynamic_rotate %662 by %c127_i32_120 dim 1 : vector<16x128xf32>, i32 -> vector<16x128xf32>
    %c45 = arith.constant 45 : index
    %669 = memref.load %arg4[%c45] : memref<324xf32, #tpu.memory_space<smem>>
    %670 = vector.broadcast %669 : f32 to vector<16x128xf32>
    %671 = arith.mulf %663, %670 : vector<16x128xf32>
    %c46 = arith.constant 46 : index
    %672 = memref.load %arg4[%c46] : memref<324xf32, #tpu.memory_space<smem>>
    %673 = vector.broadcast %672 : f32 to vector<16x128xf32>
    %674 = arith.mulf %650, %673 : vector<16x128xf32>
    %675 = arith.addf %671, %674 : vector<16x128xf32>
    %c47 = arith.constant 47 : index
    %676 = memref.load %arg4[%c47] : memref<324xf32, #tpu.memory_space<smem>>
    %677 = vector.broadcast %676 : f32 to vector<16x128xf32>
    %678 = arith.mulf %664, %677 : vector<16x128xf32>
    %679 = arith.addf %675, %678 : vector<16x128xf32>
    %c48 = arith.constant 48 : index
    %680 = memref.load %arg4[%c48] : memref<324xf32, #tpu.memory_space<smem>>
    %681 = vector.broadcast %680 : f32 to vector<16x128xf32>
    %682 = arith.mulf %665, %681 : vector<16x128xf32>
    %683 = arith.addf %679, %682 : vector<16x128xf32>
    %c49 = arith.constant 49 : index
    %684 = memref.load %arg4[%c49] : memref<324xf32, #tpu.memory_space<smem>>
    %685 = vector.broadcast %684 : f32 to vector<16x128xf32>
    %686 = arith.mulf %658, %685 : vector<16x128xf32>
    %687 = arith.addf %683, %686 : vector<16x128xf32>
    %c50 = arith.constant 50 : index
    %688 = memref.load %arg4[%c50] : memref<324xf32, #tpu.memory_space<smem>>
    %689 = vector.broadcast %688 : f32 to vector<16x128xf32>
    %690 = arith.mulf %666, %689 : vector<16x128xf32>
    %691 = arith.addf %687, %690 : vector<16x128xf32>
    %c51 = arith.constant 51 : index
    %692 = memref.load %arg4[%c51] : memref<324xf32, #tpu.memory_space<smem>>
    %693 = vector.broadcast %692 : f32 to vector<16x128xf32>
    %694 = arith.mulf %667, %693 : vector<16x128xf32>
    %695 = arith.addf %691, %694 : vector<16x128xf32>
    %c52 = arith.constant 52 : index
    %696 = memref.load %arg4[%c52] : memref<324xf32, #tpu.memory_space<smem>>
    %697 = vector.broadcast %696 : f32 to vector<16x128xf32>
    %698 = arith.mulf %662, %697 : vector<16x128xf32>
    %699 = arith.addf %695, %698 : vector<16x128xf32>
    %c53 = arith.constant 53 : index
    %700 = memref.load %arg4[%c53] : memref<324xf32, #tpu.memory_space<smem>>
    %701 = vector.broadcast %700 : f32 to vector<16x128xf32>
    %702 = arith.mulf %668, %701 : vector<16x128xf32>
    %703 = arith.addf %699, %702 : vector<16x128xf32>
    %704 = arith.addf %576, %703 : vector<16x128xf32>
    %c153 = arith.constant 153 : index
    %705 = memref.load %arg4[%c153] : memref<324xf32, #tpu.memory_space<smem>>
    %706 = vector.broadcast %705 : f32 to vector<16x128xf32>
    %707 = arith.mulf %663, %706 : vector<16x128xf32>
    %c154 = arith.constant 154 : index
    %708 = memref.load %arg4[%c154] : memref<324xf32, #tpu.memory_space<smem>>
    %709 = vector.broadcast %708 : f32 to vector<16x128xf32>
    %710 = arith.mulf %650, %709 : vector<16x128xf32>
    %711 = arith.addf %707, %710 : vector<16x128xf32>
    %c155 = arith.constant 155 : index
    %712 = memref.load %arg4[%c155] : memref<324xf32, #tpu.memory_space<smem>>
    %713 = vector.broadcast %712 : f32 to vector<16x128xf32>
    %714 = arith.mulf %664, %713 : vector<16x128xf32>
    %715 = arith.addf %711, %714 : vector<16x128xf32>
    %c156 = arith.constant 156 : index
    %716 = memref.load %arg4[%c156] : memref<324xf32, #tpu.memory_space<smem>>
    %717 = vector.broadcast %716 : f32 to vector<16x128xf32>
    %718 = arith.mulf %665, %717 : vector<16x128xf32>
    %719 = arith.addf %715, %718 : vector<16x128xf32>
    %c157 = arith.constant 157 : index
    %720 = memref.load %arg4[%c157] : memref<324xf32, #tpu.memory_space<smem>>
    %721 = vector.broadcast %720 : f32 to vector<16x128xf32>
    %722 = arith.mulf %658, %721 : vector<16x128xf32>
    %723 = arith.addf %719, %722 : vector<16x128xf32>
    %c158 = arith.constant 158 : index
    %724 = memref.load %arg4[%c158] : memref<324xf32, #tpu.memory_space<smem>>
    %725 = vector.broadcast %724 : f32 to vector<16x128xf32>
    %726 = arith.mulf %666, %725 : vector<16x128xf32>
    %727 = arith.addf %723, %726 : vector<16x128xf32>
    %c159 = arith.constant 159 : index
    %728 = memref.load %arg4[%c159] : memref<324xf32, #tpu.memory_space<smem>>
    %729 = vector.broadcast %728 : f32 to vector<16x128xf32>
    %730 = arith.mulf %667, %729 : vector<16x128xf32>
    %731 = arith.addf %727, %730 : vector<16x128xf32>
    %c160 = arith.constant 160 : index
    %732 = memref.load %arg4[%c160] : memref<324xf32, #tpu.memory_space<smem>>
    %733 = vector.broadcast %732 : f32 to vector<16x128xf32>
    %734 = arith.mulf %662, %733 : vector<16x128xf32>
    %735 = arith.addf %731, %734 : vector<16x128xf32>
    %c161 = arith.constant 161 : index
    %736 = memref.load %arg4[%c161] : memref<324xf32, #tpu.memory_space<smem>>
    %737 = vector.broadcast %736 : f32 to vector<16x128xf32>
    %738 = arith.mulf %668, %737 : vector<16x128xf32>
    %739 = arith.addf %735, %738 : vector<16x128xf32>
    %740 = arith.addf %612, %739 : vector<16x128xf32>
    %c261 = arith.constant 261 : index
    %741 = memref.load %arg4[%c261] : memref<324xf32, #tpu.memory_space<smem>>
    %742 = vector.broadcast %741 : f32 to vector<16x128xf32>
    %743 = arith.mulf %663, %742 : vector<16x128xf32>
    %c262 = arith.constant 262 : index
    %744 = memref.load %arg4[%c262] : memref<324xf32, #tpu.memory_space<smem>>
    %745 = vector.broadcast %744 : f32 to vector<16x128xf32>
    %746 = arith.mulf %650, %745 : vector<16x128xf32>
    %747 = arith.addf %743, %746 : vector<16x128xf32>
    %c263 = arith.constant 263 : index
    %748 = memref.load %arg4[%c263] : memref<324xf32, #tpu.memory_space<smem>>
    %749 = vector.broadcast %748 : f32 to vector<16x128xf32>
    %750 = arith.mulf %664, %749 : vector<16x128xf32>
    %751 = arith.addf %747, %750 : vector<16x128xf32>
    %c264 = arith.constant 264 : index
    %752 = memref.load %arg4[%c264] : memref<324xf32, #tpu.memory_space<smem>>
    %753 = vector.broadcast %752 : f32 to vector<16x128xf32>
    %754 = arith.mulf %665, %753 : vector<16x128xf32>
    %755 = arith.addf %751, %754 : vector<16x128xf32>
    %c265 = arith.constant 265 : index
    %756 = memref.load %arg4[%c265] : memref<324xf32, #tpu.memory_space<smem>>
    %757 = vector.broadcast %756 : f32 to vector<16x128xf32>
    %758 = arith.mulf %658, %757 : vector<16x128xf32>
    %759 = arith.addf %755, %758 : vector<16x128xf32>
    %c266 = arith.constant 266 : index
    %760 = memref.load %arg4[%c266] : memref<324xf32, #tpu.memory_space<smem>>
    %761 = vector.broadcast %760 : f32 to vector<16x128xf32>
    %762 = arith.mulf %666, %761 : vector<16x128xf32>
    %763 = arith.addf %759, %762 : vector<16x128xf32>
    %c267 = arith.constant 267 : index
    %764 = memref.load %arg4[%c267] : memref<324xf32, #tpu.memory_space<smem>>
    %765 = vector.broadcast %764 : f32 to vector<16x128xf32>
    %766 = arith.mulf %667, %765 : vector<16x128xf32>
    %767 = arith.addf %763, %766 : vector<16x128xf32>
    %c268 = arith.constant 268 : index
    %768 = memref.load %arg4[%c268] : memref<324xf32, #tpu.memory_space<smem>>
    %769 = vector.broadcast %768 : f32 to vector<16x128xf32>
    %770 = arith.mulf %662, %769 : vector<16x128xf32>
    %771 = arith.addf %767, %770 : vector<16x128xf32>
    %c269 = arith.constant 269 : index
    %772 = memref.load %arg4[%c269] : memref<324xf32, #tpu.memory_space<smem>>
    %773 = vector.broadcast %772 : f32 to vector<16x128xf32>
    %774 = arith.mulf %668, %773 : vector<16x128xf32>
    %775 = arith.addf %771, %774 : vector<16x128xf32>
    %776 = arith.addf %648, %775 : vector<16x128xf32>
    %c0_121 = arith.constant 0 : index
    %c6_122 = arith.constant 6 : index
    %c0_123 = arith.constant 0 : index
    %c0_124 = arith.constant 0 : index
    %777 = vector.load %arg2[%c0_121, %c6_122, %c0_123, %c0_124] : memref<1x12x16x128xf32, #tpu.memory_space<vmem>>, vector<1x1x16x128xf32>
    %778 = vector.shape_cast %777 : vector<1x1x16x128xf32> to vector<16x128xf32>
    %c0_125 = arith.constant 0 : index
    %c6_126 = arith.constant 6 : index
    %c0_127 = arith.constant 0 : index
    %c0_128 = arith.constant 0 : index
    %779 = vector.load %arg3[%c0_125, %c6_126, %c0_127, %c0_128] : memref<1x12x8x128xf32, #tpu.memory_space<vmem>>, vector<1x1x1x128xf32>
    %780 = vector.shape_cast %779 : vector<1x1x1x128xf32> to vector<1x128xf32>
    %c0_129 = arith.constant 0 : index
    %c6_130 = arith.constant 6 : index
    %c1_131 = arith.constant 1 : index
    %c0_132 = arith.constant 0 : index
    %781 = vector.load %arg3[%c0_129, %c6_130, %c1_131, %c0_132] : memref<1x12x8x128xf32, #tpu.memory_space<vmem>>, vector<1x1x1x128xf32>
    %782 = vector.shape_cast %781 : vector<1x1x1x128xf32> to vector<1x128xf32>
    %c15_i32_133 = arith.constant 15 : i32
    %783 = tpu.dynamic_rotate %778 by %c15_i32_133 dim 0 : vector<16x128xf32>, i32 -> vector<16x128xf32>
    %784 = vector.shape_cast %780 : vector<1x128xf32> to vector<1x128xf32>
    %785 = vector.broadcast %784 : vector<1x128xf32> to vector<16x128xf32>
    %786 = arith.select %2, %783, %785 : vector<16x128xi1>, vector<16x128xf32>
    %c15_i32_134 = arith.constant 15 : i32
    %787 = tpu.dynamic_rotate %786 by %c15_i32_134 dim 0 : vector<16x128xf32>, i32 -> vector<16x128xf32>
    %788 = vector.shape_cast %782 : vector<1x128xf32> to vector<1x128xf32>
    %789 = vector.broadcast %788 : vector<1x128xf32> to vector<16x128xf32>
    %790 = arith.select %2, %787, %789 : vector<16x128xi1>, vector<16x128xf32>
    %c1_i32_135 = arith.constant 1 : i32
    %791 = tpu.dynamic_rotate %778 by %c1_i32_135 dim 1 : vector<16x128xf32>, i32 -> vector<16x128xf32>
    %c127_i32_136 = arith.constant 127 : i32
    %792 = tpu.dynamic_rotate %778 by %c127_i32_136 dim 1 : vector<16x128xf32>, i32 -> vector<16x128xf32>
    %c1_i32_137 = arith.constant 1 : i32
    %793 = tpu.dynamic_rotate %786 by %c1_i32_137 dim 1 : vector<16x128xf32>, i32 -> vector<16x128xf32>
    %c127_i32_138 = arith.constant 127 : i32
    %794 = tpu.dynamic_rotate %786 by %c127_i32_138 dim 1 : vector<16x128xf32>, i32 -> vector<16x128xf32>
    %c1_i32_139 = arith.constant 1 : i32
    %795 = tpu.dynamic_rotate %790 by %c1_i32_139 dim 1 : vector<16x128xf32>, i32 -> vector<16x128xf32>
    %c127_i32_140 = arith.constant 127 : i32
    %796 = tpu.dynamic_rotate %790 by %c127_i32_140 dim 1 : vector<16x128xf32>, i32 -> vector<16x128xf32>
    %c54 = arith.constant 54 : index
    %797 = memref.load %arg4[%c54] : memref<324xf32, #tpu.memory_space<smem>>
    %798 = vector.broadcast %797 : f32 to vector<16x128xf32>
    %799 = arith.mulf %791, %798 : vector<16x128xf32>
    %c55 = arith.constant 55 : index
    %800 = memref.load %arg4[%c55] : memref<324xf32, #tpu.memory_space<smem>>
    %801 = vector.broadcast %800 : f32 to vector<16x128xf32>
    %802 = arith.mulf %778, %801 : vector<16x128xf32>
    %803 = arith.addf %799, %802 : vector<16x128xf32>
    %c56 = arith.constant 56 : index
    %804 = memref.load %arg4[%c56] : memref<324xf32, #tpu.memory_space<smem>>
    %805 = vector.broadcast %804 : f32 to vector<16x128xf32>
    %806 = arith.mulf %792, %805 : vector<16x128xf32>
    %807 = arith.addf %803, %806 : vector<16x128xf32>
    %c57 = arith.constant 57 : index
    %808 = memref.load %arg4[%c57] : memref<324xf32, #tpu.memory_space<smem>>
    %809 = vector.broadcast %808 : f32 to vector<16x128xf32>
    %810 = arith.mulf %793, %809 : vector<16x128xf32>
    %811 = arith.addf %807, %810 : vector<16x128xf32>
    %c58 = arith.constant 58 : index
    %812 = memref.load %arg4[%c58] : memref<324xf32, #tpu.memory_space<smem>>
    %813 = vector.broadcast %812 : f32 to vector<16x128xf32>
    %814 = arith.mulf %786, %813 : vector<16x128xf32>
    %815 = arith.addf %811, %814 : vector<16x128xf32>
    %c59 = arith.constant 59 : index
    %816 = memref.load %arg4[%c59] : memref<324xf32, #tpu.memory_space<smem>>
    %817 = vector.broadcast %816 : f32 to vector<16x128xf32>
    %818 = arith.mulf %794, %817 : vector<16x128xf32>
    %819 = arith.addf %815, %818 : vector<16x128xf32>
    %c60 = arith.constant 60 : index
    %820 = memref.load %arg4[%c60] : memref<324xf32, #tpu.memory_space<smem>>
    %821 = vector.broadcast %820 : f32 to vector<16x128xf32>
    %822 = arith.mulf %795, %821 : vector<16x128xf32>
    %823 = arith.addf %819, %822 : vector<16x128xf32>
    %c61 = arith.constant 61 : index
    %824 = memref.load %arg4[%c61] : memref<324xf32, #tpu.memory_space<smem>>
    %825 = vector.broadcast %824 : f32 to vector<16x128xf32>
    %826 = arith.mulf %790, %825 : vector<16x128xf32>
    %827 = arith.addf %823, %826 : vector<16x128xf32>
    %c62 = arith.constant 62 : index
    %828 = memref.load %arg4[%c62] : memref<324xf32, #tpu.memory_space<smem>>
    %829 = vector.broadcast %828 : f32 to vector<16x128xf32>
    %830 = arith.mulf %796, %829 : vector<16x128xf32>
    %831 = arith.addf %827, %830 : vector<16x128xf32>
    %832 = arith.addf %704, %831 : vector<16x128xf32>
    %c162 = arith.constant 162 : index
    %833 = memref.load %arg4[%c162] : memref<324xf32, #tpu.memory_space<smem>>
    %834 = vector.broadcast %833 : f32 to vector<16x128xf32>
    %835 = arith.mulf %791, %834 : vector<16x128xf32>
    %c163 = arith.constant 163 : index
    %836 = memref.load %arg4[%c163] : memref<324xf32, #tpu.memory_space<smem>>
    %837 = vector.broadcast %836 : f32 to vector<16x128xf32>
    %838 = arith.mulf %778, %837 : vector<16x128xf32>
    %839 = arith.addf %835, %838 : vector<16x128xf32>
    %c164 = arith.constant 164 : index
    %840 = memref.load %arg4[%c164] : memref<324xf32, #tpu.memory_space<smem>>
    %841 = vector.broadcast %840 : f32 to vector<16x128xf32>
    %842 = arith.mulf %792, %841 : vector<16x128xf32>
    %843 = arith.addf %839, %842 : vector<16x128xf32>
    %c165 = arith.constant 165 : index
    %844 = memref.load %arg4[%c165] : memref<324xf32, #tpu.memory_space<smem>>
    %845 = vector.broadcast %844 : f32 to vector<16x128xf32>
    %846 = arith.mulf %793, %845 : vector<16x128xf32>
    %847 = arith.addf %843, %846 : vector<16x128xf32>
    %c166 = arith.constant 166 : index
    %848 = memref.load %arg4[%c166] : memref<324xf32, #tpu.memory_space<smem>>
    %849 = vector.broadcast %848 : f32 to vector<16x128xf32>
    %850 = arith.mulf %786, %849 : vector<16x128xf32>
    %851 = arith.addf %847, %850 : vector<16x128xf32>
    %c167 = arith.constant 167 : index
    %852 = memref.load %arg4[%c167] : memref<324xf32, #tpu.memory_space<smem>>
    %853 = vector.broadcast %852 : f32 to vector<16x128xf32>
    %854 = arith.mulf %794, %853 : vector<16x128xf32>
    %855 = arith.addf %851, %854 : vector<16x128xf32>
    %c168 = arith.constant 168 : index
    %856 = memref.load %arg4[%c168] : memref<324xf32, #tpu.memory_space<smem>>
    %857 = vector.broadcast %856 : f32 to vector<16x128xf32>
    %858 = arith.mulf %795, %857 : vector<16x128xf32>
    %859 = arith.addf %855, %858 : vector<16x128xf32>
    %c169 = arith.constant 169 : index
    %860 = memref.load %arg4[%c169] : memref<324xf32, #tpu.memory_space<smem>>
    %861 = vector.broadcast %860 : f32 to vector<16x128xf32>
    %862 = arith.mulf %790, %861 : vector<16x128xf32>
    %863 = arith.addf %859, %862 : vector<16x128xf32>
    %c170 = arith.constant 170 : index
    %864 = memref.load %arg4[%c170] : memref<324xf32, #tpu.memory_space<smem>>
    %865 = vector.broadcast %864 : f32 to vector<16x128xf32>
    %866 = arith.mulf %796, %865 : vector<16x128xf32>
    %867 = arith.addf %863, %866 : vector<16x128xf32>
    %868 = arith.addf %740, %867 : vector<16x128xf32>
    %c270 = arith.constant 270 : index
    %869 = memref.load %arg4[%c270] : memref<324xf32, #tpu.memory_space<smem>>
    %870 = vector.broadcast %869 : f32 to vector<16x128xf32>
    %871 = arith.mulf %791, %870 : vector<16x128xf32>
    %c271 = arith.constant 271 : index
    %872 = memref.load %arg4[%c271] : memref<324xf32, #tpu.memory_space<smem>>
    %873 = vector.broadcast %872 : f32 to vector<16x128xf32>
    %874 = arith.mulf %778, %873 : vector<16x128xf32>
    %875 = arith.addf %871, %874 : vector<16x128xf32>
    %c272 = arith.constant 272 : index
    %876 = memref.load %arg4[%c272] : memref<324xf32, #tpu.memory_space<smem>>
    %877 = vector.broadcast %876 : f32 to vector<16x128xf32>
    %878 = arith.mulf %792, %877 : vector<16x128xf32>
    %879 = arith.addf %875, %878 : vector<16x128xf32>
    %c273 = arith.constant 273 : index
    %880 = memref.load %arg4[%c273] : memref<324xf32, #tpu.memory_space<smem>>
    %881 = vector.broadcast %880 : f32 to vector<16x128xf32>
    %882 = arith.mulf %793, %881 : vector<16x128xf32>
    %883 = arith.addf %879, %882 : vector<16x128xf32>
    %c274 = arith.constant 274 : index
    %884 = memref.load %arg4[%c274] : memref<324xf32, #tpu.memory_space<smem>>
    %885 = vector.broadcast %884 : f32 to vector<16x128xf32>
    %886 = arith.mulf %786, %885 : vector<16x128xf32>
    %887 = arith.addf %883, %886 : vector<16x128xf32>
    %c275 = arith.constant 275 : index
    %888 = memref.load %arg4[%c275] : memref<324xf32, #tpu.memory_space<smem>>
    %889 = vector.broadcast %888 : f32 to vector<16x128xf32>
    %890 = arith.mulf %794, %889 : vector<16x128xf32>
    %891 = arith.addf %887, %890 : vector<16x128xf32>
    %c276 = arith.constant 276 : index
    %892 = memref.load %arg4[%c276] : memref<324xf32, #tpu.memory_space<smem>>
    %893 = vector.broadcast %892 : f32 to vector<16x128xf32>
    %894 = arith.mulf %795, %893 : vector<16x128xf32>
    %895 = arith.addf %891, %894 : vector<16x128xf32>
    %c277 = arith.constant 277 : index
    %896 = memref.load %arg4[%c277] : memref<324xf32, #tpu.memory_space<smem>>
    %897 = vector.broadcast %896 : f32 to vector<16x128xf32>
    %898 = arith.mulf %790, %897 : vector<16x128xf32>
    %899 = arith.addf %895, %898 : vector<16x128xf32>
    %c278 = arith.constant 278 : index
    %900 = memref.load %arg4[%c278] : memref<324xf32, #tpu.memory_space<smem>>
    %901 = vector.broadcast %900 : f32 to vector<16x128xf32>
    %902 = arith.mulf %796, %901 : vector<16x128xf32>
    %903 = arith.addf %899, %902 : vector<16x128xf32>
    %904 = arith.addf %776, %903 : vector<16x128xf32>
    %c0_141 = arith.constant 0 : index
    %c7_142 = arith.constant 7 : index
    %c0_143 = arith.constant 0 : index
    %c0_144 = arith.constant 0 : index
    %905 = vector.load %arg2[%c0_141, %c7_142, %c0_143, %c0_144] : memref<1x12x16x128xf32, #tpu.memory_space<vmem>>, vector<1x1x16x128xf32>
    %906 = vector.shape_cast %905 : vector<1x1x16x128xf32> to vector<16x128xf32>
    %c0_145 = arith.constant 0 : index
    %c7_146 = arith.constant 7 : index
    %c0_147 = arith.constant 0 : index
    %c0_148 = arith.constant 0 : index
    %907 = vector.load %arg3[%c0_145, %c7_146, %c0_147, %c0_148] : memref<1x12x8x128xf32, #tpu.memory_space<vmem>>, vector<1x1x1x128xf32>
    %908 = vector.shape_cast %907 : vector<1x1x1x128xf32> to vector<1x128xf32>
    %c0_149 = arith.constant 0 : index
    %c7_150 = arith.constant 7 : index
    %c1_151 = arith.constant 1 : index
    %c0_152 = arith.constant 0 : index
    %909 = vector.load %arg3[%c0_149, %c7_150, %c1_151, %c0_152] : memref<1x12x8x128xf32, #tpu.memory_space<vmem>>, vector<1x1x1x128xf32>
    %910 = vector.shape_cast %909 : vector<1x1x1x128xf32> to vector<1x128xf32>
    %c15_i32_153 = arith.constant 15 : i32
    %911 = tpu.dynamic_rotate %906 by %c15_i32_153 dim 0 : vector<16x128xf32>, i32 -> vector<16x128xf32>
    %912 = vector.shape_cast %908 : vector<1x128xf32> to vector<1x128xf32>
    %913 = vector.broadcast %912 : vector<1x128xf32> to vector<16x128xf32>
    %914 = arith.select %2, %911, %913 : vector<16x128xi1>, vector<16x128xf32>
    %c15_i32_154 = arith.constant 15 : i32
    %915 = tpu.dynamic_rotate %914 by %c15_i32_154 dim 0 : vector<16x128xf32>, i32 -> vector<16x128xf32>
    %916 = vector.shape_cast %910 : vector<1x128xf32> to vector<1x128xf32>
    %917 = vector.broadcast %916 : vector<1x128xf32> to vector<16x128xf32>
    %918 = arith.select %2, %915, %917 : vector<16x128xi1>, vector<16x128xf32>
    %c1_i32_155 = arith.constant 1 : i32
    %919 = tpu.dynamic_rotate %906 by %c1_i32_155 dim 1 : vector<16x128xf32>, i32 -> vector<16x128xf32>
    %c127_i32_156 = arith.constant 127 : i32
    %920 = tpu.dynamic_rotate %906 by %c127_i32_156 dim 1 : vector<16x128xf32>, i32 -> vector<16x128xf32>
    %c1_i32_157 = arith.constant 1 : i32
    %921 = tpu.dynamic_rotate %914 by %c1_i32_157 dim 1 : vector<16x128xf32>, i32 -> vector<16x128xf32>
    %c127_i32_158 = arith.constant 127 : i32
    %922 = tpu.dynamic_rotate %914 by %c127_i32_158 dim 1 : vector<16x128xf32>, i32 -> vector<16x128xf32>
    %c1_i32_159 = arith.constant 1 : i32
    %923 = tpu.dynamic_rotate %918 by %c1_i32_159 dim 1 : vector<16x128xf32>, i32 -> vector<16x128xf32>
    %c127_i32_160 = arith.constant 127 : i32
    %924 = tpu.dynamic_rotate %918 by %c127_i32_160 dim 1 : vector<16x128xf32>, i32 -> vector<16x128xf32>
    %c63 = arith.constant 63 : index
    %925 = memref.load %arg4[%c63] : memref<324xf32, #tpu.memory_space<smem>>
    %926 = vector.broadcast %925 : f32 to vector<16x128xf32>
    %927 = arith.mulf %919, %926 : vector<16x128xf32>
    %c64 = arith.constant 64 : index
    %928 = memref.load %arg4[%c64] : memref<324xf32, #tpu.memory_space<smem>>
    %929 = vector.broadcast %928 : f32 to vector<16x128xf32>
    %930 = arith.mulf %906, %929 : vector<16x128xf32>
    %931 = arith.addf %927, %930 : vector<16x128xf32>
    %c65 = arith.constant 65 : index
    %932 = memref.load %arg4[%c65] : memref<324xf32, #tpu.memory_space<smem>>
    %933 = vector.broadcast %932 : f32 to vector<16x128xf32>
    %934 = arith.mulf %920, %933 : vector<16x128xf32>
    %935 = arith.addf %931, %934 : vector<16x128xf32>
    %c66 = arith.constant 66 : index
    %936 = memref.load %arg4[%c66] : memref<324xf32, #tpu.memory_space<smem>>
    %937 = vector.broadcast %936 : f32 to vector<16x128xf32>
    %938 = arith.mulf %921, %937 : vector<16x128xf32>
    %939 = arith.addf %935, %938 : vector<16x128xf32>
    %c67 = arith.constant 67 : index
    %940 = memref.load %arg4[%c67] : memref<324xf32, #tpu.memory_space<smem>>
    %941 = vector.broadcast %940 : f32 to vector<16x128xf32>
    %942 = arith.mulf %914, %941 : vector<16x128xf32>
    %943 = arith.addf %939, %942 : vector<16x128xf32>
    %c68 = arith.constant 68 : index
    %944 = memref.load %arg4[%c68] : memref<324xf32, #tpu.memory_space<smem>>
    %945 = vector.broadcast %944 : f32 to vector<16x128xf32>
    %946 = arith.mulf %922, %945 : vector<16x128xf32>
    %947 = arith.addf %943, %946 : vector<16x128xf32>
    %c69 = arith.constant 69 : index
    %948 = memref.load %arg4[%c69] : memref<324xf32, #tpu.memory_space<smem>>
    %949 = vector.broadcast %948 : f32 to vector<16x128xf32>
    %950 = arith.mulf %923, %949 : vector<16x128xf32>
    %951 = arith.addf %947, %950 : vector<16x128xf32>
    %c70 = arith.constant 70 : index
    %952 = memref.load %arg4[%c70] : memref<324xf32, #tpu.memory_space<smem>>
    %953 = vector.broadcast %952 : f32 to vector<16x128xf32>
    %954 = arith.mulf %918, %953 : vector<16x128xf32>
    %955 = arith.addf %951, %954 : vector<16x128xf32>
    %c71 = arith.constant 71 : index
    %956 = memref.load %arg4[%c71] : memref<324xf32, #tpu.memory_space<smem>>
    %957 = vector.broadcast %956 : f32 to vector<16x128xf32>
    %958 = arith.mulf %924, %957 : vector<16x128xf32>
    %959 = arith.addf %955, %958 : vector<16x128xf32>
    %960 = arith.addf %832, %959 : vector<16x128xf32>
    %c171 = arith.constant 171 : index
    %961 = memref.load %arg4[%c171] : memref<324xf32, #tpu.memory_space<smem>>
    %962 = vector.broadcast %961 : f32 to vector<16x128xf32>
    %963 = arith.mulf %919, %962 : vector<16x128xf32>
    %c172 = arith.constant 172 : index
    %964 = memref.load %arg4[%c172] : memref<324xf32, #tpu.memory_space<smem>>
    %965 = vector.broadcast %964 : f32 to vector<16x128xf32>
    %966 = arith.mulf %906, %965 : vector<16x128xf32>
    %967 = arith.addf %963, %966 : vector<16x128xf32>
    %c173 = arith.constant 173 : index
    %968 = memref.load %arg4[%c173] : memref<324xf32, #tpu.memory_space<smem>>
    %969 = vector.broadcast %968 : f32 to vector<16x128xf32>
    %970 = arith.mulf %920, %969 : vector<16x128xf32>
    %971 = arith.addf %967, %970 : vector<16x128xf32>
    %c174 = arith.constant 174 : index
    %972 = memref.load %arg4[%c174] : memref<324xf32, #tpu.memory_space<smem>>
    %973 = vector.broadcast %972 : f32 to vector<16x128xf32>
    %974 = arith.mulf %921, %973 : vector<16x128xf32>
    %975 = arith.addf %971, %974 : vector<16x128xf32>
    %c175 = arith.constant 175 : index
    %976 = memref.load %arg4[%c175] : memref<324xf32, #tpu.memory_space<smem>>
    %977 = vector.broadcast %976 : f32 to vector<16x128xf32>
    %978 = arith.mulf %914, %977 : vector<16x128xf32>
    %979 = arith.addf %975, %978 : vector<16x128xf32>
    %c176 = arith.constant 176 : index
    %980 = memref.load %arg4[%c176] : memref<324xf32, #tpu.memory_space<smem>>
    %981 = vector.broadcast %980 : f32 to vector<16x128xf32>
    %982 = arith.mulf %922, %981 : vector<16x128xf32>
    %983 = arith.addf %979, %982 : vector<16x128xf32>
    %c177 = arith.constant 177 : index
    %984 = memref.load %arg4[%c177] : memref<324xf32, #tpu.memory_space<smem>>
    %985 = vector.broadcast %984 : f32 to vector<16x128xf32>
    %986 = arith.mulf %923, %985 : vector<16x128xf32>
    %987 = arith.addf %983, %986 : vector<16x128xf32>
    %c178 = arith.constant 178 : index
    %988 = memref.load %arg4[%c178] : memref<324xf32, #tpu.memory_space<smem>>
    %989 = vector.broadcast %988 : f32 to vector<16x128xf32>
    %990 = arith.mulf %918, %989 : vector<16x128xf32>
    %991 = arith.addf %987, %990 : vector<16x128xf32>
    %c179 = arith.constant 179 : index
    %992 = memref.load %arg4[%c179] : memref<324xf32, #tpu.memory_space<smem>>
    %993 = vector.broadcast %992 : f32 to vector<16x128xf32>
    %994 = arith.mulf %924, %993 : vector<16x128xf32>
    %995 = arith.addf %991, %994 : vector<16x128xf32>
    %996 = arith.addf %868, %995 : vector<16x128xf32>
    %c279 = arith.constant 279 : index
    %997 = memref.load %arg4[%c279] : memref<324xf32, #tpu.memory_space<smem>>
    %998 = vector.broadcast %997 : f32 to vector<16x128xf32>
    %999 = arith.mulf %919, %998 : vector<16x128xf32>
    %c280 = arith.constant 280 : index
    %1000 = memref.load %arg4[%c280] : memref<324xf32, #tpu.memory_space<smem>>
    %1001 = vector.broadcast %1000 : f32 to vector<16x128xf32>
    %1002 = arith.mulf %906, %1001 : vector<16x128xf32>
    %1003 = arith.addf %999, %1002 : vector<16x128xf32>
    %c281 = arith.constant 281 : index
    %1004 = memref.load %arg4[%c281] : memref<324xf32, #tpu.memory_space<smem>>
    %1005 = vector.broadcast %1004 : f32 to vector<16x128xf32>
    %1006 = arith.mulf %920, %1005 : vector<16x128xf32>
    %1007 = arith.addf %1003, %1006 : vector<16x128xf32>
    %c282 = arith.constant 282 : index
    %1008 = memref.load %arg4[%c282] : memref<324xf32, #tpu.memory_space<smem>>
    %1009 = vector.broadcast %1008 : f32 to vector<16x128xf32>
    %1010 = arith.mulf %921, %1009 : vector<16x128xf32>
    %1011 = arith.addf %1007, %1010 : vector<16x128xf32>
    %c283 = arith.constant 283 : index
    %1012 = memref.load %arg4[%c283] : memref<324xf32, #tpu.memory_space<smem>>
    %1013 = vector.broadcast %1012 : f32 to vector<16x128xf32>
    %1014 = arith.mulf %914, %1013 : vector<16x128xf32>
    %1015 = arith.addf %1011, %1014 : vector<16x128xf32>
    %c284 = arith.constant 284 : index
    %1016 = memref.load %arg4[%c284] : memref<324xf32, #tpu.memory_space<smem>>
    %1017 = vector.broadcast %1016 : f32 to vector<16x128xf32>
    %1018 = arith.mulf %922, %1017 : vector<16x128xf32>
    %1019 = arith.addf %1015, %1018 : vector<16x128xf32>
    %c285 = arith.constant 285 : index
    %1020 = memref.load %arg4[%c285] : memref<324xf32, #tpu.memory_space<smem>>
    %1021 = vector.broadcast %1020 : f32 to vector<16x128xf32>
    %1022 = arith.mulf %923, %1021 : vector<16x128xf32>
    %1023 = arith.addf %1019, %1022 : vector<16x128xf32>
    %c286 = arith.constant 286 : index
    %1024 = memref.load %arg4[%c286] : memref<324xf32, #tpu.memory_space<smem>>
    %1025 = vector.broadcast %1024 : f32 to vector<16x128xf32>
    %1026 = arith.mulf %918, %1025 : vector<16x128xf32>
    %1027 = arith.addf %1023, %1026 : vector<16x128xf32>
    %c287 = arith.constant 287 : index
    %1028 = memref.load %arg4[%c287] : memref<324xf32, #tpu.memory_space<smem>>
    %1029 = vector.broadcast %1028 : f32 to vector<16x128xf32>
    %1030 = arith.mulf %924, %1029 : vector<16x128xf32>
    %1031 = arith.addf %1027, %1030 : vector<16x128xf32>
    %1032 = arith.addf %904, %1031 : vector<16x128xf32>
    %c0_161 = arith.constant 0 : index
    %c8_162 = arith.constant 8 : index
    %c0_163 = arith.constant 0 : index
    %c0_164 = arith.constant 0 : index
    %1033 = vector.load %arg2[%c0_161, %c8_162, %c0_163, %c0_164] : memref<1x12x16x128xf32, #tpu.memory_space<vmem>>, vector<1x1x16x128xf32>
    %1034 = vector.shape_cast %1033 : vector<1x1x16x128xf32> to vector<16x128xf32>
    %c0_165 = arith.constant 0 : index
    %c8_166 = arith.constant 8 : index
    %c0_167 = arith.constant 0 : index
    %c0_168 = arith.constant 0 : index
    %1035 = vector.load %arg3[%c0_165, %c8_166, %c0_167, %c0_168] : memref<1x12x8x128xf32, #tpu.memory_space<vmem>>, vector<1x1x1x128xf32>
    %1036 = vector.shape_cast %1035 : vector<1x1x1x128xf32> to vector<1x128xf32>
    %c0_169 = arith.constant 0 : index
    %c8_170 = arith.constant 8 : index
    %c1_171 = arith.constant 1 : index
    %c0_172 = arith.constant 0 : index
    %1037 = vector.load %arg3[%c0_169, %c8_170, %c1_171, %c0_172] : memref<1x12x8x128xf32, #tpu.memory_space<vmem>>, vector<1x1x1x128xf32>
    %1038 = vector.shape_cast %1037 : vector<1x1x1x128xf32> to vector<1x128xf32>
    %c15_i32_173 = arith.constant 15 : i32
    %1039 = tpu.dynamic_rotate %1034 by %c15_i32_173 dim 0 : vector<16x128xf32>, i32 -> vector<16x128xf32>
    %1040 = vector.shape_cast %1036 : vector<1x128xf32> to vector<1x128xf32>
    %1041 = vector.broadcast %1040 : vector<1x128xf32> to vector<16x128xf32>
    %1042 = arith.select %2, %1039, %1041 : vector<16x128xi1>, vector<16x128xf32>
    %c15_i32_174 = arith.constant 15 : i32
    %1043 = tpu.dynamic_rotate %1042 by %c15_i32_174 dim 0 : vector<16x128xf32>, i32 -> vector<16x128xf32>
    %1044 = vector.shape_cast %1038 : vector<1x128xf32> to vector<1x128xf32>
    %1045 = vector.broadcast %1044 : vector<1x128xf32> to vector<16x128xf32>
    %1046 = arith.select %2, %1043, %1045 : vector<16x128xi1>, vector<16x128xf32>
    %c1_i32_175 = arith.constant 1 : i32
    %1047 = tpu.dynamic_rotate %1034 by %c1_i32_175 dim 1 : vector<16x128xf32>, i32 -> vector<16x128xf32>
    %c127_i32_176 = arith.constant 127 : i32
    %1048 = tpu.dynamic_rotate %1034 by %c127_i32_176 dim 1 : vector<16x128xf32>, i32 -> vector<16x128xf32>
    %c1_i32_177 = arith.constant 1 : i32
    %1049 = tpu.dynamic_rotate %1042 by %c1_i32_177 dim 1 : vector<16x128xf32>, i32 -> vector<16x128xf32>
    %c127_i32_178 = arith.constant 127 : i32
    %1050 = tpu.dynamic_rotate %1042 by %c127_i32_178 dim 1 : vector<16x128xf32>, i32 -> vector<16x128xf32>
    %c1_i32_179 = arith.constant 1 : i32
    %1051 = tpu.dynamic_rotate %1046 by %c1_i32_179 dim 1 : vector<16x128xf32>, i32 -> vector<16x128xf32>
    %c127_i32_180 = arith.constant 127 : i32
    %1052 = tpu.dynamic_rotate %1046 by %c127_i32_180 dim 1 : vector<16x128xf32>, i32 -> vector<16x128xf32>
    %c72 = arith.constant 72 : index
    %1053 = memref.load %arg4[%c72] : memref<324xf32, #tpu.memory_space<smem>>
    %1054 = vector.broadcast %1053 : f32 to vector<16x128xf32>
    %1055 = arith.mulf %1047, %1054 : vector<16x128xf32>
    %c73 = arith.constant 73 : index
    %1056 = memref.load %arg4[%c73] : memref<324xf32, #tpu.memory_space<smem>>
    %1057 = vector.broadcast %1056 : f32 to vector<16x128xf32>
    %1058 = arith.mulf %1034, %1057 : vector<16x128xf32>
    %1059 = arith.addf %1055, %1058 : vector<16x128xf32>
    %c74 = arith.constant 74 : index
    %1060 = memref.load %arg4[%c74] : memref<324xf32, #tpu.memory_space<smem>>
    %1061 = vector.broadcast %1060 : f32 to vector<16x128xf32>
    %1062 = arith.mulf %1048, %1061 : vector<16x128xf32>
    %1063 = arith.addf %1059, %1062 : vector<16x128xf32>
    %c75 = arith.constant 75 : index
    %1064 = memref.load %arg4[%c75] : memref<324xf32, #tpu.memory_space<smem>>
    %1065 = vector.broadcast %1064 : f32 to vector<16x128xf32>
    %1066 = arith.mulf %1049, %1065 : vector<16x128xf32>
    %1067 = arith.addf %1063, %1066 : vector<16x128xf32>
    %c76 = arith.constant 76 : index
    %1068 = memref.load %arg4[%c76] : memref<324xf32, #tpu.memory_space<smem>>
    %1069 = vector.broadcast %1068 : f32 to vector<16x128xf32>
    %1070 = arith.mulf %1042, %1069 : vector<16x128xf32>
    %1071 = arith.addf %1067, %1070 : vector<16x128xf32>
    %c77 = arith.constant 77 : index
    %1072 = memref.load %arg4[%c77] : memref<324xf32, #tpu.memory_space<smem>>
    %1073 = vector.broadcast %1072 : f32 to vector<16x128xf32>
    %1074 = arith.mulf %1050, %1073 : vector<16x128xf32>
    %1075 = arith.addf %1071, %1074 : vector<16x128xf32>
    %c78 = arith.constant 78 : index
    %1076 = memref.load %arg4[%c78] : memref<324xf32, #tpu.memory_space<smem>>
    %1077 = vector.broadcast %1076 : f32 to vector<16x128xf32>
    %1078 = arith.mulf %1051, %1077 : vector<16x128xf32>
    %1079 = arith.addf %1075, %1078 : vector<16x128xf32>
    %c79 = arith.constant 79 : index
    %1080 = memref.load %arg4[%c79] : memref<324xf32, #tpu.memory_space<smem>>
    %1081 = vector.broadcast %1080 : f32 to vector<16x128xf32>
    %1082 = arith.mulf %1046, %1081 : vector<16x128xf32>
    %1083 = arith.addf %1079, %1082 : vector<16x128xf32>
    %c80 = arith.constant 80 : index
    %1084 = memref.load %arg4[%c80] : memref<324xf32, #tpu.memory_space<smem>>
    %1085 = vector.broadcast %1084 : f32 to vector<16x128xf32>
    %1086 = arith.mulf %1052, %1085 : vector<16x128xf32>
    %1087 = arith.addf %1083, %1086 : vector<16x128xf32>
    %1088 = arith.addf %960, %1087 : vector<16x128xf32>
    %c180 = arith.constant 180 : index
    %1089 = memref.load %arg4[%c180] : memref<324xf32, #tpu.memory_space<smem>>
    %1090 = vector.broadcast %1089 : f32 to vector<16x128xf32>
    %1091 = arith.mulf %1047, %1090 : vector<16x128xf32>
    %c181 = arith.constant 181 : index
    %1092 = memref.load %arg4[%c181] : memref<324xf32, #tpu.memory_space<smem>>
    %1093 = vector.broadcast %1092 : f32 to vector<16x128xf32>
    %1094 = arith.mulf %1034, %1093 : vector<16x128xf32>
    %1095 = arith.addf %1091, %1094 : vector<16x128xf32>
    %c182 = arith.constant 182 : index
    %1096 = memref.load %arg4[%c182] : memref<324xf32, #tpu.memory_space<smem>>
    %1097 = vector.broadcast %1096 : f32 to vector<16x128xf32>
    %1098 = arith.mulf %1048, %1097 : vector<16x128xf32>
    %1099 = arith.addf %1095, %1098 : vector<16x128xf32>
    %c183 = arith.constant 183 : index
    %1100 = memref.load %arg4[%c183] : memref<324xf32, #tpu.memory_space<smem>>
    %1101 = vector.broadcast %1100 : f32 to vector<16x128xf32>
    %1102 = arith.mulf %1049, %1101 : vector<16x128xf32>
    %1103 = arith.addf %1099, %1102 : vector<16x128xf32>
    %c184 = arith.constant 184 : index
    %1104 = memref.load %arg4[%c184] : memref<324xf32, #tpu.memory_space<smem>>
    %1105 = vector.broadcast %1104 : f32 to vector<16x128xf32>
    %1106 = arith.mulf %1042, %1105 : vector<16x128xf32>
    %1107 = arith.addf %1103, %1106 : vector<16x128xf32>
    %c185 = arith.constant 185 : index
    %1108 = memref.load %arg4[%c185] : memref<324xf32, #tpu.memory_space<smem>>
    %1109 = vector.broadcast %1108 : f32 to vector<16x128xf32>
    %1110 = arith.mulf %1050, %1109 : vector<16x128xf32>
    %1111 = arith.addf %1107, %1110 : vector<16x128xf32>
    %c186 = arith.constant 186 : index
    %1112 = memref.load %arg4[%c186] : memref<324xf32, #tpu.memory_space<smem>>
    %1113 = vector.broadcast %1112 : f32 to vector<16x128xf32>
    %1114 = arith.mulf %1051, %1113 : vector<16x128xf32>
    %1115 = arith.addf %1111, %1114 : vector<16x128xf32>
    %c187 = arith.constant 187 : index
    %1116 = memref.load %arg4[%c187] : memref<324xf32, #tpu.memory_space<smem>>
    %1117 = vector.broadcast %1116 : f32 to vector<16x128xf32>
    %1118 = arith.mulf %1046, %1117 : vector<16x128xf32>
    %1119 = arith.addf %1115, %1118 : vector<16x128xf32>
    %c188 = arith.constant 188 : index
    %1120 = memref.load %arg4[%c188] : memref<324xf32, #tpu.memory_space<smem>>
    %1121 = vector.broadcast %1120 : f32 to vector<16x128xf32>
    %1122 = arith.mulf %1052, %1121 : vector<16x128xf32>
    %1123 = arith.addf %1119, %1122 : vector<16x128xf32>
    %1124 = arith.addf %996, %1123 : vector<16x128xf32>
    %c288 = arith.constant 288 : index
    %1125 = memref.load %arg4[%c288] : memref<324xf32, #tpu.memory_space<smem>>
    %1126 = vector.broadcast %1125 : f32 to vector<16x128xf32>
    %1127 = arith.mulf %1047, %1126 : vector<16x128xf32>
    %c289 = arith.constant 289 : index
    %1128 = memref.load %arg4[%c289] : memref<324xf32, #tpu.memory_space<smem>>
    %1129 = vector.broadcast %1128 : f32 to vector<16x128xf32>
    %1130 = arith.mulf %1034, %1129 : vector<16x128xf32>
    %1131 = arith.addf %1127, %1130 : vector<16x128xf32>
    %c290 = arith.constant 290 : index
    %1132 = memref.load %arg4[%c290] : memref<324xf32, #tpu.memory_space<smem>>
    %1133 = vector.broadcast %1132 : f32 to vector<16x128xf32>
    %1134 = arith.mulf %1048, %1133 : vector<16x128xf32>
    %1135 = arith.addf %1131, %1134 : vector<16x128xf32>
    %c291 = arith.constant 291 : index
    %1136 = memref.load %arg4[%c291] : memref<324xf32, #tpu.memory_space<smem>>
    %1137 = vector.broadcast %1136 : f32 to vector<16x128xf32>
    %1138 = arith.mulf %1049, %1137 : vector<16x128xf32>
    %1139 = arith.addf %1135, %1138 : vector<16x128xf32>
    %c292 = arith.constant 292 : index
    %1140 = memref.load %arg4[%c292] : memref<324xf32, #tpu.memory_space<smem>>
    %1141 = vector.broadcast %1140 : f32 to vector<16x128xf32>
    %1142 = arith.mulf %1042, %1141 : vector<16x128xf32>
    %1143 = arith.addf %1139, %1142 : vector<16x128xf32>
    %c293 = arith.constant 293 : index
    %1144 = memref.load %arg4[%c293] : memref<324xf32, #tpu.memory_space<smem>>
    %1145 = vector.broadcast %1144 : f32 to vector<16x128xf32>
    %1146 = arith.mulf %1050, %1145 : vector<16x128xf32>
    %1147 = arith.addf %1143, %1146 : vector<16x128xf32>
    %c294 = arith.constant 294 : index
    %1148 = memref.load %arg4[%c294] : memref<324xf32, #tpu.memory_space<smem>>
    %1149 = vector.broadcast %1148 : f32 to vector<16x128xf32>
    %1150 = arith.mulf %1051, %1149 : vector<16x128xf32>
    %1151 = arith.addf %1147, %1150 : vector<16x128xf32>
    %c295 = arith.constant 295 : index
    %1152 = memref.load %arg4[%c295] : memref<324xf32, #tpu.memory_space<smem>>
    %1153 = vector.broadcast %1152 : f32 to vector<16x128xf32>
    %1154 = arith.mulf %1046, %1153 : vector<16x128xf32>
    %1155 = arith.addf %1151, %1154 : vector<16x128xf32>
    %c296 = arith.constant 296 : index
    %1156 = memref.load %arg4[%c296] : memref<324xf32, #tpu.memory_space<smem>>
    %1157 = vector.broadcast %1156 : f32 to vector<16x128xf32>
    %1158 = arith.mulf %1052, %1157 : vector<16x128xf32>
    %1159 = arith.addf %1155, %1158 : vector<16x128xf32>
    %1160 = arith.addf %1032, %1159 : vector<16x128xf32>
    %c0_181 = arith.constant 0 : index
    %c9_182 = arith.constant 9 : index
    %c0_183 = arith.constant 0 : index
    %c0_184 = arith.constant 0 : index
    %1161 = vector.load %arg2[%c0_181, %c9_182, %c0_183, %c0_184] : memref<1x12x16x128xf32, #tpu.memory_space<vmem>>, vector<1x1x16x128xf32>
    %1162 = vector.shape_cast %1161 : vector<1x1x16x128xf32> to vector<16x128xf32>
    %c0_185 = arith.constant 0 : index
    %c9_186 = arith.constant 9 : index
    %c0_187 = arith.constant 0 : index
    %c0_188 = arith.constant 0 : index
    %1163 = vector.load %arg3[%c0_185, %c9_186, %c0_187, %c0_188] : memref<1x12x8x128xf32, #tpu.memory_space<vmem>>, vector<1x1x1x128xf32>
    %1164 = vector.shape_cast %1163 : vector<1x1x1x128xf32> to vector<1x128xf32>
    %c0_189 = arith.constant 0 : index
    %c9_190 = arith.constant 9 : index
    %c1_191 = arith.constant 1 : index
    %c0_192 = arith.constant 0 : index
    %1165 = vector.load %arg3[%c0_189, %c9_190, %c1_191, %c0_192] : memref<1x12x8x128xf32, #tpu.memory_space<vmem>>, vector<1x1x1x128xf32>
    %1166 = vector.shape_cast %1165 : vector<1x1x1x128xf32> to vector<1x128xf32>
    %c15_i32_193 = arith.constant 15 : i32
    %1167 = tpu.dynamic_rotate %1162 by %c15_i32_193 dim 0 : vector<16x128xf32>, i32 -> vector<16x128xf32>
    %1168 = vector.shape_cast %1164 : vector<1x128xf32> to vector<1x128xf32>
    %1169 = vector.broadcast %1168 : vector<1x128xf32> to vector<16x128xf32>
    %1170 = arith.select %2, %1167, %1169 : vector<16x128xi1>, vector<16x128xf32>
    %c15_i32_194 = arith.constant 15 : i32
    %1171 = tpu.dynamic_rotate %1170 by %c15_i32_194 dim 0 : vector<16x128xf32>, i32 -> vector<16x128xf32>
    %1172 = vector.shape_cast %1166 : vector<1x128xf32> to vector<1x128xf32>
    %1173 = vector.broadcast %1172 : vector<1x128xf32> to vector<16x128xf32>
    %1174 = arith.select %2, %1171, %1173 : vector<16x128xi1>, vector<16x128xf32>
    %c1_i32_195 = arith.constant 1 : i32
    %1175 = tpu.dynamic_rotate %1162 by %c1_i32_195 dim 1 : vector<16x128xf32>, i32 -> vector<16x128xf32>
    %c127_i32_196 = arith.constant 127 : i32
    %1176 = tpu.dynamic_rotate %1162 by %c127_i32_196 dim 1 : vector<16x128xf32>, i32 -> vector<16x128xf32>
    %c1_i32_197 = arith.constant 1 : i32
    %1177 = tpu.dynamic_rotate %1170 by %c1_i32_197 dim 1 : vector<16x128xf32>, i32 -> vector<16x128xf32>
    %c127_i32_198 = arith.constant 127 : i32
    %1178 = tpu.dynamic_rotate %1170 by %c127_i32_198 dim 1 : vector<16x128xf32>, i32 -> vector<16x128xf32>
    %c1_i32_199 = arith.constant 1 : i32
    %1179 = tpu.dynamic_rotate %1174 by %c1_i32_199 dim 1 : vector<16x128xf32>, i32 -> vector<16x128xf32>
    %c127_i32_200 = arith.constant 127 : i32
    %1180 = tpu.dynamic_rotate %1174 by %c127_i32_200 dim 1 : vector<16x128xf32>, i32 -> vector<16x128xf32>
    %c81 = arith.constant 81 : index
    %1181 = memref.load %arg4[%c81] : memref<324xf32, #tpu.memory_space<smem>>
    %1182 = vector.broadcast %1181 : f32 to vector<16x128xf32>
    %1183 = arith.mulf %1175, %1182 : vector<16x128xf32>
    %c82 = arith.constant 82 : index
    %1184 = memref.load %arg4[%c82] : memref<324xf32, #tpu.memory_space<smem>>
    %1185 = vector.broadcast %1184 : f32 to vector<16x128xf32>
    %1186 = arith.mulf %1162, %1185 : vector<16x128xf32>
    %1187 = arith.addf %1183, %1186 : vector<16x128xf32>
    %c83 = arith.constant 83 : index
    %1188 = memref.load %arg4[%c83] : memref<324xf32, #tpu.memory_space<smem>>
    %1189 = vector.broadcast %1188 : f32 to vector<16x128xf32>
    %1190 = arith.mulf %1176, %1189 : vector<16x128xf32>
    %1191 = arith.addf %1187, %1190 : vector<16x128xf32>
    %c84 = arith.constant 84 : index
    %1192 = memref.load %arg4[%c84] : memref<324xf32, #tpu.memory_space<smem>>
    %1193 = vector.broadcast %1192 : f32 to vector<16x128xf32>
    %1194 = arith.mulf %1177, %1193 : vector<16x128xf32>
    %1195 = arith.addf %1191, %1194 : vector<16x128xf32>
    %c85 = arith.constant 85 : index
    %1196 = memref.load %arg4[%c85] : memref<324xf32, #tpu.memory_space<smem>>
    %1197 = vector.broadcast %1196 : f32 to vector<16x128xf32>
    %1198 = arith.mulf %1170, %1197 : vector<16x128xf32>
    %1199 = arith.addf %1195, %1198 : vector<16x128xf32>
    %c86 = arith.constant 86 : index
    %1200 = memref.load %arg4[%c86] : memref<324xf32, #tpu.memory_space<smem>>
    %1201 = vector.broadcast %1200 : f32 to vector<16x128xf32>
    %1202 = arith.mulf %1178, %1201 : vector<16x128xf32>
    %1203 = arith.addf %1199, %1202 : vector<16x128xf32>
    %c87 = arith.constant 87 : index
    %1204 = memref.load %arg4[%c87] : memref<324xf32, #tpu.memory_space<smem>>
    %1205 = vector.broadcast %1204 : f32 to vector<16x128xf32>
    %1206 = arith.mulf %1179, %1205 : vector<16x128xf32>
    %1207 = arith.addf %1203, %1206 : vector<16x128xf32>
    %c88 = arith.constant 88 : index
    %1208 = memref.load %arg4[%c88] : memref<324xf32, #tpu.memory_space<smem>>
    %1209 = vector.broadcast %1208 : f32 to vector<16x128xf32>
    %1210 = arith.mulf %1174, %1209 : vector<16x128xf32>
    %1211 = arith.addf %1207, %1210 : vector<16x128xf32>
    %c89 = arith.constant 89 : index
    %1212 = memref.load %arg4[%c89] : memref<324xf32, #tpu.memory_space<smem>>
    %1213 = vector.broadcast %1212 : f32 to vector<16x128xf32>
    %1214 = arith.mulf %1180, %1213 : vector<16x128xf32>
    %1215 = arith.addf %1211, %1214 : vector<16x128xf32>
    %1216 = arith.addf %1088, %1215 : vector<16x128xf32>
    %c189 = arith.constant 189 : index
    %1217 = memref.load %arg4[%c189] : memref<324xf32, #tpu.memory_space<smem>>
    %1218 = vector.broadcast %1217 : f32 to vector<16x128xf32>
    %1219 = arith.mulf %1175, %1218 : vector<16x128xf32>
    %c190 = arith.constant 190 : index
    %1220 = memref.load %arg4[%c190] : memref<324xf32, #tpu.memory_space<smem>>
    %1221 = vector.broadcast %1220 : f32 to vector<16x128xf32>
    %1222 = arith.mulf %1162, %1221 : vector<16x128xf32>
    %1223 = arith.addf %1219, %1222 : vector<16x128xf32>
    %c191 = arith.constant 191 : index
    %1224 = memref.load %arg4[%c191] : memref<324xf32, #tpu.memory_space<smem>>
    %1225 = vector.broadcast %1224 : f32 to vector<16x128xf32>
    %1226 = arith.mulf %1176, %1225 : vector<16x128xf32>
    %1227 = arith.addf %1223, %1226 : vector<16x128xf32>
    %c192 = arith.constant 192 : index
    %1228 = memref.load %arg4[%c192] : memref<324xf32, #tpu.memory_space<smem>>
    %1229 = vector.broadcast %1228 : f32 to vector<16x128xf32>
    %1230 = arith.mulf %1177, %1229 : vector<16x128xf32>
    %1231 = arith.addf %1227, %1230 : vector<16x128xf32>
    %c193 = arith.constant 193 : index
    %1232 = memref.load %arg4[%c193] : memref<324xf32, #tpu.memory_space<smem>>
    %1233 = vector.broadcast %1232 : f32 to vector<16x128xf32>
    %1234 = arith.mulf %1170, %1233 : vector<16x128xf32>
    %1235 = arith.addf %1231, %1234 : vector<16x128xf32>
    %c194 = arith.constant 194 : index
    %1236 = memref.load %arg4[%c194] : memref<324xf32, #tpu.memory_space<smem>>
    %1237 = vector.broadcast %1236 : f32 to vector<16x128xf32>
    %1238 = arith.mulf %1178, %1237 : vector<16x128xf32>
    %1239 = arith.addf %1235, %1238 : vector<16x128xf32>
    %c195 = arith.constant 195 : index
    %1240 = memref.load %arg4[%c195] : memref<324xf32, #tpu.memory_space<smem>>
    %1241 = vector.broadcast %1240 : f32 to vector<16x128xf32>
    %1242 = arith.mulf %1179, %1241 : vector<16x128xf32>
    %1243 = arith.addf %1239, %1242 : vector<16x128xf32>
    %c196 = arith.constant 196 : index
    %1244 = memref.load %arg4[%c196] : memref<324xf32, #tpu.memory_space<smem>>
    %1245 = vector.broadcast %1244 : f32 to vector<16x128xf32>
    %1246 = arith.mulf %1174, %1245 : vector<16x128xf32>
    %1247 = arith.addf %1243, %1246 : vector<16x128xf32>
    %c197 = arith.constant 197 : index
    %1248 = memref.load %arg4[%c197] : memref<324xf32, #tpu.memory_space<smem>>
    %1249 = vector.broadcast %1248 : f32 to vector<16x128xf32>
    %1250 = arith.mulf %1180, %1249 : vector<16x128xf32>
    %1251 = arith.addf %1247, %1250 : vector<16x128xf32>
    %1252 = arith.addf %1124, %1251 : vector<16x128xf32>
    %c297 = arith.constant 297 : index
    %1253 = memref.load %arg4[%c297] : memref<324xf32, #tpu.memory_space<smem>>
    %1254 = vector.broadcast %1253 : f32 to vector<16x128xf32>
    %1255 = arith.mulf %1175, %1254 : vector<16x128xf32>
    %c298 = arith.constant 298 : index
    %1256 = memref.load %arg4[%c298] : memref<324xf32, #tpu.memory_space<smem>>
    %1257 = vector.broadcast %1256 : f32 to vector<16x128xf32>
    %1258 = arith.mulf %1162, %1257 : vector<16x128xf32>
    %1259 = arith.addf %1255, %1258 : vector<16x128xf32>
    %c299 = arith.constant 299 : index
    %1260 = memref.load %arg4[%c299] : memref<324xf32, #tpu.memory_space<smem>>
    %1261 = vector.broadcast %1260 : f32 to vector<16x128xf32>
    %1262 = arith.mulf %1176, %1261 : vector<16x128xf32>
    %1263 = arith.addf %1259, %1262 : vector<16x128xf32>
    %c300 = arith.constant 300 : index
    %1264 = memref.load %arg4[%c300] : memref<324xf32, #tpu.memory_space<smem>>
    %1265 = vector.broadcast %1264 : f32 to vector<16x128xf32>
    %1266 = arith.mulf %1177, %1265 : vector<16x128xf32>
    %1267 = arith.addf %1263, %1266 : vector<16x128xf32>
    %c301 = arith.constant 301 : index
    %1268 = memref.load %arg4[%c301] : memref<324xf32, #tpu.memory_space<smem>>
    %1269 = vector.broadcast %1268 : f32 to vector<16x128xf32>
    %1270 = arith.mulf %1170, %1269 : vector<16x128xf32>
    %1271 = arith.addf %1267, %1270 : vector<16x128xf32>
    %c302 = arith.constant 302 : index
    %1272 = memref.load %arg4[%c302] : memref<324xf32, #tpu.memory_space<smem>>
    %1273 = vector.broadcast %1272 : f32 to vector<16x128xf32>
    %1274 = arith.mulf %1178, %1273 : vector<16x128xf32>
    %1275 = arith.addf %1271, %1274 : vector<16x128xf32>
    %c303 = arith.constant 303 : index
    %1276 = memref.load %arg4[%c303] : memref<324xf32, #tpu.memory_space<smem>>
    %1277 = vector.broadcast %1276 : f32 to vector<16x128xf32>
    %1278 = arith.mulf %1179, %1277 : vector<16x128xf32>
    %1279 = arith.addf %1275, %1278 : vector<16x128xf32>
    %c304 = arith.constant 304 : index
    %1280 = memref.load %arg4[%c304] : memref<324xf32, #tpu.memory_space<smem>>
    %1281 = vector.broadcast %1280 : f32 to vector<16x128xf32>
    %1282 = arith.mulf %1174, %1281 : vector<16x128xf32>
    %1283 = arith.addf %1279, %1282 : vector<16x128xf32>
    %c305 = arith.constant 305 : index
    %1284 = memref.load %arg4[%c305] : memref<324xf32, #tpu.memory_space<smem>>
    %1285 = vector.broadcast %1284 : f32 to vector<16x128xf32>
    %1286 = arith.mulf %1180, %1285 : vector<16x128xf32>
    %1287 = arith.addf %1283, %1286 : vector<16x128xf32>
    %1288 = arith.addf %1160, %1287 : vector<16x128xf32>
    %c0_201 = arith.constant 0 : index
    %c10_202 = arith.constant 10 : index
    %c0_203 = arith.constant 0 : index
    %c0_204 = arith.constant 0 : index
    %1289 = vector.load %arg2[%c0_201, %c10_202, %c0_203, %c0_204] : memref<1x12x16x128xf32, #tpu.memory_space<vmem>>, vector<1x1x16x128xf32>
    %1290 = vector.shape_cast %1289 : vector<1x1x16x128xf32> to vector<16x128xf32>
    %c0_205 = arith.constant 0 : index
    %c10_206 = arith.constant 10 : index
    %c0_207 = arith.constant 0 : index
    %c0_208 = arith.constant 0 : index
    %1291 = vector.load %arg3[%c0_205, %c10_206, %c0_207, %c0_208] : memref<1x12x8x128xf32, #tpu.memory_space<vmem>>, vector<1x1x1x128xf32>
    %1292 = vector.shape_cast %1291 : vector<1x1x1x128xf32> to vector<1x128xf32>
    %c0_209 = arith.constant 0 : index
    %c10_210 = arith.constant 10 : index
    %c1_211 = arith.constant 1 : index
    %c0_212 = arith.constant 0 : index
    %1293 = vector.load %arg3[%c0_209, %c10_210, %c1_211, %c0_212] : memref<1x12x8x128xf32, #tpu.memory_space<vmem>>, vector<1x1x1x128xf32>
    %1294 = vector.shape_cast %1293 : vector<1x1x1x128xf32> to vector<1x128xf32>
    %c15_i32_213 = arith.constant 15 : i32
    %1295 = tpu.dynamic_rotate %1290 by %c15_i32_213 dim 0 : vector<16x128xf32>, i32 -> vector<16x128xf32>
    %1296 = vector.shape_cast %1292 : vector<1x128xf32> to vector<1x128xf32>
    %1297 = vector.broadcast %1296 : vector<1x128xf32> to vector<16x128xf32>
    %1298 = arith.select %2, %1295, %1297 : vector<16x128xi1>, vector<16x128xf32>
    %c15_i32_214 = arith.constant 15 : i32
    %1299 = tpu.dynamic_rotate %1298 by %c15_i32_214 dim 0 : vector<16x128xf32>, i32 -> vector<16x128xf32>
    %1300 = vector.shape_cast %1294 : vector<1x128xf32> to vector<1x128xf32>
    %1301 = vector.broadcast %1300 : vector<1x128xf32> to vector<16x128xf32>
    %1302 = arith.select %2, %1299, %1301 : vector<16x128xi1>, vector<16x128xf32>
    %c1_i32_215 = arith.constant 1 : i32
    %1303 = tpu.dynamic_rotate %1290 by %c1_i32_215 dim 1 : vector<16x128xf32>, i32 -> vector<16x128xf32>
    %c127_i32_216 = arith.constant 127 : i32
    %1304 = tpu.dynamic_rotate %1290 by %c127_i32_216 dim 1 : vector<16x128xf32>, i32 -> vector<16x128xf32>
    %c1_i32_217 = arith.constant 1 : i32
    %1305 = tpu.dynamic_rotate %1298 by %c1_i32_217 dim 1 : vector<16x128xf32>, i32 -> vector<16x128xf32>
    %c127_i32_218 = arith.constant 127 : i32
    %1306 = tpu.dynamic_rotate %1298 by %c127_i32_218 dim 1 : vector<16x128xf32>, i32 -> vector<16x128xf32>
    %c1_i32_219 = arith.constant 1 : i32
    %1307 = tpu.dynamic_rotate %1302 by %c1_i32_219 dim 1 : vector<16x128xf32>, i32 -> vector<16x128xf32>
    %c127_i32_220 = arith.constant 127 : i32
    %1308 = tpu.dynamic_rotate %1302 by %c127_i32_220 dim 1 : vector<16x128xf32>, i32 -> vector<16x128xf32>
    %c90 = arith.constant 90 : index
    %1309 = memref.load %arg4[%c90] : memref<324xf32, #tpu.memory_space<smem>>
    %1310 = vector.broadcast %1309 : f32 to vector<16x128xf32>
    %1311 = arith.mulf %1303, %1310 : vector<16x128xf32>
    %c91 = arith.constant 91 : index
    %1312 = memref.load %arg4[%c91] : memref<324xf32, #tpu.memory_space<smem>>
    %1313 = vector.broadcast %1312 : f32 to vector<16x128xf32>
    %1314 = arith.mulf %1290, %1313 : vector<16x128xf32>
    %1315 = arith.addf %1311, %1314 : vector<16x128xf32>
    %c92 = arith.constant 92 : index
    %1316 = memref.load %arg4[%c92] : memref<324xf32, #tpu.memory_space<smem>>
    %1317 = vector.broadcast %1316 : f32 to vector<16x128xf32>
    %1318 = arith.mulf %1304, %1317 : vector<16x128xf32>
    %1319 = arith.addf %1315, %1318 : vector<16x128xf32>
    %c93 = arith.constant 93 : index
    %1320 = memref.load %arg4[%c93] : memref<324xf32, #tpu.memory_space<smem>>
    %1321 = vector.broadcast %1320 : f32 to vector<16x128xf32>
    %1322 = arith.mulf %1305, %1321 : vector<16x128xf32>
    %1323 = arith.addf %1319, %1322 : vector<16x128xf32>
    %c94 = arith.constant 94 : index
    %1324 = memref.load %arg4[%c94] : memref<324xf32, #tpu.memory_space<smem>>
    %1325 = vector.broadcast %1324 : f32 to vector<16x128xf32>
    %1326 = arith.mulf %1298, %1325 : vector<16x128xf32>
    %1327 = arith.addf %1323, %1326 : vector<16x128xf32>
    %c95 = arith.constant 95 : index
    %1328 = memref.load %arg4[%c95] : memref<324xf32, #tpu.memory_space<smem>>
    %1329 = vector.broadcast %1328 : f32 to vector<16x128xf32>
    %1330 = arith.mulf %1306, %1329 : vector<16x128xf32>
    %1331 = arith.addf %1327, %1330 : vector<16x128xf32>
    %c96 = arith.constant 96 : index
    %1332 = memref.load %arg4[%c96] : memref<324xf32, #tpu.memory_space<smem>>
    %1333 = vector.broadcast %1332 : f32 to vector<16x128xf32>
    %1334 = arith.mulf %1307, %1333 : vector<16x128xf32>
    %1335 = arith.addf %1331, %1334 : vector<16x128xf32>
    %c97 = arith.constant 97 : index
    %1336 = memref.load %arg4[%c97] : memref<324xf32, #tpu.memory_space<smem>>
    %1337 = vector.broadcast %1336 : f32 to vector<16x128xf32>
    %1338 = arith.mulf %1302, %1337 : vector<16x128xf32>
    %1339 = arith.addf %1335, %1338 : vector<16x128xf32>
    %c98 = arith.constant 98 : index
    %1340 = memref.load %arg4[%c98] : memref<324xf32, #tpu.memory_space<smem>>
    %1341 = vector.broadcast %1340 : f32 to vector<16x128xf32>
    %1342 = arith.mulf %1308, %1341 : vector<16x128xf32>
    %1343 = arith.addf %1339, %1342 : vector<16x128xf32>
    %1344 = arith.addf %1216, %1343 : vector<16x128xf32>
    %c198 = arith.constant 198 : index
    %1345 = memref.load %arg4[%c198] : memref<324xf32, #tpu.memory_space<smem>>
    %1346 = vector.broadcast %1345 : f32 to vector<16x128xf32>
    %1347 = arith.mulf %1303, %1346 : vector<16x128xf32>
    %c199 = arith.constant 199 : index
    %1348 = memref.load %arg4[%c199] : memref<324xf32, #tpu.memory_space<smem>>
    %1349 = vector.broadcast %1348 : f32 to vector<16x128xf32>
    %1350 = arith.mulf %1290, %1349 : vector<16x128xf32>
    %1351 = arith.addf %1347, %1350 : vector<16x128xf32>
    %c200 = arith.constant 200 : index
    %1352 = memref.load %arg4[%c200] : memref<324xf32, #tpu.memory_space<smem>>
    %1353 = vector.broadcast %1352 : f32 to vector<16x128xf32>
    %1354 = arith.mulf %1304, %1353 : vector<16x128xf32>
    %1355 = arith.addf %1351, %1354 : vector<16x128xf32>
    %c201 = arith.constant 201 : index
    %1356 = memref.load %arg4[%c201] : memref<324xf32, #tpu.memory_space<smem>>
    %1357 = vector.broadcast %1356 : f32 to vector<16x128xf32>
    %1358 = arith.mulf %1305, %1357 : vector<16x128xf32>
    %1359 = arith.addf %1355, %1358 : vector<16x128xf32>
    %c202 = arith.constant 202 : index
    %1360 = memref.load %arg4[%c202] : memref<324xf32, #tpu.memory_space<smem>>
    %1361 = vector.broadcast %1360 : f32 to vector<16x128xf32>
    %1362 = arith.mulf %1298, %1361 : vector<16x128xf32>
    %1363 = arith.addf %1359, %1362 : vector<16x128xf32>
    %c203 = arith.constant 203 : index
    %1364 = memref.load %arg4[%c203] : memref<324xf32, #tpu.memory_space<smem>>
    %1365 = vector.broadcast %1364 : f32 to vector<16x128xf32>
    %1366 = arith.mulf %1306, %1365 : vector<16x128xf32>
    %1367 = arith.addf %1363, %1366 : vector<16x128xf32>
    %c204 = arith.constant 204 : index
    %1368 = memref.load %arg4[%c204] : memref<324xf32, #tpu.memory_space<smem>>
    %1369 = vector.broadcast %1368 : f32 to vector<16x128xf32>
    %1370 = arith.mulf %1307, %1369 : vector<16x128xf32>
    %1371 = arith.addf %1367, %1370 : vector<16x128xf32>
    %c205 = arith.constant 205 : index
    %1372 = memref.load %arg4[%c205] : memref<324xf32, #tpu.memory_space<smem>>
    %1373 = vector.broadcast %1372 : f32 to vector<16x128xf32>
    %1374 = arith.mulf %1302, %1373 : vector<16x128xf32>
    %1375 = arith.addf %1371, %1374 : vector<16x128xf32>
    %c206 = arith.constant 206 : index
    %1376 = memref.load %arg4[%c206] : memref<324xf32, #tpu.memory_space<smem>>
    %1377 = vector.broadcast %1376 : f32 to vector<16x128xf32>
    %1378 = arith.mulf %1308, %1377 : vector<16x128xf32>
    %1379 = arith.addf %1375, %1378 : vector<16x128xf32>
    %1380 = arith.addf %1252, %1379 : vector<16x128xf32>
    %c306 = arith.constant 306 : index
    %1381 = memref.load %arg4[%c306] : memref<324xf32, #tpu.memory_space<smem>>
    %1382 = vector.broadcast %1381 : f32 to vector<16x128xf32>
    %1383 = arith.mulf %1303, %1382 : vector<16x128xf32>
    %c307 = arith.constant 307 : index
    %1384 = memref.load %arg4[%c307] : memref<324xf32, #tpu.memory_space<smem>>
    %1385 = vector.broadcast %1384 : f32 to vector<16x128xf32>
    %1386 = arith.mulf %1290, %1385 : vector<16x128xf32>
    %1387 = arith.addf %1383, %1386 : vector<16x128xf32>
    %c308 = arith.constant 308 : index
    %1388 = memref.load %arg4[%c308] : memref<324xf32, #tpu.memory_space<smem>>
    %1389 = vector.broadcast %1388 : f32 to vector<16x128xf32>
    %1390 = arith.mulf %1304, %1389 : vector<16x128xf32>
    %1391 = arith.addf %1387, %1390 : vector<16x128xf32>
    %c309 = arith.constant 309 : index
    %1392 = memref.load %arg4[%c309] : memref<324xf32, #tpu.memory_space<smem>>
    %1393 = vector.broadcast %1392 : f32 to vector<16x128xf32>
    %1394 = arith.mulf %1305, %1393 : vector<16x128xf32>
    %1395 = arith.addf %1391, %1394 : vector<16x128xf32>
    %c310 = arith.constant 310 : index
    %1396 = memref.load %arg4[%c310] : memref<324xf32, #tpu.memory_space<smem>>
    %1397 = vector.broadcast %1396 : f32 to vector<16x128xf32>
    %1398 = arith.mulf %1298, %1397 : vector<16x128xf32>
    %1399 = arith.addf %1395, %1398 : vector<16x128xf32>
    %c311 = arith.constant 311 : index
    %1400 = memref.load %arg4[%c311] : memref<324xf32, #tpu.memory_space<smem>>
    %1401 = vector.broadcast %1400 : f32 to vector<16x128xf32>
    %1402 = arith.mulf %1306, %1401 : vector<16x128xf32>
    %1403 = arith.addf %1399, %1402 : vector<16x128xf32>
    %c312 = arith.constant 312 : index
    %1404 = memref.load %arg4[%c312] : memref<324xf32, #tpu.memory_space<smem>>
    %1405 = vector.broadcast %1404 : f32 to vector<16x128xf32>
    %1406 = arith.mulf %1307, %1405 : vector<16x128xf32>
    %1407 = arith.addf %1403, %1406 : vector<16x128xf32>
    %c313 = arith.constant 313 : index
    %1408 = memref.load %arg4[%c313] : memref<324xf32, #tpu.memory_space<smem>>
    %1409 = vector.broadcast %1408 : f32 to vector<16x128xf32>
    %1410 = arith.mulf %1302, %1409 : vector<16x128xf32>
    %1411 = arith.addf %1407, %1410 : vector<16x128xf32>
    %c314 = arith.constant 314 : index
    %1412 = memref.load %arg4[%c314] : memref<324xf32, #tpu.memory_space<smem>>
    %1413 = vector.broadcast %1412 : f32 to vector<16x128xf32>
    %1414 = arith.mulf %1308, %1413 : vector<16x128xf32>
    %1415 = arith.addf %1411, %1414 : vector<16x128xf32>
    %1416 = arith.addf %1288, %1415 : vector<16x128xf32>
    %c0_221 = arith.constant 0 : index
    %c11_222 = arith.constant 11 : index
    %c0_223 = arith.constant 0 : index
    %c0_224 = arith.constant 0 : index
    %1417 = vector.load %arg2[%c0_221, %c11_222, %c0_223, %c0_224] : memref<1x12x16x128xf32, #tpu.memory_space<vmem>>, vector<1x1x16x128xf32>
    %1418 = vector.shape_cast %1417 : vector<1x1x16x128xf32> to vector<16x128xf32>
    %c0_225 = arith.constant 0 : index
    %c11_226 = arith.constant 11 : index
    %c0_227 = arith.constant 0 : index
    %c0_228 = arith.constant 0 : index
    %1419 = vector.load %arg3[%c0_225, %c11_226, %c0_227, %c0_228] : memref<1x12x8x128xf32, #tpu.memory_space<vmem>>, vector<1x1x1x128xf32>
    %1420 = vector.shape_cast %1419 : vector<1x1x1x128xf32> to vector<1x128xf32>
    %c0_229 = arith.constant 0 : index
    %c11_230 = arith.constant 11 : index
    %c1_231 = arith.constant 1 : index
    %c0_232 = arith.constant 0 : index
    %1421 = vector.load %arg3[%c0_229, %c11_230, %c1_231, %c0_232] : memref<1x12x8x128xf32, #tpu.memory_space<vmem>>, vector<1x1x1x128xf32>
    %1422 = vector.shape_cast %1421 : vector<1x1x1x128xf32> to vector<1x128xf32>
    %c15_i32_233 = arith.constant 15 : i32
    %1423 = tpu.dynamic_rotate %1418 by %c15_i32_233 dim 0 : vector<16x128xf32>, i32 -> vector<16x128xf32>
    %1424 = vector.shape_cast %1420 : vector<1x128xf32> to vector<1x128xf32>
    %1425 = vector.broadcast %1424 : vector<1x128xf32> to vector<16x128xf32>
    %1426 = arith.select %2, %1423, %1425 : vector<16x128xi1>, vector<16x128xf32>
    %c15_i32_234 = arith.constant 15 : i32
    %1427 = tpu.dynamic_rotate %1426 by %c15_i32_234 dim 0 : vector<16x128xf32>, i32 -> vector<16x128xf32>
    %1428 = vector.shape_cast %1422 : vector<1x128xf32> to vector<1x128xf32>
    %1429 = vector.broadcast %1428 : vector<1x128xf32> to vector<16x128xf32>
    %1430 = arith.select %2, %1427, %1429 : vector<16x128xi1>, vector<16x128xf32>
    %c1_i32_235 = arith.constant 1 : i32
    %1431 = tpu.dynamic_rotate %1418 by %c1_i32_235 dim 1 : vector<16x128xf32>, i32 -> vector<16x128xf32>
    %c127_i32_236 = arith.constant 127 : i32
    %1432 = tpu.dynamic_rotate %1418 by %c127_i32_236 dim 1 : vector<16x128xf32>, i32 -> vector<16x128xf32>
    %c1_i32_237 = arith.constant 1 : i32
    %1433 = tpu.dynamic_rotate %1426 by %c1_i32_237 dim 1 : vector<16x128xf32>, i32 -> vector<16x128xf32>
    %c127_i32_238 = arith.constant 127 : i32
    %1434 = tpu.dynamic_rotate %1426 by %c127_i32_238 dim 1 : vector<16x128xf32>, i32 -> vector<16x128xf32>
    %c1_i32_239 = arith.constant 1 : i32
    %1435 = tpu.dynamic_rotate %1430 by %c1_i32_239 dim 1 : vector<16x128xf32>, i32 -> vector<16x128xf32>
    %c127_i32_240 = arith.constant 127 : i32
    %1436 = tpu.dynamic_rotate %1430 by %c127_i32_240 dim 1 : vector<16x128xf32>, i32 -> vector<16x128xf32>
    %c99 = arith.constant 99 : index
    %1437 = memref.load %arg4[%c99] : memref<324xf32, #tpu.memory_space<smem>>
    %1438 = vector.broadcast %1437 : f32 to vector<16x128xf32>
    %1439 = arith.mulf %1431, %1438 : vector<16x128xf32>
    %c100 = arith.constant 100 : index
    %1440 = memref.load %arg4[%c100] : memref<324xf32, #tpu.memory_space<smem>>
    %1441 = vector.broadcast %1440 : f32 to vector<16x128xf32>
    %1442 = arith.mulf %1418, %1441 : vector<16x128xf32>
    %1443 = arith.addf %1439, %1442 : vector<16x128xf32>
    %c101 = arith.constant 101 : index
    %1444 = memref.load %arg4[%c101] : memref<324xf32, #tpu.memory_space<smem>>
    %1445 = vector.broadcast %1444 : f32 to vector<16x128xf32>
    %1446 = arith.mulf %1432, %1445 : vector<16x128xf32>
    %1447 = arith.addf %1443, %1446 : vector<16x128xf32>
    %c102 = arith.constant 102 : index
    %1448 = memref.load %arg4[%c102] : memref<324xf32, #tpu.memory_space<smem>>
    %1449 = vector.broadcast %1448 : f32 to vector<16x128xf32>
    %1450 = arith.mulf %1433, %1449 : vector<16x128xf32>
    %1451 = arith.addf %1447, %1450 : vector<16x128xf32>
    %c103 = arith.constant 103 : index
    %1452 = memref.load %arg4[%c103] : memref<324xf32, #tpu.memory_space<smem>>
    %1453 = vector.broadcast %1452 : f32 to vector<16x128xf32>
    %1454 = arith.mulf %1426, %1453 : vector<16x128xf32>
    %1455 = arith.addf %1451, %1454 : vector<16x128xf32>
    %c104 = arith.constant 104 : index
    %1456 = memref.load %arg4[%c104] : memref<324xf32, #tpu.memory_space<smem>>
    %1457 = vector.broadcast %1456 : f32 to vector<16x128xf32>
    %1458 = arith.mulf %1434, %1457 : vector<16x128xf32>
    %1459 = arith.addf %1455, %1458 : vector<16x128xf32>
    %c105 = arith.constant 105 : index
    %1460 = memref.load %arg4[%c105] : memref<324xf32, #tpu.memory_space<smem>>
    %1461 = vector.broadcast %1460 : f32 to vector<16x128xf32>
    %1462 = arith.mulf %1435, %1461 : vector<16x128xf32>
    %1463 = arith.addf %1459, %1462 : vector<16x128xf32>
    %c106 = arith.constant 106 : index
    %1464 = memref.load %arg4[%c106] : memref<324xf32, #tpu.memory_space<smem>>
    %1465 = vector.broadcast %1464 : f32 to vector<16x128xf32>
    %1466 = arith.mulf %1430, %1465 : vector<16x128xf32>
    %1467 = arith.addf %1463, %1466 : vector<16x128xf32>
    %c107 = arith.constant 107 : index
    %1468 = memref.load %arg4[%c107] : memref<324xf32, #tpu.memory_space<smem>>
    %1469 = vector.broadcast %1468 : f32 to vector<16x128xf32>
    %1470 = arith.mulf %1436, %1469 : vector<16x128xf32>
    %1471 = arith.addf %1467, %1470 : vector<16x128xf32>
    %1472 = arith.addf %1344, %1471 : vector<16x128xf32>
    %c207 = arith.constant 207 : index
    %1473 = memref.load %arg4[%c207] : memref<324xf32, #tpu.memory_space<smem>>
    %1474 = vector.broadcast %1473 : f32 to vector<16x128xf32>
    %1475 = arith.mulf %1431, %1474 : vector<16x128xf32>
    %c208 = arith.constant 208 : index
    %1476 = memref.load %arg4[%c208] : memref<324xf32, #tpu.memory_space<smem>>
    %1477 = vector.broadcast %1476 : f32 to vector<16x128xf32>
    %1478 = arith.mulf %1418, %1477 : vector<16x128xf32>
    %1479 = arith.addf %1475, %1478 : vector<16x128xf32>
    %c209 = arith.constant 209 : index
    %1480 = memref.load %arg4[%c209] : memref<324xf32, #tpu.memory_space<smem>>
    %1481 = vector.broadcast %1480 : f32 to vector<16x128xf32>
    %1482 = arith.mulf %1432, %1481 : vector<16x128xf32>
    %1483 = arith.addf %1479, %1482 : vector<16x128xf32>
    %c210 = arith.constant 210 : index
    %1484 = memref.load %arg4[%c210] : memref<324xf32, #tpu.memory_space<smem>>
    %1485 = vector.broadcast %1484 : f32 to vector<16x128xf32>
    %1486 = arith.mulf %1433, %1485 : vector<16x128xf32>
    %1487 = arith.addf %1483, %1486 : vector<16x128xf32>
    %c211 = arith.constant 211 : index
    %1488 = memref.load %arg4[%c211] : memref<324xf32, #tpu.memory_space<smem>>
    %1489 = vector.broadcast %1488 : f32 to vector<16x128xf32>
    %1490 = arith.mulf %1426, %1489 : vector<16x128xf32>
    %1491 = arith.addf %1487, %1490 : vector<16x128xf32>
    %c212 = arith.constant 212 : index
    %1492 = memref.load %arg4[%c212] : memref<324xf32, #tpu.memory_space<smem>>
    %1493 = vector.broadcast %1492 : f32 to vector<16x128xf32>
    %1494 = arith.mulf %1434, %1493 : vector<16x128xf32>
    %1495 = arith.addf %1491, %1494 : vector<16x128xf32>
    %c213 = arith.constant 213 : index
    %1496 = memref.load %arg4[%c213] : memref<324xf32, #tpu.memory_space<smem>>
    %1497 = vector.broadcast %1496 : f32 to vector<16x128xf32>
    %1498 = arith.mulf %1435, %1497 : vector<16x128xf32>
    %1499 = arith.addf %1495, %1498 : vector<16x128xf32>
    %c214 = arith.constant 214 : index
    %1500 = memref.load %arg4[%c214] : memref<324xf32, #tpu.memory_space<smem>>
    %1501 = vector.broadcast %1500 : f32 to vector<16x128xf32>
    %1502 = arith.mulf %1430, %1501 : vector<16x128xf32>
    %1503 = arith.addf %1499, %1502 : vector<16x128xf32>
    %c215 = arith.constant 215 : index
    %1504 = memref.load %arg4[%c215] : memref<324xf32, #tpu.memory_space<smem>>
    %1505 = vector.broadcast %1504 : f32 to vector<16x128xf32>
    %1506 = arith.mulf %1436, %1505 : vector<16x128xf32>
    %1507 = arith.addf %1503, %1506 : vector<16x128xf32>
    %1508 = arith.addf %1380, %1507 : vector<16x128xf32>
    %c315 = arith.constant 315 : index
    %1509 = memref.load %arg4[%c315] : memref<324xf32, #tpu.memory_space<smem>>
    %1510 = vector.broadcast %1509 : f32 to vector<16x128xf32>
    %1511 = arith.mulf %1431, %1510 : vector<16x128xf32>
    %c316 = arith.constant 316 : index
    %1512 = memref.load %arg4[%c316] : memref<324xf32, #tpu.memory_space<smem>>
    %1513 = vector.broadcast %1512 : f32 to vector<16x128xf32>
    %1514 = arith.mulf %1418, %1513 : vector<16x128xf32>
    %1515 = arith.addf %1511, %1514 : vector<16x128xf32>
    %c317 = arith.constant 317 : index
    %1516 = memref.load %arg4[%c317] : memref<324xf32, #tpu.memory_space<smem>>
    %1517 = vector.broadcast %1516 : f32 to vector<16x128xf32>
    %1518 = arith.mulf %1432, %1517 : vector<16x128xf32>
    %1519 = arith.addf %1515, %1518 : vector<16x128xf32>
    %c318 = arith.constant 318 : index
    %1520 = memref.load %arg4[%c318] : memref<324xf32, #tpu.memory_space<smem>>
    %1521 = vector.broadcast %1520 : f32 to vector<16x128xf32>
    %1522 = arith.mulf %1433, %1521 : vector<16x128xf32>
    %1523 = arith.addf %1519, %1522 : vector<16x128xf32>
    %c319 = arith.constant 319 : index
    %1524 = memref.load %arg4[%c319] : memref<324xf32, #tpu.memory_space<smem>>
    %1525 = vector.broadcast %1524 : f32 to vector<16x128xf32>
    %1526 = arith.mulf %1426, %1525 : vector<16x128xf32>
    %1527 = arith.addf %1523, %1526 : vector<16x128xf32>
    %c320 = arith.constant 320 : index
    %1528 = memref.load %arg4[%c320] : memref<324xf32, #tpu.memory_space<smem>>
    %1529 = vector.broadcast %1528 : f32 to vector<16x128xf32>
    %1530 = arith.mulf %1434, %1529 : vector<16x128xf32>
    %1531 = arith.addf %1527, %1530 : vector<16x128xf32>
    %c321 = arith.constant 321 : index
    %1532 = memref.load %arg4[%c321] : memref<324xf32, #tpu.memory_space<smem>>
    %1533 = vector.broadcast %1532 : f32 to vector<16x128xf32>
    %1534 = arith.mulf %1435, %1533 : vector<16x128xf32>
    %1535 = arith.addf %1531, %1534 : vector<16x128xf32>
    %c322 = arith.constant 322 : index
    %1536 = memref.load %arg4[%c322] : memref<324xf32, #tpu.memory_space<smem>>
    %1537 = vector.broadcast %1536 : f32 to vector<16x128xf32>
    %1538 = arith.mulf %1430, %1537 : vector<16x128xf32>
    %1539 = arith.addf %1535, %1538 : vector<16x128xf32>
    %c323 = arith.constant 323 : index
    %1540 = memref.load %arg4[%c323] : memref<324xf32, #tpu.memory_space<smem>>
    %1541 = vector.broadcast %1540 : f32 to vector<16x128xf32>
    %1542 = arith.mulf %1436, %1541 : vector<16x128xf32>
    %1543 = arith.addf %1539, %1542 : vector<16x128xf32>
    %1544 = arith.addf %1416, %1543 : vector<16x128xf32>
    %cst = arith.constant 0.000000e+00 : f32
    %1545 = vector.broadcast %cst : f32 to vector<16x128xf32>
    %1546 = arith.maximumf %1472, %1545 : vector<16x128xf32>
    %cst_241 = arith.constant 0.000000e+00 : f32
    %1547 = vector.broadcast %cst_241 : f32 to vector<16x128xf32>
    %1548 = arith.maximumf %1508, %1547 : vector<16x128xf32>
    %cst_242 = arith.constant 0.000000e+00 : f32
    %1549 = vector.broadcast %cst_242 : f32 to vector<16x128xf32>
    %1550 = arith.maximumf %1544, %1549 : vector<16x128xf32>
    %c0_243 = arith.constant 0 : index
    %1551 = memref.load %arg6[%c0_243] : memref<9xf32, #tpu.memory_space<smem>>
    %1552 = vector.broadcast %1551 : f32 to vector<16x128xf32>
    %1553 = arith.mulf %1546, %1552 : vector<16x128xf32>
    %c1_244 = arith.constant 1 : index
    %1554 = memref.load %arg6[%c1_244] : memref<9xf32, #tpu.memory_space<smem>>
    %1555 = vector.broadcast %1554 : f32 to vector<16x128xf32>
    %1556 = arith.mulf %1548, %1555 : vector<16x128xf32>
    %1557 = arith.addf %1553, %1556 : vector<16x128xf32>
    %c2_245 = arith.constant 2 : index
    %1558 = memref.load %arg6[%c2_245] : memref<9xf32, #tpu.memory_space<smem>>
    %1559 = vector.broadcast %1558 : f32 to vector<16x128xf32>
    %1560 = arith.mulf %1550, %1559 : vector<16x128xf32>
    %1561 = arith.addf %1557, %1560 : vector<16x128xf32>
    %cst_246 = arith.constant 0.000000e+00 : f32
    %1562 = vector.broadcast %cst_246 : f32 to vector<16x128xf32>
    %1563 = arith.maximumf %1561, %1562 : vector<16x128xf32>
    %1564 = arith.negf %1563 : vector<16x128xf32>
    %1565 = math.exp %1564 : vector<16x128xf32>
    %cst_247 = arith.constant 1.000000e+00 : f32
    %1566 = vector.broadcast %cst_247 : f32 to vector<16x128xf32>
    %1567 = arith.addf %1566, %1565 : vector<16x128xf32>
    %1568 = arith.divf %1566, %1567 : vector<16x128xf32>
    %c3_248 = arith.constant 3 : index
    %1569 = memref.load %arg6[%c3_248] : memref<9xf32, #tpu.memory_space<smem>>
    %1570 = vector.broadcast %1569 : f32 to vector<16x128xf32>
    %1571 = arith.mulf %1546, %1570 : vector<16x128xf32>
    %c4_249 = arith.constant 4 : index
    %1572 = memref.load %arg6[%c4_249] : memref<9xf32, #tpu.memory_space<smem>>
    %1573 = vector.broadcast %1572 : f32 to vector<16x128xf32>
    %1574 = arith.mulf %1548, %1573 : vector<16x128xf32>
    %1575 = arith.addf %1571, %1574 : vector<16x128xf32>
    %c5_250 = arith.constant 5 : index
    %1576 = memref.load %arg6[%c5_250] : memref<9xf32, #tpu.memory_space<smem>>
    %1577 = vector.broadcast %1576 : f32 to vector<16x128xf32>
    %1578 = arith.mulf %1550, %1577 : vector<16x128xf32>
    %1579 = arith.addf %1575, %1578 : vector<16x128xf32>
    %cst_251 = arith.constant 0.000000e+00 : f32
    %1580 = vector.broadcast %cst_251 : f32 to vector<16x128xf32>
    %1581 = arith.maximumf %1579, %1580 : vector<16x128xf32>
    %1582 = arith.negf %1581 : vector<16x128xf32>
    %1583 = math.exp %1582 : vector<16x128xf32>
    %cst_252 = arith.constant 1.000000e+00 : f32
    %1584 = vector.broadcast %cst_252 : f32 to vector<16x128xf32>
    %1585 = arith.addf %1584, %1583 : vector<16x128xf32>
    %1586 = arith.divf %1584, %1585 : vector<16x128xf32>
    %c6_253 = arith.constant 6 : index
    %1587 = memref.load %arg6[%c6_253] : memref<9xf32, #tpu.memory_space<smem>>
    %1588 = vector.broadcast %1587 : f32 to vector<16x128xf32>
    %1589 = arith.mulf %1546, %1588 : vector<16x128xf32>
    %c7_254 = arith.constant 7 : index
    %1590 = memref.load %arg6[%c7_254] : memref<9xf32, #tpu.memory_space<smem>>
    %1591 = vector.broadcast %1590 : f32 to vector<16x128xf32>
    %1592 = arith.mulf %1548, %1591 : vector<16x128xf32>
    %1593 = arith.addf %1589, %1592 : vector<16x128xf32>
    %c8_255 = arith.constant 8 : index
    %1594 = memref.load %arg6[%c8_255] : memref<9xf32, #tpu.memory_space<smem>>
    %1595 = vector.broadcast %1594 : f32 to vector<16x128xf32>
    %1596 = arith.mulf %1550, %1595 : vector<16x128xf32>
    %1597 = arith.addf %1593, %1596 : vector<16x128xf32>
    %cst_256 = arith.constant 0.000000e+00 : f32
    %1598 = vector.broadcast %cst_256 : f32 to vector<16x128xf32>
    %1599 = arith.maximumf %1597, %1598 : vector<16x128xf32>
    %1600 = arith.negf %1599 : vector<16x128xf32>
    %1601 = math.exp %1600 : vector<16x128xf32>
    %cst_257 = arith.constant 1.000000e+00 : f32
    %1602 = vector.broadcast %cst_257 : f32 to vector<16x128xf32>
    %1603 = arith.addf %1602, %1601 : vector<16x128xf32>
    %1604 = arith.divf %1602, %1603 : vector<16x128xf32>
    %cst_258 = arith.constant 1.000000e+00 : f32
    %1605 = vector.broadcast %cst_258 : f32 to vector<16x128xf32>
    %1606 = arith.addf %1568, %1605 : vector<16x128xf32>
    %cst_259 = arith.constant 1.000000e+00 : f32
    %1607 = vector.broadcast %cst_259 : f32 to vector<16x128xf32>
    %1608 = arith.addf %1586, %1607 : vector<16x128xf32>
    %cst_260 = arith.constant 1.000000e+00 : f32
    %1609 = vector.broadcast %cst_260 : f32 to vector<16x128xf32>
    %1610 = arith.addf %1604, %1609 : vector<16x128xf32>
    %c0_261 = arith.constant 0 : index
    %c0_262 = arith.constant 0 : index
    %c0_263 = arith.constant 0 : index
    %c0_264 = arith.constant 0 : index
    %1611 = vector.load %arg2[%c0_261, %c0_262, %c0_263, %c0_264] : memref<1x12x16x128xf32, #tpu.memory_space<vmem>>, vector<1x1x16x128xf32>
    %1612 = vector.shape_cast %1611 : vector<1x1x16x128xf32> to vector<16x128xf32>
    %c0_265 = arith.constant 0 : index
    %c0_266 = arith.constant 0 : index
    %c0_267 = arith.constant 0 : index
    %c0_268 = arith.constant 0 : index
    %1613 = vector.load %arg3[%c0_265, %c0_266, %c0_267, %c0_268] : memref<1x12x8x128xf32, #tpu.memory_space<vmem>>, vector<1x1x1x128xf32>
    %1614 = vector.shape_cast %1613 : vector<1x1x1x128xf32> to vector<1x128xf32>
    %c15_i32_269 = arith.constant 15 : i32
    %1615 = tpu.dynamic_rotate %1612 by %c15_i32_269 dim 0 : vector<16x128xf32>, i32 -> vector<16x128xf32>
    %1616 = vector.shape_cast %1614 : vector<1x128xf32> to vector<1x128xf32>
    %1617 = vector.broadcast %1616 : vector<1x128xf32> to vector<16x128xf32>
    %1618 = arith.select %2, %1615, %1617 : vector<16x128xi1>, vector<16x128xf32>
    %c0_270 = arith.constant 0 : index
    %c0_271 = arith.constant 0 : index
    %c0_272 = arith.constant 0 : index
    %c0_273 = arith.constant 0 : index
    %1619 = vector.load %arg8[%c0_270, %c0_271, %c0_272, %c0_273] : memref<1x12x16x128xf32, #tpu.memory_space<vmem>>, vector<1x1x16x128xf32>
    %1620 = vector.shape_cast %1619 : vector<1x1x16x128xf32> to vector<16x128xf32>
    %1621 = vector.shape_cast %1568 : vector<16x128xf32> to vector<1x1x16x128xf32>
    tpu.vector_store %arg8[%c0_270, %c0_271, %c0_272, %c0_273], %1621 {strides = array<i32>} : memref<1x12x16x128xf32, #tpu.memory_space<vmem>>, vector<1x1x16x128xf32>,
    %1622 = arith.mulf %1618, %1606 : vector<16x128xf32>
    %c0_274 = arith.constant 0 : index
    %c0_275 = arith.constant 0 : index
    %c0_276 = arith.constant 0 : index
    %c0_277 = arith.constant 0 : index
    %1623 = vector.load %arg7[%c0_274, %c0_275, %c0_276, %c0_277] : memref<1x12x16x128xf32, #tpu.memory_space<vmem>>, vector<1x1x16x128xf32>
    %1624 = vector.shape_cast %1623 : vector<1x1x16x128xf32> to vector<16x128xf32>
    %1625 = vector.shape_cast %1622 : vector<16x128xf32> to vector<1x1x16x128xf32>
    tpu.vector_store %arg7[%c0_274, %c0_275, %c0_276, %c0_277], %1625 {strides = array<i32>} : memref<1x12x16x128xf32, #tpu.memory_space<vmem>>, vector<1x1x16x128xf32>,
    %c0_278 = arith.constant 0 : index
    %c1_279 = arith.constant 1 : index
    %c0_280 = arith.constant 0 : index
    %c0_281 = arith.constant 0 : index
    %1626 = vector.load %arg2[%c0_278, %c1_279, %c0_280, %c0_281] : memref<1x12x16x128xf32, #tpu.memory_space<vmem>>, vector<1x1x16x128xf32>
    %1627 = vector.shape_cast %1626 : vector<1x1x16x128xf32> to vector<16x128xf32>
    %c0_282 = arith.constant 0 : index
    %c1_283 = arith.constant 1 : index
    %c0_284 = arith.constant 0 : index
    %c0_285 = arith.constant 0 : index
    %1628 = vector.load %arg3[%c0_282, %c1_283, %c0_284, %c0_285] : memref<1x12x8x128xf32, #tpu.memory_space<vmem>>, vector<1x1x1x128xf32>
    %1629 = vector.shape_cast %1628 : vector<1x1x1x128xf32> to vector<1x128xf32>
    %c15_i32_286 = arith.constant 15 : i32
    %1630 = tpu.dynamic_rotate %1627 by %c15_i32_286 dim 0 : vector<16x128xf32>, i32 -> vector<16x128xf32>
    %1631 = vector.shape_cast %1629 : vector<1x128xf32> to vector<1x128xf32>
    %1632 = vector.broadcast %1631 : vector<1x128xf32> to vector<16x128xf32>
    %1633 = arith.select %2, %1630, %1632 : vector<16x128xi1>, vector<16x128xf32>
    %c0_287 = arith.constant 0 : index
    %c1_288 = arith.constant 1 : index
    %c0_289 = arith.constant 0 : index
    %c0_290 = arith.constant 0 : index
    %1634 = vector.load %arg8[%c0_287, %c1_288, %c0_289, %c0_290] : memref<1x12x16x128xf32, #tpu.memory_space<vmem>>, vector<1x1x16x128xf32>
    %1635 = vector.shape_cast %1634 : vector<1x1x16x128xf32> to vector<16x128xf32>
    %1636 = vector.shape_cast %1568 : vector<16x128xf32> to vector<1x1x16x128xf32>
    tpu.vector_store %arg8[%c0_287, %c1_288, %c0_289, %c0_290], %1636 {strides = array<i32>} : memref<1x12x16x128xf32, #tpu.memory_space<vmem>>, vector<1x1x16x128xf32>,
    %1637 = arith.mulf %1633, %1606 : vector<16x128xf32>
    %c0_291 = arith.constant 0 : index
    %c1_292 = arith.constant 1 : index
    %c0_293 = arith.constant 0 : index
    %c0_294 = arith.constant 0 : index
    %1638 = vector.load %arg7[%c0_291, %c1_292, %c0_293, %c0_294] : memref<1x12x16x128xf32, #tpu.memory_space<vmem>>, vector<1x1x16x128xf32>
    %1639 = vector.shape_cast %1638 : vector<1x1x16x128xf32> to vector<16x128xf32>
    %1640 = vector.shape_cast %1637 : vector<16x128xf32> to vector<1x1x16x128xf32>
    tpu.vector_store %arg7[%c0_291, %c1_292, %c0_293, %c0_294], %1640 {strides = array<i32>} : memref<1x12x16x128xf32, #tpu.memory_space<vmem>>, vector<1x1x16x128xf32>,
    %c0_295 = arith.constant 0 : index
    %c2_296 = arith.constant 2 : index
    %c0_297 = arith.constant 0 : index
    %c0_298 = arith.constant 0 : index
    %1641 = vector.load %arg2[%c0_295, %c2_296, %c0_297, %c0_298] : memref<1x12x16x128xf32, #tpu.memory_space<vmem>>, vector<1x1x16x128xf32>
    %1642 = vector.shape_cast %1641 : vector<1x1x16x128xf32> to vector<16x128xf32>
    %c0_299 = arith.constant 0 : index
    %c2_300 = arith.constant 2 : index
    %c0_301 = arith.constant 0 : index
    %c0_302 = arith.constant 0 : index
    %1643 = vector.load %arg3[%c0_299, %c2_300, %c0_301, %c0_302] : memref<1x12x8x128xf32, #tpu.memory_space<vmem>>, vector<1x1x1x128xf32>
    %1644 = vector.shape_cast %1643 : vector<1x1x1x128xf32> to vector<1x128xf32>
    %c15_i32_303 = arith.constant 15 : i32
    %1645 = tpu.dynamic_rotate %1642 by %c15_i32_303 dim 0 : vector<16x128xf32>, i32 -> vector<16x128xf32>
    %1646 = vector.shape_cast %1644 : vector<1x128xf32> to vector<1x128xf32>
    %1647 = vector.broadcast %1646 : vector<1x128xf32> to vector<16x128xf32>
    %1648 = arith.select %2, %1645, %1647 : vector<16x128xi1>, vector<16x128xf32>
    %c0_304 = arith.constant 0 : index
    %c2_305 = arith.constant 2 : index
    %c0_306 = arith.constant 0 : index
    %c0_307 = arith.constant 0 : index
    %1649 = vector.load %arg8[%c0_304, %c2_305, %c0_306, %c0_307] : memref<1x12x16x128xf32, #tpu.memory_space<vmem>>, vector<1x1x16x128xf32>
    %1650 = vector.shape_cast %1649 : vector<1x1x16x128xf32> to vector<16x128xf32>
    %1651 = vector.shape_cast %1568 : vector<16x128xf32> to vector<1x1x16x128xf32>
    tpu.vector_store %arg8[%c0_304, %c2_305, %c0_306, %c0_307], %1651 {strides = array<i32>} : memref<1x12x16x128xf32, #tpu.memory_space<vmem>>, vector<1x1x16x128xf32>,
    %1652 = arith.mulf %1648, %1606 : vector<16x128xf32>
    %c0_308 = arith.constant 0 : index
    %c2_309 = arith.constant 2 : index
    %c0_310 = arith.constant 0 : index
    %c0_311 = arith.constant 0 : index
    %1653 = vector.load %arg7[%c0_308, %c2_309, %c0_310, %c0_311] : memref<1x12x16x128xf32, #tpu.memory_space<vmem>>, vector<1x1x16x128xf32>
    %1654 = vector.shape_cast %1653 : vector<1x1x16x128xf32> to vector<16x128xf32>
    %1655 = vector.shape_cast %1652 : vector<16x128xf32> to vector<1x1x16x128xf32>
    tpu.vector_store %arg7[%c0_308, %c2_309, %c0_310, %c0_311], %1655 {strides = array<i32>} : memref<1x12x16x128xf32, #tpu.memory_space<vmem>>, vector<1x1x16x128xf32>,
    %c0_312 = arith.constant 0 : index
    %c3_313 = arith.constant 3 : index
    %c0_314 = arith.constant 0 : index
    %c0_315 = arith.constant 0 : index
    %1656 = vector.load %arg2[%c0_312, %c3_313, %c0_314, %c0_315] : memref<1x12x16x128xf32, #tpu.memory_space<vmem>>, vector<1x1x16x128xf32>
    %1657 = vector.shape_cast %1656 : vector<1x1x16x128xf32> to vector<16x128xf32>
    %c0_316 = arith.constant 0 : index
    %c3_317 = arith.constant 3 : index
    %c0_318 = arith.constant 0 : index
    %c0_319 = arith.constant 0 : index
    %1658 = vector.load %arg3[%c0_316, %c3_317, %c0_318, %c0_319] : memref<1x12x8x128xf32, #tpu.memory_space<vmem>>, vector<1x1x1x128xf32>
    %1659 = vector.shape_cast %1658 : vector<1x1x1x128xf32> to vector<1x128xf32>
    %c15_i32_320 = arith.constant 15 : i32
    %1660 = tpu.dynamic_rotate %1657 by %c15_i32_320 dim 0 : vector<16x128xf32>, i32 -> vector<16x128xf32>
    %1661 = vector.shape_cast %1659 : vector<1x128xf32> to vector<1x128xf32>
    %1662 = vector.broadcast %1661 : vector<1x128xf32> to vector<16x128xf32>
    %1663 = arith.select %2, %1660, %1662 : vector<16x128xi1>, vector<16x128xf32>
    %c0_321 = arith.constant 0 : index
    %c3_322 = arith.constant 3 : index
    %c0_323 = arith.constant 0 : index
    %c0_324 = arith.constant 0 : index
    %1664 = vector.load %arg8[%c0_321, %c3_322, %c0_323, %c0_324] : memref<1x12x16x128xf32, #tpu.memory_space<vmem>>, vector<1x1x16x128xf32>
    %1665 = vector.shape_cast %1664 : vector<1x1x16x128xf32> to vector<16x128xf32>
    %1666 = vector.shape_cast %1568 : vector<16x128xf32> to vector<1x1x16x128xf32>
    tpu.vector_store %arg8[%c0_321, %c3_322, %c0_323, %c0_324], %1666 {strides = array<i32>} : memref<1x12x16x128xf32, #tpu.memory_space<vmem>>, vector<1x1x16x128xf32>,
    %1667 = arith.mulf %1663, %1606 : vector<16x128xf32>
    %c0_325 = arith.constant 0 : index
    %c3_326 = arith.constant 3 : index
    %c0_327 = arith.constant 0 : index
    %c0_328 = arith.constant 0 : index
    %1668 = vector.load %arg7[%c0_325, %c3_326, %c0_327, %c0_328] : memref<1x12x16x128xf32, #tpu.memory_space<vmem>>, vector<1x1x16x128xf32>
    %1669 = vector.shape_cast %1668 : vector<1x1x16x128xf32> to vector<16x128xf32>
    %1670 = vector.shape_cast %1667 : vector<16x128xf32> to vector<1x1x16x128xf32>
    tpu.vector_store %arg7[%c0_325, %c3_326, %c0_327, %c0_328], %1670 {strides = array<i32>} : memref<1x12x16x128xf32, #tpu.memory_space<vmem>>, vector<1x1x16x128xf32>,
    %c0_329 = arith.constant 0 : index
    %c4_330 = arith.constant 4 : index
    %c0_331 = arith.constant 0 : index
    %c0_332 = arith.constant 0 : index
    %1671 = vector.load %arg2[%c0_329, %c4_330, %c0_331, %c0_332] : memref<1x12x16x128xf32, #tpu.memory_space<vmem>>, vector<1x1x16x128xf32>
    %1672 = vector.shape_cast %1671 : vector<1x1x16x128xf32> to vector<16x128xf32>
    %c0_333 = arith.constant 0 : index
    %c4_334 = arith.constant 4 : index
    %c0_335 = arith.constant 0 : index
    %c0_336 = arith.constant 0 : index
    %1673 = vector.load %arg3[%c0_333, %c4_334, %c0_335, %c0_336] : memref<1x12x8x128xf32, #tpu.memory_space<vmem>>, vector<1x1x1x128xf32>
    %1674 = vector.shape_cast %1673 : vector<1x1x1x128xf32> to vector<1x128xf32>
    %c15_i32_337 = arith.constant 15 : i32
    %1675 = tpu.dynamic_rotate %1672 by %c15_i32_337 dim 0 : vector<16x128xf32>, i32 -> vector<16x128xf32>
    %1676 = vector.shape_cast %1674 : vector<1x128xf32> to vector<1x128xf32>
    %1677 = vector.broadcast %1676 : vector<1x128xf32> to vector<16x128xf32>
    %1678 = arith.select %2, %1675, %1677 : vector<16x128xi1>, vector<16x128xf32>
    %c0_338 = arith.constant 0 : index
    %c4_339 = arith.constant 4 : index
    %c0_340 = arith.constant 0 : index
    %c0_341 = arith.constant 0 : index
    %1679 = vector.load %arg8[%c0_338, %c4_339, %c0_340, %c0_341] : memref<1x12x16x128xf32, #tpu.memory_space<vmem>>, vector<1x1x16x128xf32>
    %1680 = vector.shape_cast %1679 : vector<1x1x16x128xf32> to vector<16x128xf32>
    %1681 = vector.shape_cast %1586 : vector<16x128xf32> to vector<1x1x16x128xf32>
    tpu.vector_store %arg8[%c0_338, %c4_339, %c0_340, %c0_341], %1681 {strides = array<i32>} : memref<1x12x16x128xf32, #tpu.memory_space<vmem>>, vector<1x1x16x128xf32>,
    %1682 = arith.mulf %1678, %1608 : vector<16x128xf32>
    %c0_342 = arith.constant 0 : index
    %c4_343 = arith.constant 4 : index
    %c0_344 = arith.constant 0 : index
    %c0_345 = arith.constant 0 : index
    %1683 = vector.load %arg7[%c0_342, %c4_343, %c0_344, %c0_345] : memref<1x12x16x128xf32, #tpu.memory_space<vmem>>, vector<1x1x16x128xf32>
    %1684 = vector.shape_cast %1683 : vector<1x1x16x128xf32> to vector<16x128xf32>
    %1685 = vector.shape_cast %1682 : vector<16x128xf32> to vector<1x1x16x128xf32>
    tpu.vector_store %arg7[%c0_342, %c4_343, %c0_344, %c0_345], %1685 {strides = array<i32>} : memref<1x12x16x128xf32, #tpu.memory_space<vmem>>, vector<1x1x16x128xf32>,
    %c0_346 = arith.constant 0 : index
    %c5_347 = arith.constant 5 : index
    %c0_348 = arith.constant 0 : index
    %c0_349 = arith.constant 0 : index
    %1686 = vector.load %arg2[%c0_346, %c5_347, %c0_348, %c0_349] : memref<1x12x16x128xf32, #tpu.memory_space<vmem>>, vector<1x1x16x128xf32>
    %1687 = vector.shape_cast %1686 : vector<1x1x16x128xf32> to vector<16x128xf32>
    %c0_350 = arith.constant 0 : index
    %c5_351 = arith.constant 5 : index
    %c0_352 = arith.constant 0 : index
    %c0_353 = arith.constant 0 : index
    %1688 = vector.load %arg3[%c0_350, %c5_351, %c0_352, %c0_353] : memref<1x12x8x128xf32, #tpu.memory_space<vmem>>, vector<1x1x1x128xf32>
    %1689 = vector.shape_cast %1688 : vector<1x1x1x128xf32> to vector<1x128xf32>
    %c15_i32_354 = arith.constant 15 : i32
    %1690 = tpu.dynamic_rotate %1687 by %c15_i32_354 dim 0 : vector<16x128xf32>, i32 -> vector<16x128xf32>
    %1691 = vector.shape_cast %1689 : vector<1x128xf32> to vector<1x128xf32>
    %1692 = vector.broadcast %1691 : vector<1x128xf32> to vector<16x128xf32>
    %1693 = arith.select %2, %1690, %1692 : vector<16x128xi1>, vector<16x128xf32>
    %c0_355 = arith.constant 0 : index
    %c5_356 = arith.constant 5 : index
    %c0_357 = arith.constant 0 : index
    %c0_358 = arith.constant 0 : index
    %1694 = vector.load %arg8[%c0_355, %c5_356, %c0_357, %c0_358] : memref<1x12x16x128xf32, #tpu.memory_space<vmem>>, vector<1x1x16x128xf32>
    %1695 = vector.shape_cast %1694 : vector<1x1x16x128xf32> to vector<16x128xf32>
    %1696 = vector.shape_cast %1586 : vector<16x128xf32> to vector<1x1x16x128xf32>
    tpu.vector_store %arg8[%c0_355, %c5_356, %c0_357, %c0_358], %1696 {strides = array<i32>} : memref<1x12x16x128xf32, #tpu.memory_space<vmem>>, vector<1x1x16x128xf32>,
    %1697 = arith.mulf %1693, %1608 : vector<16x128xf32>
    %c0_359 = arith.constant 0 : index
    %c5_360 = arith.constant 5 : index
    %c0_361 = arith.constant 0 : index
    %c0_362 = arith.constant 0 : index
    %1698 = vector.load %arg7[%c0_359, %c5_360, %c0_361, %c0_362] : memref<1x12x16x128xf32, #tpu.memory_space<vmem>>, vector<1x1x16x128xf32>
    %1699 = vector.shape_cast %1698 : vector<1x1x16x128xf32> to vector<16x128xf32>
    %1700 = vector.shape_cast %1697 : vector<16x128xf32> to vector<1x1x16x128xf32>
    tpu.vector_store %arg7[%c0_359, %c5_360, %c0_361, %c0_362], %1700 {strides = array<i32>} : memref<1x12x16x128xf32, #tpu.memory_space<vmem>>, vector<1x1x16x128xf32>,
    %c0_363 = arith.constant 0 : index
    %c6_364 = arith.constant 6 : index
    %c0_365 = arith.constant 0 : index
    %c0_366 = arith.constant 0 : index
    %1701 = vector.load %arg2[%c0_363, %c6_364, %c0_365, %c0_366] : memref<1x12x16x128xf32, #tpu.memory_space<vmem>>, vector<1x1x16x128xf32>
    %1702 = vector.shape_cast %1701 : vector<1x1x16x128xf32> to vector<16x128xf32>
    %c0_367 = arith.constant 0 : index
    %c6_368 = arith.constant 6 : index
    %c0_369 = arith.constant 0 : index
    %c0_370 = arith.constant 0 : index
    %1703 = vector.load %arg3[%c0_367, %c6_368, %c0_369, %c0_370] : memref<1x12x8x128xf32, #tpu.memory_space<vmem>>, vector<1x1x1x128xf32>
    %1704 = vector.shape_cast %1703 : vector<1x1x1x128xf32> to vector<1x128xf32>
    %c15_i32_371 = arith.constant 15 : i32
    %1705 = tpu.dynamic_rotate %1702 by %c15_i32_371 dim 0 : vector<16x128xf32>, i32 -> vector<16x128xf32>
    %1706 = vector.shape_cast %1704 : vector<1x128xf32> to vector<1x128xf32>
    %1707 = vector.broadcast %1706 : vector<1x128xf32> to vector<16x128xf32>
    %1708 = arith.select %2, %1705, %1707 : vector<16x128xi1>, vector<16x128xf32>
    %c0_372 = arith.constant 0 : index
    %c6_373 = arith.constant 6 : index
    %c0_374 = arith.constant 0 : index
    %c0_375 = arith.constant 0 : index
    %1709 = vector.load %arg8[%c0_372, %c6_373, %c0_374, %c0_375] : memref<1x12x16x128xf32, #tpu.memory_space<vmem>>, vector<1x1x16x128xf32>
    %1710 = vector.shape_cast %1709 : vector<1x1x16x128xf32> to vector<16x128xf32>
    %1711 = vector.shape_cast %1586 : vector<16x128xf32> to vector<1x1x16x128xf32>
    tpu.vector_store %arg8[%c0_372, %c6_373, %c0_374, %c0_375], %1711 {strides = array<i32>} : memref<1x12x16x128xf32, #tpu.memory_space<vmem>>, vector<1x1x16x128xf32>,
    %1712 = arith.mulf %1708, %1608 : vector<16x128xf32>
    %c0_376 = arith.constant 0 : index
    %c6_377 = arith.constant 6 : index
    %c0_378 = arith.constant 0 : index
    %c0_379 = arith.constant 0 : index
    %1713 = vector.load %arg7[%c0_376, %c6_377, %c0_378, %c0_379] : memref<1x12x16x128xf32, #tpu.memory_space<vmem>>, vector<1x1x16x128xf32>
    %1714 = vector.shape_cast %1713 : vector<1x1x16x128xf32> to vector<16x128xf32>
    %1715 = vector.shape_cast %1712 : vector<16x128xf32> to vector<1x1x16x128xf32>
    tpu.vector_store %arg7[%c0_376, %c6_377, %c0_378, %c0_379], %1715 {strides = array<i32>} : memref<1x12x16x128xf32, #tpu.memory_space<vmem>>, vector<1x1x16x128xf32>,
    %c0_380 = arith.constant 0 : index
    %c7_381 = arith.constant 7 : index
    %c0_382 = arith.constant 0 : index
    %c0_383 = arith.constant 0 : index
    %1716 = vector.load %arg2[%c0_380, %c7_381, %c0_382, %c0_383] : memref<1x12x16x128xf32, #tpu.memory_space<vmem>>, vector<1x1x16x128xf32>
    %1717 = vector.shape_cast %1716 : vector<1x1x16x128xf32> to vector<16x128xf32>
    %c0_384 = arith.constant 0 : index
    %c7_385 = arith.constant 7 : index
    %c0_386 = arith.constant 0 : index
    %c0_387 = arith.constant 0 : index
    %1718 = vector.load %arg3[%c0_384, %c7_385, %c0_386, %c0_387] : memref<1x12x8x128xf32, #tpu.memory_space<vmem>>, vector<1x1x1x128xf32>
    %1719 = vector.shape_cast %1718 : vector<1x1x1x128xf32> to vector<1x128xf32>
    %c15_i32_388 = arith.constant 15 : i32
    %1720 = tpu.dynamic_rotate %1717 by %c15_i32_388 dim 0 : vector<16x128xf32>, i32 -> vector<16x128xf32>
    %1721 = vector.shape_cast %1719 : vector<1x128xf32> to vector<1x128xf32>
    %1722 = vector.broadcast %1721 : vector<1x128xf32> to vector<16x128xf32>
    %1723 = arith.select %2, %1720, %1722 : vector<16x128xi1>, vector<16x128xf32>
    %c0_389 = arith.constant 0 : index
    %c7_390 = arith.constant 7 : index
    %c0_391 = arith.constant 0 : index
    %c0_392 = arith.constant 0 : index
    %1724 = vector.load %arg8[%c0_389, %c7_390, %c0_391, %c0_392] : memref<1x12x16x128xf32, #tpu.memory_space<vmem>>, vector<1x1x16x128xf32>
    %1725 = vector.shape_cast %1724 : vector<1x1x16x128xf32> to vector<16x128xf32>
    %1726 = vector.shape_cast %1586 : vector<16x128xf32> to vector<1x1x16x128xf32>
    tpu.vector_store %arg8[%c0_389, %c7_390, %c0_391, %c0_392], %1726 {strides = array<i32>} : memref<1x12x16x128xf32, #tpu.memory_space<vmem>>, vector<1x1x16x128xf32>,
    %1727 = arith.mulf %1723, %1608 : vector<16x128xf32>
    %c0_393 = arith.constant 0 : index
    %c7_394 = arith.constant 7 : index
    %c0_395 = arith.constant 0 : index
    %c0_396 = arith.constant 0 : index
    %1728 = vector.load %arg7[%c0_393, %c7_394, %c0_395, %c0_396] : memref<1x12x16x128xf32, #tpu.memory_space<vmem>>, vector<1x1x16x128xf32>
    %1729 = vector.shape_cast %1728 : vector<1x1x16x128xf32> to vector<16x128xf32>
    %1730 = vector.shape_cast %1727 : vector<16x128xf32> to vector<1x1x16x128xf32>
    tpu.vector_store %arg7[%c0_393, %c7_394, %c0_395, %c0_396], %1730 {strides = array<i32>} : memref<1x12x16x128xf32, #tpu.memory_space<vmem>>, vector<1x1x16x128xf32>,
    %c0_397 = arith.constant 0 : index
    %c8_398 = arith.constant 8 : index
    %c0_399 = arith.constant 0 : index
    %c0_400 = arith.constant 0 : index
    %1731 = vector.load %arg2[%c0_397, %c8_398, %c0_399, %c0_400] : memref<1x12x16x128xf32, #tpu.memory_space<vmem>>, vector<1x1x16x128xf32>
    %1732 = vector.shape_cast %1731 : vector<1x1x16x128xf32> to vector<16x128xf32>
    %c0_401 = arith.constant 0 : index
    %c8_402 = arith.constant 8 : index
    %c0_403 = arith.constant 0 : index
    %c0_404 = arith.constant 0 : index
    %1733 = vector.load %arg3[%c0_401, %c8_402, %c0_403, %c0_404] : memref<1x12x8x128xf32, #tpu.memory_space<vmem>>, vector<1x1x1x128xf32>
    %1734 = vector.shape_cast %1733 : vector<1x1x1x128xf32> to vector<1x128xf32>
    %c15_i32_405 = arith.constant 15 : i32
    %1735 = tpu.dynamic_rotate %1732 by %c15_i32_405 dim 0 : vector<16x128xf32>, i32 -> vector<16x128xf32>
    %1736 = vector.shape_cast %1734 : vector<1x128xf32> to vector<1x128xf32>
    %1737 = vector.broadcast %1736 : vector<1x128xf32> to vector<16x128xf32>
    %1738 = arith.select %2, %1735, %1737 : vector<16x128xi1>, vector<16x128xf32>
    %c0_406 = arith.constant 0 : index
    %c8_407 = arith.constant 8 : index
    %c0_408 = arith.constant 0 : index
    %c0_409 = arith.constant 0 : index
    %1739 = vector.load %arg8[%c0_406, %c8_407, %c0_408, %c0_409] : memref<1x12x16x128xf32, #tpu.memory_space<vmem>>, vector<1x1x16x128xf32>
    %1740 = vector.shape_cast %1739 : vector<1x1x16x128xf32> to vector<16x128xf32>
    %1741 = vector.shape_cast %1604 : vector<16x128xf32> to vector<1x1x16x128xf32>
    tpu.vector_store %arg8[%c0_406, %c8_407, %c0_408, %c0_409], %1741 {strides = array<i32>} : memref<1x12x16x128xf32, #tpu.memory_space<vmem>>, vector<1x1x16x128xf32>,
    %1742 = arith.mulf %1738, %1610 : vector<16x128xf32>
    %c0_410 = arith.constant 0 : index
    %c8_411 = arith.constant 8 : index
    %c0_412 = arith.constant 0 : index
    %c0_413 = arith.constant 0 : index
    %1743 = vector.load %arg7[%c0_410, %c8_411, %c0_412, %c0_413] : memref<1x12x16x128xf32, #tpu.memory_space<vmem>>, vector<1x1x16x128xf32>
    %1744 = vector.shape_cast %1743 : vector<1x1x16x128xf32> to vector<16x128xf32>
    %1745 = vector.shape_cast %1742 : vector<16x128xf32> to vector<1x1x16x128xf32>
    tpu.vector_store %arg7[%c0_410, %c8_411, %c0_412, %c0_413], %1745 {strides = array<i32>} : memref<1x12x16x128xf32, #tpu.memory_space<vmem>>, vector<1x1x16x128xf32>,
    %c0_414 = arith.constant 0 : index
    %c9_415 = arith.constant 9 : index
    %c0_416 = arith.constant 0 : index
    %c0_417 = arith.constant 0 : index
    %1746 = vector.load %arg2[%c0_414, %c9_415, %c0_416, %c0_417] : memref<1x12x16x128xf32, #tpu.memory_space<vmem>>, vector<1x1x16x128xf32>
    %1747 = vector.shape_cast %1746 : vector<1x1x16x128xf32> to vector<16x128xf32>
    %c0_418 = arith.constant 0 : index
    %c9_419 = arith.constant 9 : index
    %c0_420 = arith.constant 0 : index
    %c0_421 = arith.constant 0 : index
    %1748 = vector.load %arg3[%c0_418, %c9_419, %c0_420, %c0_421] : memref<1x12x8x128xf32, #tpu.memory_space<vmem>>, vector<1x1x1x128xf32>
    %1749 = vector.shape_cast %1748 : vector<1x1x1x128xf32> to vector<1x128xf32>
    %c15_i32_422 = arith.constant 15 : i32
    %1750 = tpu.dynamic_rotate %1747 by %c15_i32_422 dim 0 : vector<16x128xf32>, i32 -> vector<16x128xf32>
    %1751 = vector.shape_cast %1749 : vector<1x128xf32> to vector<1x128xf32>
    %1752 = vector.broadcast %1751 : vector<1x128xf32> to vector<16x128xf32>
    %1753 = arith.select %2, %1750, %1752 : vector<16x128xi1>, vector<16x128xf32>
    %c0_423 = arith.constant 0 : index
    %c9_424 = arith.constant 9 : index
    %c0_425 = arith.constant 0 : index
    %c0_426 = arith.constant 0 : index
    %1754 = vector.load %arg8[%c0_423, %c9_424, %c0_425, %c0_426] : memref<1x12x16x128xf32, #tpu.memory_space<vmem>>, vector<1x1x16x128xf32>
    %1755 = vector.shape_cast %1754 : vector<1x1x16x128xf32> to vector<16x128xf32>
    %1756 = vector.shape_cast %1604 : vector<16x128xf32> to vector<1x1x16x128xf32>
    tpu.vector_store %arg8[%c0_423, %c9_424, %c0_425, %c0_426], %1756 {strides = array<i32>} : memref<1x12x16x128xf32, #tpu.memory_space<vmem>>, vector<1x1x16x128xf32>,
    %1757 = arith.mulf %1753, %1610 : vector<16x128xf32>
    %c0_427 = arith.constant 0 : index
    %c9_428 = arith.constant 9 : index
    %c0_429 = arith.constant 0 : index
    %c0_430 = arith.constant 0 : index
    %1758 = vector.load %arg7[%c0_427, %c9_428, %c0_429, %c0_430] : memref<1x12x16x128xf32, #tpu.memory_space<vmem>>, vector<1x1x16x128xf32>
    %1759 = vector.shape_cast %1758 : vector<1x1x16x128xf32> to vector<16x128xf32>
    %1760 = vector.shape_cast %1757 : vector<16x128xf32> to vector<1x1x16x128xf32>
    tpu.vector_store %arg7[%c0_427, %c9_428, %c0_429, %c0_430], %1760 {strides = array<i32>} : memref<1x12x16x128xf32, #tpu.memory_space<vmem>>, vector<1x1x16x128xf32>,
    %c0_431 = arith.constant 0 : index
    %c10_432 = arith.constant 10 : index
    %c0_433 = arith.constant 0 : index
    %c0_434 = arith.constant 0 : index
    %1761 = vector.load %arg2[%c0_431, %c10_432, %c0_433, %c0_434] : memref<1x12x16x128xf32, #tpu.memory_space<vmem>>, vector<1x1x16x128xf32>
    %1762 = vector.shape_cast %1761 : vector<1x1x16x128xf32> to vector<16x128xf32>
    %c0_435 = arith.constant 0 : index
    %c10_436 = arith.constant 10 : index
    %c0_437 = arith.constant 0 : index
    %c0_438 = arith.constant 0 : index
    %1763 = vector.load %arg3[%c0_435, %c10_436, %c0_437, %c0_438] : memref<1x12x8x128xf32, #tpu.memory_space<vmem>>, vector<1x1x1x128xf32>
    %1764 = vector.shape_cast %1763 : vector<1x1x1x128xf32> to vector<1x128xf32>
    %c15_i32_439 = arith.constant 15 : i32
    %1765 = tpu.dynamic_rotate %1762 by %c15_i32_439 dim 0 : vector<16x128xf32>, i32 -> vector<16x128xf32>
    %1766 = vector.shape_cast %1764 : vector<1x128xf32> to vector<1x128xf32>
    %1767 = vector.broadcast %1766 : vector<1x128xf32> to vector<16x128xf32>
    %1768 = arith.select %2, %1765, %1767 : vector<16x128xi1>, vector<16x128xf32>
    %c0_440 = arith.constant 0 : index
    %c10_441 = arith.constant 10 : index
    %c0_442 = arith.constant 0 : index
    %c0_443 = arith.constant 0 : index
    %1769 = vector.load %arg8[%c0_440, %c10_441, %c0_442, %c0_443] : memref<1x12x16x128xf32, #tpu.memory_space<vmem>>, vector<1x1x16x128xf32>
    %1770 = vector.shape_cast %1769 : vector<1x1x16x128xf32> to vector<16x128xf32>
    %1771 = vector.shape_cast %1604 : vector<16x128xf32> to vector<1x1x16x128xf32>
    tpu.vector_store %arg8[%c0_440, %c10_441, %c0_442, %c0_443], %1771 {strides = array<i32>} : memref<1x12x16x128xf32, #tpu.memory_space<vmem>>, vector<1x1x16x128xf32>,
    %1772 = arith.mulf %1768, %1610 : vector<16x128xf32>
    %c0_444 = arith.constant 0 : index
    %c10_445 = arith.constant 10 : index
    %c0_446 = arith.constant 0 : index
    %c0_447 = arith.constant 0 : index
    %1773 = vector.load %arg7[%c0_444, %c10_445, %c0_446, %c0_447] : memref<1x12x16x128xf32, #tpu.memory_space<vmem>>, vector<1x1x16x128xf32>
    %1774 = vector.shape_cast %1773 : vector<1x1x16x128xf32> to vector<16x128xf32>
    %1775 = vector.shape_cast %1772 : vector<16x128xf32> to vector<1x1x16x128xf32>
    tpu.vector_store %arg7[%c0_444, %c10_445, %c0_446, %c0_447], %1775 {strides = array<i32>} : memref<1x12x16x128xf32, #tpu.memory_space<vmem>>, vector<1x1x16x128xf32>,
    %c0_448 = arith.constant 0 : index
    %c11_449 = arith.constant 11 : index
    %c0_450 = arith.constant 0 : index
    %c0_451 = arith.constant 0 : index
    %1776 = vector.load %arg2[%c0_448, %c11_449, %c0_450, %c0_451] : memref<1x12x16x128xf32, #tpu.memory_space<vmem>>, vector<1x1x16x128xf32>
    %1777 = vector.shape_cast %1776 : vector<1x1x16x128xf32> to vector<16x128xf32>
    %c0_452 = arith.constant 0 : index
    %c11_453 = arith.constant 11 : index
    %c0_454 = arith.constant 0 : index
    %c0_455 = arith.constant 0 : index
    %1778 = vector.load %arg3[%c0_452, %c11_453, %c0_454, %c0_455] : memref<1x12x8x128xf32, #tpu.memory_space<vmem>>, vector<1x1x1x128xf32>
    %1779 = vector.shape_cast %1778 : vector<1x1x1x128xf32> to vector<1x128xf32>
    %c15_i32_456 = arith.constant 15 : i32
    %1780 = tpu.dynamic_rotate %1777 by %c15_i32_456 dim 0 : vector<16x128xf32>, i32 -> vector<16x128xf32>
    %1781 = vector.shape_cast %1779 : vector<1x128xf32> to vector<1x128xf32>
    %1782 = vector.broadcast %1781 : vector<1x128xf32> to vector<16x128xf32>
    %1783 = arith.select %2, %1780, %1782 : vector<16x128xi1>, vector<16x128xf32>
    %c0_457 = arith.constant 0 : index
    %c11_458 = arith.constant 11 : index
    %c0_459 = arith.constant 0 : index
    %c0_460 = arith.constant 0 : index
    %1784 = vector.load %arg8[%c0_457, %c11_458, %c0_459, %c0_460] : memref<1x12x16x128xf32, #tpu.memory_space<vmem>>, vector<1x1x16x128xf32>
    %1785 = vector.shape_cast %1784 : vector<1x1x16x128xf32> to vector<16x128xf32>
    %1786 = vector.shape_cast %1604 : vector<16x128xf32> to vector<1x1x16x128xf32>
    tpu.vector_store %arg8[%c0_457, %c11_458, %c0_459, %c0_460], %1786 {strides = array<i32>} : memref<1x12x16x128xf32, #tpu.memory_space<vmem>>, vector<1x1x16x128xf32>,
    %1787 = arith.mulf %1783, %1610 : vector<16x128xf32>
    %c0_461 = arith.constant 0 : index
    %c11_462 = arith.constant 11 : index
    %c0_463 = arith.constant 0 : index
    %c0_464 = arith.constant 0 : index
    %1788 = vector.load %arg7[%c0_461, %c11_462, %c0_463, %c0_464] : memref<1x12x16x128xf32, #tpu.memory_space<vmem>>, vector<1x1x16x128xf32>
    %1789 = vector.shape_cast %1788 : vector<1x1x16x128xf32> to vector<16x128xf32>
    %1790 = vector.shape_cast %1787 : vector<16x128xf32> to vector<1x1x16x128xf32>
    tpu.vector_store %arg7[%c0_461, %c11_462, %c0_463, %c0_464], %1790 {strides = array<i32>} : memref<1x12x16x128xf32, #tpu.memory_space<vmem>>, vector<1x1x16x128xf32>,
    return
  }
  func.func @transform_0(%arg0: i32, %arg1: i32) -> (i32, i32, i32, i32) {
    %c0_i32 = arith.constant 0 : i32
    %c0_i32_0 = arith.constant 0 : i32
    %c0_i32_1 = arith.constant 0 : i32
    return %arg0, %c0_i32, %arg1, %c0_i32_0 : i32, i32, i32, i32
  }
  func.func @transform_1(%arg0: i32, %arg1: i32) -> (i32, i32, i32, i32) {
    %c1_i32 = arith.constant 1 : i32
    %0 = arith.addi %arg1, %c1_i32 : i32
    %c2_i32 = arith.constant 2 : i32
    %1 = arith.muli %0, %c2_i32 : i32
    %c0_i32 = arith.constant 0 : i32
    %c0_i32_0 = arith.constant 0 : i32
    %c0_i32_1 = arith.constant 0 : i32
    return %arg0, %c0_i32, %1, %c0_i32_0 : i32, i32, i32, i32
  }
  func.func @transform_2(%arg0: i32, %arg1: i32) -> i32 {
    %c0_i32 = arith.constant 0 : i32
    %c0_i32_0 = arith.constant 0 : i32
    return %c0_i32 : i32
  }
  func.func @transform_3(%arg0: i32, %arg1: i32) -> i32 {
    %c0_i32 = arith.constant 0 : i32
    %c0_i32_0 = arith.constant 0 : i32
    return %c0_i32 : i32
  }
  func.func @transform_4(%arg0: i32, %arg1: i32) -> i32 {
    %c0_i32 = arith.constant 0 : i32
    %c0_i32_0 = arith.constant 0 : i32
    return %c0_i32 : i32
  }
  func.func @transform_5(%arg0: i32, %arg1: i32) -> (i32, i32, i32, i32) {
    %c0_i32 = arith.constant 0 : i32
    %c0_i32_0 = arith.constant 0 : i32
    %c0_i32_1 = arith.constant 0 : i32
    return %arg0, %c0_i32, %arg1, %c0_i32_0 : i32, i32, i32, i32
  }
  func.func @transform_6(%arg0: i32, %arg1: i32) -> (i32, i32, i32, i32) {
    %c0_i32 = arith.constant 0 : i32
    %c0_i32_0 = arith.constant 0 : i32
    %c0_i32_1 = arith.constant 0 : i32
    return %arg0, %c0_i32, %arg1, %c0_i32_0 : i32, i32, i32, i32
  }
}

</mosaic_0001>

<bundles_post_ra>
// kernel: spatial_atten.1
= control target key start
LH: loop header
LB: loop body
LE: loop exit
PB: predicated region body
PF: predicated region fallthrough
CT: control target
= control target key end

     0   :  { %s8799_s0 = inlined_call_operand.vmem [shape: f32[2,12,24,128], index: 0, kind: input, shape index: {}, may-alias: {0,1}]   ;;  %s8800_s1 = inlined_call_operand.vmem [shape: f32[2,12,24,128], index: 1, kind: input, shape index: {}, may-alias: {0,1}]   ;;  %s8801_s2 = inlined_call_operand.vmem [shape: f32[324], index: 2, kind: input, shape index: {}]   ;;  %s8802_s3 = inlined_call_operand.vmem [shape: f32[3], index: 3, kind: input, shape index: {}]   ;;  %s8803_s4 = inlined_call_operand.vmem [shape: f32[9], index: 4, kind: input, shape index: {}]   ;;  %s8804_s5 = inlined_call_operand.hbm [shape: f32[2,12,16,128], index: 5, kind: output, shape index: {0}]   ;;  %s8805_s6 = inlined_call_operand.hbm [shape: f32[2,12,16,128], index: 6, kind: output, shape index: {1}]  }
   0x1   :  { %9052 = sst [smem:[#allocation195_spill]] %s8799_s0 }
   0x2   :  { %9053 = sst [smem:[#allocation196_spill]] %s8800_s1 }
   0x3   :  { %9054 = sst [smem:[#allocation197_spill]] %s8801_s2 }
   0x4   :  { %9055 = sst [smem:[#allocation198_spill]] %s8802_s3 }
   0x5   :  { %9056 = sst [smem:[#allocation199_spill]] %s8803_s4 }
   0x6   :  { %9057 = sst [smem:[#allocation200_spill]] %s8804_s5 }
   0x7   :  { %9058 = sst [smem:[#allocation201_spill]] %s8805_s6 }
   0x8   :  { %12 = vsyncpa [#allocation6], 0 }
   0x9   :  { %13 = vsyncpa [#allocation8], 0 }
   0xa   :  { %14 = vsyncpa [#allocation5], 0 }
   0xb   :  { %16 = vsyncpa [#allocation5 + $0x1], 0 }
   0xc   :  { %17 = vsyncpa [#allocation12], 0 }
   0xd   :  { %19 = vsyncpa [#allocation12 + $0x1], 0  ;;  %s4775_s21 = smov 0   ;;  %s4777_s22 = smov 0  }
   0xe   :  { %s4779_s23 = smov 0   ;;  %s4781_s24 = smov 0  }
   0xf   :  { %s4783_s25 = smov 0   ;;  %s4785_s26 = smov 0  }
  0x10 LB: > { %9059 = sst [smem:[#allocation17_spill]] %s4705_s21  ;;  %s3832_s27 = sadd.s32 4294967295, %s4725_s26   ;;  %s4725_s26 = sphi %s4785_s26, %s25_s26   ;;  %s4721_s25 = sphi %s4783_s25, %s9738_s25   ;;  %s4717_s24 = sphi %s4781_s24, %s9737_s24   ;;  %s4713_s23 = sphi %s4779_s23, %s9736_s23   ;;  %s4709_s22 = sphi %s4777_s22, %s9735_s22   ;;  %s4705_s21 = sphi %s4775_s21, %s9734_s21  }
  0x11   : > { %9060 = sst [smem:[#allocation18_spill]] %s4709_s22  ;;  %s3833_s28 = sadd.s32 4294967294, %s4725_s26  }
  0x12   : > { %9061 = sst [smem:[#allocation19_spill]] %s4713_s23  ;;  %s37_s29 = sadd.s32 1, %s4721_s25 }
  0x13   : > { %9062 = sst [smem:[#allocation20_spill]] %s4717_s24  ;;  %s46_s30 = sadd.s32 1, %s4713_s23 }
  0x14   : > { %9063 = sst [smem:[#allocation21_spill]] %s4721_s25  ;;  %p39_p0 = scmp.ge.s32.totalorder %s37_s29, 2 }
  0x15   : > { %9064 = sst [smem:[#allocation22_spill]] %s4725_s26  ;;  %p53_p1 = scmp.ne.s32.totalorder %s4713_s23, %s4709_s22 }
  0x16   : > { %p54_p2 = scmp.eq.s32.totalorder %s4725_s26, 0  ;;  %p180_p3 = scmp.eq.s32.totalorder %s3832_s27, 1 }
  0x17   : > { %s9740_s29 = smov (%p39_p0, %s37_s29), 0  ;;  %p185_p6 = scmp.ne.s32.totalorder %s4709_s22, %s4705_s21 }
  0x18   : > { %9065 = sst [smem:[#allocation23_spill]] %s9740_s29  ;;  %p4814_p4 = por %p54_p2, %p53_p1 }
  0x19   : > { %p4818_p5 = por %p180_p3, %p53_p1  ;;  %s41_s9 = ssub.s32 %s4721_s25, %s9740_s29 }
  0x1a   : > { %s9066_s7 = scalar_select %p4814_p4, 1, 0 }
  0x1b   : > { %s9067_s8 = scalar_select %p4818_p5, 1, 0 }
  0x1c   : > { %p44_p7 = scmp.eq.s32.totalorder %s41_s9, 0  ;;  %p186_p8 = scmp.eq.s32.totalorder %s3833_s28, 1 }
  0x1d   : > { %9068 = sst [smem:[#allocation24_spill]] %s9067_s8  ;;  %p3834_p9 = scmp.ge.s32.totalorder %s4725_s26, 1 }
  0x1e   : > { %p221_p10 = scmp.lt.s32.totalorder %s4725_s26, 3  ;;  %p4831_p11 = por %p186_p8, %p185_p6 }
  0x1f   : > { %s4829_s10 = scalar_select %p44_p7, %s4713_s23, %s46_s30  }
  0x20   : > { %s9070_s11 = scalar_select %p4831_p11, 1, 0 }
  0x21   : > { %9069 = sst [smem:[#allocation25_spill]] %s4829_s10  ;;  %p4835_p12 = pnand %p3834_p9, %p221_p10 }
  0x22   : > { %9071 = sst [smem:[#allocation26_spill]] %s9070_s11  ;;  %p4839_p13 = scmp.eq.s32.totalorder %s3832_s27, 0 }
  0x23   : > { %s9072_s12 = scalar_select %p4835_p12, 1, 0 }
  0x24   : > { %s9073_s13 = scalar_select %p4839_p13, 1, 0 }
  0x25   : > { %p4387_p0 = pneg %p4835_p12  ;;  %s9074_s3 = sld [smem:[#allocation198_spill]] }
  0x26   : > { %s9076_s2 = sld [smem:[#allocation197_spill]] }
  0x27   : > { %p4850_p1 = pnand %p4839_p13, %p4387_p0 }
  0x29   : > { %p4548_p3 = pneg %p4850_p1 }
  0x2b   : > { %s245_s16 = sshll.u32 %s9074_s3, 4  ;;  %s246_s16 = int_to_ptr.vmem [resolvable:$true] %s245_s16 }
  0x2c   : > { %s234_s20 = sshll.u32 %s9076_s2, 4  ;;  %s4546_s27 = scalar_lea.vmem %s246_s16, 16  ;;  %s235_s20 = int_to_ptr.vmem [resolvable:$true] %s234_s20 }
  0x2d   : > { %p4547_p2 = scmp.ne.s32.totalorder %s246_s16, %s4546_s27  ;;  %p4554_p8 = scmp.lt.s32.totalorder %s246_s16, %s246_s16 }
  0x2e   : > { %p4555_p9 = scmp.lt.s32.totalorder %s4546_s27, %s4546_s27 }
  0x2f   : > { %p4549_p6 = pnand %p4548_p3, %p4547_p2 }
  0x30   : > { %p4556_p10 = por %p4555_p9, %p4554_p8 }
  0x31   : > { %p4550_p7 = pneg %p4549_p6 }
  0x33   : > { %p4557_p0 = pnand %p4556_p10, %p4550_p7 }
  0x35   : > { %4560 = shalt.err (!%p4557_p0)
}
  0x36   : > { %s4731_s28 = smov [#allocation7]   ;;  %s9077_s4 = sld [smem:[#allocation199_spill]] }
  0x37   : > { %4393 = dma.vmem_to_smem (!%p4850_p1), %s246_s16, 16, %s4731_s28, [#allocation8]  }
  0x38   : > { %s4561_s15 = scalar_lea.vmem %s235_s20, 48  ;;  %s4568_s18 = scalar_lea.vmem %s235_s20, 64 }
  0x39   : > { %p4562_p11 = scmp.ne.s32.totalorder %s235_s20, %s4561_s15  ;;  %p4569_p5 = scmp.lt.s32.totalorder %s235_s20, %s235_s20 }
  0x3a   : > { %p4570_p8 = scmp.lt.s32.totalorder %s4568_s18, %s4561_s15 }
  0x3b   : > { %p4564_p2 = pnand %p4562_p11, %p4548_p3 }
  0x3c   : > { %s256_s14 = sshll.u32 %s9077_s4, 4  ;;  %p4571_p7 = por %p4570_p8, %p4569_p5  ;;  %s257_s14 = int_to_ptr.vmem [resolvable:$true] %s256_s14 }
  0x3d   : > { %p4565_p6 = pneg %p4564_p2 }
  0x3f   : > { %p4572_p9 = pnand %p4571_p7, %p4565_p6 }
  0x41   : > { %4575 = shalt.err (!%p4572_p9)
}
  0x42   : > { %s4732_s19 = smov [#allocation4]   ;;  %s4576_s16 = scalar_lea.vmem %s257_s14, 16 }
  0x43   : > { %4390 = dma.vmem_to_smem (!%p4850_p1), %s235_s20, 48, %s4732_s19, [#allocation6]  }
  0x44   : > { %p4577_p10 = scmp.ne.s32.totalorder %s257_s14, %s4576_s16  ;;  %p4584_p11 = scmp.lt.s32.totalorder %s257_s14, %s257_s14 }
  0x45   : > { %p4585_p2 = scmp.lt.s32.totalorder %s4576_s16, %s4576_s16 }
  0x46   : > { %p4579_p0 = pnand %p4577_p10, %p4548_p3 }
  0x47   : > { %p4586_p12 = por %p4585_p2, %p4584_p11 }
  0x48   : > { %p4580_p13 = pneg %p4579_p0 }
  0x4a   : > { %p4587_p4 = pnand %p4586_p12, %p4580_p13 }
  0x4c   : > { %4590 = shalt.err (!%p4587_p4)
}
  0x4d   : > { %s4733_s27 = smov [#allocation9]   ;;  %p3838_p5 = scmp.ge.s32.totalorder %s4725_s26, 2 }
  0x4e   : > { %4396 = dma.vmem_to_smem (!%p4850_p1), %s257_s14, 16, %s4733_s27, [#allocation8]  }
  0x4f   : > { %263 = sbr.rel (%p3838_p5) target bundleno = 123 (0x7b), region = 28  ;;  %p9078_p6 = scmp.ne.s32.totalorder (!%p3838_p5), %s9066_s7, 0 }
  0x56   : > { %266 = sbr.rel (!%p9078_p6) target bundleno = 107 (0x6b), region = 32  ;;  %s268_s20 = sand.u32 (%p9078_p6), 1, %s4713_s23  }
  0x57   : > { %s4365_s28 = smul.u32 (%p9078_p6), 288, %s4721_s25  ;;  %s9079_s0 = sld [smem:[#allocation195_spill]] (%p9078_p6) }
  0x58   : > { %s4364_s30 = smul.u32 (%p9078_p6), 192, %s268_s20  ;;  %s4891_s14 = smov (%p9078_p6), 0  }
  0x5a   : > { %s4889_s17 = scalar_lea.vmem (%p9078_p6), [#allocation2], %s4364_s30  }
  0x5d   : > { %s4887_s18 = scalar_lea.vmem %s9079_s0, %s4365_s28  }
  0x5e LB: >> { %v413_v0 = vld [vmem:[%s4887_s18] sm:$0xff]  ;;  %v415_v1 = vld [vmem:[%s4887_s18 + $0x8] sm:$0xff]  ;;  %v417_v2 = vld [vmem:[%s4887_s18 + $0x18] sm:$0xff]  ;;  %s407_s14 = sadd.s32 1, %s4729_s14   ;;  %s4729_s14 = sphi %s4891_s14, %s407_s14  }
  0x5f   : >> { %414 = vst [vmem:[%s4889_s17] sm:$0xff] %v413_v0  ;;  %416 = vst [vmem:[%s4889_s17 + $0x8] sm:$0xff] %v415_v1  ;;  %v419_v3 = vld [vmem:[%s4887_s18 + $0x20] sm:$0xff]  ;;  %v421_v4 = vld [vmem:[%s4887_s18 + $0x30] sm:$0xff]  ;;  %p406_p4 = scmp.ge.s32.totalorder %s407_s14, 1 }
  0x60   : >> { %418 = vst [vmem:[%s4889_s17 + $0x10] sm:$0xff] %v417_v2  ;;  %v423_v5 = vld [vmem:[%s4887_s18 + $0x38] sm:$0xff]  ;;  %420 = vst [vmem:[%s4889_s17 + $0x18] sm:$0xff] %v419_v3  ;;  %v425_v6 = vld [vmem:[%s4887_s18 + $0x48] sm:$0xff] }
  0x61   : >> { %422 = vst [vmem:[%s4889_s17 + $0x20] sm:$0xff] %v421_v4  ;;  %424 = vst [vmem:[%s4889_s17 + $0x28] sm:$0xff] %v423_v5  ;;  %v427_v7 = vld [vmem:[%s4887_s18 + $0x50] sm:$0xff]  ;;  %v429_v8 = vld [vmem:[%s4887_s18 + $0x60] sm:$0xff] }
  0x62   : >> { %426 = vst [vmem:[%s4889_s17 + $0x30] sm:$0xff] %v425_v6  ;;  %428 = vst [vmem:[%s4889_s17 + $0x38] sm:$0xff] %v427_v7  ;;  %v431_v9 = vld [vmem:[%s4887_s18 + $0x68] sm:$0xff]  ;;  %v433_v10 = vld [vmem:[%s4887_s18 + $0x78] sm:$0xff] }
  0x63   : >> { %430 = vst [vmem:[%s4889_s17 + $0x40] sm:$0xff] %v429_v8  ;;  %v435_v11 = vld [vmem:[%s4887_s18 + $0x80] sm:$0xff]  ;;  %432 = vst [vmem:[%s4889_s17 + $0x48] sm:$0xff] %v431_v9  ;;  %v437_v12 = vld [vmem:[%s4887_s18 + $0x90] sm:$0xff] }
  0x64   : >> { %434 = vst [vmem:[%s4889_s17 + $0x50] sm:$0xff] %v433_v10  ;;  %436 = vst [vmem:[%s4889_s17 + $0x58] sm:$0xff] %v435_v11  ;;  %v439_v13 = vld [vmem:[%s4887_s18 + $0x98] sm:$0xff]  ;;  %v441_v14 = vld [vmem:[%s4887_s18 + $0xa8] sm:$0xff]  ;;  %409 = sbr.rel (!%p406_p4) target bundleno = 94 (0x5e), region = 260 }
  0x65   : >> { %438 = vst [vmem:[%s4889_s17 + $0x60] sm:$0xff] %v437_v12  ;;  %440 = vst [vmem:[%s4889_s17 + $0x68] sm:$0xff] %v439_v13  ;;  %v443_v15 = vld [vmem:[%s4887_s18 + $0xb0] sm:$0xff]  ;;  %v445_v16 = vld [vmem:[%s4887_s18 + $0xc0] sm:$0xff] }
  0x66   : >> { %442 = vst [vmem:[%s4889_s17 + $0x70] sm:$0xff] %v441_v14  ;;  %v447_v17 = vld [vmem:[%s4887_s18 + $0xc8] sm:$0xff]  ;;  %444 = vst [vmem:[%s4889_s17 + $0x78] sm:$0xff] %v443_v15  ;;  %v449_v18 = vld [vmem:[%s4887_s18 + $0xd8] sm:$0xff] }
  0x67   : >> { %446 = vst [vmem:[%s4889_s17 + $0x80] sm:$0xff] %v445_v16  ;;  %448 = vst [vmem:[%s4889_s17 + $0x88] sm:$0xff] %v447_v17  ;;  %v451_v19 = vld [vmem:[%s4887_s18 + $0xe0] sm:$0xff]  ;;  %v453_v20 = vld [vmem:[%s4887_s18 + $0xf0] sm:$0xff] }
  0x68   : >> { %450 = vst [vmem:[%s4889_s17 + $0x90] sm:$0xff] %v449_v18  ;;  %452 = vst [vmem:[%s4889_s17 + $0x98] sm:$0xff] %v451_v19  ;;  %v455_v21 = vld [vmem:[%s4887_s18 + $0xf8] sm:$0xff]  ;;  %v457_v22 = vld [vmem:[%s4887_s18 + $0x108] sm:$0xff] }
  0x69   : >> { %454 = vst [vmem:[%s4889_s17 + $0xa0] sm:$0xff] %v453_v20  ;;  %v459_v23 = vld [vmem:[%s4887_s18 + $0x110] sm:$0xff]  ;;  %456 = vst [vmem:[%s4889_s17 + $0xa8] sm:$0xff] %v455_v21 }
  0x6a   : >> { %458 = vst [vmem:[%s4889_s17 + $0xb0] sm:$0xff] %v457_v22  ;;  %460 = vst [vmem:[%s4889_s17 + $0xb8] sm:$0xff] %v459_v23 }
  0x6b PF: > { %p9080_p12 = scmp.ne.s32.totalorder %s9066_s7, 0 }
  0x6c   : > { %s522_s19 = sand.u32 (%p9080_p12), 1, %s4713_s23   ;;  %s3848_s16 = smul.u32 (%p9080_p12), 288, %s4721_s25 }
  0x6d   : > { %520 = sbr.rel (!%p9080_p12) target bundleno = 123 (0x7b), region = 84  ;;  %s9081_s1 = sld [smem:[#allocation196_spill]] (%p9080_p12) }
  0x6e   : > { %s4366_s27 = smul.u32 (%p9080_p12), 96, %s522_s19 }
  0x70   : > { %s524_s9 = scalar_lea.vmem (%p9080_p12), [#allocation3], %s4366_s27 }
  0x73   : > { %s3691_s30 = scalar_lea.vmem (%p9080_p12), %s9081_s1, %s3848_s16 }
  0x74   : > { %v3849_v24 = vld [vmem:[%s3691_s30 + $0x10] sm:$0xff]  ;;  %v3850_v25 = vld [vmem:[%s3691_s30 + $0x28] sm:$0xff]  ;;  %v3851_v26 = vld [vmem:[%s3691_s30 + $0x40] sm:$0xff] }
  0x75   : > { %581 = vst [vmem:[%s524_s9] sm:$0xff] %v3849_v24  ;;  %583 = vst [vmem:[%s524_s9 + $0x8] sm:$0xff] %v3850_v25  ;;  %v3852_v27 = vld [vmem:[%s3691_s30 + $0x58] sm:$0xff]  ;;  %v3853_v28 = vld [vmem:[%s3691_s30 + $0x70] sm:$0xff] }
  0x76   : > { %585 = vst [vmem:[%s524_s9 + $0x10] sm:$0xff] %v3851_v26  ;;  %v3854_v29 = vld [vmem:[%s3691_s30 + $0x88] sm:$0xff]  ;;  %587 = vst [vmem:[%s524_s9 + $0x18] sm:$0xff] %v3852_v27  ;;  %v3855_v30 = vld [vmem:[%s3691_s30 + $0xa0] sm:$0xff] }
  0x77   : > { %589 = vst [vmem:[%s524_s9 + $0x20] sm:$0xff] %v3853_v28  ;;  %591 = vst [vmem:[%s524_s9 + $0x28] sm:$0xff] %v3854_v29  ;;  %v3856_v31 = vld [vmem:[%s3691_s30 + $0xb8] sm:$0xff]  ;;  %v3857_v32 = vld [vmem:[%s3691_s30 + $0xd0] sm:$0xff] }
  0x78   : > { %593 = vst [vmem:[%s524_s9 + $0x30] sm:$0xff] %v3855_v30  ;;  %595 = vst [vmem:[%s524_s9 + $0x38] sm:$0xff] %v3856_v31  ;;  %v3858_v33 = vld [vmem:[%s3691_s30 + $0xe8] sm:$0xff]  ;;  %v3859_v34 = vld [vmem:[%s3691_s30 + $0x100] sm:$0xff] }
  0x79   : > { %597 = vst [vmem:[%s524_s9 + $0x40] sm:$0xff] %v3857_v32  ;;  %v3860_v35 = vld [vmem:[%s3691_s30 + $0x118] sm:$0xff]  ;;  %599 = vst [vmem:[%s524_s9 + $0x48] sm:$0xff] %v3858_v33 }
  0x7a   : > { %601 = vst [vmem:[%s524_s9 + $0x50] sm:$0xff] %v3859_v34  ;;  %603 = vst [vmem:[%s524_s9 + $0x58] sm:$0xff] %v3860_v35 }
  0x7b PF: > { %p9082_p13 = scmp.ne.s32.totalorder %s9072_s12, 0 }
  0x7d   : > { %612 = sbr.rel (%p9082_p13) target bundleno = 763 (0x2fb), region = 122 }
  0x84   : > { %s4957_s7 = sand.u32 1, %s4709_s22   ;;  %p9086_p1 = scmp.ne.s32.totalorder %s9073_s13, 0 }
  0x85   : > { %9083 = sst [smem:[#allocation27_spill]] %s4957_s7  ;;  %s4960_s15 = smul.u32 192, %s4957_s7 }
  0x86   : > { %s4368_s18 = smul.u32 96, %s4957_s7 }
  0x87   : > { %9084 = sst [smem:[#allocation28_spill]] %s4960_s15  ;;  %s4964_s17 = scalar_lea.vmem [#allocation2], %s4960_s15 }
  0x88   : > { %s4966_s14 = scalar_lea.vmem [#allocation3], %s4368_s18 }
  0x89   : > { %9085 = sst [smem:[#allocation29_spill]] %s4966_s14 }
  0x8a   : > { %4688 = dma.done.wait (%p9086_p1), [#allocation6], 48  }
  0x8b   : > { %4690 = vsyncadd (%p9086_p1), [#allocation6], 4294967248 }
  0x8c   : > { %4692 = dma.done.wait (%p9086_p1), [#allocation8], 32  }
  0x8d   : > { %4694 = vsyncadd (%p9086_p1), [#allocation8], 4294967264 }
  0x8e   : > { %640 = sfence }
  0x8f   : > { %v4977_v36 = vld [vmem:[%s4964_s17] sm:$0xff]  ;;  %v4980_v37 = vld [vmem:[%s4964_s17 + $0x8] sm:$0xff]  ;;  %v682_v38 = vlaneseq  ;;  %s8810_s12 = smov 127   ;;  %s8812_s19 = smov 1   ;;  %v5040_v53 = vld [vmem:[%s4964_s17 + $0x18] sm:$0xff] }
  0x90   : > { %722 = vrot.lane.b32.xlu1 %v4977_v36, %s8810_s12  ;;  %718 = vrot.lane.b32.xlu0 %v4977_v36, %s8812_s19  ;;  %v697_v39 = vrot.slane %v4977_v36, 1  ;;  %v698_v40 = vrot.slane %v4980_v37, 1  ;;  %v3867_v43 = vld [vmem:[%s4966_s14] ss:$0 sm:$0xff]  ;;  %v3868_v49 = vld [vmem:[%s4966_s14 + $0x1] ss:$0 sm:$0xff] }
  0x91   : > { %v4988_v41 = vshrl.u32 %v682_v38, 7  ;;  %v5043_v54 = vld [vmem:[%s4964_s17 + $0x10] sm:$0xff]  ;;  %v911_v56 = vrot.slane %v5040_v53, 1  ;;  %v3899_v57 = vld [vmem:[%s4966_s14 + $0x8] ss:$0 sm:$0xff]  ;;  %v5070_v62 = vld [vmem:[%s4964_s17 + $0x20] sm:$0xff] }
  0x92   : > { %v910_v55 = vrot.slane %v5043_v54, 1  ;;  %v5067_v61 = vld [vmem:[%s4964_s17 + $0x28] sm:$0xff]  ;;  %v1122_v1 = vrot.slane %v5070_v62, 1  ;;  %v5077_v3 = vld [vmem:[%s4964_s17 + $0x38] sm:$0xff]  ;;  %v5080_v4 = vld [vmem:[%s4964_s17 + $0x30] sm:$0xff]  ;;  %s5109_s13 = sld [smem:[#allocation4 + $0x2]] }
  0x93   : > { %9087 = vst [vmem:[#allocation30_spill] sm:$0xff] %v4988_v41  ;;  %vm699_vm0 = vcmp.lt.s32.totalorder %v4988_v41, 7  ;;  %v4992_v42 = vadd.s32 8, %v4988_v41  ;;  %v1123_v2 = vrot.slane %v5067_v61, 1  ;;  %v1334_v5 = vrot.slane %v5080_v4, 1  ;;  %v5089_v7 = vld [vmem:[%s4964_s17 + $0x48] sm:$0xff] }
  0x94   : > { %724 = vrot.lane.b32.xlu1 %v4980_v37, %s8810_s12  ;;  %720 = vrot.lane.b32.xlu0 %v4980_v37, %s8812_s19  ;;  %v701_v44 = vsel %vm699_vm0, %v698_v40, %v697_v39  ;;  %v5003_v45 = vsel %vm699_vm0, %v697_v39, %v698_v40  ;;  %v913_v58 = vsel %vm699_vm0, %v911_v56, %v910_v55  ;;  %v1335_v6 = vrot.slane %v5077_v3, 1  ;;  %v5092_v8 = vld [vmem:[%s4964_s17 + $0x40] sm:$0xff]  ;;  %v3900_v9 = vld [vmem:[%s4966_s14 + $0x9] ss:$0 sm:$0xff]  ;;  %s5111_s16 = sld [smem:[#allocation4 + $0x6e]]  ;;  %s5130_s27 = sld [smem:[#allocation4 + $0xda]] }
  0x95   : > { %9088 = vst [vmem:[#allocation31_spill] sm:$0xff] %v4992_v42  ;;  %9089 = vst [vmem:[#allocation32_spill] sm:$0xff] %v5003_v45  ;;  %vm686_vm1 = vcmp.lt.s32.totalorder %v4992_v42, 15  ;;  %v708_v47 = vrot.slane %v5003_v45, 1  ;;  %v5064_v60 = vsel %vm699_vm0, %v910_v55, %v911_v56  ;;  %v3932_v11 = vld [vmem:[%s4966_s14 + $0x10] ss:$0 sm:$0xff]  ;;  %v1125_v12 = vsel %vm699_vm0, %v1123_v2, %v1122_v1 }
  0x96   : > { %v5008_v46 = vsel %vm686_vm1, %v701_v44, %v3867_v43  ;;  %v5060_v59 = vsel %vm686_vm1, %v913_v58, %v3899_v57  ;;  %v920_v63 = vrot.slane %v5064_v60, 1  ;;  %v1546_v13 = vrot.slane %v5092_v8, 1  ;;  %v3965_v15 = vld [vmem:[%s4966_s14 + $0x18] ss:$0 sm:$0xff]  ;;  %v3998_v21 = vld [vmem:[%s4966_s14 + $0x20] ss:$0 sm:$0xff] }
  0x97   : > { %9090 = vst [vmem:[#allocation33_spill] sm:$0xff] %v5008_v46  ;;  %v709_v48 = vrot.slane %v5008_v46, 1  ;;  %v921_v0 = vrot.slane %v5060_v59, 1  ;;  %v1547_v14 = vrot.slane %v5089_v7, 1  ;;  %v1337_v16 = vsel %vm699_vm0, %v1335_v6, %v1334_v5  ;;  %s5132_s20 = sld [smem:[#allocation4 + $0x1]]  ;;  %s5138_s28 = sld [smem:[#allocation4 + $0x6d]] }
  0x98   : > { %726 = vrot.lane.b32.xlu0 %v5003_v45, %s8812_s19  ;;  %728 = vrot.lane.b32.xlu1 %v5008_v46, %s8812_s19  ;;  %v5123_v19 = vsel %vm686_vm1, %v1125_v12, %v3932_v11  ;;  %v5127_v20 = vsel %vm699_vm0, %v1122_v1, %v1123_v2  ;;  %s5140_s30 = sld [smem:[#allocation4 + $0xd9]]  ;;  %v5144_v25 = vsel %vm686_vm1, %v1337_v16, %v3965_v15  ;;  %s5150_s9 = sld [smem:[#allocation4]]  ;;  %v3933_v29 = vld [vmem:[%s4966_s14 + $0x11] ss:$0 sm:$0xff]  ;;  %v3966_v33 = vld [vmem:[%s4966_s14 + $0x19] ss:$0 sm:$0xff] }
  0x99   : > { %v711_v50 = vsel %vm699_vm0, %v709_v48, %v708_v47  ;;  %v5029_v52 = vsel %vm699_vm0, %v708_v47, %v709_v48  ;;  %v923_v10 = vsel %vm699_vm0, %v921_v0, %v920_v63  ;;  %v5119_v18 = vsel %vm699_vm0, %v920_v63, %v921_v0  ;;  %s5152_s18 = sld [smem:[#allocation4 + $0x6c]]  ;;  %s5162_s0 = sld [smem:[#allocation4 + $0x3]]  ;;  %v5187_v38 = vld [vmem:[%s4964_s17 + $0x58] sm:$0xff]  ;;  %v5190_v39 = vld [vmem:[%s4964_s17 + $0x50] sm:$0xff]  ;;  %v3999_v55 = vld [vmem:[%s4966_s14 + $0x21] ss:$0 sm:$0xff] }
  0x9a   : > { %v5025_v51 = vsel %vm686_vm1, %v711_v50, %v3868_v49  ;;  %v5115_v17 = vsel %vm686_vm1, %v923_v10, %v3900_v9  ;;  %v1132_v22 = vrot.slane %v5127_v20, 1  ;;  %v1133_v23 = vrot.slane %v5123_v19, 1  ;;  %s5175_s1 = sld [smem:[#allocation4 + $0xdb]]  ;;  %s5182_s2 = sld [smem:[#allocation4 + $0x4]]  ;;  %v4031_v16 = vld [vmem:[%s4966_s14 + $0x28] ss:$0 sm:$0xff] }
  0x9b   : > { %v1549_v24 = vsel %vm699_vm0, %v1547_v14, %v1546_v13  ;;  %v5148_v26 = vsel %vm699_vm0, %v1334_v5, %v1335_v6  ;;  %v1345_v28 = vrot.slane %v5144_v25, 1  ;;  %v5171_v31 = vsel %vm699_vm0, %v1546_v13, %v1547_v14  ;;  %s5184_s3 = sld [smem:[#allocation4 + $0x70]]  ;;  %s5192_s4 = sld [smem:[#allocation4 + $0x5]]  ;;  %v4032_v10 = vld [vmem:[%s4966_s14 + $0x29] ss:$0 sm:$0xff] }
  0x9c   : > { %730 = vrot.lane.b32.xlu0 %v5003_v45, %s8810_s12  ;;  %732 = vrot.lane.b32.xlu1 %v5008_v46, %s8810_s12  ;;  %v1344_v27 = vrot.slane %v5148_v26, 1  ;;  %v5167_v30 = vsel %vm686_vm1, %v1549_v24, %v3998_v21  ;;  %v1135_v32 = vsel %vm699_vm0, %v1133_v23, %v1132_v22  ;;  %v1556_v34 = vrot.slane %v5171_v31, 1  ;;  %s5194_s29 = sld [smem:[#allocation4 + $0xdc]]  ;;  %s9097_s25 = smov 127  }
  0x9d   : > { %v1557_v35 = vrot.slane %v5167_v30, 1  ;;  %s5202_s10 = sld [smem:[#allocation4 + $0x71]]  ;;  %s5204_s23 = sld [smem:[#allocation4 + $0xdd]]  ;;  %v1758_v43 = vrot.slane %v5190_v39, 1  ;;  %v1759_v44 = vrot.slane %v5187_v38, 1  ;;  %v5210_v47 = vsel %vm686_vm1, %v1135_v32, %v3933_v29 }
  0x9e   : > { %v1347_v40 = vsel %vm699_vm0, %v1345_v28, %v1344_v27  ;;  %v5214_v48 = vsel %vm699_vm0, %v1132_v22, %v1133_v23  ;;  %s5218_s22 = sld [smem:[#allocation4 + $0x6]]  ;;  %s5220_s26 = sld [smem:[#allocation4 + $0x72]]  ;;  %v747_v57 = vstv %s5132_s20  ;;  %v801_v58 = vstv %s5138_s28 }
  0x9f   : > { %9091 = sst [smem:[#allocation34_spill]] %s5152_s18  ;;  %v1559_v56 = vsel %vm699_vm0, %v1557_v35, %v1556_v34  ;;  %v855_v63 = vstv %s5140_s30  ;;  %s5228_s11 = sld [smem:[#allocation4 + $0xde]]  ;;  %v5234_v0 = vsel %vm686_vm1, %v1347_v40, %v3966_v33  ;;  %v5238_v1 = vsel %vm699_vm0, %v1344_v27, %v1345_v28 }
  0xa0   : > { %736 = vrot.lane.b32.xlu1 %v5025_v51, %s8812_s19  ;;  %734 = vrot.lane.b32.xlu0 %v5029_v52, %s8812_s19  ;;  %9093 = sst [smem:[#allocation36_spill]] %s5162_s0  ;;  %s5230_s21 = sld [smem:[#allocation7]]  ;;  %v5252_v6 = vsel %vm699_vm0, %v1556_v34, %v1557_v35  ;;  %v1761_v11 = vsel %vm699_vm0, %v1759_v44, %v1758_v43  ;;  %v5264_v12 = vsel %vm686_vm1, %v1559_v56, %v3999_v55  ;;  %v765_v23 = vstv %s5182_s2 }
  0xa1   : > { %9095 = sst [smem:[#allocation38_spill]] %s5175_s1  ;;  %s5242_s5 = sld [smem:[#allocation4 + $0x7]]  ;;  %v5267_v13 = vmul.f32 %v747_v57, %v4977_v36  ;;  %v5270_v14 = vmul.f32 %v801_v58, %v4977_v36  ;;  %v5273_v15 = vmul.f32 %v855_v63, %v4977_v36  ;;  %v5281_v21 = vmul.f32 %v747_v57, %v4980_v37 }
  0xa2   : > { %9096 = sst [smem:[#allocation39_spill]] %s5192_s4  ;;  %s5244_s20 = sld [smem:[#allocation4 + $0x73]]  ;;  %v5284_v22 = vmul.f32 %v801_v58, %v4980_v37  ;;  %v819_v24 = vstv %s5184_s3  ;;  %v5293_v36 = vmul.f32 %v855_v63, %v4980_v37  ;;  %v873_v29 = vstv %s5194_s29 }
  0xa3   : > { %9098 = sst [smem:[#allocation40_spill]] %s5202_s10  ;;  %s9104_s28 = smov 1   ;;  %v5310_v34 = vsel %vm686_vm1, %v1761_v11, %v4031_v16  ;;  %v5314_v37 = vsel %vm699_vm0, %v1758_v43, %v1759_v44  ;;  %v5323_v55 = vmul.f32 %v765_v23, %v5003_v45  ;;  %v5326_v56 = vmul.f32 %v819_v24, %v5003_v45 }
  0xa4   : > { %740 = vrot.lane.b32.xlu1 %v5025_v51, %s8810_s12  ;;  %738 = vrot.lane.b32.xlu0 %v5029_v52, %s8810_s12  ;;  %9099 = sst [smem:[#allocation41_spill]] %s5204_s23  ;;  %s5258_s30 = sld [smem:[#allocation7 + $0x1]]  ;;  %v5333_v43 = vmul.f32 %v873_v29, %v5003_v45  ;;  %v5336_v44 = vmul.f32 %v765_v23, %v5008_v46  ;;  %v1768_v57 = vrot.slane %v5314_v37, 1  ;;  %v1769_v58 = vrot.slane %v5310_v34, 1 }
  0xa5   : > { %9100 = sst [smem:[#allocation42_spill]] %s5218_s22  ;;  %s5260_s8 = sld [smem:[#allocation4 + $0xdf]]  ;;  %v5357_v23 = vmul.f32 %v819_v24, %v5008_v46  ;;  %v5360_v11 = vmul.f32 %v873_v29, %v5008_v46 }
  0xa6   : > { %9101 = sst [smem:[#allocation43_spill]] %s5220_s26  ;;  %s5276_s7 = sld [smem:[#allocation7 + $0x2]]  ;;  %v1771_v33 = vsel %vm699_vm0, %v1769_v58, %v1768_v57 }
  0xa7   : > { %9102 = sst [smem:[#allocation44_spill]] %s5228_s11  ;;  %s5278_s6 = sld [smem:[#allocation4 + $0x8]]  ;;  %v783_v16 = vstv %s5242_s5  ;;  %v5420_v50 = vsel %vm686_vm1, %v1771_v33, %v4032_v10  ;;  %v5443_v33 = vld [vmem:[%s4964_s17 + $0x68] sm:$0xff] }
  0xa8   : > { %932 = vrot.lane.b32.xlu1 %v5040_v53, %s8812_s19  ;;  %930 = vrot.lane.b32.xlu0 %v5043_v54, %s8812_s19  ;;  %9103 = sst [smem:[#allocation45_spill]] %s5230_s21  ;;  %s5288_s24 = sld [smem:[#allocation4 + $0x74]]  ;;  %v837_v40 = vstv %s5244_s20  ;;  %v5378_v29 = vmul.f32 %v783_v16, %v5025_v51  ;;  %9125 = vst [vmem:[#allocation66_spill] sm:$0xff] %v5443_v33  ;;  %v1971_v49 = vrot.slane %v5443_v33, 1 }
  0xa9   : > { %s5290_s15 = sld [smem:[#allocation4 + $0xa]]  ;;  %s5316_s2 = sld [smem:[#allocation4 + $0xe0]]  ;;  %v5381_v63 = vmul.f32 %v837_v40, %v5025_v51  ;;  %v5409_v5 = vmul.f32 %v837_v40, %v5029_v52 }
  0xaa   : > { %9105 = sst [smem:[#allocation46_spill]] %s5258_s30  ;;  %s5300_s18 = sld [smem:[#allocation4 + $0xe2]] }
  0xab   : > { %s5318_s3 = sld [smem:[#allocation4 + $0x9]]  ;;  %s5328_s29 = sld [smem:[#allocation4 + $0x75]]  ;;  %v891_v35 = vstv %s5260_s8 }
  0xac   : > { %936 = vrot.lane.b32.xlu1 %v5040_v53, %s8810_s12  ;;  %934 = vrot.lane.b32.xlu0 %v5043_v54, %s8810_s12  ;;  %9106 = sst [smem:[#allocation47_spill]] %s5276_s7  ;;  %s5330_s4 = sld [smem:[#allocation4 + $0xe1]]  ;;  %v5391_v28 = vmul.f32 %v891_v35, %v5025_v51  ;;  %v5406_v51 = vmul.f32 %v783_v16, %v5029_v52  ;;  %v5412_v2 = vmul.f32 %v891_v35, %v5029_v52 }
  0xad   : > { %9107 = sst [smem:[#allocation48_spill]] %s5278_s6  ;;  %s5342_s10 = sld [smem:[#allocation4 + $0x77]]  ;;  %v5424_v16 = vsel %vm699_vm0, %v1768_v57, %v1769_v58  ;;  %v5446_v57 = vld [vmem:[%s4964_s17 + $0x60] sm:$0xff] }
  0xae   : > { %9108 = sst [smem:[#allocation49_spill]] %s5288_s24  ;;  %s5340_s23 = sld [smem:[#allocation4 + $0xb]]  ;;  %9126 = vst [vmem:[#allocation67_spill] sm:$0xff] %v5446_v57 }
  0xaf   : > { %9109 = sst [smem:[#allocation50_spill]] %s5316_s2  ;;  %s5348_s1 = sld [smem:[#allocation4 + $0xe3]]  ;;  %v959_v32 = vstv %s5290_s15 }
  0xb0   : > { %940 = vrot.lane.b32.xlu1 %v5060_v59, %s8812_s19  ;;  %938 = vrot.lane.b32.xlu0 %v5064_v60, %s8812_s19  ;;  %s5364_s5 = sld [smem:[#allocation4 + $0xc]]  ;;  %s5366_s20 = sld [smem:[#allocation4 + $0x79]]  ;;  %v1067_v27 = vstv %s5300_s18  ;;  %v5433_v52 = vmul.f32 %v5040_v53, %v959_v32  ;;  %v5453_v58 = vmul.f32 %v5043_v54, %v959_v32 }
  0xb1   : > { %9110 = sst [smem:[#allocation51_spill]] %s5318_s3  ;;  %s5372_s26 = sld [smem:[#allocation4 + $0x78]]  ;;  %v5440_v10 = vmul.f32 %v5040_v53, %v1067_v27  ;;  %v5470_v9 = vmul.f32 %v5043_v54, %v1067_v27 }
  0xb2   : > { %9111 = sst [smem:[#allocation52_spill]] %s5328_s29  ;;  %s5374_s22 = sld [smem:[#allocation4 + $0xe5]]  ;;  %9128 = vst [vmem:[#allocation69_spill] sm:$0xff] %v5453_v58 }
  0xb3   : > { %9112 = sst [smem:[#allocation53_spill]] %s5330_s4  ;;  %s5386_s8 = sld [smem:[#allocation4 + $0xe4]]  ;;  %9124 = vst [vmem:[#allocation65_spill] sm:$0xff] %v5440_v10  ;;  %9132 = vst [vmem:[#allocation73_spill] sm:$0xff] %v5470_v9 }
  0xb4   : > { %944 = vrot.lane.b32.xlu1 %v5060_v59, %s8810_s12  ;;  %942 = vrot.lane.b32.xlu0 %v5064_v60, %s8810_s12  ;;  %s5160_s12 = sld [smem:[#allocation4 + $0xd8]]  ;;  %9113 = sst [smem:[#allocation54_spill]] %s5340_s23 }
  0xb5   : > { %9114 = sst [smem:[#allocation55_spill]] %s5342_s10  ;;  %s5388_s7 = sld [smem:[#allocation4 + $0xe]] }
  0xb6   : > { %9115 = sst [smem:[#allocation56_spill]] %s5348_s1  ;;  %s5396_s30 = sld [smem:[#allocation4 + $0x7a]]  ;;  %v1031_v46 = vstv %s5366_s20 }
  0xb7   : > { %9116 = sst [smem:[#allocation57_spill]] %s5364_s5  ;;  %s5398_s21 = sld [smem:[#allocation4 + $0xe6]]  ;;  %v5497_v33 = vmul.f32 %v1031_v46, %v5060_v59  ;;  %v5519_v45 = vmul.f32 %v1031_v46, %v5064_v60 }
  0xb8   : > { %948 = vrot.lane.b32.xlu1 %v5115_v17, %s8812_s19  ;;  %946 = vrot.lane.b32.xlu0 %v5119_v18, %s8812_s19  ;;  %s5173_s19 = sld [smem:[#allocation4 + $0x6f]]  ;;  %9117 = sst [smem:[#allocation58_spill]] %s5372_s26  ;;  %v1085_v10 = vstv %s5374_s22 }
  0xb9   : > { %9118 = sst [smem:[#allocation59_spill]] %s5386_s8  ;;  %s5414_s15 = sld [smem:[#allocation4 + $0xf]]  ;;  %9137 = vst [vmem:[#allocation78_spill] sm:$0xff] %v5497_v33 }
  0xba   : > { %9092 = sst [smem:[#allocation35_spill]] %s5160_s12  ;;  %s5428_s18 = sld [smem:[#allocation4 + $0x10]] }
  0xbb   : > { %s5298_s12 = sld [smem:[#allocation4 + $0x76]]  ;;  %9119 = sst [smem:[#allocation60_spill]] %s5388_s7 }
  0xbc   : > { %952 = vrot.lane.b32.xlu1 %v5115_v17, %s9097_s25  ;;  %950 = vrot.lane.b32.xlu0 %v5119_v18, %s9097_s25  ;;  %9120 = sst [smem:[#allocation61_spill]] %s5396_s30  ;;  %s5430_s2 = sld [smem:[#allocation4 + $0x7c]] }
  0xbd   : > { %9121 = sst [smem:[#allocation62_spill]] %s5398_s21  ;;  %s5448_s29 = sld [smem:[#allocation4 + $0xe7]] }
  0xbe   : > { %9094 = sst [smem:[#allocation37_spill]] %s5173_s19  ;;  %s5350_s19 = sld [smem:[#allocation4 + $0xd]] }
  0xbf   : > { %9122 = sst [smem:[#allocation63_spill]] %s5414_s15  ;;  %s5450_s3 = sld [smem:[#allocation4 + $0xe8]] }
  0xc0   : > { %1144 = vrot.lane.b32.xlu1 %v5067_v61, %s9104_s28  ;;  %1142 = vrot.lane.b32.xlu0 %v5070_v62, %s9104_s28  ;;  %s5458_s4 = sld [smem:[#allocation4 + $0x11]]  ;;  %s5460_s24 = sld [smem:[#allocation4 + $0x7d]]  ;;  %v995_v9 = vstv %s5428_s18 }
  0xc1   : > { %v1013_v24 = vstv %s5298_s12  ;;  %s5416_s12 = sld [smem:[#allocation4 + $0x7b]]  ;;  %s5482_s11 = sld [smem:[#allocation4 + $0x12]] }
  0xc2   : > { %v5436_v35 = vmul.f32 %v5040_v53, %v1013_v24  ;;  %v1970_v53 = vrot.slane %v5446_v57, 1  ;;  %v5467_v32 = vmul.f32 %v5043_v54, %v1013_v24  ;;  %s5476_s6 = sld [smem:[#allocation4 + $0x13]]  ;;  %s5484_s0 = sld [smem:[#allocation4 + $0x7f]]  ;;  %v4064_v54 = vld [vmem:[%s4966_s14 + $0x30] ss:$0 sm:$0xff] }
  0xc3   : > { %9127 = sst [smem:[#allocation68_spill]] %s5448_s29  ;;  %s5492_s20 = sld [smem:[#allocation4 + $0x7e]] }
  0xc4   : > { %1148 = vrot.lane.b32.xlu1 %v5067_v61, %s9097_s25  ;;  %1146 = vrot.lane.b32.xlu0 %v5070_v62, %s9097_s25  ;;  %v977_v40 = vstv %s5350_s19  ;;  %9131 = vst [vmem:[#allocation72_spill] sm:$0xff] %v5467_v32  ;;  %s5474_s19 = sld [smem:[#allocation4 + $0xe9]]  ;;  %s5494_s23 = sld [smem:[#allocation4 + $0xeb]]  ;;  %v1973_v24 = vsel %vm699_vm0, %v1971_v49, %v1970_v53  ;;  %v1049_v32 = vstv %s5430_s2 }
  0xc5   : > { %v5489_v27 = vmul.f32 %v977_v40, %v5060_v59  ;;  %v5501_v57 = vmul.f32 %v977_v40, %v5064_v60  ;;  %s5506_s22 = sld [smem:[#allocation4 + $0xea]]  ;;  %s5508_s7 = sld [smem:[#allocation4 + $0x14]]  ;;  %v5515_v40 = vmul.f32 %v1085_v10, %v5060_v59  ;;  %v5538_v46 = vsel %vm686_vm1, %v1973_v24, %v4064_v54 }
  0xc6   : > { %9129 = sst [smem:[#allocation70_spill]] %s5458_s4  ;;  %s5524_s30 = sld [smem:[#allocation4 + $0x80]]  ;;  %v5542_v59 = vsel %vm699_vm0, %v1970_v53, %v1971_v49  ;;  %v5563_v49 = vmul.f32 %v995_v9, %v5115_v17  ;;  %v5566_v53 = vmul.f32 %v1049_v32, %v5115_v17  ;;  %v5581_v58 = vmul.f32 %v1049_v32, %v5119_v18 }
  0xc7   : > { %9123 = sst [smem:[#allocation64_spill]] %s5416_s12  ;;  %9135 = vst [vmem:[#allocation76_spill] sm:$0xff] %v5489_v27  ;;  %9138 = vst [vmem:[#allocation79_spill] sm:$0xff] %v5501_v57  ;;  %v5522_v57 = vmul.f32 %v1085_v10, %v5064_v60  ;;  %s5526_s8 = sld [smem:[#allocation4 + $0x16]]  ;;  %v1103_v10 = vstv %s5450_s3  ;;  %v5578_v60 = vmul.f32 %v995_v9, %v5119_v18  ;;  %v9155_v9 = vrot.slane %v5538_v46, 1 }
  0xc8   : > { %1152 = vrot.lane.b32.xlu1 %v5123_v19, %s9104_s28  ;;  %1150 = vrot.lane.b32.xlu0 %v5127_v20, %s9104_s28  ;;  %9130 = sst [smem:[#allocation71_spill]] %s5460_s24  ;;  %s5532_s26 = sld [smem:[#allocation4 + $0xec]]  ;;  %9145 = vst [vmem:[#allocation86_spill] sm:$0xff] %v5563_v49  ;;  %9146 = vst [vmem:[#allocation87_spill] sm:$0xff] %v5566_v53  ;;  %v1171_v33 = vstv %s5476_s6  ;;  %v5575_v27 = vmul.f32 %v1103_v10, %v5115_v17  ;;  %v1225_v24 = vstv %s5484_s0  ;;  %v9156_v32 = vrot.slane %v5542_v59, 1 }
  0xc9   : > { %9134 = sst [smem:[#allocation75_spill]] %s5482_s11  ;;  %9140 = vst [vmem:[#allocation81_spill] sm:$0xff] %v5522_v57  ;;  %s5534_s5 = sld [smem:[#allocation4 + $0x82]]  ;;  %9149 = vst [vmem:[#allocation90_spill] sm:$0xff] %v5578_v60  ;;  %v5589_v54 = vmul.f32 %v1103_v10, %v5119_v18  ;;  %v5599_v17 = vld [vmem:[%s4964_s17 + $0x70] sm:$0xff]  ;;  %v5610_v18 = vmul.f32 %v5067_v61, %v1171_v33  ;;  %v5614_v49 = vmul.f32 %v5070_v62, %v1171_v33  ;;  %v4094_v53 = vld [vmem:[%s4964_s17 + $0x78] sm:$0xff] }
  0xca   : > { %9133 = sst [smem:[#allocation74_spill]] %s5474_s19  ;;  %s5546_s15 = sld [smem:[#allocation4 + $0x15]]  ;;  %9150 = vst [vmem:[#allocation91_spill] sm:$0xff] %v5581_v58  ;;  %v1279_v57 = vstv %s5494_s23  ;;  %9154 = vst [vmem:[#allocation95_spill] sm:$0xff] %v5599_v17  ;;  %v5607_v58 = vsel %vm699_vm0, %v9156_v32, %v9155_v9  ;;  %v5626_v9 = vmul.f32 %v5067_v61, %v1225_v24  ;;  %v2182_v33 = vrot.slane %v5599_v17, 1 }
  0xcb   : > { %9136 = sst [smem:[#allocation77_spill]] %s5492_s20  ;;  %s5548_s18 = sld [smem:[#allocation4 + $0xee]]  ;;  %9152 = vst [vmem:[#allocation93_spill] sm:$0xff] %v5589_v54  ;;  %9157 = vst [vmem:[#allocation96_spill] sm:$0xff] %v5607_v58  ;;  %v2183_v32 = vrot.slane %v4094_v53, 1  ;;  %v5641_v58 = vmul.f32 %v5070_v62, %v1279_v57 }
  0xcc   : > { %1156 = vrot.lane.b32.xlu1 %v5123_v19, %s9097_s25  ;;  %1154 = vrot.lane.b32.xlu0 %v5127_v20, %s9097_s25  ;;  %9139 = sst [smem:[#allocation80_spill]] %s5506_s22  ;;  %s5554_s2 = sld [smem:[#allocation4 + $0x81]]  ;;  %9158 = vst [vmem:[#allocation97_spill] sm:$0xff] %v5610_v18  ;;  %9159 = vst [vmem:[#allocation98_spill] sm:$0xff] %v5614_v49  ;;  %v5635_v49 = vmul.f32 %v5067_v61, %v1279_v57  ;;  %v5638_v18 = vmul.f32 %v5070_v62, %v1225_v24 }
  0xcd   : > { %s5556_s12 = sld [smem:[#allocation4 + $0xed]]  ;;  %s5570_s3 = sld [smem:[#allocation4 + $0x17]]  ;;  %9161 = vst [vmem:[#allocation100_spill] sm:$0xff] %v5626_v9  ;;  %v1189_v10 = vstv %s5526_s8  ;;  %9166 = vst [vmem:[#allocation105_spill] sm:$0xff] %v5641_v58  ;;  %v5672_v62 = vsel %vm699_vm0, %v2182_v33, %v2183_v32  ;;  %v2185_v24 = vsel %vm699_vm0, %v2183_v32, %v2182_v33 }
  0xce   : > { %9141 = sst [smem:[#allocation82_spill]] %s5532_s26  ;;  %s5584_s4 = sld [smem:[#allocation4 + $0xef]]  ;;  %9164 = vst [vmem:[#allocation103_spill] sm:$0xff] %v5635_v49  ;;  %9165 = vst [vmem:[#allocation104_spill] sm:$0xff] %v5638_v18  ;;  %v5660_v57 = vmul.f32 %v1189_v10, %v5123_v19  ;;  %v5679_v17 = vmul.f32 %v1189_v10, %v5127_v20  ;;  %v5698_v10 = vld [vmem:[%s4964_s17 + $0x80] sm:$0xff] }
  0xcf   : > { %s5572_s24 = sld [smem:[#allocation4 + $0x83]]  ;;  %s5586_s19 = sld [smem:[#allocation4 + $0x19]]  ;;  %v1243_v9 = vstv %s5534_s5  ;;  %v2394_v18 = vrot.slane %v5698_v10, 1 }
  0xd0   : > { %1160 = vrot.lane.b32.xlu1 %v5210_v47, %s9104_s28  ;;  %1158 = vrot.lane.b32.xlu0 %v5214_v48, %s9104_s28  ;;  %9142 = sst [smem:[#allocation83_spill]] %s5546_s15  ;;  %s5594_s6 = sld [smem:[#allocation4 + $0x18]]  ;;  %9169 = vst [vmem:[#allocation108_spill] sm:$0xff] %v5660_v57  ;;  %v5676_v61 = vmul.f32 %v1243_v9, %v5123_v19  ;;  %9172 = vst [vmem:[#allocation111_spill] sm:$0xff] %v5679_v17  ;;  %v4097_v57 = vld [vmem:[%s4966_s14 + $0x38] ss:$0 sm:$0xff]  ;;  %v5703_v54 = vmul.f32 %v1243_v9, %v5127_v20 }
  0xd1   : > { %s5596_s29 = sld [smem:[#allocation4 + $0x85]]  ;;  %s5617_s0 = sld [smem:[#allocation4 + $0x84]]  ;;  %v1297_v60 = vstv %s5548_s18  ;;  %v4127_v17 = vld [vmem:[%s4964_s17 + $0x88] sm:$0xff] }
  0xd2   : > { %9143 = sst [smem:[#allocation84_spill]] %s5554_s2  ;;  %s5619_s23 = sld [smem:[#allocation4 + $0xf1]]  ;;  %9171 = vst [vmem:[#allocation110_spill] sm:$0xff] %v5676_v61  ;;  %v5687_v53 = vmul.f32 %v1297_v60, %v5123_v19  ;;  %9178 = vst [vmem:[#allocation117_spill] sm:$0xff] %v5703_v54  ;;  %v5706_v19 = vmul.f32 %v1297_v60, %v5127_v20  ;;  %v2395_v49 = vrot.slane %v4127_v17, 1  ;;  %v5726_v20 = vsel %vm686_vm1, %v2185_v24, %v4097_v57 }
  0xd3   : > { %9144 = sst [smem:[#allocation85_spill]] %s5556_s12  ;;  %s5630_s22 = sld [smem:[#allocation4 + $0xf0]] }
  0xd4   : > { %1164 = vrot.lane.b32.xlu1 %v5210_v47, %s9097_s25  ;;  %1162 = vrot.lane.b32.xlu0 %v5214_v48, %s9097_s25  ;;  %9147 = sst [smem:[#allocation88_spill]] %s5570_s3  ;;  %s5632_s20 = sld [smem:[#allocation4 + $0x1a]]  ;;  %9175 = vst [vmem:[#allocation114_spill] sm:$0xff] %v5687_v53  ;;  %9179 = vst [vmem:[#allocation118_spill] sm:$0xff] %v5706_v19  ;;  %v5767_v57 = vsel %vm699_vm0, %v2394_v18, %v2395_v49 }
  0xd5   : > { %9148 = sst [smem:[#allocation89_spill]] %s5572_s24  ;;  %s5644_s11 = sld [smem:[#allocation4 + $0x86]]  ;;  %v1207_v58 = vstv %s5586_s19  ;;  %9193 = vst [vmem:[#allocation132_spill] sm:$0xff] %v5767_v57 }
  0xd6   : > { %9151 = sst [smem:[#allocation92_spill]] %s5584_s4  ;;  %s5646_s21 = sld [smem:[#allocation4 + $0x1c]]  ;;  %v5731_v17 = vmul.f32 %v1207_v58, %v5210_v47  ;;  %v5742_v19 = vmul.f32 %v1207_v58, %v5214_v48  ;;  %v4130_v58 = vld [vmem:[%s4966_s14 + $0x40] ss:$0 sm:$0xff] }
  0xd7   : > { %9153 = sst [smem:[#allocation94_spill]] %s5594_s6  ;;  %s5654_s1 = sld [smem:[#allocation4 + $0x88]]  ;;  %v1261_v53 = vstv %s5596_s29 }
  0xd8   : > { %1356 = vrot.lane.b32.xlu1 %v5077_v3, %s9104_s28  ;;  %1354 = vrot.lane.b32.xlu0 %v5080_v4, %s9104_s28  ;;  %9160 = sst [smem:[#allocation99_spill]] %s5617_s0  ;;  %s5652_s8 = sld [smem:[#allocation4 + $0xf2]]  ;;  %v1315_v32 = vstv %s5619_s23  ;;  %9182 = vst [vmem:[#allocation121_spill] sm:$0xff] %v5731_v17  ;;  %v5739_v61 = vmul.f32 %v1261_v53, %v5210_v47  ;;  %9186 = vst [vmem:[#allocation125_spill] sm:$0xff] %v5742_v19  ;;  %v5754_v33 = vmul.f32 %v1261_v53, %v5214_v48  ;;  %v5779_v53 = vld [vmem:[%s4964_s17 + $0x90] sm:$0xff] }
  0xd9   : > { %9162 = sst [smem:[#allocation101_spill]] %s5630_s22  ;;  %s5662_s5 = sld [smem:[#allocation4 + $0x1b]]  ;;  %v5751_v9 = vmul.f32 %v1315_v32, %v5210_v47  ;;  %v5763_v19 = vmul.f32 %v1315_v32, %v5214_v48  ;;  %9194 = vst [vmem:[#allocation133_spill] sm:$0xff] %v5779_v53  ;;  %v2606_v54 = vrot.slane %v5779_v53, 1 }
  0xda   : > { %9163 = sst [smem:[#allocation102_spill]] %s5632_s20  ;;  %s5664_s10 = sld [smem:[#allocation4 + $0xf4]]  ;;  %9185 = vst [vmem:[#allocation124_spill] sm:$0xff] %v5739_v61  ;;  %9189 = vst [vmem:[#allocation128_spill] sm:$0xff] %v5754_v33 }
  0xdb   : > { %9167 = sst [smem:[#allocation106_spill]] %s5644_s11  ;;  %s5681_s18 = sld [smem:[#allocation4 + $0x87]]  ;;  %9188 = vst [vmem:[#allocation127_spill] sm:$0xff] %v5751_v9  ;;  %9192 = vst [vmem:[#allocation131_spill] sm:$0xff] %v5763_v19  ;;  %v2397_v19 = vsel %vm699_vm0, %v2395_v49, %v2394_v18  ;;  %v4160_v49 = vld [vmem:[%s4964_s17 + $0x98] sm:$0xff] }
  0xdc   : > { %1360 = vrot.lane.b32.xlu1 %v5077_v3, %s9097_s25  ;;  %1358 = vrot.lane.b32.xlu0 %v5080_v4, %s9097_s25  ;;  %s5683_s12 = sld [smem:[#allocation4 + $0xf3]]  ;;  %s5693_s3 = sld [smem:[#allocation4 + $0x1d]]  ;;  %v1383_v24 = vstv %s5646_s21  ;;  %v4065_v9 = vld [vmem:[%s4966_s14 + $0x31] ss:$0 sm:$0xff] }
  0xdd   : > { %s5695_s2 = sld [smem:[#allocation4 + $0x89]]  ;;  %s5709_s24 = sld [smem:[#allocation4 + $0xf5]]  ;;  %v1437_v60 = vstv %s5654_s1  ;;  %v5783_v32 = vmul.f32 %v5077_v3, %v1383_v24  ;;  %v5797_v48 = vmul.f32 %v5080_v4, %v1383_v24  ;;  %v9203_v24 = vrot.slane %v5542_v59, 1 }
  0xde   : > { %9168 = sst [smem:[#allocation107_spill]] %s5652_s8  ;;  %s5711_s19 = sld [smem:[#allocation4 + $0x1e]]  ;;  %v5793_v33 = vmul.f32 %v5077_v3, %v1437_v60 }
  0xdf   : > { %9170 = sst [smem:[#allocation109_spill]] %s5662_s5  ;;  %s5716_s4 = sld [smem:[#allocation4 + $0x1f]]  ;;  %9195 = vst [vmem:[#allocation134_spill] sm:$0xff] %v5783_v32  ;;  %9199 = vst [vmem:[#allocation138_spill] sm:$0xff] %v5797_v48  ;;  %v5800_v32 = vmul.f32 %v5080_v4, %v1437_v60  ;;  %v9204_v48 = vrot.slane %v5538_v46, 1 }
  0xe0   : > { %1364 = vrot.lane.b32.xlu1 %v5144_v25, %s9104_s28  ;;  %1362 = vrot.lane.b32.xlu0 %v5148_v26, %s9104_s28  ;;  %s5718_s15 = sld [smem:[#allocation4 + $0x8b]]  ;;  %s5733_s29 = sld [smem:[#allocation4 + $0x8a]]  ;;  %v1491_v47 = vstv %s5664_s10  ;;  %9198 = vst [vmem:[#allocation137_spill] sm:$0xff] %v5793_v33 }
  0xe1   : > { %9173 = sst [smem:[#allocation112_spill]] %s5681_s18  ;;  %s5735_s23 = sld [smem:[#allocation4 + $0xf6]]  ;;  %9200 = vst [vmem:[#allocation139_spill] sm:$0xff] %v5800_v32  ;;  %v5809_v18 = vmul.f32 %v5077_v3, %v1491_v47  ;;  %v1983_v60 = vsel %vm699_vm0, %v9204_v48, %v9203_v24  ;;  %v2607_v3 = vrot.slane %v4160_v49, 1  ;;  %v5832_v48 = vmul.f32 %v5080_v4, %v1491_v47 }
  0xe2   : > { %9174 = sst [smem:[#allocation113_spill]] %s5683_s12  ;;  %s5745_s6 = sld [smem:[#allocation4 + $0x20]]  ;;  %v5836_v24 = vsel %vm686_vm1, %v2397_v19, %v4130_v58  ;;  %v5848_v4 = vsel %vm686_vm1, %v1983_v60, %v4065_v9  ;;  %v4163_v60 = vld [vmem:[%s4966_s14 + $0x48] ss:$0 sm:$0xff]  ;;  %v5948_v9 = vld [vmem:[%s4964_s17 + $0xa0] sm:$0xff] }
  0xe3   : > { %9176 = sst [smem:[#allocation115_spill]] %s5693_s3  ;;  %s5747_s22 = sld [smem:[#allocation4 + $0xf7]]  ;;  %9202 = vst [vmem:[#allocation141_spill] sm:$0xff] %v5809_v18  ;;  %9206 = vst [vmem:[#allocation143_spill] sm:$0xff] %v5832_v48  ;;  %v2609_v18 = vsel %vm699_vm0, %v2607_v3, %v2606_v54 }
  0xe4   : > { %9177 = sst [smem:[#allocation116_spill]] %s5695_s2  ;;  %1368 = vrot.lane.b32.xlu1 %v5144_v25, %s9097_s25  ;;  %1366 = vrot.lane.b32.xlu0 %v5148_v26, %s9097_s25  ;;  %s5759_s0 = sld [smem:[#allocation4 + $0xf8]]  ;;  %9208 = vst [vmem:[#allocation145_spill] sm:$0xff] %v5848_v4 }
  0xe5   : > { %9180 = sst [smem:[#allocation119_spill]] %s5709_s24  ;;  %s5757_s20 = sld [smem:[#allocation4 + $0x8c]]  ;;  %v1401_v32 = vstv %s5716_s4 }
  0xe6   : > { %9181 = sst [smem:[#allocation120_spill]] %s5711_s19  ;;  %s5770_s21 = sld [smem:[#allocation4 + $0x22]]  ;;  %v1455_v17 = vstv %s5718_s15  ;;  %v5856_v19 = vmul.f32 %v1401_v32, %v5144_v25  ;;  %v5863_v61 = vmul.f32 %v1401_v32, %v5148_v26 }
  0xe7   : > { %9183 = sst [smem:[#allocation122_spill]] %s5733_s29  ;;  %s5772_s11 = sld [smem:[#allocation4 + $0x8e]]  ;;  %v5860_v49 = vmul.f32 %v1455_v17, %v5144_v25 }
  0xe8   : > { %9184 = sst [smem:[#allocation123_spill]] %s5735_s23  ;;  %1372 = vrot.lane.b32.xlu1 %v5234_v0, %s9104_s28  ;;  %1370 = vrot.lane.b32.xlu0 %v5238_v1, %s9104_s28  ;;  %s5788_s1 = sld [smem:[#allocation4 + $0x21]]  ;;  %9210 = vst [vmem:[#allocation147_spill] sm:$0xff] %v5856_v19  ;;  %9212 = vst [vmem:[#allocation149_spill] sm:$0xff] %v5863_v61  ;;  %v5888_v61 = vmul.f32 %v1455_v17, %v5148_v26 }
  0xe9   : > { %9187 = sst [smem:[#allocation126_spill]] %s5745_s6  ;;  %s5790_s10 = sld [smem:[#allocation4 + $0x8d]]  ;;  %v1509_v47 = vstv %s5747_s22  ;;  %9211 = vst [vmem:[#allocation148_spill] sm:$0xff] %v5860_v49 }
  0xea   : > { %9191 = sst [smem:[#allocation130_spill]] %s5759_s0  ;;  %s5803_s18 = sld [smem:[#allocation4 + $0xf9]]  ;;  %v5884_v32 = vmul.f32 %v1509_v47, %v5144_v25  ;;  %9217 = vst [vmem:[#allocation154_spill] sm:$0xff] %v5888_v61  ;;  %v5891_v49 = vmul.f32 %v1509_v47, %v5148_v26  ;;  %v5907_v25 = vsel %vm686_vm1, %v2609_v18, %v4163_v60  ;;  %v5911_v26 = vsel %vm699_vm0, %v2606_v54, %v2607_v3 }
  0xeb   : > { %9190 = sst [smem:[#allocation129_spill]] %s5757_s20  ;;  %s5823_s12 = sld [smem:[#allocation4 + $0x23]]  ;;  %9219 = vst [vmem:[#allocation156_spill] sm:$0xff] %v5907_v25  ;;  %9220 = vst [vmem:[#allocation157_spill] sm:$0xff] %v5911_v26  ;;  %v2192_v60 = vrot.slane %v5672_v62, 1  ;;  %v2193_v54 = vrot.slane %v5726_v20, 1 }
  0xec   : > { %s5805_s5 = sld [smem:[#allocation4 + $0xfa]]  ;;  %s5825_s3 = sld [smem:[#allocation4 + $0x25]]  ;;  %1376 = vrot.lane.b32.xlu1 %v5234_v0, %s9097_s25  ;;  %1374 = vrot.lane.b32.xlu0 %v5238_v1, %s9097_s25  ;;  %v1419_v58 = vstv %s5770_s21  ;;  %9216 = vst [vmem:[#allocation153_spill] sm:$0xff] %v5884_v32  ;;  %9218 = vst [vmem:[#allocation155_spill] sm:$0xff] %v5891_v49 }
  0xed   : > { %s5840_s4 = sld [smem:[#allocation4 + $0x8f]]  ;;  %s5842_s15 = sld [smem:[#allocation4 + $0x91]]  ;;  %v1473_v33 = vstv %s5772_s11  ;;  %v5914_v17 = vmul.f32 %v1419_v58, %v5234_v0  ;;  %v5940_v4 = vmul.f32 %v1419_v58, %v5238_v1 }
  0xee   : > { %9196 = sst [smem:[#allocation135_spill]] %s5788_s1  ;;  %s5851_s2 = sld [smem:[#allocation4 + $0xfb]]  ;;  %v5917_v47 = vmul.f32 %v1473_v33, %v5234_v0  ;;  %v5955_v3 = vmul.f32 %v1473_v33, %v5238_v1  ;;  %v2195_v33 = vsel %vm699_vm0, %v2193_v54, %v2192_v60 }
  0xef   : > { %9197 = sst [smem:[#allocation136_spill]] %s5790_s10  ;;  %s5865_s23 = sld [smem:[#allocation4 + $0x24]]  ;;  %9221 = vst [vmem:[#allocation158_spill] sm:$0xff] %v5914_v17  ;;  %9224 = vst [vmem:[#allocation161_spill] sm:$0xff] %v5940_v4  ;;  %v4098_v17 = vld [vmem:[%s4966_s14 + $0x39] ss:$0 sm:$0xff] }
  0xf0   : > { %9201 = sst [smem:[#allocation140_spill]] %s5803_s18  ;;  %s5853_s8 = sld [smem:[#allocation4 + $0xfd]]  ;;  %1568 = vrot.lane.b32.xlu1 %v5089_v7, %s9104_s28  ;;  %1566 = vrot.lane.b32.xlu0 %v5092_v8, %s9104_s28  ;;  %9222 = vst [vmem:[#allocation159_spill] sm:$0xff] %v5917_v47  ;;  %v5951_v47 = vld [vmem:[%s4964_s17 + $0xa8] sm:$0xff]  ;;  %9226 = vst [vmem:[#allocation163_spill] sm:$0xff] %v5955_v3 }
  0xf1   : > { %9205 = sst [smem:[#allocation142_spill]] %s5823_s12  ;;  %s5867_s29 = sld [smem:[#allocation4 + $0x90]] }
  0xf2   : > { %s5875_s22 = sld [smem:[#allocation4 + $0xfc]]  ;;  %s5877_s6 = sld [smem:[#allocation4 + $0x26]]  ;;  %v1527_v53 = vstv %s5805_s5  ;;  %v1595_v18 = vstv %s5825_s3 }
  0xf3   : > { %9207 = sst [smem:[#allocation144_spill]] %s5840_s4  ;;  %s5893_s11 = sld [smem:[#allocation4 + $0x92]]  ;;  %v5937_v48 = vmul.f32 %v1527_v53, %v5234_v0  ;;  %v1649_v19 = vstv %s5842_s15  ;;  %v5958_v0 = vmul.f32 %v1527_v53, %v5238_v1  ;;  %v5967_v4 = vmul.f32 %v5089_v7, %v1595_v18 }
  0xf4   : > { %9209 = sst [smem:[#allocation146_spill]] %s5851_s2  ;;  %s5895_s21 = sld [smem:[#allocation4 + $0xfe]]  ;;  %1572 = vrot.lane.b32.xlu1 %v5089_v7, %s9097_s25  ;;  %1570 = vrot.lane.b32.xlu0 %v5092_v8, %s9097_s25  ;;  %v5971_v25 = vmul.f32 %v5092_v8, %v1595_v18  ;;  %v5979_v1 = vmul.f32 %v5089_v7, %v1649_v19  ;;  %v2818_v53 = vrot.slane %v5948_v9, 1  ;;  %v2819_v18 = vrot.slane %v5951_v47, 1 }
  0xf5   : > { %9213 = sst [smem:[#allocation150_spill]] %s5865_s23  ;;  %s5901_s20 = sld [smem:[#allocation4 + $0x28]]  ;;  %9223 = vst [vmem:[#allocation160_spill] sm:$0xff] %v5937_v48  ;;  %9227 = vst [vmem:[#allocation164_spill] sm:$0xff] %v5958_v0 }
  0xf6   : > { %s5903_s0 = sld [smem:[#allocation4 + $0x94]]  ;;  %s5919_s5 = sld [smem:[#allocation4 + $0x27]]  ;;  %v1703_v48 = vstv %s5853_s8  ;;  %9228 = vst [vmem:[#allocation165_spill] sm:$0xff] %v5967_v4  ;;  %9229 = vst [vmem:[#allocation166_spill] sm:$0xff] %v5971_v25  ;;  %v5998_v25 = vmul.f32 %v5092_v8, %v1649_v19 }
  0xf7   : > { %9214 = sst [smem:[#allocation151_spill]] %s5867_s29  ;;  %s5921_s18 = sld [smem:[#allocation4 + $0x100]]  ;;  %9231 = vst [vmem:[#allocation168_spill] sm:$0xff] %v5979_v1  ;;  %v5995_v58 = vmul.f32 %v5089_v7, %v1703_v48  ;;  %v6001_v1 = vmul.f32 %v5092_v8, %v1703_v48  ;;  %v6018_v8 = vsel %vm686_vm1, %v2195_v33, %v4098_v17  ;;  %v6022_v48 = vsel %vm699_vm0, %v2192_v60, %v2193_v54 }
  0xf8   : > { %9215 = sst [smem:[#allocation152_spill]] %s5875_s22  ;;  %s5927_s10 = sld [smem:[#allocation4 + $0x93]]  ;;  %1576 = vrot.lane.b32.xlu1 %v5167_v30, %s9104_s28  ;;  %1574 = vrot.lane.b32.xlu0 %v5171_v31, %s9104_s28  ;;  %9233 = vst [vmem:[#allocation170_spill] sm:$0xff] %v5998_v25  ;;  %9235 = vst [vmem:[#allocation172_spill] sm:$0xff] %v6018_v8  ;;  %v4196_v25 = vld [vmem:[%s4966_s14 + $0x50] ss:$0 sm:$0xff] }
  0xf9   : > { %s5929_s1 = sld [smem:[#allocation4 + $0xff]]  ;;  %s5943_s3 = sld [smem:[#allocation4 + $0x29]]  ;;  %9232 = vst [vmem:[#allocation169_spill] sm:$0xff] %v5995_v58  ;;  %9234 = vst [vmem:[#allocation171_spill] sm:$0xff] %v6001_v1  ;;  %v2821_v58 = vsel %vm699_vm0, %v2819_v18, %v2818_v53 }
  0xfa   : > { %s5945_s12 = sld [smem:[#allocation4 + $0x95]]  ;;  %s5961_s4 = sld [smem:[#allocation4 + $0x101]]  ;;  %9236 = vst [vmem:[#allocation173_spill] sm:$0xff] %v6022_v48  ;;  %v9263_v48 = vstv %s5111_s16 }
  0xfb   : > { %s5963_s19 = sld [smem:[#allocation4 + $0x2a]]  ;;  %s5974_s15 = sld [smem:[#allocation4 + $0x96]]  ;;  %v1613_v26 = vstv %s5901_s20 }
  0xfc   : > { %s5976_s2 = sld [smem:[#allocation4 + $0x102]]  ;;  %s5985_s8 = sld [smem:[#allocation4 + $0x2b]]  ;;  %v1667_v3 = vstv %s5903_s0  ;;  %1580 = vrot.lane.b32.xlu1 %v5167_v30, %s9097_s25  ;;  %1578 = vrot.lane.b32.xlu0 %v5171_v31, %s9097_s25  ;;  %v6036_v17 = vmul.f32 %v1613_v26, %v5167_v30  ;;  %v6043_v33 = vmul.f32 %v1613_v26, %v5171_v31  ;;  %v6063_v26 = vsel %vm686_vm1, %v2821_v58, %v4196_v25 }
  0xfd   : > { %s5987_s29 = sld [smem:[#allocation4 + $0x2c]]  ;;  %s6003_s23 = sld [smem:[#allocation4 + $0x97]]  ;;  %v1721_v19 = vstv %s5921_s18  ;;  %v6040_v54 = vmul.f32 %v1667_v3, %v5167_v30  ;;  %v6050_v0 = vmul.f32 %v1667_v3, %v5171_v31  ;;  %9243 = vst [vmem:[#allocation180_spill] sm:$0xff] %v6063_v26 }
  0xfe   : > { %s6005_s24 = sld [smem:[#allocation4 + $0x98]]  ;;  %s6011_s22 = sld [smem:[#allocation4 + $0x103]]  ;;  %9237 = vst [vmem:[#allocation174_spill] sm:$0xff] %v6036_v17  ;;  %9239 = vst [vmem:[#allocation176_spill] sm:$0xff] %v6043_v33  ;;  %v6047_v4 = vmul.f32 %v1721_v19, %v5167_v30 }
  0xff   : > { %s6013_s26 = sld [smem:[#allocation4 + $0x104]]  ;;  %9238 = vst [vmem:[#allocation175_spill] sm:$0xff] %v6040_v54  ;;  %9241 = vst [vmem:[#allocation178_spill] sm:$0xff] %v6050_v0  ;;  %s6053_s20 = sld [smem:[#allocation4 + $0x2d]]  ;;  %v6059_v54 = vmul.f32 %v1721_v19, %v5171_v31  ;;  %v6082_v31 = vsel %vm699_vm0, %v2818_v53, %v2819_v18 }
 0x100   : > { %9225 = sst [smem:[#allocation162_spill]] %s5945_s12  ;;  %9240 = vst [vmem:[#allocation177_spill] sm:$0xff] %v6047_v4  ;;  %s6055_s0 = sld [smem:[#allocation4 + $0x2e]]  ;;  %1584 = vrot.lane.b32.xlu1 %v5264_v12, %s9104_s28  ;;  %1582 = vrot.lane.b32.xlu0 %v5252_v6, %s9104_s28  ;;  %9246 = vst [vmem:[#allocation183_spill] sm:$0xff] %v6082_v31 }
 0x101   : > { %9242 = vst [vmem:[#allocation179_spill] sm:$0xff] %v6059_v54  ;;  %s6066_s18 = sld [smem:[#allocation4 + $0x99]]  ;;  %s6068_s12 = sld [smem:[#allocation4 + $0x9a]]  ;;  %v9258_v54 = vstv %s5150_s9 }
 0x102   : > { %9230 = sst [smem:[#allocation167_spill]] %s5976_s2  ;;  %v1631_v7 = vstv %s5985_s8  ;;  %s6074_s8 = sld [smem:[#allocation4 + $0x105]]  ;;  %v723_v18 = vpop.permute.xlu1 %722  ;;  %v719_v58 = vpop.permute.xlu0 %718 }
 0x103   : > { %v1685_v30 = vstv %s6003_s23  ;;  %v6085_v25 = vmul.f32 %v1631_v7, %v5264_v12  ;;  %s9248_s23 = sld [smem:[#allocation34_spill]]  ;;  %s9249_s2 = sld [smem:[#allocation35_spill]]  ;;  %v6096_v3 = vmul.f32 %v1631_v7, %v5252_v6  ;;  %v744_v26 = vmul.f32 %v9258_v54, %v719_v58 }
 0x104   : > { %v1739_v33 = vstv %s6011_s22  ;;  %s6089_s22 = sld [smem:[#allocation4 + $0x106]]  ;;  %v6092_v0 = vmul.f32 %v1685_v30, %v5264_v12  ;;  %v6099_v53 = vmul.f32 %v1685_v30, %v5252_v6  ;;  %1588 = vrot.lane.b32.xlu1 %v5264_v12, %s9097_s25  ;;  %1586 = vrot.lane.b32.xlu0 %v5252_v6, %s9097_s25 }
 0x105   : > { %9247 = vst [vmem:[#allocation184_spill] sm:$0xff] %v6085_v25  ;;  %9251 = vst [vmem:[#allocation186_spill] sm:$0xff] %v6096_v3  ;;  %v6102_v19 = vmul.f32 %v1739_v33, %v5264_v12  ;;  %v6105_v60 = vmul.f32 %v1739_v33, %v5252_v6  ;;  %v9255_v3 = vstv %s5109_s13  ;;  %v9256_v25 = vstv %s5111_s16  ;;  %s9278_s13 = sld [smem:[#allocation39_spill]]  ;;  %s9279_s16 = sld [smem:[#allocation40_spill]] }
 0x106   : > { %9250 = vst [vmem:[#allocation185_spill] sm:$0xff] %v6092_v0  ;;  %9252 = vst [vmem:[#allocation187_spill] sm:$0xff] %v6099_v53  ;;  %v754_v0 = vmul.f32 %v9255_v3, %v723_v18  ;;  %v808_v30 = vmul.f32 %v9256_v25, %v723_v18  ;;  %v9257_v53 = vstv %s5130_s27  ;;  %v1807_v25 = vstv %s6055_s0  ;;  %v721_v7 = vpop.permute.xlu0 %720  ;;  %s9269_s0 = sld [smem:[#allocation37_spill]]  ;;  %s9281_s27 = sld [smem:[#allocation41_spill]] }
 0x107   : > { %9244 = sst [smem:[#allocation181_spill]] %s6066_s18  ;;  %9253 = vst [vmem:[#allocation188_spill] sm:$0xff] %v6102_v19  ;;  %9254 = vst [vmem:[#allocation189_spill] sm:$0xff] %v6105_v60  ;;  %v862_v31 = vmul.f32 %v9257_v53, %v723_v18  ;;  %v750_v54 = vadd.f32 %v5267_v13, %v744_v26  ;;  %v725_v18 = vpop.permute.xlu1 %724  ;;  %v9262_v1 = vmov %v9255_v3  ;;  %v9264_v26 = vmov %v9257_v53  ;;  %s6298_s18 = sld [smem:[#allocation4 + $0x9b]] }
 0x108   : > { %9245 = sst [smem:[#allocation182_spill]] %s6074_s8  ;;  %v755_v60 = vmul.f32 %v9262_v1, %v725_v18  ;;  %v809_v13 = vmul.f32 %v9263_v48, %v725_v18  ;;  %v863_v8 = vmul.f32 %v9264_v26, %v725_v18  ;;  %1780 = vrot.lane.b32.xlu1 %v5187_v38, %s9104_s28  ;;  %s9270_s8 = sld [smem:[#allocation38_spill]]  ;;  %1778 = vrot.lane.b32.xlu0 %v5190_v39, %s9104_s28 }
 0x109   : > { %v9259_v4 = vstv %s9248_s23  ;;  %v9260_v17 = vstv %s9249_s2  ;;  %v9266_v49 = vstv %s9248_s23  ;;  %v9267_v32 = vstv %s9249_s2  ;;  %s9288_s2 = sld [smem:[#allocation43_spill]]  ;;  %s9298_s23 = sld [smem:[#allocation48_spill]] }
 0x10a   : > { %v798_v19 = vmul.f32 %v9259_v4, %v719_v58  ;;  %v852_v33 = vmul.f32 %v9260_v17, %v719_v58  ;;  %v6129_v4 = vmul.f32 %v5187_v38, %v1807_v25  ;;  %v1861_v17 = vstv %s6068_s12  ;;  %s9268_s12 = sld [smem:[#allocation36_spill]] }
 0x10b   : > { %v6136_v6 = vmul.f32 %v5187_v38, %v1861_v17  ;;  %v799_v61 = vmul.f32 %v9266_v49, %v721_v7  ;;  %v1915_v1 = vstv %s6089_s22  ;;  %v729_v18 = vpop.permute.xlu1 %728  ;;  %s9299_s22 = sld [smem:[#allocation49_spill]] }
 0x10c   : > { %9261 = vst [vmem:[#allocation190_spill] sm:$0xff] %v6129_v4  ;;  %v804_v58 = vadd.f32 %v5270_v14, %v798_v19  ;;  %v858_v12 = vadd.f32 %v5273_v15, %v852_v33  ;;  %v9265_v4 = vstv %s5150_s9  ;;  %v853_v14 = vmul.f32 %v9267_v32, %v721_v7  ;;  %s9287_s9 = sld [smem:[#allocation42_spill]] }
 0x10d   : > { %v745_v53 = vmul.f32 %v9265_v4, %v721_v7  ;;  %v756_v15 = vadd.f32 %v754_v0, %v750_v54  ;;  %v6158_v49 = vmul.f32 %v5187_v38, %v1915_v1  ;;  %v805_v32 = vadd.f32 %v5284_v22, %v799_v61  ;;  %v727_v4 = vpop.permute.xlu0 %726 }
 0x10e   : > { %v810_v19 = vadd.f32 %v808_v30, %v804_v58  ;;  %v864_v33 = vadd.f32 %v862_v31, %v858_v12  ;;  %v859_v7 = vadd.f32 %v5293_v36, %v853_v14  ;;  %v6163_v0 = vmul.f32 %v5190_v39, %v1807_v25 }
 0x10f   : > { %v751_v48 = vadd.f32 %v5281_v21, %v745_v53  ;;  %9271 = vst [vmem:[#allocation191_spill] sm:$0xff] %v6158_v49  ;;  %v6166_v21 = vmul.f32 %v5190_v39, %v1861_v17  ;;  %v9274_v54 = vstv %s9269_s0  ;;  %v9275_v38 = vstv %s9270_s8  ;;  %v4522_v49 = vld [vmem:[%s4964_s17 + $0x58] sm:$0xff]  ;;  %s9290_s8 = sld [smem:[#allocation44_spill]]  ;;  %s9309_s0 = sld [smem:[#allocation45_spill]] }
 0x110   : > { %v9273_v30 = vstv %s9268_s12  ;;  %v814_v53 = vmul.f32 %v9274_v54, %v727_v4  ;;  %v868_v58 = vmul.f32 %v9275_v38, %v727_v4  ;;  %v811_v22 = vadd.f32 %v809_v13, %v805_v32  ;;  %1784 = vrot.lane.b32.xlu1 %v4522_v49, %s9097_s25  ;;  %s9301_s12 = sld [smem:[#allocation50_spill]] }
 0x111   : > { %9272 = vst [vmem:[#allocation192_spill] sm:$0xff] %v6166_v21  ;;  %v760_v31 = vmul.f32 %v9273_v30, %v727_v4  ;;  %v757_v12 = vadd.f32 %v755_v60, %v751_v48  ;;  %v865_v61 = vadd.f32 %v863_v8, %v859_v7  ;;  %v9276_v36 = vmov %v9273_v30  ;;  %v4523_v21 = vld [vmem:[%s4964_s17 + $0x50] sm:$0xff]  ;;  %v731_v13 = vpop.permute.xlu0 %730  ;;  %v733_v48 = vpop.permute.xlu1 %732 }
 0x112   : > { %v761_v26 = vmul.f32 %v9276_v36, %v729_v18  ;;  %v9277_v14 = vmov %v9274_v54  ;;  %v816_v39 = vadd.f32 %v814_v53, %v810_v19  ;;  %v870_v17 = vadd.f32 %v868_v58, %v864_v33  ;;  %1782 = vrot.lane.b32.xlu0 %v4523_v21, %s9097_s25 }
 0x113   : > { %v815_v3 = vmul.f32 %v9277_v14, %v729_v18  ;;  %v762_v25 = vadd.f32 %v760_v31, %v756_v15  ;;  %v9280_v30 = vmov %v9275_v38  ;;  %v6184_v32 = vmul.f32 %v4523_v21, %v1915_v1 }
 0x114   : > { %v869_v54 = vmul.f32 %v9280_v30, %v729_v18  ;;  %v763_v60 = vadd.f32 %v761_v26, %v757_v12  ;;  %v9282_v49 = vrot.slane %v5767_v57, 1  ;;  %v9283_v15 = vrot.slane %v5836_v24, 1  ;;  %1788 = vrot.lane.b32.xlu1 %v5310_v34, %s9104_s28  ;;  %v4131_v30 = vld [vmem:[%s4966_s14 + $0x41] ss:$0 sm:$0xff] }
 0x115   : > { %v817_v8 = vadd.f32 %v815_v3, %v811_v22  ;;  %v768_v7 = vadd.f32 %v5323_v55, %v762_v25  ;;  %v9284_v4 = vstv %s9278_s13  ;;  %v822_v3 = vadd.f32 %v5326_v56, %v816_v39  ;;  %v737_v39 = vpop.permute.xlu1 %736  ;;  %s9310_s13 = sld [smem:[#allocation51_spill]] }
 0x116   : > { %v2407_v19 = vsel %vm699_vm0, %v9283_v15, %v9282_v49  ;;  %v871_v33 = vadd.f32 %v869_v54, %v865_v61  ;;  %v772_v18 = vmul.f32 %v9284_v4, %v731_v13  ;;  %v9285_v31 = vstv %s9279_s16  ;;  %1786 = vrot.lane.b32.xlu0 %v5314_v37, %s9104_s28  ;;  %s9312_s16 = sld [smem:[#allocation46_spill]] }
 0x117   : > { %v826_v53 = vmul.f32 %v9285_v31, %v731_v13  ;;  %v876_v1 = vadd.f32 %v5333_v43, %v870_v17  ;;  %v9286_v21 = vstv %s9281_s27  ;;  %v769_v58 = vadd.f32 %v5336_v44, %v763_v60  ;;  %v735_v17 = vpop.permute.xlu0 %734  ;;  %s9313_s27 = sld [smem:[#allocation47_spill]] }
 0x118   : > { %v880_v38 = vmul.f32 %v9286_v21, %v731_v13  ;;  %v774_v55 = vadd.f32 %v772_v18, %v768_v7  ;;  %v9289_v12 = vmov %v9284_v4  ;;  %v823_v56 = vadd.f32 %v5357_v23, %v817_v8  ;;  %1792 = vrot.lane.b32.xlu1 %v5310_v34, %s9097_s25 }
 0x119   : > { %v773_v22 = vmul.f32 %v9289_v12, %v733_v48  ;;  %v9291_v61 = vmov %v9285_v31  ;;  %v828_v43 = vadd.f32 %v826_v53, %v822_v3  ;;  %v877_v26 = vadd.f32 %v5360_v11, %v871_v33 }
 0x11a   : > { %v827_v36 = vmul.f32 %v9291_v61, %v733_v48  ;;  %v882_v44 = vadd.f32 %v880_v38, %v876_v1  ;;  %v9292_v14 = vmov %v9286_v21  ;;  %v9293_v23 = vstv %s9287_s9  ;;  %1790 = vrot.lane.b32.xlu0 %v5314_v37, %s9097_s25  ;;  %s9315_s9 = sld [smem:[#allocation52_spill]] }
 0x11b   : > { %v881_v25 = vmul.f32 %v9292_v14, %v733_v48  ;;  %v775_v54 = vadd.f32 %v773_v22, %v769_v58  ;;  %v779_v8 = vmul.f32 %v9293_v23, %v737_v39  ;;  %v9294_v13 = vstv %s9288_s2  ;;  %v741_v22 = vpop.permute.xlu1 %740  ;;  %s9317_s2 = sld [smem:[#allocation53_spill]] }
 0x11c   : > { %v829_v60 = vadd.f32 %v827_v36, %v823_v56  ;;  %v833_v49 = vmul.f32 %v9294_v13, %v737_v39  ;;  %v9295_v7 = vstv %s9290_s8  ;;  %v9296_v18 = vmov %v9293_v23  ;;  %v739_v56 = vpop.permute.xlu0 %738  ;;  %1796 = vrot.lane.b32.xlu1 %v5420_v50, %s9104_s28  ;;  %s6265_s8 = sld [smem:[#allocation4 + $0x2f]] }
 0x11d   : > { %v883_v15 = vadd.f32 %v881_v25, %v877_v26  ;;  %v887_v4 = vmul.f32 %v9295_v7, %v737_v39  ;;  %v778_v3 = vmul.f32 %v9296_v18, %v735_v17  ;;  %v9297_v31 = vmov %v9294_v13 }
 0x11e   : > { %v832_v11 = vmul.f32 %v9297_v31, %v735_v17  ;;  %v781_v48 = vadd.f32 %v779_v8, %v775_v54  ;;  %v835_v33 = vadd.f32 %v833_v49, %v829_v60  ;;  %v9300_v53 = vmov %v9295_v7  ;;  %1794 = vrot.lane.b32.xlu0 %v5424_v16, %s9104_s28 }
 0x11f   : > { %v886_v1 = vmul.f32 %v9300_v53, %v735_v17  ;;  %v6233_v21 = vsel %vm686_vm1, %v2407_v19, %v4131_v30  ;;  %v889_v38 = vadd.f32 %v887_v4, %v883_v15  ;;  %v780_v58 = vadd.f32 %v778_v3, %v774_v55  ;;  %v933_v18 = vpop.permute.xlu1 %932 }
 0x120   : > { %9302 = vst [vmem:[#allocation193_spill] sm:$0xff] %v6233_v21  ;;  %v834_v12 = vadd.f32 %v832_v11, %v828_v43  ;;  %v9303_v61 = vrot.slane %v5836_v24, 1  ;;  %v9304_v36 = vrot.slane %v5767_v57, 1  ;;  %v787_v25 = vadd.f32 %v5378_v29, %v781_v48  ;;  %v931_v3 = vpop.permute.xlu0 %930  ;;  %1800 = vrot.lane.b32.xlu1 %v5420_v50, %s9097_s25 }
 0x121   : > { %v888_v14 = vadd.f32 %v886_v1, %v882_v44  ;;  %v9306_v19 = vstv %s9298_s23  ;;  %v841_v55 = vadd.f32 %v5381_v63, %v835_v33  ;;  %v9307_v43 = vstv %s9299_s22  ;;  %s9324_s23 = sld [smem:[#allocation54_spill]]  ;;  %s9326_s22 = sld [smem:[#allocation55_spill]] }
 0x122   : > { %v6241_v26 = vsel %vm699_vm0, %v9304_v36, %v9303_v61  ;;  %v791_v39 = vmul.f32 %v9306_v19, %v741_v22  ;;  %v845_v17 = vmul.f32 %v9307_v43, %v741_v22  ;;  %v895_v30 = vadd.f32 %v5391_v28, %v889_v38  ;;  %1798 = vrot.lane.b32.xlu0 %v5424_v16, %s9097_s25 }
 0x123   : > { %9305 = vst [vmem:[#allocation194_spill] sm:$0xff] %v6241_v26  ;;  %v9308_v54 = vstv %s9301_s12  ;;  %v786_v23 = vadd.f32 %v5406_v51, %v780_v58  ;;  %v9311_v29 = vmov %v9306_v19  ;;  %v840_v63 = vadd.f32 %v5409_v5, %v834_v12  ;;  %s9328_s12 = sld [smem:[#allocation56_spill]] }
 0x124   : > { %v899_v60 = vmul.f32 %v9308_v54, %v741_v22  ;;  %v793_v44 = vadd.f32 %v791_v39, %v787_v25  ;;  %v790_v8 = vmul.f32 %v9311_v29, %v739_v56  ;;  %v9314_v13 = vmov %v9307_v43  ;;  %v935_v29 = vpop.permute.xlu0 %934 }
 0x125   : > { %v844_v49 = vmul.f32 %v9314_v13, %v739_v56  ;;  %v847_v28 = vadd.f32 %v845_v17, %v841_v55  ;;  %v894_v15 = vadd.f32 %v5412_v2, %v888_v14  ;;  %v9316_v7 = vmov %v9308_v54 }
 0x126   : > { %v901_v51 = vadd.f32 %v899_v60, %v895_v30  ;;  %v898_v4 = vmul.f32 %v9316_v7, %v739_v56  ;;  %v9318_v5 = vstv %s9309_s0  ;;  %v792_v11 = vadd.f32 %v790_v8, %v786_v23  ;;  %s6309_s0 = sld [smem:[#allocation4 + $0x107]]  ;;  %v9333_v8 = vld [vmem:[#allocation65_spill] sm:$0xff] }
 0x127   : > { %v6269_v31 = vadd.f32 %v793_v44, %v9318_v5  ;;  %v846_v48 = vadd.f32 %v844_v49, %v840_v63  ;;  %v9319_v33 = vstv %s9310_s13  ;;  %v9320_v1 = vstv %s9312_s16  ;;  %s9341_s13 = sld [smem:[#allocation57_spill]]  ;;  %s9343_s16 = sld [smem:[#allocation58_spill]] }
 0x128   : > { %v957_v53 = vmul.f32 %v9319_v33, %v933_v18  ;;  %v6275_v38 = vadd.f32 %v847_v28, %v9320_v1  ;;  %v9321_v2 = vstv %s9313_s27  ;;  %v900_v12 = vadd.f32 %v898_v4, %v894_v15  ;;  %v9337_v4 = vld [vmem:[#allocation69_spill] sm:$0xff]  ;;  %s9345_s27 = sld [smem:[#allocation59_spill]] }
 0x129   : > { %v6279_v58 = vadd.f32 %v901_v51, %v9321_v2  ;;  %v9322_v22 = vstv %s9315_s9  ;;  %v9323_v61 = vmov %v9318_v5  ;;  %v9325_v14 = vmov %v9320_v1  ;;  %v9342_v1 = vld [vmem:[#allocation66_spill] sm:$0xff]  ;;  %s6334_s9 = sld [smem:[#allocation4 + $0x30]] }
 0x12a   : > { %v1011_v56 = vmul.f32 %v9322_v22, %v933_v18  ;;  %v6287_v36 = vadd.f32 %v792_v11, %v9323_v61  ;;  %v6291_v25 = vadd.f32 %v846_v48, %v9325_v14  ;;  %v963_v19 = vadd.f32 %v5433_v52, %v957_v53  ;;  %v937_v52 = vpop.permute.xlu1 %936  ;;  %1992 = vrot.lane.b32.xlu1 %v9342_v1, %s9104_s28  ;;  %v9347_v14 = vld [vmem:[#allocation67_spill] sm:$0xff] }
 0x12b   : > { %v9327_v39 = vstv %s9317_s2  ;;  %v9329_v43 = vmov %v9321_v2  ;;  %v9330_v54 = vmov %v9319_v33  ;;  %v9331_v23 = vmov %v9322_v22  ;;  %v9344_v2 = vld [vmem:[#allocation73_spill] sm:$0xff]  ;;  %1990 = vrot.lane.b32.xlu0 %v9347_v14, %s9104_s28  ;;  %s9355_s2 = sld [smem:[#allocation60_spill]]  ;;  %v4533_v14 = vld [vmem:[%s4964_s17 + $0xa0] sm:$0xff] }
 0x12c   : > { %v1065_v55 = vmul.f32 %v9327_v39, %v933_v18  ;;  %v6302_v17 = vadd.f32 %v900_v12, %v9329_v43  ;;  %v1017_v30 = vadd.f32 %v5436_v35, %v1011_v56  ;;  %v956_v60 = vmul.f32 %v9330_v54, %v931_v3  ;;  %9332 = sst [smem:[#allocation34_spill]] %s6309_s0  ;;  %v9338_v18 = vld [vmem:[#allocation72_spill] sm:$0xff]  ;;  %s9368_s0 = sld [smem:[#allocation68_spill]] }
 0x12d   : > { %v1010_v44 = vmul.f32 %v9331_v23, %v931_v3  ;;  %v9334_v13 = vmov %v9327_v39  ;;  %v9335_v28 = vstv %s9324_s23  ;;  %v9336_v15 = vstv %s9326_s22  ;;  %v939_v23 = vpop.permute.xlu0 %938  ;;  %s9356_s23 = sld [smem:[#allocation61_spill]]  ;;  %s9357_s22 = sld [smem:[#allocation62_spill]] }
 0x12e   : > { %v1071_v63 = vadd.f32 %v9333_v8, %v1065_v55  ;;  %v1064_v49 = vmul.f32 %v9334_v13, %v931_v3  ;;  %v967_v51 = vmul.f32 %v9335_v28, %v937_v52  ;;  %v1021_v7 = vmul.f32 %v9336_v15, %v937_v52 }
 0x12f   : > { %v962_v35 = vadd.f32 %v9337_v4, %v956_v60  ;;  %v1016_v5 = vadd.f32 %v9338_v18, %v1010_v44  ;;  %v9339_v11 = vstv %s9328_s12  ;;  %v9340_v33 = vmov %v9335_v28  ;;  %v941_v60 = vpop.permute.xlu1 %940  ;;  %v4524_v18 = vld [vmem:[%s4964_s17 + $0x68] sm:$0xff]  ;;  %s6353_s12 = sld [smem:[#allocation4 + $0x9c]] }
 0x130   : > { %v1075_v48 = vmul.f32 %v9339_v11, %v937_v52  ;;  %v966_v53 = vmul.f32 %v9340_v33, %v935_v29  ;;  %v1070_v3 = vadd.f32 %v9344_v2, %v1064_v49  ;;  %v969_v12 = vadd.f32 %v967_v51, %v963_v19  ;;  %1996 = vrot.lane.b32.xlu1 %v4524_v18, %s9097_s25  ;;  %v4525_v33 = vld [vmem:[%s4964_s17 + $0x60] sm:$0xff] }
 0x131   : > { %v1023_v22 = vadd.f32 %v1021_v7, %v1017_v30  ;;  %v9346_v56 = vmov %v9336_v15  ;;  %v9348_v43 = vmov %v9339_v11  ;;  %v9349_v30 = vstv %s9341_s13  ;;  %1994 = vrot.lane.b32.xlu0 %v4525_v33, %s9097_s25  ;;  %s6356_s13 = sld [smem:[#allocation4 + $0x108]] }
 0x132   : > { %v1020_v61 = vmul.f32 %v9346_v56, %v935_v29  ;;  %v1077_v39 = vadd.f32 %v1075_v48, %v1071_v63  ;;  %v968_v55 = vadd.f32 %v966_v53, %v962_v35  ;;  %v1074_v54 = vmul.f32 %v9348_v43, %v935_v29 }
 0x133   : > { %v973_v52 = vmul.f32 %v9349_v30, %v941_v60  ;;  %v9350_v8 = vstv %s9343_s16  ;;  %v9351_v49 = vstv %s9345_s27  ;;  %v9352_v15 = vmov %v9349_v30  ;;  %v945_v56 = vpop.permute.xlu1 %944  ;;  %s9365_s16 = sld [smem:[#allocation63_spill]]  ;;  %s9366_s27 = sld [smem:[#allocation64_spill]] }
 0x134   : > { %v1022_v19 = vadd.f32 %v1020_v61, %v1016_v5  ;;  %v1027_v13 = vmul.f32 %v9350_v8, %v941_v60  ;;  %v1081_v28 = vmul.f32 %v9351_v49, %v941_v60  ;;  %v1076_v51 = vadd.f32 %v1074_v54, %v1070_v3  ;;  %v943_v61 = vpop.permute.xlu0 %942  ;;  %2000 = vrot.lane.b32.xlu1 %v5538_v46, %s9104_s28 }
 0x135   : > { %v972_v63 = vmul.f32 %v9352_v15, %v939_v23  ;;  %v9353_v7 = vmov %v9350_v8  ;;  %v9354_v29 = vmov %v9351_v49  ;;  %v975_v11 = vadd.f32 %v973_v52, %v969_v12  ;;  %v9359_v12 = vld [vmem:[#allocation76_spill] sm:$0xff]  ;;  %v9364_v8 = vld [vmem:[#allocation79_spill] sm:$0xff]  ;;  %1998 = vrot.lane.b32.xlu0 %v5542_v59, %s9104_s28 }
 0x136   : > { %v1026_v4 = vmul.f32 %v9353_v7, %v939_v23  ;;  %v1080_v35 = vmul.f32 %v9354_v29, %v939_v23  ;;  %v1029_v48 = vadd.f32 %v1027_v13, %v1023_v22  ;;  %v1083_v5 = vadd.f32 %v1081_v28, %v1077_v39  ;;  %v9360_v39 = vld [vmem:[#allocation78_spill] sm:$0xff] }
 0x137   : > { %v974_v1 = vadd.f32 %v972_v63, %v968_v55  ;;  %9358 = sst [smem:[#allocation35_spill]] %s6356_s13  ;;  %v981_v22 = vadd.f32 %v9359_v12, %v975_v11  ;;  %v9361_v60 = vstv %s9355_s2  ;;  %v9362_v30 = vstv %s9356_s23  ;;  %v949_v11 = vpop.permute.xlu1 %948  ;;  %s9377_s2 = sld [smem:[#allocation70_spill]] }
 0x138   : > { %v1028_v2 = vadd.f32 %v1026_v4, %v1022_v19  ;;  %v1082_v3 = vadd.f32 %v1080_v35, %v1076_v51  ;;  %v1035_v43 = vadd.f32 %v9360_v39, %v1029_v48  ;;  %v1089_v54 = vadd.f32 %v5515_v40, %v1083_v5  ;;  %v9367_v51 = vld [vmem:[#allocation81_spill] sm:$0xff]  ;;  %v947_v48 = vpop.permute.xlu0 %946  ;;  %2004 = vrot.lane.b32.xlu1 %v5538_v46, %s9097_s25  ;;  %s9378_s23 = sld [smem:[#allocation71_spill]] }
 0x139   : > { %v985_v23 = vmul.f32 %v9361_v60, %v945_v56  ;;  %v1039_v55 = vmul.f32 %v9362_v30, %v945_v56  ;;  %v9363_v19 = vstv %s9357_s22  ;;  %v980_v13 = vadd.f32 %v9364_v8, %v974_v1  ;;  %s9380_s22 = sld [smem:[#allocation74_spill]]  ;;  %2002 = vrot.lane.b32.xlu0 %v5542_v59, %s9097_s25  ;;  %s9516_s13 = sld [smem:[#allocation140_spill]] }
 0x13a   : > { %v1093_v52 = vmul.f32 %v9363_v19, %v945_v56  ;;  %v1034_v49 = vadd.f32 %v5519_v45, %v1028_v2  ;;  %v1088_v40 = vadd.f32 %v9367_v51, %v1082_v3  ;;  %v9369_v15 = vmov %v9361_v60 }
 0x13b   : > { %v987_v28 = vadd.f32 %v985_v23, %v981_v22  ;;  %v984_v63 = vmul.f32 %v9369_v15, %v943_v61  ;;  %v9370_v7 = vmov %v9362_v30  ;;  %v1041_v29 = vadd.f32 %v1039_v55, %v1035_v43 }
 0x13c   : > { %v1038_v4 = vmul.f32 %v9370_v7, %v943_v61  ;;  %v1095_v35 = vadd.f32 %v1093_v52, %v1089_v54  ;;  %v9371_v45 = vmov %v9363_v19  ;;  %v9372_v2 = vstv %s9365_s16  ;;  %v951_v15 = vpop.permute.xlu0 %950  ;;  %s9389_s16 = sld [smem:[#allocation77_spill]] }
 0x13d   : > { %v1092_v18 = vmul.f32 %v9371_v45, %v943_v61  ;;  %v986_v33 = vadd.f32 %v984_v63, %v980_v13  ;;  %v991_v3 = vmul.f32 %v9372_v2, %v949_v11  ;;  %v9373_v56 = vstv %s9366_s27  ;;  %v9382_v45 = vld [vmem:[#allocation87_spill] sm:$0xff]  ;;  %s9396_s27 = sld [smem:[#allocation80_spill]]  ;;  %v9448_v63 = vld [vmem:[#allocation133_spill] sm:$0xff] }
 0x13e   : > { %v1040_v1 = vadd.f32 %v1038_v4, %v1034_v49  ;;  %v1045_v12 = vmul.f32 %v9373_v56, %v949_v11  ;;  %v9374_v39 = vstv %s9368_s0  ;;  %v9375_v23 = vmov %v9372_v2  ;;  %v9381_v4 = vld [vmem:[#allocation86_spill] sm:$0xff]  ;;  %s9387_s0 = sld [smem:[#allocation75_spill]] }
 0x13f   : > { %v1094_v22 = vadd.f32 %v1092_v18, %v1088_v40  ;;  %v1099_v60 = vmul.f32 %v9374_v39, %v949_v11  ;;  %v990_v43 = vmul.f32 %v9375_v23, %v947_v48  ;;  %v9376_v54 = vmov %v9373_v56  ;;  %v953_v40 = vpop.permute.xlu1 %952  ;;  %v9391_v23 = vld [vmem:[#allocation93_spill] sm:$0xff] }
 0x140   : > { %v1044_v30 = vmul.f32 %v9376_v54, %v947_v48  ;;  %v993_v61 = vadd.f32 %v991_v3, %v987_v28  ;;  %v1047_v55 = vadd.f32 %v1045_v12, %v1041_v29  ;;  %v9379_v19 = vmov %v9374_v39  ;;  %v9388_v12 = vld [vmem:[#allocation95_spill] sm:$0xff]  ;;  %v9390_v39 = vld [vmem:[#allocation91_spill] sm:$0xff] }
 0x141   : > { %v1098_v52 = vmul.f32 %v9379_v19, %v947_v48  ;;  %v1101_v13 = vadd.f32 %v1099_v60, %v1095_v35  ;;  %v992_v49 = vadd.f32 %v990_v43, %v986_v33  ;;  %v9383_v18 = vstv %s9377_s2  ;;  %2202 = vrot.lane.b32.xlu1 %v9388_v12, %s9104_s28  ;;  %s9402_s2 = sld [smem:[#allocation82_spill]] }
 0x142   : > { %v1046_v51 = vadd.f32 %v1044_v30, %v1040_v1  ;;  %v999_v28 = vadd.f32 %v9381_v4, %v993_v61  ;;  %v1053_v29 = vadd.f32 %v9382_v45, %v1047_v55  ;;  %v1003_v11 = vmul.f32 %v9383_v18, %v953_v40  ;;  %v9386_v1 = vld [vmem:[#allocation90_spill] sm:$0xff]  ;;  %v1143_v4 = vpop.permute.xlu0 %1142 }
 0x143   : > { %v1100_v7 = vadd.f32 %v1098_v52, %v1094_v22  ;;  %v1107_v48 = vadd.f32 %v5575_v27, %v1101_v13  ;;  %v9384_v2 = vstv %s9378_s23  ;;  %v9385_v35 = vstv %s9380_s22  ;;  %v9393_v27 = vld [vmem:[#allocation96_spill] sm:$0xff]  ;;  %s6455_s23 = sld [smem:[#allocation4 + $0x31]]  ;;  %s9413_s22 = sld [smem:[#allocation83_spill]] }
 0x144   : > { %v1057_v3 = vmul.f32 %v9384_v2, %v953_v40  ;;  %v1111_v33 = vmul.f32 %v9385_v35, %v953_v40  ;;  %v998_v56 = vadd.f32 %v9386_v1, %v992_v49  ;;  %v1005_v22 = vadd.f32 %v1003_v11, %v999_v28  ;;  %2006 = vrot.lane.b32.xlu0 %v9393_v27, %s9104_s28  ;;  %v1145_v40 = vpop.permute.xlu1 %1144  ;;  %v9400_v1 = vld [vmem:[#allocation100_spill] sm:$0xff] }
 0x145   : > { %v1052_v60 = vadd.f32 %v9390_v39, %v1046_v51  ;;  %v1106_v43 = vadd.f32 %v9391_v23, %v1100_v7  ;;  %v9392_v54 = vmov %v9383_v18  ;;  %v9394_v19 = vmov %v9384_v2 }
 0x146   : > { %v1002_v30 = vmul.f32 %v9392_v54, %v951_v15  ;;  %v1059_v61 = vadd.f32 %v1057_v3, %v1053_v29  ;;  %v1113_v55 = vadd.f32 %v1111_v33, %v1107_v48  ;;  %v1056_v52 = vmul.f32 %v9394_v19, %v951_v15  ;;  %v4526_v3 = vld [vmem:[%s4964_s17 + $0x70] sm:$0xff] }
 0x147   : > { %v9395_v13 = vmov %v9385_v35  ;;  %v6422_v51 = vadd.f32 %v1005_v22, %v6269_v31  ;;  %v9397_v28 = vstv %s9387_s0  ;;  %v9398_v18 = vstv %s9389_s16  ;;  %2206 = vrot.lane.b32.xlu1 %v4526_v3, %s9097_s25  ;;  %v9399_v35 = vld [vmem:[#allocation97_spill] sm:$0xff]  ;;  %s9414_s0 = sld [smem:[#allocation84_spill]]  ;;  %v9415_v3 = vld [vmem:[#allocation105_spill] sm:$0xff]  ;;  %s9416_s16 = sld [smem:[#allocation85_spill]] }
 0x148   : > { %v1110_v49 = vmul.f32 %v9395_v13, %v951_v15  ;;  %v1004_v7 = vadd.f32 %v1002_v30, %v998_v56  ;;  %v1169_v45 = vmul.f32 %v9397_v28, %v1145_v40  ;;  %v1223_v11 = vmul.f32 %v9398_v18, %v1145_v40  ;;  %v1149_v54 = vpop.permute.xlu1 %1148  ;;  %v1147_v30 = vpop.permute.xlu0 %1146 }
 0x149   : > { %v6429_v29 = vadd.f32 %v1059_v61, %v6275_v38  ;;  %v6432_v48 = vadd.f32 %v1113_v55, %v6279_v58  ;;  %v1058_v15 = vadd.f32 %v1056_v52, %v1052_v60  ;;  %v9401_v38 = vstv %s9396_s27  ;;  %v4527_v58 = vld [vmem:[%s4964_s17 + $0x78] sm:$0xff]  ;;  %v9405_v61 = vld [vmem:[#allocation103_spill] sm:$0xff]  ;;  %s9427_s27 = sld [smem:[#allocation92_spill]] }
 0x14a   : > { %v1112_v2 = vadd.f32 %v1110_v49, %v1106_v43  ;;  %v6437_v31 = vadd.f32 %v1004_v7, %v6287_v36  ;;  %v1175_v33 = vadd.f32 %v9399_v35, %v1169_v45  ;;  %v1229_v56 = vadd.f32 %v9400_v1, %v1223_v11  ;;  %2204 = vrot.lane.b32.xlu0 %v4527_v58, %s9104_s28 }
 0x14b   : > { %v1277_v12 = vmul.f32 %v9401_v38, %v1145_v40  ;;  %v6446_v22 = vadd.f32 %v1058_v15, %v6291_v25  ;;  %v9403_v36 = vmov %v9397_v28  ;;  %v9404_v23 = vmov %v9398_v18  ;;  %v9409_v40 = vld [vmem:[#allocation98_spill] sm:$0xff]  ;;  %v9410_v28 = vld [vmem:[#allocation104_spill] sm:$0xff]  ;;  %2414 = vrot.lane.b32.xlu1 %v5698_v10, %s9104_s28 }
 0x14c   : > { %v6449_v39 = vadd.f32 %v1112_v2, %v6302_v17  ;;  %v1168_v60 = vmul.f32 %v9403_v36, %v1143_v4  ;;  %v1222_v43 = vmul.f32 %v9404_v23, %v1143_v4  ;;  %v9406_v19 = vmov %v9401_v38  ;;  %v6477_v36 = vld [vmem:[%s4964_s17 + $0xb0] sm:$0xff]  ;;  %v1153_v10 = vpop.permute.xlu1 %1152 }
 0x14d   : > { %v1283_v55 = vadd.f32 %v9405_v61, %v1277_v12  ;;  %v1276_v52 = vmul.f32 %v9406_v19, %v1143_v4  ;;  %v9407_v13 = vstv %s5508_s7  ;;  %v9408_v49 = vstv %s5524_s30  ;;  %v1151_v61 = vpop.permute.xlu0 %1150  ;;  %s9425_s7 = sld [smem:[#allocation88_spill]]  ;;  %s9426_s30 = sld [smem:[#allocation89_spill]] }
 0x14e   : > { %v1179_v25 = vmul.f32 %v9407_v13, %v1149_v54  ;;  %v1233_v17 = vmul.f32 %v9408_v49, %v1149_v54  ;;  %v1174_v7 = vadd.f32 %v9409_v40, %v1168_v60  ;;  %v1228_v45 = vadd.f32 %v9410_v28, %v1222_v43  ;;  %2208 = vrot.lane.b32.xlu0 %v4527_v58, %s9097_s25 }
 0x14f   : > { %v9411_v18 = vstv %s9402_s2  ;;  %v9412_v15 = vmov %v9407_v13  ;;  %v1282_v4 = vadd.f32 %v9415_v3, %v1276_v52  ;;  %v9417_v38 = vmov %v9408_v49  ;;  %2210 = vrot.lane.b32.xlu1 %v5672_v62, %s9104_s28  ;;  %v4528_v3 = vld [vmem:[%s4964_s17 + $0x88] sm:$0xff]  ;;  %s9436_s2 = sld [smem:[#allocation94_spill]] }
 0x150   : > { %v1287_v11 = vmul.f32 %v9411_v18, %v1149_v54  ;;  %v1178_v2 = vmul.f32 %v9412_v15, %v1147_v30  ;;  %v1181_v35 = vadd.f32 %v1179_v25, %v1175_v33  ;;  %v1235_v1 = vadd.f32 %v1233_v17, %v1229_v56 }
 0x151   : > { %v1232_v12 = vmul.f32 %v9417_v38, %v1147_v30  ;;  %v9418_v43 = vmov %v9411_v18  ;;  %v3030_v33 = vrot.slane %v6477_v36, 1  ;;  %v9419_v56 = vstv %s9413_s22  ;;  %s9437_s22 = sld [smem:[#allocation99_spill]] }
 0x152   : > { %v1289_v60 = vadd.f32 %v1287_v11, %v1283_v55  ;;  %v1180_v23 = vadd.f32 %v1178_v2, %v1174_v7  ;;  %v1286_v54 = vmul.f32 %v9418_v43, %v1147_v30  ;;  %v1185_v52 = vmul.f32 %v9419_v56, %v1153_v10  ;;  %v6497_v11 = vld [vmem:[%s4964_s17 + $0xb8] sm:$0xff]  ;;  %2416 = vrot.lane.b32.xlu0 %v4528_v3, %s9104_s28 }
 0x153   : > { %v1234_v19 = vadd.f32 %v1232_v12, %v1228_v45  ;;  %v9420_v13 = vstv %s9414_s0  ;;  %v9421_v49 = vstv %s9416_s16  ;;  %v9422_v40 = vmov %v9419_v56  ;;  %v9428_v56 = vld [vmem:[#allocation108_spill] sm:$0xff]  ;;  %s9440_s0 = sld [smem:[#allocation101_spill]]  ;;  %s9449_s16 = sld [smem:[#allocation102_spill]] }
 0x154   : > { %v1239_v25 = vmul.f32 %v9420_v13, %v1153_v10  ;;  %v1293_v17 = vmul.f32 %v9421_v49, %v1153_v10  ;;  %v1288_v58 = vadd.f32 %v1286_v54, %v1282_v4  ;;  %v1184_v28 = vmul.f32 %v9422_v40, %v1151_v61  ;;  %v1157_v54 = vpop.permute.xlu1 %1156  ;;  %v1155_v10 = vpop.permute.xlu0 %1154 }
 0x155   : > { %v9423_v18 = vmov %v9420_v13  ;;  %v9424_v7 = vmov %v9421_v49  ;;  %v1187_v45 = vadd.f32 %v1185_v52, %v1181_v35  ;;  %v3031_v4 = vrot.slane %v6497_v11, 1  ;;  %v9429_v52 = vld [vmem:[#allocation110_spill] sm:$0xff]  ;;  %v9430_v13 = vld [vmem:[#allocation114_spill] sm:$0xff] }
 0x156   : > { %v1238_v55 = vmul.f32 %v9423_v18, %v1151_v61  ;;  %v1292_v30 = vmul.f32 %v9424_v7, %v1151_v61  ;;  %v1241_v15 = vadd.f32 %v1239_v25, %v1235_v1  ;;  %v1295_v2 = vadd.f32 %v1293_v17, %v1289_v60  ;;  %v4529_v7 = vld [vmem:[%s4964_s17 + $0x80] sm:$0xff]  ;;  %2212 = vrot.lane.b32.xlu0 %v5726_v20, %s9104_s28 }
 0x157   : > { %v1186_v38 = vadd.f32 %v1184_v28, %v1180_v23  ;;  %v1825_v61 = vstv %s6455_s23  ;;  %v1193_v35 = vadd.f32 %v9428_v56, %v1187_v45  ;;  %v9431_v25 = vstv %s9425_s7  ;;  %v9435_v28 = vld [vmem:[#allocation117_spill] sm:$0xff]  ;;  %2418 = vrot.lane.b32.xlu1 %v4529_v7, %s9097_s25  ;;  %v9438_v45 = vld [vmem:[#allocation118_spill] sm:$0xff]  ;;  %s9450_s7 = sld [smem:[#allocation106_spill]]  ;;  %s7023_s23 = sld [smem:[#allocation4 + $0x37]] }
 0x158   : > { %v1240_v12 = vadd.f32 %v1238_v55, %v1234_v19  ;;  %v1294_v43 = vadd.f32 %v1292_v30, %v1288_v58  ;;  %v1247_v1 = vadd.f32 %v9429_v52, %v1241_v15  ;;  %v1301_v60 = vadd.f32 %v9430_v13, %v1295_v2  ;;  %v9434_v19 = vld [vmem:[#allocation111_spill] sm:$0xff] }
 0x159   : > { %v1197_v49 = vmul.f32 %v9431_v25, %v1157_v54  ;;  %v9432_v17 = vstv %s9426_s30  ;;  %v9433_v18 = vstv %s9427_s27  ;;  %v1192_v58 = vadd.f32 %v9434_v19, %v1186_v38  ;;  %s9452_s30 = sld [smem:[#allocation107_spill]]  ;;  %s9462_s27 = sld [smem:[#allocation109_spill]] }
 0x15a   : > { %v1251_v40 = vmul.f32 %v9432_v17, %v1157_v54  ;;  %v1305_v23 = vmul.f32 %v9433_v18, %v1157_v54  ;;  %v1246_v55 = vadd.f32 %v9435_v28, %v1240_v12  ;;  %v1300_v15 = vadd.f32 %v9438_v45, %v1294_v43  ;;  %2420 = vrot.lane.b32.xlu0 %v4528_v3, %s9097_s25 }
 0x15b   : > { %v1199_v30 = vadd.f32 %v1197_v49, %v1193_v35  ;;  %v9439_v2 = vmov %v9431_v25  ;;  %v9441_v52 = vmov %v9432_v17  ;;  %v9442_v54 = vmov %v9433_v18  ;;  %v1161_v17 = vpop.permute.xlu1 %1160  ;;  %v1159_v18 = vpop.permute.xlu0 %1158  ;;  %v4229_v35 = vld [vmem:[%s4966_s14 + $0x58] ss:$0 sm:$0xff]  ;;  %2626 = vrot.lane.b32.xlu1 %v9448_v63, %s9104_s28  ;;  %s9494_s14 = sld [smem:[#allocation123_spill]] }
 0x15c   : > { %v1196_v56 = vmul.f32 %v9439_v2, %v1155_v10  ;;  %v1250_v13 = vmul.f32 %v9441_v52, %v1155_v10  ;;  %v1253_v38 = vadd.f32 %v1251_v40, %v1247_v1  ;;  %v1307_v12 = vadd.f32 %v1305_v23, %v1301_v60 }
 0x15d   : > { %v1304_v25 = vmul.f32 %v9442_v54, %v1155_v10  ;;  %v3033_v43 = vsel %vm699_vm0, %v3031_v4, %v3030_v33  ;;  %v9443_v28 = vstv %s9436_s2  ;;  %v9444_v45 = vstv %s9437_s22  ;;  %s9463_s2 = sld [smem:[#allocation112_spill]]  ;;  %s9464_s22 = sld [smem:[#allocation113_spill]] }
 0x15e   : > { %v1198_v49 = vadd.f32 %v1196_v56, %v1192_v58  ;;  %v1252_v19 = vadd.f32 %v1250_v13, %v1246_v55  ;;  %v1203_v7 = vmul.f32 %v9443_v28, %v1161_v17  ;;  %v1257_v2 = vmul.f32 %v9444_v45, %v1161_v17 }
 0x15f   : > { %v1306_v52 = vadd.f32 %v1304_v25, %v1300_v15  ;;  %v9445_v1 = vstv %s9440_s0  ;;  %v9446_v40 = vmov %v9443_v28  ;;  %v9447_v23 = vmov %v9444_v45  ;;  %v1163_v28 = vpop.permute.xlu0 %1162  ;;  %2422 = vrot.lane.b32.xlu1 %v5767_v57, %s9104_s28  ;;  %s9475_s0 = sld [smem:[#allocation115_spill]] }
 0x160   : > { %v1311_v60 = vmul.f32 %v9445_v1, %v1161_v17  ;;  %v1202_v10 = vmul.f32 %v9446_v40, %v1159_v18  ;;  %v1256_v54 = vmul.f32 %v9447_v23, %v1159_v18  ;;  %v1205_v8 = vadd.f32 %v1203_v7, %v1199_v30  ;;  %v1165_v17 = vpop.permute.xlu1 %1164 }
 0x161   : > { %v1259_v5 = vadd.f32 %v1257_v2, %v1253_v38  ;;  %v9451_v58 = vmov %v9445_v1  ;;  %v6547_v15 = vsel %vm686_vm1, %v3033_v43, %v4229_v35  ;;  %v6553_v63 = vsel %vm699_vm0, %v3030_v33, %v3031_v4  ;;  %v9455_v38 = vld [vmem:[#allocation121_spill] sm:$0xff]  ;;  %v9466_v4 = vld [vmem:[#allocation131_spill] sm:$0xff] }
 0x162   : > { %v1310_v55 = vmul.f32 %v9451_v58, %v1159_v18  ;;  %9453 = vst [vmem:[#allocation65_spill] sm:$0xff] %v6547_v15  ;;  %v1313_v56 = vadd.f32 %v1311_v60, %v1307_v12  ;;  %v1204_v13 = vadd.f32 %v1202_v10, %v1198_v49  ;;  %v1258_v25 = vadd.f32 %v1256_v54, %v1252_v19  ;;  %v9456_v18 = vld [vmem:[#allocation124_spill] sm:$0xff]  ;;  %v9458_v49 = vld [vmem:[#allocation127_spill] sm:$0xff]  ;;  %v9461_v60 = vld [vmem:[#allocation125_spill] sm:$0xff] }
 0x163   : > { %9454 = vst [vmem:[#allocation69_spill] sm:$0xff] %v6553_v63  ;;  %v1211_v3 = vadd.f32 %v9455_v38, %v1205_v8  ;;  %v1265_v35 = vadd.f32 %v9456_v18, %v1259_v5  ;;  %v9457_v43 = vstv %s9449_s16  ;;  %v9459_v7 = vstv %s9450_s7  ;;  %v9465_v33 = vld [vmem:[#allocation128_spill] sm:$0xff]  ;;  %v4530_v54 = vld [vmem:[%s4964_s17 + $0x98] sm:$0xff]  ;;  %v1355_v18 = vpop.permute.xlu0 %1354  ;;  %s9477_s16 = sld [smem:[#allocation116_spill]]  ;;  %s9479_s7 = sld [smem:[#allocation119_spill]] }
 0x164   : > { %v1312_v30 = vadd.f32 %v1310_v55, %v1306_v52  ;;  %v1215_v12 = vmul.f32 %v9457_v43, %v1165_v17  ;;  %v1319_v19 = vadd.f32 %v9458_v49, %v1313_v56  ;;  %v1269_v45 = vmul.f32 %v9459_v7, %v1165_v17  ;;  %2628 = vrot.lane.b32.xlu0 %v4530_v54, %s9104_s28 }
 0x165   : > { %v9460_v2 = vstv %s9452_s30  ;;  %v1210_v40 = vadd.f32 %v9461_v60, %v1204_v13  ;;  %v1264_v5 = vadd.f32 %v9465_v33, %v1258_v25  ;;  %v9467_v10 = vmov %v9457_v43  ;;  %s6604_s30 = sld [smem:[#allocation4 + $0x32]] }
 0x166   : > { %v1323_v1 = vmul.f32 %v9460_v2, %v1165_v17  ;;  %v1217_v8 = vadd.f32 %v1215_v12, %v1211_v3  ;;  %v1318_v52 = vadd.f32 %v9466_v4, %v1312_v30  ;;  %v1214_v23 = vmul.f32 %v9467_v10, %v1163_v28  ;;  %v1357_v3 = vpop.permute.xlu1 %1356 }
 0x167   : > { %v1271_v58 = vadd.f32 %v1269_v45, %v1265_v35  ;;  %v9468_v56 = vmov %v9459_v7  ;;  %v9469_v17 = vmov %v9460_v2  ;;  %v9470_v43 = vstv %s9462_s27  ;;  %v4531_v45 = vld [vmem:[%s4964_s17 + $0x90] sm:$0xff]  ;;  %s6606_s27 = sld [smem:[#allocation4 + $0x9d]] }
 0x168   : > { %v1325_v55 = vadd.f32 %v1323_v1, %v1319_v19  ;;  %v1268_v13 = vmul.f32 %v9468_v56, %v1163_v28  ;;  %v1322_v38 = vmul.f32 %v9469_v17, %v1163_v28  ;;  %v1216_v25 = vadd.f32 %v1214_v23, %v1210_v40  ;;  %2630 = vrot.lane.b32.xlu1 %v4531_v45, %s9097_s25  ;;  %v9476_v28 = vld [vmem:[#allocation134_spill] sm:$0xff]  ;;  %v9478_v40 = vld [vmem:[#allocation137_spill] sm:$0xff] }
 0x169   : > { %v1381_v30 = vmul.f32 %v9470_v43, %v1357_v3  ;;  %v9471_v12 = vstv %s9463_s2  ;;  %v9472_v7 = vstv %s9464_s22  ;;  %v9473_v4 = vmov %v9470_v43  ;;  %v9480_v56 = vld [vmem:[#allocation141_spill] sm:$0xff]  ;;  %2424 = vrot.lane.b32.xlu0 %v5836_v24, %s9104_s28  ;;  %s9491_s2 = sld [smem:[#allocation120_spill]]  ;;  %s9493_s22 = sld [smem:[#allocation122_spill]] }
 0x16a   : > { %v1435_v49 = vmul.f32 %v9471_v12, %v1357_v3  ;;  %v1489_v2 = vmul.f32 %v9472_v7, %v1357_v3  ;;  %v1270_v60 = vadd.f32 %v1268_v13, %v1264_v5  ;;  %v1324_v33 = vadd.f32 %v1322_v38, %v1318_v52  ;;  %v9482_v52 = vld [vmem:[#allocation138_spill] sm:$0xff]  ;;  %v9483_v38 = vld [vmem:[#allocation139_spill] sm:$0xff] }
 0x16b   : > { %v1380_v10 = vmul.f32 %v9473_v4, %v1355_v18  ;;  %v9474_v35 = vmov %v9471_v12  ;;  %v1387_v1 = vadd.f32 %v9476_v28, %v1381_v30  ;;  %v9481_v3 = vmov %v9472_v7  ;;  %v1361_v12 = vpop.permute.xlu1 %1360  ;;  %v1359_v7 = vpop.permute.xlu0 %1358  ;;  %9484 = sst [smem:[#allocation36_spill]] %s6604_s30  ;;  %s9514_s30 = sld [smem:[#allocation136_spill]] }
 0x16c   : > { %v1434_v19 = vmul.f32 %v9474_v35, %v1355_v18  ;;  %v1441_v23 = vadd.f32 %v9478_v40, %v1435_v49  ;;  %v1495_v17 = vadd.f32 %v9480_v56, %v1489_v2  ;;  %v1488_v5 = vmul.f32 %v9481_v3, %v1355_v18  ;;  %v9485_v18 = vld [vmem:[#allocation143_spill] sm:$0xff]  ;;  %2838 = vrot.lane.b32.xlu1 %v5948_v9, %s9104_s28 }
 0x16d   : > { %v1386_v13 = vadd.f32 %v9482_v52, %v1380_v10  ;;  %v6599_v30 = vadd.f32 %v1217_v8, %v6422_v51  ;;  %v6602_v49 = vadd.f32 %v1271_v58, %v6429_v29  ;;  %v9486_v4 = vstv %s9475_s0  ;;  %2632 = vrot.lane.b32.xlu0 %v4530_v54, %s9097_s25  ;;  %s9502_s0 = sld [smem:[#allocation126_spill]] }
 0x16e   : > { %v1440_v43 = vadd.f32 %v9483_v38, %v1434_v19  ;;  %v1494_v2 = vadd.f32 %v9485_v18, %v1488_v5  ;;  %v1391_v35 = vmul.f32 %v9486_v4, %v1361_v12  ;;  %v9487_v45 = vstv %s9477_s16  ;;  %s9503_s16 = sld [smem:[#allocation129_spill]] }
 0x16f   : > { %v1445_v10 = vmul.f32 %v9487_v45, %v1361_v12  ;;  %v9488_v28 = vstv %s9479_s7  ;;  %v9489_v40 = vmov %v9486_v4  ;;  %v9490_v3 = vmov %v9487_v45  ;;  %v1365_v45 = vpop.permute.xlu1 %1364  ;;  %v1363_v9 = vpop.permute.xlu0 %1362  ;;  %s9504_s7 = sld [smem:[#allocation130_spill]] }
 0x170   : > { %v1499_v19 = vmul.f32 %v9488_v28, %v1361_v12  ;;  %v1390_v56 = vmul.f32 %v9489_v40, %v1359_v7  ;;  %v1444_v51 = vmul.f32 %v9490_v3, %v1359_v7  ;;  %v9492_v8 = vmov %v9488_v28 }
 0x171   : > { %v1498_v29 = vmul.f32 %v9492_v8, %v1359_v7  ;;  %v6624_v58 = vadd.f32 %v1325_v55, %v6432_v48  ;;  %v1393_v5 = vadd.f32 %v1391_v35, %v1387_v1  ;;  %v1447_v52 = vadd.f32 %v1445_v10, %v1441_v23  ;;  %2840 = vrot.lane.b32.xlu0 %v5951_v47, %s9104_s28 }
 0x172   : > { %v1501_v38 = vadd.f32 %v1499_v19, %v1495_v17  ;;  %v6628_v12 = vadd.f32 %v1216_v25, %v6437_v31  ;;  %v1392_v7 = vadd.f32 %v1390_v56, %v1386_v13  ;;  %v1446_v18 = vadd.f32 %v1444_v51, %v1440_v43  ;;  %v9501_v43 = vld [vmem:[#allocation145_spill] sm:$0xff] }
 0x173   : > { %v1500_v4 = vadd.f32 %v1498_v29, %v1494_v2  ;;  %v6631_v28 = vadd.f32 %v1270_v60, %v6446_v22  ;;  %v9495_v48 = vstv %s9491_s2  ;;  %v9496_v1 = vstv %s9493_s22  ;;  %2008 = vrot.lane.b32.xlu1 %v9501_v43, %s9104_s28  ;;  %s6661_s2 = sld [smem:[#allocation4 + $0x109]]  ;;  %s9513_s22 = sld [smem:[#allocation135_spill]] }
 0x174   : > { %v1397_v55 = vmul.f32 %v9495_v48, %v1365_v45  ;;  %v1451_v35 = vmul.f32 %v9496_v1, %v1365_v45  ;;  %v9497_v23 = vstv %s9494_s14  ;;  %v9498_v10 = vmov %v9495_v48  ;;  %s6657_s14 = sld [smem:[#allocation4 + $0x9e]] }
 0x175   : > { %v1505_v17 = vmul.f32 %v9497_v23, %v1365_v45  ;;  %v1396_v54 = vmul.f32 %v9498_v10, %v1363_v9  ;;  %v9499_v19 = vmov %v9496_v1  ;;  %v9500_v25 = vmov %v9497_v23  ;;  %v9511_v23 = vld [vmem:[#allocation149_spill] sm:$0xff]  ;;  %v9512_v10 = vld [vmem:[#allocation154_spill] sm:$0xff]  ;;  %2214 = vrot.lane.b32.xlu0 %v5672_v62, %s9097_s25 }
 0x176   : > { %v1450_v31 = vmul.f32 %v9499_v19, %v1363_v9  ;;  %v1504_v13 = vmul.f32 %v9500_v25, %v1363_v9  ;;  %v6648_v22 = vadd.f32 %v1324_v33, %v6449_v39  ;;  %v6653_v60 = vmul.f32 %v1825_v61, %v5310_v34  ;;  %v1369_v39 = vpop.permute.xlu1 %1368  ;;  %v1367_v33 = vpop.permute.xlu0 %1366  ;;  %v9507_v9 = vld [vmem:[#allocation153_spill] sm:$0xff] }
 0x177   : > { %v1399_v2 = vadd.f32 %v1397_v55, %v1393_v5  ;;  %v1453_v40 = vadd.f32 %v1451_v35, %v1447_v52  ;;  %v1507_v56 = vadd.f32 %v1505_v17, %v1501_v38  ;;  %v1398_v3 = vadd.f32 %v1396_v54, %v1392_v7  ;;  %v9505_v5 = vld [vmem:[#allocation147_spill] sm:$0xff]  ;;  %v9506_v38 = vld [vmem:[#allocation148_spill] sm:$0xff]  ;;  %2216 = vrot.lane.b32.xlu1 %v5726_v20, %s9097_s25 }
 0x178   : > { %v1452_v51 = vadd.f32 %v1450_v31, %v1446_v18  ;;  %v1506_v8 = vadd.f32 %v1504_v13, %v1500_v4  ;;  %v1879_v45 = vstv %s6606_s27  ;;  %v9508_v47 = vstv %s9502_s0  ;;  %v9515_v31 = vld [vmem:[#allocation155_spill] sm:$0xff]  ;;  %s9526_s0 = sld [smem:[#allocation142_spill]]  ;;  %s7031_s27 = sld [smem:[#allocation4 + $0xa2]] }
 0x179   : > { %v1405_v52 = vadd.f32 %v9505_v5, %v1399_v2  ;;  %v1459_v7 = vadd.f32 %v9506_v38, %v1453_v40  ;;  %v1513_v48 = vadd.f32 %v9507_v9, %v1507_v56  ;;  %v1409_v55 = vmul.f32 %v9508_v47, %v1369_v39 }
 0x17a   : > { %v9509_v1 = vstv %s9503_s16  ;;  %v9510_v4 = vstv %s9504_s7  ;;  %v1404_v17 = vadd.f32 %v9511_v23, %v1398_v3  ;;  %v1458_v54 = vadd.f32 %v9512_v10, %v1452_v51  ;;  %v1373_v38 = vpop.permute.xlu1 %1372  ;;  %s9527_s16 = sld [smem:[#allocation144_spill]]  ;;  %s9529_s7 = sld [smem:[#allocation146_spill]] }
 0x17b   : > { %v1463_v18 = vmul.f32 %v9509_v1, %v1369_v39  ;;  %v1517_v35 = vmul.f32 %v9510_v4, %v1369_v39  ;;  %v1411_v19 = vadd.f32 %v1409_v55, %v1405_v52  ;;  %v1512_v25 = vadd.f32 %v9515_v31, %v1506_v8  ;;  %v1371_v52 = vpop.permute.xlu0 %1370 }
 0x17c   : > { %v9517_v13 = vmov %v9508_v47  ;;  %v9518_v40 = vmov %v9509_v1  ;;  %v9519_v51 = vmov %v9510_v4  ;;  %v6688_v8 = vmul.f32 %v1879_v45, %v5310_v34 }
 0x17d   : > { %v1408_v2 = vmul.f32 %v9517_v13, %v1367_v33  ;;  %v1462_v56 = vmul.f32 %v9518_v40, %v1367_v33  ;;  %v1465_v3 = vadd.f32 %v1463_v18, %v1459_v7  ;;  %v1519_v39 = vadd.f32 %v1517_v35, %v1513_v48  ;;  %v9525_v13 = vld [vmem:[#allocation156_spill] sm:$0xff] }
 0x17e   : > { %v1516_v5 = vmul.f32 %v9519_v51, %v1367_v33  ;;  %v9520_v55 = vstv %s9513_s22  ;;  %v9521_v4 = vstv %s9514_s30  ;;  %v9522_v7 = vstv %s9516_s13  ;;  %2636 = vrot.lane.b32.xlu1 %v9525_v13, %s9104_s28  ;;  %s9538_s13 = sld [smem:[#allocation150_spill]]  ;;  %s9539_s30 = sld [smem:[#allocation151_spill]] }
 0x17f   : > { %v1410_v9 = vadd.f32 %v1408_v2, %v1404_v17  ;;  %v1464_v47 = vadd.f32 %v1462_v56, %v1458_v54  ;;  %v1415_v1 = vmul.f32 %v9520_v55, %v1373_v38  ;;  %v1469_v23 = vmul.f32 %v9521_v4, %v1373_v38  ;;  %v9530_v56 = vld [vmem:[#allocation157_spill] sm:$0xff]  ;;  %s9545_s22 = sld [smem:[#allocation152_spill]] }
 0x180   : > { %v1518_v10 = vadd.f32 %v1516_v5, %v1512_v25  ;;  %v1523_v48 = vmul.f32 %v9522_v7, %v1373_v38  ;;  %v9523_v18 = vmov %v9520_v55  ;;  %v9524_v33 = vmov %v9521_v4  ;;  %2634 = vrot.lane.b32.xlu0 %v9530_v56, %s9104_s28  ;;  %v1377_v55 = vpop.permute.xlu1 %1376  ;;  %v1375_v4 = vpop.permute.xlu0 %1374 }
 0x181   : > { %v1414_v35 = vmul.f32 %v9523_v18, %v1371_v52  ;;  %v1468_v31 = vmul.f32 %v9524_v33, %v1371_v52  ;;  %v1417_v40 = vadd.f32 %v1415_v1, %v1411_v19  ;;  %v1471_v17 = vadd.f32 %v1469_v23, %v1465_v3  ;;  %v9531_v19 = vld [vmem:[#allocation158_spill] sm:$0xff]  ;;  %v9532_v3 = vld [vmem:[#allocation159_spill] sm:$0xff] }
 0x182   : > { %v9528_v54 = vmov %v9522_v7  ;;  %v1525_v51 = vadd.f32 %v1523_v48, %v1519_v39  ;;  %v9005_v7 = vstv %s6661_s2  ;;  %v9533_v33 = vstv %s9526_s0  ;;  %v9537_v48 = vld [vmem:[#allocation161_spill] sm:$0xff]  ;;  %s6754_s0 = sld [smem:[#allocation4 + $0x10a]] }
 0x183   : > { %v1522_v2 = vmul.f32 %v9528_v54, %v1371_v52  ;;  %v1416_v5 = vadd.f32 %v1414_v35, %v1410_v9  ;;  %v1470_v38 = vadd.f32 %v1468_v31, %v1464_v47  ;;  %v1423_v1 = vadd.f32 %v9531_v19, %v1417_v40  ;;  %v9534_v54 = vld [vmem:[#allocation160_spill] sm:$0xff]  ;;  %v4532_v31 = vld [vmem:[%s4964_s17 + $0xa8] sm:$0xff]  ;;  %v9540_v40 = vld [vmem:[#allocation163_spill] sm:$0xff] }
 0x184   : > { %v1477_v23 = vadd.f32 %v9532_v3, %v1471_v17  ;;  %v1427_v52 = vmul.f32 %v9533_v33, %v1377_v55  ;;  %v1531_v29 = vadd.f32 %v9534_v54, %v1525_v51  ;;  %v9535_v25 = vstv %s9527_s16  ;;  %2844 = vrot.lane.b32.xlu1 %v4532_v31, %s9097_s25  ;;  %2842 = vrot.lane.b32.xlu0 %v4533_v14, %s9097_s25  ;;  %v1567_v31 = vpop.permute.xlu0 %1566 }
 0x185   : > { %v1524_v18 = vadd.f32 %v1522_v2, %v1518_v10  ;;  %v1481_v39 = vmul.f32 %v9535_v25, %v1377_v55  ;;  %v9536_v9 = vstv %s9529_s7  ;;  %v1422_v35 = vadd.f32 %v9537_v48, %v1416_v5  ;;  %v9541_v2 = vld [vmem:[#allocation164_spill] sm:$0xff]  ;;  %v1569_v48 = vpop.permute.xlu1 %1568  ;;  %s7049_s7 = sld [smem:[#allocation4 + $0x38]] }
 0x186   : > { %v1535_v47 = vmul.f32 %v9536_v9, %v1377_v55  ;;  %v1429_v10 = vadd.f32 %v1427_v52, %v1423_v1  ;;  %v1476_v17 = vadd.f32 %v9540_v40, %v1470_v38  ;;  %v9542_v3 = vmov %v9533_v33 }
 0x187   : > { %v1530_v19 = vadd.f32 %v9541_v2, %v1524_v18  ;;  %v1426_v33 = vmul.f32 %v9542_v3, %v1375_v4  ;;  %v1483_v25 = vadd.f32 %v1481_v39, %v1477_v23  ;;  %v9543_v55 = vstv %s9527_s16  ;;  %v9548_v39 = vld [vmem:[#allocation165_spill] sm:$0xff]  ;;  %s7040_s16 = sld [smem:[#allocation4 + $0x10f]] }
 0x188   : > { %v1537_v51 = vadd.f32 %v1535_v47, %v1531_v29  ;;  %v1480_v54 = vmul.f32 %v9543_v55, %v1375_v4  ;;  %v9544_v5 = vmov %v9536_v9  ;;  %v6731_v1 = vadd.f32 %v1429_v10, %v6599_v30  ;;  %3052 = vrot.lane.b32.xlu1 %v6497_v11, %s9104_s28  ;;  %3050 = vrot.lane.b32.xlu0 %v6477_v36, %s9104_s28  ;;  %v1571_v55 = vpop.permute.xlu0 %1570 }
 0x189   : > { %v1534_v9 = vmul.f32 %v9544_v5, %v1375_v4  ;;  %v1428_v38 = vadd.f32 %v1426_v33, %v1422_v35  ;;  %v9546_v52 = vstv %s9538_s13  ;;  %v9547_v40 = vstv %s9539_s30  ;;  %v9549_v35 = vld [vmem:[#allocation168_spill] sm:$0xff]  ;;  %s7055_s13 = sld [smem:[#allocation4 + $0xa4]]  ;;  %s7057_s30 = sld [smem:[#allocation4 + $0x110]] }
 0x18a   : > { %v1593_v18 = vmul.f32 %v9546_v52, %v1569_v48  ;;  %v1647_v2 = vmul.f32 %v9547_v40, %v1569_v48  ;;  %v6738_v14 = vadd.f32 %v1483_v25, %v6602_v49  ;;  %v6741_v29 = vadd.f32 %v1537_v51, %v6624_v58  ;;  %v1573_v51 = vpop.permute.xlu1 %1572 }
 0x18b   : > { %v1482_v23 = vadd.f32 %v1480_v54, %v1476_v17  ;;  %v1536_v4 = vadd.f32 %v1534_v9, %v1530_v19  ;;  %v6746_v30 = vadd.f32 %v1428_v38, %v6628_v12  ;;  %v9550_v49 = vstv %s9545_s22  ;;  %v9553_v54 = vld [vmem:[#allocation169_spill] sm:$0xff]  ;;  %s7084_s22 = sld [smem:[#allocation4 + $0x39]] }
 0x18c   : > { %v1599_v47 = vadd.f32 %v9548_v39, %v1593_v18  ;;  %v1653_v10 = vadd.f32 %v9549_v35, %v1647_v2  ;;  %v1701_v3 = vmul.f32 %v9550_v49, %v1569_v48  ;;  %v9551_v12 = vmov %v9546_v52  ;;  %v9558_v2 = vld [vmem:[#allocation170_spill] sm:$0xff] }
 0x18d   : > { %v6757_v58 = vadd.f32 %v1482_v23, %v6631_v28  ;;  %v6760_v17 = vadd.f32 %v1536_v4, %v6648_v22  ;;  %v1592_v19 = vmul.f32 %v9551_v12, %v1567_v31  ;;  %v9552_v33 = vmov %v9547_v40  ;;  %v9557_v40 = vld [vmem:[#allocation166_spill] sm:$0xff] }
 0x18e   : > { %v1646_v25 = vmul.f32 %v9552_v33, %v1567_v31  ;;  %v1707_v5 = vadd.f32 %v9553_v54, %v1701_v3  ;;  %v9554_v9 = vmov %v9550_v49  ;;  %v9555_v38 = vstv %s5877_s6  ;;  %v9561_v3 = vld [vmem:[#allocation172_spill] sm:$0xff]  ;;  %s9572_s6 = sld [smem:[#allocation162_spill]] }
 0x18f   : > { %v1700_v48 = vmul.f32 %v9554_v9, %v1567_v31  ;;  %v1603_v52 = vmul.f32 %v9555_v38, %v1573_v51  ;;  %v9556_v18 = vstv %s5893_s11  ;;  %v1598_v22 = vadd.f32 %v9557_v40, %v1592_v19  ;;  %2220 = vrot.lane.b32.xlu1 %v9561_v3, %s9104_s28  ;;  %v9562_v31 = vld [vmem:[#allocation171_spill] sm:$0xff]  ;;  %s6888_s11 = sld [smem:[#allocation4 + $0x9f]] }
 0x190   : > { %v1657_v28 = vmul.f32 %v9556_v18, %v1573_v51  ;;  %v1652_v23 = vadd.f32 %v9558_v2, %v1646_v25  ;;  %v9559_v4 = vstv %s5895_s21  ;;  %v9560_v35 = vmov %v9555_v38  ;;  %v9564_v25 = vld [vmem:[#allocation173_spill] sm:$0xff]  ;;  %v1577_v2 = vpop.permute.xlu1 %1576  ;;  %s9632_s21 = sld [smem:[#allocation36_spill]] }
 0x191   : > { %v1711_v39 = vmul.f32 %v9559_v4, %v1573_v51  ;;  %v1602_v49 = vmul.f32 %v9560_v35, %v1571_v55  ;;  %v1706_v12 = vadd.f32 %v9562_v31, %v1700_v48  ;;  %v1605_v33 = vadd.f32 %v1603_v52, %v1599_v47  ;;  %2218 = vrot.lane.b32.xlu0 %v9564_v25, %s9104_s28 }
 0x192   : > { %v1659_v54 = vadd.f32 %v1657_v28, %v1653_v10  ;;  %v9563_v9 = vmov %v9556_v18  ;;  %v9565_v18 = vmov %v9559_v4  ;;  %v1575_v4 = vpop.permute.xlu0 %1574  ;;  %v6791_v48 = vmul.f32 %v9005_v7, %v5310_v34 }
 0x193   : > { %v1656_v19 = vmul.f32 %v9563_v9, %v1571_v55  ;;  %v1713_v51 = vadd.f32 %v1711_v39, %v1707_v5  ;;  %v1604_v38 = vadd.f32 %v1602_v49, %v1598_v22  ;;  %v1710_v40 = vmul.f32 %v9565_v18, %v1571_v55  ;;  %2428 = vrot.lane.b32.xlu1 %v5836_v24, %s9097_s25 }
 0x194   : > { %v9566_v52 = vstv %s5919_s5  ;;  %v9567_v28 = vstv %s5927_s10  ;;  %v9568_v31 = vstv %s5929_s1  ;;  %s6815_s1 = sld [smem:[#allocation4 + $0x33]]  ;;  %s9583_s10 = sld [smem:[#allocation167_spill]] }
 0x195   : > { %v1658_v47 = vadd.f32 %v1656_v19, %v1652_v23  ;;  %v1609_v10 = vmul.f32 %v9566_v52, %v1577_v2  ;;  %v1663_v35 = vmul.f32 %v9567_v28, %v1577_v2  ;;  %v1717_v9 = vmul.f32 %v9568_v31, %v1577_v2  ;;  %2426 = vrot.lane.b32.xlu0 %v5767_v57, %s9097_s25  ;;  %v9581_v2 = vld [vmem:[#allocation180_spill] sm:$0xff]  ;;  %s6967_s5 = sld [smem:[#allocation4 + $0x34]] }
 0x196   : > { %v1712_v53 = vadd.f32 %v1710_v40, %v1706_v12  ;;  %v9569_v5 = vmov %v9566_v52  ;;  %v9570_v39 = vmov %v9567_v28  ;;  %v9571_v49 = vmov %v9568_v31  ;;  %v1581_v28 = vpop.permute.xlu1 %1580 }
 0x197   : > { %v1608_v22 = vmul.f32 %v9569_v5, %v1575_v4  ;;  %v1662_v55 = vmul.f32 %v9570_v39, %v1575_v4  ;;  %v1716_v18 = vmul.f32 %v9571_v49, %v1575_v4  ;;  %v1611_v34 = vadd.f32 %v1609_v10, %v1605_v33  ;;  %v1579_v4 = vpop.permute.xlu0 %1578  ;;  %v9573_v33 = vld [vmem:[#allocation174_spill] sm:$0xff]  ;;  %2848 = vrot.lane.b32.xlu1 %v9581_v2, %s9104_s28 }
 0x198   : > { %v1665_v23 = vadd.f32 %v1663_v35, %v1659_v54  ;;  %v1719_v19 = vadd.f32 %v1717_v9, %v1713_v51  ;;  %v6813_v31 = vmul.f32 %v1825_v61, %v5314_v37  ;;  %v9574_v51 = vld [vmem:[#allocation175_spill] sm:$0xff]  ;;  %v9575_v35 = vld [vmem:[#allocation177_spill] sm:$0xff]  ;;  %v9580_v61 = vld [vmem:[#allocation178_spill] sm:$0xff] }
 0x199   : > { %v1610_v12 = vadd.f32 %v1608_v22, %v1604_v38  ;;  %v1664_v40 = vadd.f32 %v1662_v55, %v1658_v47  ;;  %v1718_v52 = vadd.f32 %v1716_v18, %v1712_v53  ;;  %v1617_v54 = vadd.f32 %v9573_v33, %v1611_v34  ;;  %v9579_v55 = vld [vmem:[#allocation176_spill] sm:$0xff] }
 0x19a   : > { %v1671_v10 = vadd.f32 %v9574_v51, %v1665_v23  ;;  %v1725_v9 = vadd.f32 %v9575_v35, %v1719_v19  ;;  %v9576_v38 = vstv %s5943_s3  ;;  %v9577_v53 = vstv %s9572_s6  ;;  %v9582_v23 = vld [vmem:[#allocation179_spill] sm:$0xff]  ;;  %s6974_s3 = sld [smem:[#allocation4 + $0x35]]  ;;  %s7089_s6 = sld [smem:[#allocation4 + $0x111]] }
 0x19b   : > { %v1621_v47 = vmul.f32 %v9576_v38, %v1581_v28  ;;  %v1675_v5 = vmul.f32 %v9577_v53, %v1581_v28  ;;  %v9578_v22 = vstv %s5961_s4  ;;  %v1616_v49 = vadd.f32 %v9579_v55, %v1610_v12  ;;  %v1585_v55 = vpop.permute.xlu1 %1584  ;;  %3056 = vrot.lane.b32.xlu1 %v6497_v11, %s9097_s25  ;;  %s9608_s4 = sld [smem:[#allocation182_spill]] }
 0x19c   : > { %v1729_v39 = vmul.f32 %v9578_v22, %v1581_v28  ;;  %v1670_v18 = vadd.f32 %v9580_v61, %v1664_v40  ;;  %v1724_v19 = vadd.f32 %v9582_v23, %v1718_v52  ;;  %v9584_v33 = vmov %v9576_v38  ;;  %v9586_v28 = vld [vmem:[#allocation183_spill] sm:$0xff] }
 0x19d   : > { %v1623_v34 = vadd.f32 %v1621_v47, %v1617_v54  ;;  %v1620_v51 = vmul.f32 %v9584_v33, %v1579_v4  ;;  %v9585_v35 = vmov %v9577_v53  ;;  %2846 = vrot.lane.b32.xlu0 %v9586_v28, %s9104_s28  ;;  %v1677_v12 = vadd.f32 %v1675_v5, %v1671_v10  ;;  %v1583_v54 = vpop.permute.xlu0 %1582 }
 0x19e   : > { %v1674_v38 = vmul.f32 %v9585_v35, %v1579_v4  ;;  %v1731_v53 = vadd.f32 %v1729_v39, %v1725_v9  ;;  %v9587_v40 = vmov %v9578_v22  ;;  %v6842_v52 = vmul.f32 %v1879_v45, %v5314_v37 }
 0x19f   : > { %v1728_v22 = vmul.f32 %v9587_v40, %v1579_v4  ;;  %v1622_v47 = vadd.f32 %v1620_v51, %v1616_v49  ;;  %v9588_v23 = vstv %s5963_s19  ;;  %v9589_v35 = vstv %s5974_s15  ;;  %2012 = vrot.lane.b32.xlu1 %v9501_v43, %s9097_s25  ;;  %s9602_s19 = sld [smem:[#allocation181_spill]]  ;;  %s6976_s15 = sld [smem:[#allocation4 + $0xa0]] }
 0x1a0   : > { %v1676_v61 = vadd.f32 %v1674_v38, %v1670_v18  ;;  %v1627_v33 = vmul.f32 %v9588_v23, %v1585_v55  ;;  %v1681_v44 = vmul.f32 %v9589_v35, %v1585_v55  ;;  %v9590_v10 = vstv %s9583_s10  ;;  %s7098_s10 = sld [smem:[#allocation4 + $0x3b]] }
 0x1a1   : > { %v1730_v7 = vadd.f32 %v1728_v22, %v1724_v19  ;;  %v1735_v9 = vmul.f32 %v9590_v10, %v1585_v55  ;;  %v9591_v5 = vmov %v9588_v23  ;;  %v9592_v4 = vmov %v9589_v35  ;;  %3054 = vrot.lane.b32.xlu0 %v6477_v36, %s9097_s25  ;;  %v1589_v35 = vpop.permute.xlu1 %1588 }
 0x1a2   : > { %v1626_v39 = vmul.f32 %v9591_v5, %v1583_v54  ;;  %v1680_v40 = vmul.f32 %v9592_v4, %v1583_v54  ;;  %v1629_v45 = vadd.f32 %v1627_v33, %v1623_v34  ;;  %v1683_v49 = vadd.f32 %v1681_v44, %v1677_v12  ;;  %v9595_v33 = vld [vmem:[#allocation184_spill] sm:$0xff]  ;;  %v9596_v12 = vld [vmem:[#allocation185_spill] sm:$0xff] }
 0x1a3   : > { %v9593_v18 = vmov %v9590_v10  ;;  %v9594_v19 = vstv %s6661_s2  ;;  %v1737_v22 = vadd.f32 %v1735_v9, %v1731_v53  ;;  %v1587_v10 = vpop.permute.xlu0 %1586  ;;  %v1837_v11 = vstv %s6815_s1  ;;  %v9598_v4 = vld [vmem:[#allocation188_spill] sm:$0xff]  ;;  %2432 = vrot.lane.b32.xlu1 %v6233_v21, %s9104_s28  ;;  %s7038_s2 = sld [smem:[#allocation4 + $0x10e]]  ;;  %s7092_s1 = sld [smem:[#allocation4 + $0x3a]] }
 0x1a4   : > { %v1734_v51 = vmul.f32 %v9593_v18, %v1583_v54  ;;  %v6863_v38 = vmul.f32 %v9594_v19, %v5314_v37  ;;  %v1628_v55 = vadd.f32 %v1626_v39, %v1622_v47  ;;  %v1682_v23 = vadd.f32 %v1680_v40, %v1676_v61  ;;  %v9601_v61 = vld [vmem:[#allocation186_spill] sm:$0xff]  ;;  %v9603_v39 = vld [vmem:[#allocation187_spill] sm:$0xff] }
 0x1a5   : > { %v1635_v44 = vadd.f32 %v9595_v33, %v1629_v45  ;;  %v1689_v54 = vadd.f32 %v9596_v12, %v1683_v49  ;;  %v9597_v5 = vstv %s5987_s29  ;;  %v1743_v18 = vadd.f32 %v9598_v4, %v1737_v22  ;;  %v9604_v45 = vld [vmem:[#allocation189_spill] sm:$0xff]  ;;  %2010 = vrot.lane.b32.xlu0 %v9393_v27, %s9097_s25  ;;  %s9623_s29 = sld [smem:[#allocation35_spill]] }
 0x1a6   : > { %v1736_v34 = vadd.f32 %v1734_v51, %v1730_v7  ;;  %v1639_v36 = vmul.f32 %v9597_v5, %v1589_v35  ;;  %v9599_v37 = vstv %s6005_s24  ;;  %v9600_v53 = vstv %s6013_s26  ;;  %s9613_s24 = sld [smem:[#allocation34_spill]]  ;;  %s6914_s26 = sld [smem:[#allocation4 + $0x10b]] }
 0x1a7   : > { %v1693_v19 = vmul.f32 %v9599_v37, %v1589_v35  ;;  %v1747_v47 = vmul.f32 %v9600_v53, %v1589_v35  ;;  %v1634_v9 = vadd.f32 %v9601_v61, %v1628_v55  ;;  %v1688_v40 = vadd.f32 %v9603_v39, %v1682_v23  ;;  %2640 = vrot.lane.b32.xlu1 %v9525_v13, %s9097_s25 }
 0x1a8   : > { %v1641_v7 = vadd.f32 %v1639_v36, %v1635_v44  ;;  %v1742_v49 = vadd.f32 %v9604_v45, %v1736_v34  ;;  %v9605_v51 = vmov %v9597_v5  ;;  %v9606_v35 = vmov %v9599_v37  ;;  %v1781_v37 = vpop.permute.xlu1 %1780 }
 0x1a9   : > { %v1638_v33 = vmul.f32 %v9605_v51, %v1587_v10  ;;  %v1695_v22 = vadd.f32 %v1693_v19, %v1689_v54  ;;  %v1749_v12 = vadd.f32 %v1747_v47, %v1743_v18  ;;  %v1692_v5 = vmul.f32 %v9606_v35, %v1587_v10  ;;  %2430 = vrot.lane.b32.xlu0 %v6241_v26, %s9104_s28 }
 0x1aa   : > { %v9607_v55 = vmov %v9600_v53  ;;  %v1779_v53 = vpop.permute.xlu0 %1778  ;;  %v6891_v23 = vadd.f32 %v1641_v7, %v6731_v1  ;;  %v9609_v44 = vstv %s6053_s20  ;;  %v9610_v61 = vstv %s9602_s19  ;;  %s6986_s20 = sld [smem:[#allocation4 + $0xa1]]  ;;  %s7100_s19 = sld [smem:[#allocation4 + $0xa6]] }
 0x1ab   : > { %v1746_v4 = vmul.f32 %v9607_v55, %v1587_v10  ;;  %v1640_v34 = vadd.f32 %v1638_v33, %v1634_v9  ;;  %v1805_v36 = vmul.f32 %v9609_v44, %v1781_v37  ;;  %v1859_v54 = vmul.f32 %v9610_v61, %v1781_v37  ;;  %v9611_v9 = vld [vmem:[#allocation190_spill] sm:$0xff]  ;;  %3060 = vrot.lane.b32.xlu1 %v6547_v15, %s9104_s28 }
 0x1ac   : > { %v6898_v18 = vadd.f32 %v1695_v22, %v6738_v14  ;;  %v6901_v10 = vadd.f32 %v1749_v12, %v6741_v29  ;;  %v1694_v19 = vadd.f32 %v1692_v5, %v1688_v40  ;;  %v9612_v14 = vstv %s9608_s4  ;;  %v1785_v33 = vpop.permute.xlu1 %1784  ;;  %v9616_v22 = vld [vmem:[#allocation191_spill] sm:$0xff]  ;;  %s7105_s4 = sld [smem:[#allocation4 + $0xa7]] }
 0x1ad   : > { %v1748_v47 = vadd.f32 %v1746_v4, %v1742_v49  ;;  %v6906_v1 = vadd.f32 %v1640_v34, %v6746_v30  ;;  %v1811_v7 = vadd.f32 %v9611_v9, %v1805_v36  ;;  %v1865_v39 = vadd.f32 %v6136_v6, %v1859_v54  ;;  %2638 = vrot.lane.b32.xlu0 %v9530_v56, %s9097_s25 }
 0x1ae   : > { %v1913_v45 = vmul.f32 %v9612_v14, %v1781_v37  ;;  %v6917_v29 = vadd.f32 %v1694_v19, %v6757_v58  ;;  %v9614_v30 = vmov %v9609_v44  ;;  %v9615_v51 = vmov %v9610_v61  ;;  %v1783_v58 = vpop.permute.xlu0 %1782  ;;  %v9620_v44 = vld [vmem:[#allocation192_spill] sm:$0xff] }
 0x1af   : > { %v6920_v40 = vadd.f32 %v1748_v47, %v6760_v17  ;;  %v1804_v49 = vmul.f32 %v9614_v30, %v1779_v53  ;;  %v1858_v6 = vmul.f32 %v9615_v51, %v1779_v53  ;;  %v9617_v35 = vmov %v9612_v14  ;;  %2224 = vrot.lane.b32.xlu1 %v9561_v3, %s9097_s25 }
 0x1b0   : > { %v1919_v12 = vadd.f32 %v9616_v22, %v1913_v45  ;;  %v1912_v5 = vmul.f32 %v9617_v35, %v1779_v53  ;;  %v9618_v55 = vstv %s6265_s8  ;;  %v9619_v37 = vstv %s6298_s18  ;;  %s6988_s18 = sld [smem:[#allocation4 + $0x10c]] }
 0x1b1   : > { %v1815_v4 = vmul.f32 %v9618_v55, %v1785_v33  ;;  %v1869_v34 = vmul.f32 %v9619_v37, %v1785_v33  ;;  %v1810_v17 = vadd.f32 %v6163_v0, %v1804_v49  ;;  %v1864_v36 = vadd.f32 %v9620_v44, %v1858_v6  ;;  %3058 = vrot.lane.b32.xlu0 %v6553_v63, %s9104_s28  ;;  %s9636_s8 = sld [smem:[#allocation29_spill]] }
 0x1b2   : > { %v9621_v61 = vstv %s9613_s24  ;;  %v9622_v19 = vmov %v9618_v55  ;;  %v1918_v53 = vadd.f32 %v6184_v32, %v1912_v5  ;;  %v9624_v45 = vmov %v9619_v37  ;;  %v1787_v37 = vpop.permute.xlu0 %1786  ;;  %s7111_s24 = sld [smem:[#allocation4 + $0x113]] }
 0x1b3   : > { %v1923_v54 = vmul.f32 %v9621_v61, %v1785_v33  ;;  %v1814_v47 = vmul.f32 %v9622_v19, %v1783_v58  ;;  %v1817_v9 = vadd.f32 %v1815_v4, %v1811_v7  ;;  %v1871_v14 = vadd.f32 %v1869_v34, %v1865_v39  ;;  %v1789_v33 = vpop.permute.xlu1 %1788 }
 0x1b4   : > { %v1868_v0 = vmul.f32 %v9624_v45, %v1783_v58  ;;  %v9625_v51 = vmov %v9621_v61  ;;  %v1891_v22 = vstv %s6888_s11  ;;  %v9626_v55 = vstv %s6334_s9  ;;  %s6997_s9 = sld [smem:[#allocation4 + $0x10d]]  ;;  %s7107_s11 = sld [smem:[#allocation4 + $0x112]] }
 0x1b5   : > { %v1925_v30 = vadd.f32 %v1923_v54, %v1919_v12  ;;  %v1816_v49 = vadd.f32 %v1814_v47, %v1810_v17  ;;  %v1922_v6 = vmul.f32 %v9625_v51, %v1783_v58  ;;  %v1821_v32 = vmul.f32 %v9626_v55, %v1789_v33  ;;  %2222 = vrot.lane.b32.xlu0 %v9564_v25, %s9097_s25 }
 0x1b6   : > { %v1870_v35 = vadd.f32 %v1868_v0, %v1864_v36  ;;  %v9627_v5 = vstv %s6353_s12  ;;  %v9628_v4 = vstv %s9623_s29  ;;  %v9629_v44 = vmov %v9626_v55  ;;  %s7013_s12 = sld [smem:[#allocation4 + $0x36]]  ;;  %s7138_s29 = sld [smem:[#allocation4 + $0x40]] }
 0x1b7   : > { %v1875_v7 = vmul.f32 %v9627_v5, %v1789_v33  ;;  %v1929_v39 = vmul.f32 %v9628_v4, %v1789_v33  ;;  %v1924_v34 = vadd.f32 %v1922_v6, %v1918_v53  ;;  %v1820_v61 = vmul.f32 %v9629_v44, %v1787_v37  ;;  %v1793_v6 = vpop.permute.xlu1 %1792 }
 0x1b8   : > { %v9630_v19 = vmov %v9627_v5  ;;  %v9631_v12 = vmov %v9628_v4  ;;  %v1823_v58 = vadd.f32 %v1821_v32, %v1817_v9  ;;  %v1945_v47 = vstv %s6914_s26  ;;  %v1791_v5 = vpop.permute.xlu0 %1790  ;;  %s7136_s26 = sld [smem:[#allocation4 + $0x3f]] }
 0x1b9   : > { %v1874_v45 = vmul.f32 %v9630_v19, %v1787_v37  ;;  %v1928_v17 = vmul.f32 %v9631_v12, %v1787_v37  ;;  %v1877_v36 = vadd.f32 %v1875_v7, %v1871_v14  ;;  %v1931_v54 = vadd.f32 %v1929_v39, %v1925_v30 }
 0x1ba   : > { %v1822_v53 = vadd.f32 %v1820_v61, %v1816_v49  ;;  %v2616_v33 = vrot.slane %v9530_v56, 1  ;;  %v1829_v55 = vadd.f32 %v6653_v60, %v1823_v58  ;;  %v9633_v30 = vstv %s9632_s21  ;;  %s7143_s21 = sld [smem:[#allocation4 + $0xab]] }
 0x1bb   : > { %v1876_v0 = vadd.f32 %v1874_v45, %v1870_v35  ;;  %v1930_v51 = vadd.f32 %v1928_v17, %v1924_v34  ;;  %v1883_v9 = vadd.f32 %v6688_v8, %v1877_v36  ;;  %v1937_v14 = vadd.f32 %v6791_v48, %v1931_v54  ;;  %v1797_v12 = vpop.permute.xlu1 %1796 }
 0x1bc   : > { %v1833_v32 = vmul.f32 %v9633_v30, %v1793_v6  ;;  %v9634_v49 = vstv %s6657_s14  ;;  %v9635_v7 = vstv %s6754_s0  ;;  %v1828_v60 = vadd.f32 %v6813_v31, %v1822_v53  ;;  %v1795_v53 = vpop.permute.xlu0 %1794  ;;  %s7033_s14 = sld [smem:[#allocation4 + $0xa3]]  ;;  %s7087_s0 = sld [smem:[#allocation4 + $0xa5]] }
 0x1bd   : > { %v1887_v35 = vmul.f32 %v9634_v49, %v1793_v6  ;;  %v1941_v4 = vmul.f32 %v9635_v7, %v1793_v6  ;;  %v1882_v39 = vadd.f32 %v6842_v52, %v1876_v0  ;;  %v1936_v48 = vadd.f32 %v6863_v38, %v1930_v51  ;;  %v4164_v0 = vld [vmem:[%s9636_s8 + $0x49] ss:$0 sm:$0xff] }
 0x1be   : > { %v1835_v8 = vadd.f32 %v1833_v32, %v1829_v55  ;;  %v9637_v37 = vmov %v9633_v30  ;;  %v9638_v44 = vmov %v9634_v49  ;;  %v9639_v19 = vmov %v9635_v7 }
 0x1bf   : > { %v1832_v34 = vmul.f32 %v9637_v37, %v1791_v5  ;;  %v1886_v61 = vmul.f32 %v9638_v44, %v1791_v5  ;;  %v1889_v31 = vadd.f32 %v1887_v35, %v1883_v9  ;;  %v1943_v52 = vadd.f32 %v1941_v4, %v1937_v14 }
 0x1c0   : > { %v1940_v45 = vmul.f32 %v9639_v19, %v1791_v5  ;;  %v2617_v17 = vrot.slane %v9525_v13, 1  ;;  %v1839_v38 = vmul.f32 %v1837_v11, %v1797_v12  ;;  %v1893_v54 = vmul.f32 %v1891_v22, %v1797_v12 }
 0x1c1   : > { %v1834_v58 = vadd.f32 %v1832_v34, %v1828_v60  ;;  %v1888_v36 = vadd.f32 %v1886_v61, %v1882_v39  ;;  %v1947_v6 = vmul.f32 %v1945_v47, %v1797_v12  ;;  %v1838_v55 = vmul.f32 %v1837_v11, %v1795_v53  ;;  %v1801_v60 = vpop.permute.xlu1 %1800 }
 0x1c2   : > { %v1942_v51 = vadd.f32 %v1940_v45, %v1936_v48  ;;  %v1892_v9 = vmul.f32 %v1891_v22, %v1795_v53  ;;  %v1841_v14 = vadd.f32 %v1839_v38, %v1835_v8  ;;  %v1895_v30 = vadd.f32 %v1893_v54, %v1889_v31  ;;  %v1799_v8 = vpop.permute.xlu0 %1798 }
 0x1c3   : > { %v1946_v32 = vmul.f32 %v1945_v47, %v1795_v53  ;;  %v2619_v5 = vsel %vm699_vm0, %v2617_v17, %v2616_v33  ;;  %v1949_v49 = vadd.f32 %v1947_v6, %v1943_v52  ;;  %v1840_v35 = vadd.f32 %v1838_v55, %v1834_v58 }
 0x1c4   : > { %v1894_v7 = vadd.f32 %v1892_v9, %v1888_v36  ;;  %v7011_v4 = vsel %vm686_vm1, %v2619_v5, %v4164_v0  ;;  %v7019_v22 = vsel %vm699_vm0, %v2616_v33, %v2617_v17  ;;  %v1843_v47 = vstv %s6967_s5  ;;  %s7145_s5 = sld [smem:[#allocation4 + $0xac]] }
 0x1c5   : > { %9640 = vst [vmem:[#allocation72_spill] sm:$0xff] %v7011_v4  ;;  %v1948_v11 = vadd.f32 %v1946_v32, %v1942_v51  ;;  %2644 = vrot.lane.b32.xlu1 %v7011_v4, %s9104_s28  ;;  %9641 = vst [vmem:[#allocation66_spill] sm:$0xff] %v7019_v22  ;;  %v1849_v39 = vstv %s6974_s3  ;;  %2642 = vrot.lane.b32.xlu0 %v7019_v22, %s9104_s28  ;;  %v1845_v48 = vmul.f32 %v1843_v47, %v5420_v50  ;;  %v1993_v58 = vpop.permute.xlu1 %1992  ;;  %s7154_s3 = sld [smem:[#allocation4 + $0x117]] }
 0x1c6   : > { %v1897_v37 = vstv %s6976_s15  ;;  %v1903_v34 = vstv %s6986_s20  ;;  %v1951_v44 = vstv %s6988_s18  ;;  %v1957_v31 = vstv %s6997_s9  ;;  %s7156_s15 = sld [smem:[#allocation4 + $0x118]]  ;;  %s7164_s20 = sld [smem:[#allocation4 + $0x3c]] }
 0x1c7   : > { %v1899_v33 = vmul.f32 %v1897_v37, %v5420_v50  ;;  %v1953_v61 = vmul.f32 %v1951_v44, %v5420_v50  ;;  %v1851_v52 = vmul.f32 %v1849_v39, %v1801_v60  ;;  %v1847_v19 = vadd.f32 %v1845_v48, %v1841_v14  ;;  %v1991_v50 = vpop.permute.xlu0 %1990  ;;  %s7170_s18 = sld [smem:[#allocation4 + $0xa8]]  ;;  %s7172_s9 = sld [smem:[#allocation4 + $0x114]] }
 0x1c8   : > { %v1905_v45 = vmul.f32 %v1903_v34, %v1801_v60  ;;  %v1959_v12 = vmul.f32 %v1957_v31, %v1801_v60  ;;  %v1844_v17 = vmul.f32 %v1843_v47, %v5424_v16  ;;  %v1898_v54 = vmul.f32 %v1897_v37, %v5424_v16  ;;  %v4534_v37 = vld [vmem:[%s4964_s17 + $0x68] sm:$0xff] }
 0x1c9   : > { %v1901_v36 = vadd.f32 %v1899_v33, %v1895_v30  ;;  %v1955_v38 = vadd.f32 %v1953_v61, %v1949_v49  ;;  %v1952_v53 = vmul.f32 %v1951_v44, %v5424_v16  ;;  %2852 = vrot.lane.b32.xlu1 %v9581_v2, %s9097_s25  ;;  %v1853_v0 = vadd.f32 %v1851_v52, %v1847_v19  ;;  %v1997_v60 = vpop.permute.xlu1 %1996 }
 0x1ca   : > { %v1846_v51 = vadd.f32 %v1844_v17, %v1840_v35  ;;  %v1850_v6 = vmul.f32 %v1849_v39, %v1799_v8  ;;  %v1904_v55 = vmul.f32 %v1903_v34, %v1799_v8  ;;  %2850 = vrot.lane.b32.xlu0 %v9586_v28, %s9097_s25  ;;  %v1900_v30 = vadd.f32 %v1898_v54, %v1894_v7 }
 0x1cb   : > { %v1907_v9 = vadd.f32 %v1905_v45, %v1901_v36  ;;  %v1961_v14 = vadd.f32 %v1959_v12, %v1955_v38  ;;  %v1954_v32 = vadd.f32 %v1952_v53, %v1948_v11  ;;  %v7052_v16 = vadd.f32 %v1853_v0, %v6891_v23  ;;  %v1995_v39 = vpop.permute.xlu0 %1994  ;;  %v4535_v36 = vld [vmem:[%s4964_s17 + $0x60] sm:$0xff] }
 0x1cc   : > { %v1852_v5 = vadd.f32 %v1850_v6, %v1846_v51  ;;  %v1958_v49 = vmul.f32 %v1957_v31, %v1799_v8  ;;  %v2015_v35 = vstv %s7013_s12  ;;  %v1906_v23 = vadd.f32 %v1904_v55, %v1900_v30  ;;  %s7185_s12 = sld [smem:[#allocation4 + $0x41]] }
 0x1cd   : > { %v7060_v7 = vadd.f32 %v1907_v9, %v6898_v18  ;;  %v7063_v11 = vadd.f32 %v1961_v14, %v6901_v10  ;;  %v2019_v47 = vstv %s7023_s23  ;;  %2436 = vrot.lane.b32.xlu1 %v6233_v21, %s9097_s25  ;;  %v2069_v44 = vstv %s7031_s27  ;;  %v2001_v45 = vpop.permute.xlu1 %2000  ;;  %s7194_s23 = sld [smem:[#allocation4 + $0xad]]  ;;  %s7196_s27 = sld [smem:[#allocation4 + $0x119]] }
 0x1ce   : > { %v7069_v8 = vadd.f32 %v1852_v5, %v6906_v1  ;;  %v1960_v48 = vadd.f32 %v1958_v49, %v1954_v32  ;;  %v2021_v34 = vmul.f32 %v4534_v37, %v2019_v47  ;;  %2434 = vrot.lane.b32.xlu0 %v6241_v26, %s9097_s25  ;;  %v7076_v18 = vadd.f32 %v1906_v23, %v6917_v29 }
 0x1cf   : > { %9642 = vst [vmem:[#allocation73_spill] sm:$0xff] %v7063_v11  ;;  %v2073_v10 = vstv %s7033_s14  ;;  %v2123_v33 = vstv %s7038_s2  ;;  %v2127_v61 = vstv %s7040_s16  ;;  %v2017_v19 = vmul.f32 %v2015_v35, %v1993_v58  ;;  %s7213_s14 = sld [smem:[#allocation4 + $0x48]]  ;;  %s7215_s2 = sld [smem:[#allocation4 + $0x49]] }
 0x1d0   : > { %9643 = vst [vmem:[#allocation67_spill] sm:$0xff] %v7069_v8  ;;  %9644 = vst [vmem:[#allocation76_spill] sm:$0xff] %v7076_v18  ;;  %v7082_v31 = vadd.f32 %v1960_v48, %v6920_v40  ;;  %v2075_v52 = vmul.f32 %v4534_v37, %v2073_v10  ;;  %v2129_v1 = vmul.f32 %v4534_v37, %v2127_v61  ;;  %v1999_v40 = vpop.permute.xlu0 %1998  ;;  %v2025_v14 = vstv %s7049_s7  ;;  %s7222_s16 = sld [smem:[#allocation4 + $0xb4]]  ;;  %s7224_s7 = sld [smem:[#allocation4 + $0xb5]] }
 0x1d1   : > { %v2071_v12 = vmul.f32 %v2069_v44, %v1993_v58  ;;  %v2125_v17 = vmul.f32 %v2123_v33, %v1993_v58  ;;  %v2020_v38 = vmul.f32 %v4535_v36, %v2019_v47  ;;  %v2074_v29 = vmul.f32 %v4535_v36, %v2073_v10  ;;  %v7096_v49 = vpop.permute.xlu1 %2004 }
 0x1d2   : > { %9645 = vst [vmem:[#allocation78_spill] sm:$0xff] %v7082_v31  ;;  %v2023_v54 = vadd.f32 %v2021_v34, %v2017_v19  ;;  %v2128_v53 = vmul.f32 %v4535_v36, %v2127_v61  ;;  %v2016_v0 = vmul.f32 %v2015_v35, %v1991_v50  ;;  %v2070_v51 = vmul.f32 %v2069_v44, %v1991_v50 }
 0x1d3   : > { %v2077_v6 = vadd.f32 %v2075_v52, %v2071_v12  ;;  %v2131_v55 = vadd.f32 %v2129_v1, %v2125_v17  ;;  %v2124_v9 = vmul.f32 %v2123_v33, %v1991_v50  ;;  %v2079_v32 = vstv %s7055_s13  ;;  %v4197_v52 = vld [vmem:[%s9636_s8 + $0x51] ss:$0 sm:$0xff]  ;;  %s7240_s13 = sld [smem:[#allocation4 + $0x120]] }
 0x1d4   : > { %v2022_v58 = vadd.f32 %v2020_v38, %v2016_v0  ;;  %v2076_v30 = vadd.f32 %v2074_v29, %v2070_v51  ;;  %v2133_v5 = vstv %s7057_s30  ;;  %v2027_v47 = vmul.f32 %v2025_v14, %v1997_v60  ;;  %v7102_v35 = vpop.permute.xlu0 %2002  ;;  %s7242_s30 = sld [smem:[#allocation4 + $0x121]] }
 0x1d5   : > { %v2130_v23 = vadd.f32 %v2128_v53, %v2124_v9  ;;  %v2081_v48 = vmul.f32 %v2079_v32, %v1997_v60  ;;  %v2135_v37 = vmul.f32 %v2133_v5, %v1997_v60  ;;  %v2026_v50 = vmul.f32 %v2025_v14, %v1995_v39  ;;  %v7114_v36 = vpop.permute.xlu1 %2202 }
 0x1d6   : > { %v2080_v34 = vmul.f32 %v2079_v32, %v1995_v39  ;;  %v2134_v44 = vmul.f32 %v2133_v5, %v1995_v39  ;;  %v2828_v10 = vrot.slane %v9586_v28, 1  ;;  %v2029_v33 = vadd.f32 %v2027_v47, %v2023_v54 }
 0x1d7   : > { %v2083_v60 = vadd.f32 %v2081_v48, %v2077_v6  ;;  %v2137_v61 = vadd.f32 %v2135_v37, %v2131_v55  ;;  %v2829_v1 = vrot.slane %v9581_v2, 1  ;;  %v2028_v19 = vadd.f32 %v2026_v50, %v2022_v58 }
 0x1d8   : > { %v2082_v12 = vadd.f32 %v2080_v34, %v2076_v30  ;;  %v2136_v17 = vadd.f32 %v2134_v44, %v2130_v23  ;;  %v2031_v39 = vstv %s7084_s22  ;;  %v2085_v54 = vstv %s7087_s0  ;;  %v7124_v0 = vpop.permute.xlu0 %2006  ;;  %s7260_s22 = sld [smem:[#allocation4 + $0x42]]  ;;  %s7270_s0 = sld [smem:[#allocation4 + $0xae]] }
 0x1d9   : > { %v2831_v38 = vsel %vm699_vm0, %v2829_v1, %v2828_v10  ;;  %v7120_v29 = vsel %vm699_vm0, %v2828_v10, %v2829_v1  ;;  %v2139_v53 = vstv %s7089_s6  ;;  %v2033_v6 = vmul.f32 %v2031_v39, %v2001_v45  ;;  %s7277_s6 = sld [smem:[#allocation4 + $0x11a]] }
 0x1da   : > { %9646 = vst [vmem:[#allocation79_spill] sm:$0xff] %v7120_v29  ;;  %v7128_v51 = vsel %vm686_vm1, %v2831_v38, %v4197_v52  ;;  %2854 = vrot.lane.b32.xlu0 %v7120_v29, %s9104_s28  ;;  %v2087_v55 = vmul.f32 %v2085_v54, %v2001_v45  ;;  %v2141_v9 = vmul.f32 %v2139_v53, %v2001_v45  ;;  %v2037_v32 = vstv %s7092_s1  ;;  %v7140_v45 = vpop.permute.xlu1 %2206  ;;  %s7292_s1 = sld [smem:[#allocation4 + $0xb6]] }
 0x1db   : > { %9647 = vst [vmem:[#allocation81_spill] sm:$0xff] %v7128_v51  ;;  %2856 = vrot.lane.b32.xlu1 %v7128_v51, %s9104_s28  ;;  %v2032_v14 = vmul.f32 %v2031_v39, %v1999_v40  ;;  %v2086_v58 = vmul.f32 %v2085_v54, %v1999_v40  ;;  %v2140_v30 = vmul.f32 %v2139_v53, %v1999_v40  ;;  %v2043_v40 = vstv %s7098_s10  ;;  %s7300_s10 = sld [smem:[#allocation4 + $0x122]] }
 0x1dc   : > { %v2035_v5 = vadd.f32 %v2033_v6, %v2029_v33  ;;  %v2089_v23 = vadd.f32 %v2087_v55, %v2083_v60  ;;  %v2143_v47 = vadd.f32 %v2141_v9, %v2137_v61  ;;  %v2039_v48 = vmul.f32 %v2037_v32, %v5538_v46  ;;  %v7147_v44 = vpop.permute.xlu0 %2204 }
 0x1dd   : > { %v2034_v37 = vadd.f32 %v2032_v14, %v2028_v19  ;;  %v2088_v50 = vadd.f32 %v2086_v58, %v2082_v12  ;;  %v2142_v34 = vadd.f32 %v2140_v30, %v2136_v17  ;;  %v2091_v33 = vstv %s7100_s19  ;;  %s7309_s19 = sld [smem:[#allocation4 + $0x51]] }
 0x1de   : > { %3062 = vrot.lane.b32.xlu0 %v6553_v63, %s9097_s25  ;;  %v2041_v10 = vadd.f32 %v2039_v48, %v2035_v5  ;;  %v2097_v60 = vstv %s7105_s4  ;;  %v2145_v61 = vstv %s7107_s11  ;;  %v2093_v52 = vmul.f32 %v2091_v33, %v5538_v46  ;;  %v7174_v53 = vpop.permute.xlu1 %2414  ;;  %s7314_s4 = sld [smem:[#allocation4 + $0x52]]  ;;  %s7321_s11 = sld [smem:[#allocation4 + $0xbd]] }
 0x1df   : > { %3064 = vrot.lane.b32.xlu1 %v6547_v15, %s9097_s25  ;;  %v2147_v1 = vmul.f32 %v2145_v61, %v5538_v46  ;;  %v2151_v19 = vstv %s7111_s24  ;;  %v2045_v12 = vmul.f32 %v2043_v40, %v7096_v49  ;;  %v2099_v17 = vmul.f32 %v2097_v60, %v7096_v49  ;;  %s7323_s24 = sld [smem:[#allocation4 + $0xbe]] }
 0x1e0   : > { %v2153_v39 = vmul.f32 %v2151_v19, %v7096_v49  ;;  %v2038_v38 = vmul.f32 %v2037_v32, %v5542_v59  ;;  %v2092_v54 = vmul.f32 %v2091_v33, %v5542_v59  ;;  %v2095_v46 = vadd.f32 %v2093_v52, %v2089_v23  ;;  %v7179_v14 = vpop.permute.xlu0 %2208 }
 0x1e1   : > { %v2149_v6 = vadd.f32 %v2147_v1, %v2143_v47  ;;  %v7176_v55 = vadd.f32 %v2045_v12, %v2041_v10  ;;  %v2146_v9 = vmul.f32 %v2145_v61, %v5542_v59  ;;  %v2044_v30 = vmul.f32 %v2043_v40, %v7102_v35 }
 0x1e2   : > { %v2040_v49 = vadd.f32 %v2038_v38, %v2034_v37  ;;  %v2094_v58 = vadd.f32 %v2092_v54, %v2088_v50  ;;  %v2098_v32 = vmul.f32 %v2097_v60, %v7102_v35  ;;  %2646 = vrot.lane.b32.xlu0 %v7019_v22, %s9097_s25  ;;  %v7187_v5 = vadd.f32 %v2099_v17, %v2095_v46  ;;  %v7200_v10 = vpop.permute.xlu1 %2210 }
 0x1e3   : > { %v7189_v59 = vadd.f32 %v2153_v39, %v2149_v6  ;;  %v2148_v23 = vadd.f32 %v2146_v9, %v2142_v34  ;;  %v2152_v47 = vmul.f32 %v2151_v19, %v7102_v35  ;;  %2648 = vrot.lane.b32.xlu1 %v7011_v4, %s9097_s25  ;;  %v2227_v50 = vstv %s7136_s26  ;;  %v4536_v34 = vld [vmem:[%s4964_s17 + $0x70] sm:$0xff]  ;;  %s7331_s26 = sld [smem:[#allocation4 + $0x12a]] }
 0x1e4   : > { %v2046_v48 = vadd.f32 %v2044_v30, %v2040_v49  ;;  %v2100_v37 = vadd.f32 %v2098_v32, %v2094_v58  ;;  %v2231_v40 = vstv %s7138_s29  ;;  %v2281_v60 = vstv %s7143_s21  ;;  %v7205_v52 = vpop.permute.xlu0 %2416  ;;  %s7348_s29 = sld [smem:[#allocation4 + $0x4b]]  ;;  %s7350_s21 = sld [smem:[#allocation4 + $0xb7]] }
 0x1e5   : > { %v2154_v33 = vadd.f32 %v2152_v47, %v2148_v23  ;;  %v2232_v35 = vmul.f32 %v4536_v34, %v2231_v40  ;;  %v2285_v61 = vstv %s7145_s5  ;;  %v2335_v19 = vstv %s7154_s3  ;;  %s7355_s5 = sld [smem:[#allocation4 + $0x123]] }
 0x1e6   : > { %v2286_v1 = vmul.f32 %v4536_v34, %v2285_v61  ;;  %v2339_v12 = vstv %s7156_s15  ;;  %v2228_v17 = vmul.f32 %v2227_v50, %v7114_v36  ;;  %v2282_v38 = vmul.f32 %v2281_v60, %v7114_v36  ;;  %v7226_v30 = vpop.permute.xlu1 %2418  ;;  %s7372_s3 = sld [smem:[#allocation4 + $0x53]]  ;;  %s7374_s15 = sld [smem:[#allocation4 + $0xbf]] }
 0x1e7   : > { %v2340_v39 = vmul.f32 %v4536_v34, %v2339_v12  ;;  %v2336_v54 = vmul.f32 %v2335_v19, %v7114_v36  ;;  %v9006_v46 = vstv %s7164_s20  ;;  %v9010_v9 = vstv %s7170_s18  ;;  %v4230_v34 = vld [vmem:[%s9636_s8 + $0x59] ss:$0 sm:$0xff] }
 0x1e8   : > { %v2234_v6 = vadd.f32 %v2232_v35, %v2228_v17  ;;  %v9009_v49 = vstv %s7172_s9  ;;  %v2050_v58 = vmul.f32 %v9006_v46, %v7124_v0  ;;  %v2288_v36 = vadd.f32 %v2286_v1, %v2282_v38  ;;  %v7244_v1 = vpop.permute.xlu0 %2212 }
 0x1e9   : > { %v2342_v32 = vadd.f32 %v2340_v39, %v2336_v54  ;;  %v2104_v23 = vmul.f32 %v9010_v9, %v7124_v0  ;;  %v2158_v47 = vmul.f32 %v9009_v49, %v7124_v0  ;;  %v3040_v17 = vrot.slane %v6553_v63, 1 }
 0x1ea   : > { %v7235_v35 = vadd.f32 %v2050_v58, %v2046_v48  ;;  %v3041_v46 = vrot.slane %v6547_v15, 1  ;;  %v2237_v22 = vstv %s7185_s12  ;;  %v2291_v0 = vstv %s7194_s23  ;;  %s7380_s12 = sld [smem:[#allocation4 + $0x12b]] }
 0x1eb   : > { %v7246_v39 = vadd.f32 %v2104_v23, %v2100_v37  ;;  %v7248_v38 = vadd.f32 %v2158_v47, %v2154_v33  ;;  %v2345_v54 = vstv %s7196_s27  ;;  %v2238_v49 = vmul.f32 %v2237_v22, %v7140_v45  ;;  %v4537_v23 = vld [vmem:[%s4964_s17 + $0x78] sm:$0xff]  ;;  %s7405_s23 = sld [smem:[#allocation4 + $0x133]]  ;;  %s7410_s27 = sld [smem:[#allocation4 + $0x132]] }
 0x1ec   : > { %v3043_v48 = vsel %vm699_vm0, %v3041_v46, %v3040_v17  ;;  %v7256_v58 = vsel %vm699_vm0, %v3040_v17, %v3041_v46  ;;  %v2292_v9 = vmul.f32 %v2291_v0, %v7140_v45  ;;  %v2346_v33 = vmul.f32 %v2345_v54, %v7140_v45  ;;  %v7272_v17 = vpop.permute.xlu1 %2626  ;;  %v7285_v2 = vpop.permute.xlu0 %2420 }
 0x1ed   : > { %9648 = vst [vmem:[#allocation86_spill] sm:$0xff] %v7256_v58  ;;  %v7264_v37 = vsel %vm686_vm1, %v3043_v48, %v4230_v34  ;;  %3066 = vrot.lane.b32.xlu0 %v7256_v58, %s9104_s28  ;;  %v2233_v46 = vmul.f32 %v4537_v23, %v2231_v40  ;;  %v2287_v47 = vmul.f32 %v4537_v23, %v2285_v61  ;;  %v2439_v61 = vstv %s7213_s14  ;;  %s7426_s14 = sld [smem:[#allocation4 + $0x43]] }
 0x1ee   : > { %9649 = vst [vmem:[#allocation87_spill] sm:$0xff] %v7264_v37  ;;  %3068 = vrot.lane.b32.xlu1 %v7264_v37, %s9104_s28  ;;  %v2240_v34 = vadd.f32 %v2238_v49, %v2234_v6  ;;  %v2294_v48 = vadd.f32 %v2292_v9, %v2288_v36  ;;  %v2229_v42 = vmul.f32 %v2227_v50, %v7147_v44  ;;  %v2443_v15 = vstv %s7215_s2  ;;  %v4538_v50 = vld [vmem:[%s4964_s17 + $0x80] sm:$0xff]  ;;  %s7290_s28 = sld [smem:[#allocation4 + $0x4a]]  ;;  %s7428_s2 = sld [smem:[#allocation4 + $0x44]] }
 0x1ef   : > { %v2348_v45 = vadd.f32 %v2346_v33, %v2342_v32  ;;  %v2341_v41 = vmul.f32 %v4537_v23, %v2339_v12  ;;  %v2283_v40 = vmul.f32 %v2281_v60, %v7147_v44  ;;  %v2337_v63 = vmul.f32 %v2335_v19, %v7147_v44 }
 0x1f0   : > { %v2493_v4 = vstv %s7222_s16  ;;  %v2497_v28 = vstv %s7224_s7  ;;  %v2235_v6 = vadd.f32 %v2233_v46, %v2229_v42  ;;  %v2444_v49 = vmul.f32 %v4538_v50, %v2443_v15  ;;  %v7305_v46 = vpop.permute.xlu1 %2422  ;;  %s7430_s16 = sld [smem:[#allocation4 + $0xaf]]  ;;  %s7432_s7 = sld [smem:[#allocation4 + $0xb0]] }
 0x1f1   : > { %v2289_v9 = vadd.f32 %v2287_v47, %v2283_v40  ;;  %2858 = vrot.lane.b32.xlu0 %v7120_v29, %s9097_s25  ;;  %v2498_v12 = vmul.f32 %v4538_v50, %v2497_v28  ;;  %v2547_v44 = vstv %s7240_s13  ;;  %v2551_v60 = vstv %s7242_s30  ;;  %s7434_s13 = sld [smem:[#allocation4 + $0x11b]]  ;;  %s7436_s30 = sld [smem:[#allocation4 + $0x11c]] }
 0x1f2   : > { %2860 = vrot.lane.b32.xlu1 %v7128_v51, %s9097_s25  ;;  %v2440_v19 = vmul.f32 %v2439_v61, %v7174_v53  ;;  %v2494_v42 = vmul.f32 %v2493_v4, %v7174_v53  ;;  %v2552_v36 = vmul.f32 %v4538_v50, %v2551_v60  ;;  %v2548_v32 = vmul.f32 %v2547_v44, %v7174_v53 }
 0x1f3   : > { %v2239_v33 = vmul.f32 %v2237_v22, %v7179_v14  ;;  %v2293_v23 = vmul.f32 %v2291_v0, %v7179_v14  ;;  %v2343_v47 = vadd.f32 %v2341_v41, %v2337_v63  ;;  %v2347_v29 = vmul.f32 %v2345_v54, %v7179_v14  ;;  %v7325_v0 = vpop.permute.xlu0 %2628 }
 0x1f4   : > { %v2446_v40 = vadd.f32 %v2444_v49, %v2440_v19  ;;  %v2243_v51 = vstv %s7260_s22  ;;  %v2500_v26 = vadd.f32 %v2498_v12, %v2494_v42  ;;  %v2297_v22 = vstv %s7270_s0  ;;  %s7495_s22 = sld [smem:[#allocation4 + $0x134]]  ;;  %s7518_s0 = sld [smem:[#allocation4 + $0x5a]] }
 0x1f5   : > { %v2241_v21 = vadd.f32 %v2239_v33, %v2235_v6  ;;  %v2295_v50 = vadd.f32 %v2293_v23, %v2289_v9  ;;  %3070 = vrot.lane.b32.xlu0 %v7256_v58, %s9097_s25  ;;  %v2349_v53 = vadd.f32 %v2347_v29, %v2343_v47  ;;  %v2351_v41 = vstv %s7277_s6  ;;  %v4539_v29 = vld [vmem:[%s4964_s17 + $0x88] sm:$0xff]  ;;  %s7520_s6 = sld [smem:[#allocation4 + $0x5b]] }
 0x1f6   : > { %3072 = vrot.lane.b32.xlu1 %v7264_v37, %s9097_s25  ;;  %v2244_v63 = vmul.f32 %v2243_v51, %v7200_v10  ;;  %v2298_v14 = vmul.f32 %v2297_v22, %v7200_v10  ;;  %v2554_v54 = vadd.f32 %v2552_v36, %v2548_v32  ;;  %v2352_v6 = vmul.f32 %v2351_v41, %v7200_v10  ;;  %s7329_s25 = sld [smem:[#allocation4 + $0x129]] }
 0x1f7   : > { %v2445_v9 = vmul.f32 %v4539_v29, %v2443_v15  ;;  %v2499_v49 = vmul.f32 %v4539_v29, %v2497_v28  ;;  %v2441_v42 = vmul.f32 %v2439_v61, %v7205_v52  ;;  %v2495_v33 = vmul.f32 %v2493_v4, %v7205_v52  ;;  %v7343_v15 = vpop.permute.xlu1 %2630 }
 0x1f8   : > { %v7333_v12 = vadd.f32 %v2244_v63, %v2240_v34  ;;  %v7335_v19 = vadd.f32 %v2298_v14, %v2294_v48  ;;  %v7339_v23 = vadd.f32 %v2352_v6, %v2348_v45  ;;  %v2553_v36 = vmul.f32 %v4539_v29, %v2551_v60  ;;  %v2425_v14 = vpop.permute.xlu0 %2424 }
 0x1f9   : > { %v2449_v10 = vstv %s7290_s28  ;;  %v2503_v32 = vstv %s7292_s1  ;;  %v2447_v28 = vadd.f32 %v2445_v9, %v2441_v42  ;;  %v2549_v47 = vmul.f32 %v2547_v44, %v7205_v52  ;;  %s7545_s28 = sld [smem:[#allocation4 + $0xc6]]  ;;  %s4208_s1 = sld [smem:[#allocation4 + $0xc7]] }
 0x1fa   : > { %v2557_v58 = vstv %s7300_s10  ;;  %v2450_v34 = vmul.f32 %v2449_v10, %v7226_v30  ;;  %v2501_v4 = vadd.f32 %v2499_v49, %v2495_v33  ;;  %v2504_v48 = vmul.f32 %v2503_v32, %v7226_v30  ;;  %s7553_s10 = sld [smem:[#allocation4 + $0x5c]] }
 0x1fb   : > { %v2558_v45 = vmul.f32 %v2557_v58, %v7226_v30  ;;  %v2245_v61 = vmul.f32 %v2243_v51, %v7244_v1  ;;  %v2299_v44 = vmul.f32 %v2297_v22, %v7244_v1  ;;  %v2353_v60 = vmul.f32 %v2351_v41, %v7244_v1 }
 0x1fc   : > { %v2452_v52 = vadd.f32 %v2450_v34, %v2446_v40  ;;  %v2651_v63 = vstv %s7309_s19  ;;  %v2506_v6 = vadd.f32 %v2504_v48, %v2500_v26  ;;  %v2655_v30 = vstv %s7314_s4  ;;  %v4540_v40 = vld [vmem:[%s4964_s17 + $0x90] sm:$0xff]  ;;  %s7555_s19 = sld [smem:[#allocation4 + $0xc8]]  ;;  %s7557_s4 = sld [smem:[#allocation4 + $0x63]] }
 0x1fd   : > { %v2560_v29 = vadd.f32 %v2558_v45, %v2554_v54  ;;  %v7360_v9 = vadd.f32 %v2245_v61, %v2241_v21  ;;  %v2555_v49 = vadd.f32 %v2553_v36, %v2549_v47  ;;  %v7363_v42 = vadd.f32 %v2299_v44, %v2295_v50  ;;  %v7376_v21 = vpop.permute.xlu1 %2838  ;;  %v2633_v44 = vpop.permute.xlu0 %2632 }
 0x1fe   : > { %v7365_v51 = vadd.f32 %v2353_v60, %v2349_v53  ;;  %v2705_v33 = vstv %s7321_s11  ;;  %v2656_v34 = vmul.f32 %v4540_v40, %v2655_v30  ;;  %v2709_v22 = vstv %s7323_s24  ;;  %s7561_s11 = sld [smem:[#allocation4 + $0x64]]  ;;  %s7563_s24 = sld [smem:[#allocation4 + $0xd0]] }
 0x1ff   : > { %v2759_v37 = vstv %s7329_s25  ;;  %v2763_v1 = vstv %s7331_s26  ;;  %v2710_v26 = vmul.f32 %v4540_v40, %v2709_v22  ;;  %v2652_v53 = vmul.f32 %v2651_v63, %v7272_v17  ;;  %s7567_s25 = sld [smem:[#allocation4 + $0xcf]]  ;;  %s7569_s26 = sld [smem:[#allocation4 + $0x13c]] }
 0x200   : > { %v2764_v50 = vmul.f32 %v4540_v40, %v2763_v1  ;;  %v2706_v41 = vmul.f32 %v2705_v33, %v7272_v17  ;;  %v2760_v54 = vmul.f32 %v2759_v37, %v7272_v17  ;;  %v2451_v36 = vmul.f32 %v2449_v10, %v7285_v2 }
 0x201   : > { %v2505_v47 = vmul.f32 %v2503_v32, %v7285_v2  ;;  %v2559_v48 = vmul.f32 %v2557_v58, %v7285_v2  ;;  %v2455_v45 = vstv %s7348_s29  ;;  %v2509_v61 = vstv %s7350_s21  ;;  %v2009_v58 = vpop.permute.xlu1 %2008  ;;  %s7571_s29 = sld [smem:[#allocation4 + $0x13b]]  ;;  %s7575_s21 = sld [smem:[#allocation4 + $0x45]] }
 0x202   : > { %v2453_v60 = vadd.f32 %v2451_v36, %v2447_v28  ;;  %v2563_v13 = vstv %s7355_s5  ;;  %v2456_v25 = vmul.f32 %v2455_v45, %v7305_v46  ;;  %v2510_v17 = vmul.f32 %v2509_v61, %v7305_v46  ;;  %s7582_s5 = sld [smem:[#allocation4 + $0xb1]] }
 0x203   : > { %v2507_v40 = vadd.f32 %v2505_v47, %v2501_v4  ;;  %v2561_v56 = vadd.f32 %v2559_v48, %v2555_v49  ;;  %v2564_v10 = vmul.f32 %v2563_v13, %v7305_v46  ;;  %v2658_v32 = vadd.f32 %v2656_v34, %v2652_v53  ;;  %v4541_v4 = vld [vmem:[%s4964_s17 + $0x98] sm:$0xff] }
 0x204   : > { %v2712_v3 = vadd.f32 %v2710_v26, %v2706_v41  ;;  %v2766_v2 = vadd.f32 %v2764_v50, %v2760_v54  ;;  %v7392_v31 = vadd.f32 %v2456_v25, %v2452_v52  ;;  %v7394_v18 = vadd.f32 %v2510_v17, %v2506_v6  ;;  %v7407_v25 = vpop.permute.xlu0 %2840 }
 0x205   : > { %v7396_v28 = vadd.f32 %v2564_v10, %v2560_v29  ;;  %v2657_v49 = vmul.f32 %v4541_v4, %v2655_v30  ;;  %v2711_v36 = vmul.f32 %v4541_v4, %v2709_v22  ;;  %v2765_v47 = vmul.f32 %v4541_v4, %v2763_v1 }
 0x206   : > { %v2661_v48 = vstv %s7372_s3  ;;  %v2715_v8 = vstv %s7374_s15  ;;  %v2653_v57 = vmul.f32 %v2651_v63, %v7325_v0  ;;  %v2769_v11 = vstv %s7380_s12  ;;  %s7584_s3 = sld [smem:[#allocation4 + $0x11d]]  ;;  %s7611_s12 = sld [smem:[#allocation4 + $0x4c]] }
 0x207   : > { %v2662_v46 = vmul.f32 %v2661_v48, %v7343_v15  ;;  %v2716_v34 = vmul.f32 %v2715_v8, %v7343_v15  ;;  %v2770_v52 = vmul.f32 %v2769_v11, %v7343_v15  ;;  %v2457_v6 = vmul.f32 %v2455_v45, %v2425_v14  ;;  %s7606_s15 = sld [smem:[#allocation4 + $0x3d]] }
 0x208   : > { %v2511_v29 = vmul.f32 %v2509_v61, %v2425_v14  ;;  %v2565_v30 = vmul.f32 %v2563_v13, %v2425_v14  ;;  %v2707_v22 = vmul.f32 %v2705_v33, %v7325_v0  ;;  %v2761_v63 = vmul.f32 %v2759_v37, %v7325_v0  ;;  %v2217_v13 = vpop.permute.xlu1 %2216 }
 0x209   : > { %v7414_v1 = vadd.f32 %v2662_v46, %v2658_v32  ;;  %v7416_v26 = vadd.f32 %v2716_v34, %v2712_v3  ;;  %v7418_v50 = vadd.f32 %v2770_v52, %v2766_v2  ;;  %v7420_v53 = vadd.f32 %v2457_v6, %v2453_v60  ;;  %v7477_v6 = vld [vmem:[%s4964_s17 + $0xa8] sm:$0xff] }
 0x20a   : > { %v7422_v41 = vadd.f32 %v2511_v29, %v2507_v40  ;;  %v7424_v15 = vadd.f32 %v2565_v30, %v2561_v56  ;;  %v2659_v3 = vadd.f32 %v2657_v49, %v2653_v57  ;;  %v2713_v37 = vadd.f32 %v2711_v36, %v2707_v22  ;;  %v2215_v56 = vpop.permute.xlu0 %2214  ;;  %v7461_v36 = vld [vmem:[%s4964_s17 + $0xa0] sm:$0xff] }
 0x20b   : > { %v2663_v0 = vmul.f32 %v2661_v48, %v2633_v44  ;;  %v2717_v14 = vmul.f32 %v2715_v8, %v2633_v44  ;;  %v2767_v33 = vadd.f32 %v2765_v47, %v2761_v63  ;;  %v2771_v54 = vmul.f32 %v2769_v11, %v2633_v44 }
 0x20c   : > { %v9650_v45 = vstv %s7164_s20  ;;  %v2975_v60 = vstv %s7405_s23  ;;  %v9651_v57 = vstv %s7170_s18  ;;  %v2971_v8 = vstv %s7410_s27  ;;  %v2637_v44 = vpop.permute.xlu1 %2636  ;;  %s7458_s20 = sld [smem:[#allocation4 + $0x54]]  ;;  %s7468_s18 = sld [smem:[#allocation4 + $0xc0]] }
 0x20d   : > { %v2051_v61 = vmul.f32 %v9650_v45, %v2009_v58  ;;  %v7441_v40 = vadd.f32 %v2663_v0, %v2659_v3  ;;  %v7443_v17 = vadd.f32 %v2717_v14, %v2713_v37  ;;  %v2105_v10 = vmul.f32 %v9651_v57, %v2009_v58  ;;  %s7613_s23 = sld [smem:[#allocation4 + $0xb8]]  ;;  %s7618_s27 = sld [smem:[#allocation4 + $0x4d]] }
 0x20e   : > { %v7448_v32 = vadd.f32 %v2771_v54, %v2767_v33  ;;  %v9652_v4 = vstv %s7172_s9  ;;  %v2976_v47 = vmul.f32 %v7461_v36, %v2975_v60  ;;  %s7470_s9 = sld [smem:[#allocation4 + $0x12c]]  ;;  %v2255_v46 = vstv %s7428_s2  ;;  %v2635_v52 = vpop.permute.xlu0 %2634  ;;  %s7626_s2 = sld [smem:[#allocation4 + $0xb9]] }
 0x20f   : > { %v7451_v2 = vadd.f32 %v2051_v61, %v7176_v55  ;;  %v2159_v11 = vmul.f32 %v9652_v4, %v2009_v58  ;;  %v7456_v49 = vadd.f32 %v2105_v10, %v7187_v5  ;;  %v2249_v55 = vstv %s7426_s14  ;;  %s7620_s14 = sld [smem:[#allocation4 + $0x124]] }
 0x210   : > { %v2972_v5 = vmul.f32 %v2971_v8, %v7376_v21  ;;  %v2251_v58 = vmul.f32 %v2249_v55, %v5726_v20  ;;  %v2303_v34 = vstv %s7430_s16  ;;  %v2977_v29 = vmul.f32 %v7477_v6, %v2975_v60  ;;  %v7488_v61 = vpop.permute.xlu1 %2844  ;;  %s7628_s16 = sld [smem:[#allocation4 + $0x125]] }
 0x211   : > { %v7465_v48 = vadd.f32 %v2159_v11, %v7189_v59  ;;  %v2973_v30 = vmul.f32 %v2971_v8, %v7407_v25  ;;  %v2305_v59 = vmul.f32 %v2303_v34, %v5726_v20  ;;  %v2309_v22 = vstv %s7432_s7  ;;  %s7634_s7 = sld [smem:[#allocation4 + $0x3e]] }
 0x212   : > { %v2357_v63 = vstv %s7434_s13  ;;  %v2363_v3 = vstv %s7436_s30  ;;  %v2253_v37 = vadd.f32 %v2251_v58, %v7360_v9  ;;  %v2257_v0 = vmul.f32 %v2255_v46, %v2217_v13  ;;  %s7636_s13 = sld [smem:[#allocation4 + $0xa9]]  ;;  %s7642_s30 = sld [smem:[#allocation4 + $0xaa]] }
 0x213   : > { %v2359_v14 = vmul.f32 %v2357_v63, %v5726_v20  ;;  %v2307_v33 = vadd.f32 %v2305_v59, %v7363_v42  ;;  %v2311_v54 = vmul.f32 %v2309_v22, %v2217_v13  ;;  %v2365_v45 = vmul.f32 %v2363_v3, %v2217_v13  ;;  %v7503_v59 = vpop.permute.xlu0 %2842 }
 0x214   : > { %v7490_v60 = vadd.f32 %v2257_v0, %v2253_v37  ;;  %v2250_v57 = vmul.f32 %v2249_v55, %v5672_v62  ;;  %v2304_v10 = vmul.f32 %v2303_v34, %v5672_v62  ;;  %v2358_v9 = vmul.f32 %v2357_v63, %v5672_v62 }
 0x215   : > { %v7497_v20 = vadd.f32 %v2311_v54, %v2307_v33  ;;  %v2361_v42 = vadd.f32 %v2359_v14, %v7365_v51  ;;  %v2256_v13 = vmul.f32 %v2255_v46, %v2215_v56  ;;  %v2310_v8 = vmul.f32 %v2309_v22, %v2215_v56 }
 0x216   : > { %v2252_v4 = vadd.f32 %v2250_v57, %v7333_v12  ;;  %v2306_v11 = vadd.f32 %v2304_v10, %v7335_v19  ;;  %v2360_v58 = vadd.f32 %v2358_v9, %v7339_v23  ;;  %v2364_v55 = vmul.f32 %v2363_v3, %v2215_v56  ;;  %v7516_v56 = vpop.permute.xlu1 %3052 }
 0x217   : > { %v7505_v34 = vadd.f32 %v2365_v45, %v2361_v42  ;;  %v2667_v62 = vstv %s7458_s20  ;;  %v2721_v63 = vstv %s7468_s18  ;;  %v2775_v37 = vstv %s7470_s9  ;;  %v7541_v9 = vpop.permute.xlu0 %3050  ;;  %s7644_s20 = sld [smem:[#allocation4 + $0x115]]  ;;  %s7653_s18 = sld [smem:[#allocation4 + $0x116]] }
 0x218   : > { %v7510_v0 = vadd.f32 %v2256_v13, %v2252_v4  ;;  %v7512_v33 = vadd.f32 %v2310_v8, %v2306_v11  ;;  %v7514_v51 = vadd.f32 %v2364_v55, %v2360_v58  ;;  %v2669_v12 = vmul.f32 %v2667_v62, %v2637_v44  ;;  %s7707_s9 = sld [smem:[#allocation4 + $0x5d]] }
 0x219   : > { %v2723_v46 = vmul.f32 %v2721_v63, %v2637_v44  ;;  %v2777_v19 = vmul.f32 %v2775_v37, %v2637_v44  ;;  %v2668_v22 = vmul.f32 %v2667_v62, %v2635_v52  ;;  %v2722_v23 = vmul.f32 %v2721_v63, %v2635_v52 }
 0x21a   : > { %v7523_v3 = vadd.f32 %v2669_v12, %v7441_v40  ;;  %v2776_v14 = vmul.f32 %v2775_v37, %v2635_v52  ;;  %v2981_v40 = vstv %s7495_s22  ;;  %v2978_v52 = vadd.f32 %v2976_v47, %v2972_v5  ;;  %v7551_v13 = vpop.permute.xlu1 %2220  ;;  %s7709_s22 = sld [smem:[#allocation4 + $0xc9]] }
 0x21b   : > { %v7526_v54 = vadd.f32 %v2723_v46, %v7443_v17  ;;  %v7529_v45 = vadd.f32 %v2777_v19, %v7448_v32  ;;  %v7532_v44 = vadd.f32 %v2668_v22, %v7414_v1  ;;  %v7535_v57 = vadd.f32 %v2722_v23, %v7416_v26  ;;  %v7565_v5 = vpop.permute.xlu0 %2218 }
 0x21c   : > { %9653 = vst [vmem:[#allocation90_spill] sm:$0xff] %v7523_v3  ;;  %v7538_v10 = vadd.f32 %v2776_v14, %v7418_v50  ;;  %v2979_v17 = vadd.f32 %v2977_v29, %v2973_v30  ;;  %v2983_v42 = vmul.f32 %v2981_v40, %v7488_v61  ;;  %v2982_v32 = vmul.f32 %v2981_v40, %v7503_v59 }
 0x21d   : > { %9654 = vst [vmem:[#allocation95_spill] sm:$0xff] %v7526_v54  ;;  %9655 = vst [vmem:[#allocation91_spill] sm:$0xff] %v7529_v45  ;;  %v2863_v50 = vstv %s7518_s0  ;;  %v2867_v47 = vstv %s7520_s6  ;;  %v2917_v4 = vstv %s7545_s28  ;;  %v2921_v11 = vstv %s4208_s1  ;;  %s7714_s0 = sld [smem:[#allocation4 + $0x135]]  ;;  %s7728_s28 = sld [smem:[#allocation4 + $0xd1]] }
 0x21e   : > { %9656 = vst [vmem:[#allocation93_spill] sm:$0xff] %v7532_v44  ;;  %9657 = vst [vmem:[#allocation96_spill] sm:$0xff] %v7535_v57  ;;  %v7547_v1 = vadd.f32 %v2983_v42, %v2979_v17  ;;  %v7549_v26 = vadd.f32 %v2982_v32, %v2978_v52  ;;  %v2868_v29 = vmul.f32 %v7461_v36, %v2867_v47  ;;  %v7577_v8 = vpop.permute.xlu1 %2428  ;;  %v2873_v37 = vstv %s7553_s10  ;;  %s7726_s6 = sld [smem:[#allocation4 + $0x65]]  ;;  %s7776_s10 = sld [smem:[#allocation4 + $0x4e]] }
 0x21f   : > { %9658 = vst [vmem:[#allocation97_spill] sm:$0xff] %v7538_v10  ;;  %v2864_v30 = vmul.f32 %v2863_v50, %v7376_v21  ;;  %v2869_v58 = vmul.f32 %v7477_v6, %v2867_v47  ;;  %v2865_v55 = vmul.f32 %v2863_v50, %v7407_v25  ;;  %v2923_v62 = vmul.f32 %v7477_v6, %v2921_v11  ;;  %v7589_v12 = vpop.permute.xlu0 %2426  ;;  %v4545_v10 = vld [vmem:[%s4964_s17 + $0xb0] sm:$0xff]  ;;  %s7733_s1 = sld [smem:[#allocation4 + $0x13d]] }
 0x220   : > { %9659 = vst [vmem:[#allocation100_spill] sm:$0xff] %v7549_v26  ;;  %v2919_v63 = vmul.f32 %v2917_v4, %v7407_v25  ;;  %v2922_v46 = vmul.f32 %v7461_v36, %v2921_v11  ;;  %v2918_v22 = vmul.f32 %v2917_v4, %v7376_v21  ;;  %v2927_v23 = vstv %s7555_s19  ;;  %s7786_s19 = sld [smem:[#allocation4 + $0xba]] }
 0x221   : > { %v2870_v19 = vadd.f32 %v2868_v29, %v2864_v30  ;;  %v2871_v14 = vadd.f32 %v2869_v58, %v2865_v55  ;;  %v3075_v40 = vstv %s7557_s4  ;;  %v3079_v52 = vstv %s7561_s11  ;;  %v4544_v30 = vld [vmem:[%s4964_s17 + $0xb8] sm:$0xff]  ;;  %s7788_s4 = sld [smem:[#allocation4 + $0x126]] }
 0x222   : > { %v3133_v17 = vstv %s7563_s24  ;;  %v2925_v42 = vadd.f32 %v2923_v62, %v2919_v63  ;;  %v2875_v6 = vmul.f32 %v2873_v37, %v7488_v61  ;;  %v3129_v25 = vstv %s7567_s25  ;;  %v7600_v50 = vpop.permute.xlu1 %2848  ;;  %s7799_s11 = sld [smem:[#allocation4 + $0x46]]  ;;  %s7805_s24 = sld [smem:[#allocation4 + $0x47]] }
 0x223   : > { %v3187_v32 = vstv %s7569_s26  ;;  %v2929_v36 = vmul.f32 %v2927_v23, %v7488_v61  ;;  %v2874_v21 = vmul.f32 %v2873_v37, %v7503_v59  ;;  %v2928_v47 = vmul.f32 %v2927_v23, %v7503_v59  ;;  %v7622_v59 = vpop.permute.xlu0 %2846  ;;  %s7811_s25 = sld [smem:[#allocation4 + $0xb2]]  ;;  %s7813_s26 = sld [smem:[#allocation4 + $0xb3]] }
 0x224   : > { %v3183_v29 = vstv %s7571_s29  ;;  %v3081_v4 = vmul.f32 %v4544_v30, %v3079_v52  ;;  %v3135_v11 = vmul.f32 %v4544_v30, %v3133_v17  ;;  %v3077_v58 = vmul.f32 %v3075_v40, %v7516_v56  ;;  %s7824_s29 = sld [smem:[#allocation4 + $0x11e]] }
 0x225   : > { %v2261_v55 = vstv %s7575_s21  ;;  %v3189_v62 = vmul.f32 %v4544_v30, %v3187_v32  ;;  %v3131_v61 = vmul.f32 %v3129_v25, %v7516_v56  ;;  %v2315_v63 = vstv %s7582_s5  ;;  %s7826_s21 = sld [smem:[#allocation4 + $0x11f]]  ;;  %s7888_s5 = sld [smem:[#allocation4 + $0x55]] }
 0x226   : > { %v2369_v37 = vstv %s7584_s3  ;;  %v3185_v23 = vmul.f32 %v3183_v29, %v7516_v56  ;;  %v3080_v57 = vmul.f32 %v4545_v10, %v3079_v52  ;;  %v3134_v44 = vmul.f32 %v4545_v10, %v3133_v17  ;;  %v7640_v17 = vpop.permute.xlu1 %3056  ;;  %s7890_s3 = sld [smem:[#allocation4 + $0xc1]] }
 0x227   : > { %v3188_v45 = vmul.f32 %v4545_v10, %v3187_v32  ;;  %v3076_v30 = vmul.f32 %v3075_v40, %v7541_v9  ;;  %v3130_v54 = vmul.f32 %v3129_v25, %v7541_v9  ;;  %v3184_v3 = vmul.f32 %v3183_v29, %v7541_v9 }
 0x228   : > { %v2263_v26 = vmul.f32 %v2261_v55, %v7551_v13  ;;  %v2924_v56 = vadd.f32 %v2922_v46, %v2918_v22  ;;  %v2317_v52 = vmul.f32 %v2315_v63, %v7551_v13  ;;  %v2371_v10 = vmul.f32 %v2369_v37, %v7551_v13 }
 0x229   : > { %v7646_v40 = vadd.f32 %v2875_v6, %v2871_v14  ;;  %v7648_v9 = vadd.f32 %v2929_v36, %v2925_v42  ;;  %v7650_v25 = vadd.f32 %v2874_v21, %v2870_v19  ;;  %v2262_v32 = vmul.f32 %v2261_v55, %v7565_v5  ;;  %v7672_v21 = vpop.permute.xlu0 %3054 }
 0x22a   : > { %v7655_v46 = vadd.f32 %v2928_v47, %v2924_v56  ;;  %v7657_v13 = vadd.f32 %v3081_v4, %v3077_v58  ;;  %v7659_v22 = vadd.f32 %v3135_v11, %v3131_v61  ;;  %v7661_v14 = vadd.f32 %v3189_v62, %v3185_v23  ;;  %v2013_v11 = vpop.permute.xlu1 %2012 }
 0x22b   : > { %v7663_v42 = vadd.f32 %v3080_v57, %v3076_v30  ;;  %v7665_v19 = vadd.f32 %v3134_v44, %v3130_v54  ;;  %v7667_v6 = vadd.f32 %v3188_v45, %v3184_v3  ;;  %v7670_v36 = vadd.f32 %v2263_v26, %v7490_v60 }
 0x22c   : > { %v7675_v47 = vadd.f32 %v2317_v52, %v7497_v20  ;;  %v7678_v29 = vadd.f32 %v2371_v10, %v7505_v34  ;;  %v2316_v57 = vmul.f32 %v2315_v63, %v7565_v5  ;;  %v7682_v3 = vmul.f32 %v2369_v37, %v7565_v5 }
 0x22d   : > { %9660 = vst [vmem:[#allocation103_spill] sm:$0xff] %v7667_v6  ;;  %9661 = vst [vmem:[#allocation98_spill] sm:$0xff] %v7670_v36  ;;  %v7685_v60 = vadd.f32 %v2262_v32, %v7510_v0  ;;  %v2461_v54 = vstv %s7611_s12  ;;  %v2055_v44 = vstv %s7606_s15  ;;  %v2515_v26 = vstv %s7613_s23  ;;  %v2011_v10 = vpop.permute.xlu0 %2010  ;;  %s7893_s15 = sld [smem:[#allocation4 + $0x12d]]  ;;  %s7899_s12 = sld [smem:[#allocation4 + $0x56]] }
 0x22e   : > { %9662 = vst [vmem:[#allocation104_spill] sm:$0xff] %v7675_v47  ;;  %9663 = vst [vmem:[#allocation105_spill] sm:$0xff] %v7678_v29  ;;  %v2463_v20 = vmul.f32 %v2461_v54, %v5836_v24  ;;  %v2057_v4 = vmul.f32 %v2055_v44, %v9501_v43  ;;  %v2517_v58 = vmul.f32 %v2515_v26, %v5836_v24  ;;  %v2569_v5 = vstv %s7620_s14  ;;  %s7904_s23 = sld [smem:[#allocation4 + $0xc2]]  ;;  %s7931_s14 = sld [smem:[#allocation4 + $0x66]] }
 0x22f   : > { %9664 = vst [vmem:[#allocation108_spill] sm:$0xff] %v7685_v60  ;;  %v2061_v62 = vstv %s7634_s7  ;;  %v2109_v61 = vstv %s7636_s13  ;;  %v2115_v63 = vstv %s7642_s30  ;;  %v2163_v37 = vstv %s7644_s20  ;;  %s7963_s7 = sld [smem:[#allocation4 + $0x4f]]  ;;  %s7969_s13 = sld [smem:[#allocation4 + $0x50]] }
 0x230   : > { %v2059_v0 = vadd.f32 %v2057_v4, %v7451_v2  ;;  %v2111_v23 = vmul.f32 %v2109_v61, %v9501_v43  ;;  %v2165_v30 = vmul.f32 %v2163_v37, %v9501_v43  ;;  %v2169_v56 = vstv %s7653_s18  ;;  %s7971_s30 = sld [smem:[#allocation4 + $0xbb]]  ;;  %s7978_s20 = sld [smem:[#allocation4 + $0xbc]] }
 0x231   : > { %v2063_v52 = vmul.f32 %v2061_v62, %v2013_v11  ;;  %v2117_v32 = vmul.f32 %v2115_v63, %v2013_v11  ;;  %v2171_v34 = vmul.f32 %v2169_v56, %v2013_v11  ;;  %v2056_v45 = vmul.f32 %v2055_v44, %v9393_v27  ;;  %s7980_s18 = sld [smem:[#allocation4 + $0x127]] }
 0x232   : > { %v2110_v55 = vmul.f32 %v2109_v61, %v9393_v27  ;;  %v2113_v2 = vadd.f32 %v2111_v23, %v7456_v49  ;;  %v2167_v4 = vadd.f32 %v2165_v30, %v7465_v48  ;;  %v2164_v43 = vmul.f32 %v2163_v37, %v9393_v27  ;;  %v7718_v61 = vpop.permute.xlu1 %2432 }
 0x233   : > { %v2065_v60 = vadd.f32 %v2063_v52, %v2059_v0  ;;  %v2058_v29 = vadd.f32 %v2056_v45, %v7235_v35  ;;  %v2062_v44 = vmul.f32 %v2061_v62, %v2011_v10  ;;  %v2116_v47 = vmul.f32 %v2115_v63, %v2011_v10  ;;  %v7741_v62 = vpop.permute.xlu0 %2430  ;;  %v9667_v63 = vld [vmem:[#allocation132_spill] sm:$0xff] }
 0x234   : > { %v2112_v11 = vadd.f32 %v2110_v55, %v7246_v39  ;;  %v9665_v36 = vstv %s7618_s27  ;;  %v2119_v48 = vadd.f32 %v2117_v32, %v2113_v2  ;;  %v2173_v0 = vadd.f32 %v2171_v34, %v2167_v4 }
 0x235   : > { %v2469_v6 = vmul.f32 %v9665_v36, %v7577_v8  ;;  %v7724_v49 = vadd.f32 %v2065_v60, %v7052_v16  ;;  %v2166_v27 = vadd.f32 %v2164_v43, %v7248_v38  ;;  %v2064_v35 = vadd.f32 %v2062_v44, %v2058_v29  ;;  %v9666_v60 = vld [vmem:[#allocation73_spill] sm:$0xff] }
 0x236   : > { %v2118_v39 = vadd.f32 %v2116_v47, %v2112_v11  ;;  %v2170_v45 = vmul.f32 %v2169_v56, %v2011_v10  ;;  %v2571_v55 = vmul.f32 %v2569_v5, %v5836_v24  ;;  %v2465_v36 = vadd.f32 %v2463_v20, %v7420_v53  ;;  %v9668_v47 = vld [vmem:[#allocation67_spill] sm:$0xff]  ;;  %v7770_v2 = vpop.permute.xlu1 %2640 }
 0x237   : > { %v7736_v16 = vadd.f32 %v2119_v48, %v7060_v7  ;;  %v7739_v34 = vadd.f32 %v2173_v0, %v9666_v60  ;;  %v2462_v38 = vmul.f32 %v2461_v54, %v9667_v63  ;;  %v7745_v29 = vadd.f32 %v2064_v35, %v9668_v47  ;;  %v9669_v24 = vld [vmem:[#allocation76_spill] sm:$0xff]  ;;  %v7797_v0 = vpop.permute.xlu0 %2638 }
 0x238   : > { %v7748_v37 = vadd.f32 %v2118_v39, %v9669_v24  ;;  %v2172_v53 = vadd.f32 %v2170_v45, %v2166_v27  ;;  %v7751_v7 = vadd.f32 %v2316_v57, %v7512_v33  ;;  %v9670_v20 = vstv %s7626_s2  ;;  %v9672_v33 = vld [vmem:[#allocation78_spill] sm:$0xff]  ;;  %s7933_s2 = sld [smem:[#allocation4 + $0xd2]] }
 0x239   : > { %v2523_v23 = vmul.f32 %v9670_v20, %v7577_v8  ;;  %v2516_v30 = vmul.f32 %v2515_v26, %v9667_v63  ;;  %v2570_v54 = vmul.f32 %v2569_v5, %v9667_v63  ;;  %v7760_v56 = vadd.f32 %v7682_v3, %v7514_v51 }
 0x23a   : > { %v7762_v52 = vadd.f32 %v2469_v6, %v2465_v36  ;;  %v9671_v10 = vstv %s7628_s16  ;;  %v7768_v57 = vadd.f32 %v2172_v53, %v9672_v33  ;;  %v2519_v4 = vadd.f32 %v2517_v58, %v7422_v41  ;;  %v7822_v47 = vpop.permute.xlu1 %3060  ;;  %s7953_s16 = sld [smem:[#allocation4 + $0x13e]] }
 0x23b   : > { %v2577_v32 = vmul.f32 %v9671_v10, %v7577_v8  ;;  %v2573_v26 = vadd.f32 %v2571_v55, %v7424_v15  ;;  %v2879_v5 = vstv %s7707_s9  ;;  %v2933_v43 = vstv %s7709_s22  ;;  %s7990_s9 = sld [smem:[#allocation4 + $0x128]]  ;;  %s8022_s22 = sld [smem:[#allocation4 + $0x57]] }
 0x23c   : > { %v2464_v51 = vadd.f32 %v2462_v38, %v7392_v31  ;;  %v9673_v8 = vstv %s7618_s27  ;;  %v9674_v3 = vmov %v9670_v20  ;;  %v2987_v44 = vstv %s7714_s0  ;;  %s7906_s27 = sld [smem:[#allocation4 + $0x12e]]  ;;  %s8029_s0 = sld [smem:[#allocation4 + $0xc3]] }
 0x23d   : > { %v2468_v6 = vmul.f32 %v9673_v8, %v7589_v12  ;;  %v2522_v11 = vmul.f32 %v9674_v3, %v7589_v12  ;;  %v7790_v41 = vadd.f32 %v2523_v23, %v2519_v4  ;;  %v2518_v15 = vadd.f32 %v2516_v30, %v7394_v18  ;;  %v9679_v3 = vld [vmem:[#allocation172_spill] sm:$0xff] }
 0x23e   : > { %v2572_v58 = vadd.f32 %v2570_v54, %v7396_v28  ;;  %v9675_v31 = vmov %v9671_v10  ;;  %v2881_v27 = vmul.f32 %v2879_v5, %v7600_v50  ;;  %v2935_v35 = vmul.f32 %v2933_v43, %v7600_v50 }
 0x23f   : > { %v2576_v48 = vmul.f32 %v9675_v31, %v7589_v12  ;;  %v3085_v39 = vstv %s7726_s6  ;;  %v3139_v45 = vstv %s7728_s28  ;;  %v2989_v55 = vmul.f32 %v2987_v44, %v7600_v50  ;;  %s8031_s6 = sld [smem:[#allocation4 + $0x12f]]  ;;  %s8036_s28 = sld [smem:[#allocation4 + $0x5e]] }
 0x240   : > { %v2880_v18 = vmul.f32 %v2879_v5, %v7622_v59  ;;  %v2934_v28 = vmul.f32 %v2933_v43, %v7622_v59  ;;  %v3193_v36 = vstv %s7733_s1  ;;  %v7815_v12 = vadd.f32 %v2577_v32, %v2573_v26  ;;  %s8043_s1 = sld [smem:[#allocation4 + $0x136]] }
 0x241   : > { %v7817_v60 = vadd.f32 %v2468_v6, %v2464_v51  ;;  %v7819_v63 = vadd.f32 %v2522_v11, %v2518_v15  ;;  %v2988_v38 = vmul.f32 %v2987_v44, %v7622_v59  ;;  %v7828_v50 = vadd.f32 %v2576_v48, %v2572_v58  ;;  %v9677_v6 = vld [vmem:[#allocation103_spill] sm:$0xff] }
 0x242   : > { %v3087_v24 = vmul.f32 %v3085_v39, %v7640_v17  ;;  %v3141_v53 = vmul.f32 %v3139_v45, %v7640_v17  ;;  %v3086_v20 = vmul.f32 %v3085_v39, %v7672_v21  ;;  %v7834_v23 = vadd.f32 %v2881_v27, %v7646_v40  ;;  %v7851_v40 = vpop.permute.xlu0 %3058  ;;  %v9680_v39 = vld [vmem:[#allocation98_spill] sm:$0xff] }
 0x243   : > { %v3195_v59 = vmul.f32 %v3193_v36, %v7640_v17  ;;  %v3140_v30 = vmul.f32 %v3139_v45, %v7672_v21  ;;  %v3194_v54 = vmul.f32 %v3193_v36, %v7672_v21  ;;  %v7840_v10 = vadd.f32 %v2935_v35, %v7648_v9  ;;  %v9676_v17 = vld [vmem:[#allocation100_spill] sm:$0xff]  ;;  %v9681_v36 = vld [vmem:[#allocation173_spill] sm:$0xff] }
 0x244   : > { %v7843_v32 = vadd.f32 %v2989_v55, %v7547_v1  ;;  %v7846_v33 = vadd.f32 %v2880_v18, %v7650_v25  ;;  %v7849_v4 = vadd.f32 %v2934_v28, %v7655_v46  ;;  %v7854_v26 = vadd.f32 %v2988_v38, %v9676_v17 }
 0x245   : > { %v2473_v21 = vstv %s7776_s10  ;;  %v2527_v5 = vstv %s7786_s19  ;;  %v2581_v9 = vstv %s7788_s4  ;;  %v7860_v1 = vadd.f32 %v3087_v24, %v7657_v13  ;;  %s8049_s10 = sld [smem:[#allocation4 + $0x5f]]  ;;  %s8051_s19 = sld [smem:[#allocation4 + $0xca]] }
 0x246   : > { %v7863_v25 = vadd.f32 %v3141_v53, %v7659_v22  ;;  %v7866_v46 = vadd.f32 %v3086_v20, %v7663_v42  ;;  %v2267_v43 = vstv %s7799_s11  ;;  %v7870_v51 = vadd.f32 %v3195_v59, %v7661_v14  ;;  %v2225_v22 = vpop.permute.xlu1 %2224  ;;  %v2223_v55 = vpop.permute.xlu0 %2222  ;;  %v9682_v20 = vld [vmem:[#allocation104_spill] sm:$0xff]  ;;  %s8054_s4 = sld [smem:[#allocation4 + $0xcb]]  ;;  %s8056_s11 = sld [smem:[#allocation4 + $0x137]] }
 0x247   : > { %v7873_v8 = vadd.f32 %v3140_v30, %v7665_v19  ;;  %v7876_v13 = vadd.f32 %v3194_v54, %v9677_v6  ;;  %v2269_v11 = vmul.f32 %v2267_v43, %v9679_v3  ;;  %v2475_v44 = vmul.f32 %v2473_v21, %v7718_v61  ;;  %v9683_v30 = vld [vmem:[#allocation105_spill] sm:$0xff]  ;;  %v9684_v6 = vld [vmem:[#allocation108_spill] sm:$0xff] }
 0x248   : > { %v2529_v42 = vmul.f32 %v2527_v5, %v7718_v61  ;;  %v7886_v15 = vmul.f32 %v2581_v9, %v7718_v61  ;;  %v2273_v14 = vstv %s7805_s24  ;;  %v2321_v19 = vstv %s7811_s25  ;;  %s8095_s24 = sld [smem:[#allocation4 + $0x60]]  ;;  %s8097_s25 = sld [smem:[#allocation4 + $0xcc]] }
 0x249   : > { %9678 = vst [vmem:[#allocation110_spill] sm:$0xff] %v7876_v13  ;;  %v2327_v58 = vstv %s7813_s26  ;;  %v2375_v31 = vstv %s7824_s29  ;;  %v2381_v48 = vstv %s7826_s21  ;;  %v2323_v27 = vmul.f32 %v2321_v19, %v9679_v3  ;;  %s8103_s26 = sld [smem:[#allocation4 + $0x58]]  ;;  %s8105_s29 = sld [smem:[#allocation4 + $0x59]] }
 0x24a   : > { %v2377_v35 = vmul.f32 %v2375_v31, %v9679_v3  ;;  %v2271_v61 = vadd.f32 %v2269_v11, %v9680_v39  ;;  %v2275_v45 = vmul.f32 %v2273_v14, %v2225_v22  ;;  %v2329_v18 = vmul.f32 %v2327_v58, %v2225_v22  ;;  %s8116_s21 = sld [smem:[#allocation4 + $0xc4]] }
 0x24b   : > { %v2383_v28 = vmul.f32 %v2381_v48, %v2225_v22  ;;  %v2268_v38 = vmul.f32 %v2267_v43, %v9681_v36  ;;  %v2322_v24 = vmul.f32 %v2321_v19, %v9681_v36  ;;  %v2325_v59 = vadd.f32 %v2323_v27, %v9682_v20 }
 0x24c   : > { %v2277_v53 = vadd.f32 %v2275_v45, %v2271_v61  ;;  %v2379_v54 = vadd.f32 %v2377_v35, %v9683_v30  ;;  %v2376_v17 = vmul.f32 %v2375_v31, %v9681_v36  ;;  %v2274_v39 = vmul.f32 %v2273_v14, %v2223_v55 }
 0x24d   : > { %v2270_v3 = vadd.f32 %v2268_v38, %v9684_v6  ;;  %v2324_v11 = vadd.f32 %v2322_v24, %v7751_v7  ;;  %v2328_v22 = vmul.f32 %v2327_v58, %v2223_v55  ;;  %v2474_v43 = vmul.f32 %v2473_v21, %v7741_v62 }
 0x24e   : > { %v7917_v19 = vadd.f32 %v2277_v53, %v7724_v49  ;;  %v2331_v61 = vadd.f32 %v2329_v18, %v2325_v59  ;;  %v2385_v45 = vadd.f32 %v2383_v28, %v2379_v54  ;;  %v2378_v27 = vadd.f32 %v2376_v17, %v7760_v56  ;;  %v7928_v49 = vpop.permute.xlu1 %2644 }
 0x24f   : > { %v2276_v20 = vadd.f32 %v2274_v39, %v2270_v3  ;;  %v2330_v35 = vadd.f32 %v2328_v22, %v2324_v11  ;;  %v2382_v31 = vmul.f32 %v2381_v48, %v2223_v55  ;;  %v2673_v36 = vstv %s7888_s5  ;;  %v9687_v39 = vld [vmem:[#allocation90_spill] sm:$0xff]  ;;  %s8118_s5 = sld [smem:[#allocation4 + $0xc5]] }
 0x250   : > { %v2727_v38 = vstv %s7890_s3  ;;  %v7923_v7 = vadd.f32 %v2331_v61, %v7736_v16  ;;  %v7926_v21 = vadd.f32 %v2385_v45, %v7739_v34  ;;  %v2781_v14 = vstv %s7893_s15  ;;  %v9689_v45 = vld [vmem:[#allocation91_spill] sm:$0xff]  ;;  %s8128_s3 = sld [smem:[#allocation4 + $0x130]]  ;;  %s8130_s15 = sld [smem:[#allocation4 + $0x131]] }
 0x251   : > { %v7936_v56 = vadd.f32 %v2276_v20, %v7745_v29  ;;  %v7939_v58 = vadd.f32 %v2330_v35, %v7748_v37  ;;  %v2384_v16 = vadd.f32 %v2382_v31, %v2378_v27  ;;  %v7942_v48 = vadd.f32 %v2475_v44, %v7762_v52  ;;  %v7955_v29 = vpop.permute.xlu0 %2642  ;;  %v9685_v52 = vld [vmem:[#allocation156_spill] sm:$0xff]  ;;  %v9691_v31 = vld [vmem:[#allocation96_spill] sm:$0xff] }
 0x252   : > { %v7945_v34 = vadd.f32 %v2529_v42, %v7790_v41  ;;  %v2528_v55 = vmul.f32 %v2527_v5, %v7741_v62  ;;  %v2582_v18 = vmul.f32 %v2581_v9, %v7741_v62  ;;  %v2679_v28 = vstv %s7899_s12  ;;  %v9686_v42 = vld [vmem:[#allocation157_spill] sm:$0xff]  ;;  %v9690_v27 = vld [vmem:[#allocation93_spill] sm:$0xff]  ;;  %s8158_s12 = sld [smem:[#allocation4 + $0x138]] }
 0x253   : > { %v2733_v37 = vstv %s7904_s23  ;;  %v2787_v24 = vstv %s7906_s27  ;;  %v7961_v53 = vadd.f32 %v2384_v16, %v7768_v57  ;;  %v2675_v41 = vmul.f32 %v2673_v36, %v9685_v52  ;;  %s8176_s23 = sld [smem:[#allocation4 + $0x67]]  ;;  %s8181_s27 = sld [smem:[#allocation4 + $0x61]] }
 0x254   : > { %v2729_v44 = vmul.f32 %v2727_v38, %v9685_v52  ;;  %v2783_v5 = vmul.f32 %v2781_v14, %v9685_v52  ;;  %v2674_v62 = vmul.f32 %v2673_v36, %v9686_v42  ;;  %v2585_v9 = vadd.f32 %v7886_v15, %v7815_v12  ;;  %v9692_v36 = vld [vmem:[#allocation97_spill] sm:$0xff] }
 0x255   : > { %v2476_v57 = vadd.f32 %v2474_v43, %v7817_v60  ;;  %v2728_v59 = vmul.f32 %v2727_v38, %v9686_v42  ;;  %v2782_v30 = vmul.f32 %v2781_v14, %v9686_v42  ;;  %v7983_v54 = vadd.f32 %v2528_v55, %v7819_v63  ;;  %v7988_v60 = vpop.permute.xlu1 %2852  ;;  %v9688_v43 = vld [vmem:[#allocation95_spill] sm:$0xff]  ;;  %v8000_v35 = vpop.permute.xlu0 %2850 }
 0x256   : > { %v2681_v17 = vmul.f32 %v2679_v28, %v7770_v2  ;;  %v2735_v6 = vmul.f32 %v2733_v37, %v7770_v2  ;;  %v2789_v12 = vmul.f32 %v2787_v24, %v7770_v2  ;;  %v2584_v15 = vadd.f32 %v2582_v18, %v7828_v50  ;;  %v9693_v42 = vld [vmem:[#allocation193_spill] sm:$0xff] }
 0x257   : > { %v2680_v3 = vmul.f32 %v2679_v28, %v7797_v0  ;;  %v2734_v63 = vmul.f32 %v2733_v37, %v7797_v0  ;;  %v2788_v11 = vmul.f32 %v2787_v24, %v7797_v0  ;;  %v2677_v22 = vadd.f32 %v2675_v41, %v9687_v39 }
 0x258   : > { %v2731_v61 = vadd.f32 %v2729_v44, %v9688_v43  ;;  %v2785_v2 = vadd.f32 %v2783_v5, %v9689_v45  ;;  %v2676_v20 = vadd.f32 %v2674_v62, %v9690_v27  ;;  %v2730_v50 = vadd.f32 %v2728_v59, %v9691_v31 }
 0x259   : > { %v2784_v38 = vadd.f32 %v2782_v30, %v9692_v36  ;;  %v3091_v14 = vstv %s7931_s14  ;;  %v3145_v16 = vstv %s7933_s2  ;;  %v8006_v55 = vadd.f32 %v2681_v17, %v2677_v22  ;;  %v2437_v30 = vpop.permute.xlu1 %2436  ;;  %v2435_v43 = vpop.permute.xlu0 %2434  ;;  %s8183_s14 = sld [smem:[#allocation4 + $0x62]]  ;;  %s8186_s2 = sld [smem:[#allocation4 + $0xcd]] }
 0x25a   : > { %v8008_v0 = vadd.f32 %v2735_v6, %v2731_v61  ;;  %v8010_v18 = vadd.f32 %v2789_v12, %v2785_v2  ;;  %v3199_v28 = vstv %s7953_s16  ;;  %v8013_v37 = vadd.f32 %v2680_v3, %v2676_v20  ;;  %v9694_v2 = vld [vmem:[#allocation194_spill] sm:$0xff]  ;;  %s8188_s16 = sld [smem:[#allocation4 + $0x139]] }
 0x25b   : > { %v8015_v24 = vadd.f32 %v2734_v63, %v2730_v50  ;;  %v8017_v52 = vadd.f32 %v2788_v11, %v2784_v38  ;;  %v2479_v41 = vstv %s7963_s7  ;;  %v3093_v44 = vmul.f32 %v3091_v14, %v7822_v47  ;;  %s8195_s7 = sld [smem:[#allocation4 + $0xce]] }
 0x25c   : > { %v3147_v5 = vmul.f32 %v3145_v16, %v7822_v47  ;;  %v2481_v62 = vmul.f32 %v2479_v41, %v9693_v42  ;;  %v2485_v59 = vstv %s7969_s13  ;;  %v8027_v17 = vmul.f32 %v3199_v28, %v7822_v47  ;;  %s8197_s13 = sld [smem:[#allocation4 + $0x13a]] }
 0x25d   : > { %v2533_v6 = vstv %s7971_s30  ;;  %v2539_v12 = vstv %s7978_s20  ;;  %v2587_v3 = vstv %s7980_s18  ;;  %v2593_v39 = vstv %s7990_s9  ;;  %s8219_s30 = sld [smem:[#allocation4 + $0xd3]]  ;;  %s8221_s20 = sld [smem:[#allocation4 + $0x13f]] }
 0x25e   : > { %v2535_v63 = vmul.f32 %v2533_v6, %v9693_v42  ;;  %v2589_v11 = vmul.f32 %v2587_v3, %v9693_v42  ;;  %v2483_v22 = vadd.f32 %v2481_v62, %v7942_v48  ;;  %v2487_v61 = vmul.f32 %v2485_v59, %v2437_v30  ;;  %s8231_s18 = sld [smem:[#allocation4 + $0x68]]  ;;  %s8233_s9 = sld [smem:[#allocation4 + $0xd4]] }
 0x25f   : > { %v2541_v47 = vmul.f32 %v2539_v12, %v2437_v30  ;;  %v2595_v45 = vmul.f32 %v2593_v39, %v2437_v30  ;;  %v2480_v27 = vmul.f32 %v2479_v41, %v9694_v2  ;;  %v2534_v50 = vmul.f32 %v2533_v6, %v9694_v2  ;;  %v8061_v6 = vpop.permute.xlu1 %2856 }
 0x260   : > { %v2537_v20 = vadd.f32 %v2535_v63, %v7945_v34  ;;  %v2591_v31 = vadd.f32 %v2589_v11, %v2585_v9  ;;  %v2588_v36 = vmul.f32 %v2587_v3, %v9694_v2  ;;  %v2489_v38 = vadd.f32 %v2487_v61, %v2483_v22 }
 0x261   : > { %v2482_v42 = vadd.f32 %v2480_v27, %v2476_v57  ;;  %v2486_v13 = vmul.f32 %v2485_v59, %v2435_v43  ;;  %v2540_v48 = vmul.f32 %v2539_v12, %v2435_v43  ;;  %v3092_v62 = vmul.f32 %v3091_v14, %v7851_v40 }
 0x262   : > { %v2543_v41 = vadd.f32 %v2541_v47, %v2537_v20  ;;  %v2597_v34 = vadd.f32 %v2595_v45, %v2591_v31  ;;  %v2536_v9 = vadd.f32 %v2534_v50, %v7983_v54  ;;  %v8059_v57 = vadd.f32 %v2489_v38, %v7917_v19  ;;  %v9696_v50 = vld [vmem:[#allocation183_spill] sm:$0xff] }
 0x263   : > { %v2590_v59 = vadd.f32 %v2588_v36, %v2584_v15  ;;  %v2488_v14 = vadd.f32 %v2486_v13, %v2482_v42  ;;  %v2594_v30 = vmul.f32 %v2593_v39, %v2435_v43  ;;  %v2685_v12 = vstv %s8022_s22  ;;  %v8083_v43 = vpop.permute.xlu0 %2854  ;;  %s8235_s22 = sld [smem:[#allocation4 + $0x140]] }
 0x264   : > { %v8065_v3 = vadd.f32 %v2543_v41, %v7923_v7  ;;  %v8068_v63 = vadd.f32 %v2597_v34, %v7926_v21  ;;  %v2542_v54 = vadd.f32 %v2540_v48, %v2536_v9  ;;  %v2739_v11 = vstv %s8029_s0  ;;  %s8257_s0 = sld [smem:[#allocation4 + $0x69]] }
 0x265   : > { %v2793_v22 = vstv %s8031_s6  ;;  %v8073_v61 = vadd.f32 %v2488_v14, %v7936_v56  ;;  %v2596_v19 = vadd.f32 %v2594_v30, %v2590_v59  ;;  %v3146_v13 = vmul.f32 %v3145_v16, %v7851_v40  ;;  %s8264_s6 = sld [smem:[#allocation4 + $0xd5]] }
 0x266   : > { %v8077_v15 = vmul.f32 %v3199_v28, %v7851_v40  ;;  %v2885_v39 = vstv %s8036_s28  ;;  %v8081_v7 = vadd.f32 %v2542_v54, %v7939_v58  ;;  %v8086_v21 = vadd.f32 %v3093_v44, %v7860_v1  ;;  %v9695_v44 = vld [vmem:[#allocation180_spill] sm:$0xff]  ;;  %s8272_s28 = sld [smem:[#allocation4 + $0x141]] }
 0x267   : > { %v8089_v47 = vadd.f32 %v3147_v5, %v7863_v25  ;;  %v2687_v56 = vmul.f32 %v2685_v12, %v7928_v49  ;;  %v8093_v45 = vadd.f32 %v2596_v19, %v7961_v53  ;;  %v2741_v40 = vmul.f32 %v2739_v11, %v7928_v49  ;;  %v8140_v48 = vpop.permute.xlu0 %3062 }
 0x268   : > { %v2795_v58 = vmul.f32 %v2793_v22, %v7928_v49  ;;  %v2686_v1 = vmul.f32 %v2685_v12, %v7955_v29  ;;  %v2993_v16 = vstv %s8043_s1  ;;  %v8109_v25 = vadd.f32 %v8027_v17, %v7870_v51  ;;  %v8114_v49 = vpop.permute.xlu1 %3064  ;;  %s8283_s1 = sld [smem:[#allocation4 + $0x6a]] }
 0x269   : > { %v2740_v53 = vmul.f32 %v2739_v11, %v7955_v29  ;;  %v2794_v28 = vmul.f32 %v2793_v22, %v7955_v29  ;;  %v2887_v5 = vmul.f32 %v2885_v39, %v9695_v44  ;;  %v8121_v2 = vadd.f32 %v3092_v62, %v7866_v46  ;;  %v9697_v22 = vld [vmem:[#allocation72_spill] sm:$0xff] }
 0x26a   : > { %v8124_v27 = vadd.f32 %v3146_v13, %v7873_v8  ;;  %v2891_v51 = vstv %s8049_s10  ;;  %v2939_v17 = vstv %s8051_s19  ;;  %v2945_v29 = vstv %s8054_s4  ;;  %s8285_s10 = sld [smem:[#allocation4 + $0xd6]]  ;;  %s8294_s19 = sld [smem:[#allocation4 + $0x142]] }
 0x26b   : > { %v2995_v20 = vmul.f32 %v2993_v16, %v9695_v44  ;;  %v2999_v31 = vstv %s8056_s11  ;;  %v2886_v36 = vmul.f32 %v2885_v39, %v9696_v50  ;;  %v2689_v38 = vadd.f32 %v2687_v56, %v8006_v55  ;;  %s8308_s4 = sld [smem:[#allocation4 + $0x6b]]  ;;  %s8313_s11 = sld [smem:[#allocation4 + $0xd7]] }
 0x26c   : > { %v2743_v46 = vadd.f32 %v2741_v40, %v8008_v0  ;;  %v2797_v42 = vadd.f32 %v2795_v58, %v8010_v18  ;;  %v2688_v8 = vadd.f32 %v2686_v1, %v8013_v37  ;;  %v2742_v62 = vadd.f32 %v2740_v53, %v8015_v24  ;;  %v2649_v14 = vpop.permute.xlu1 %2648  ;;  %v2647_v58 = vpop.permute.xlu0 %2646 }
 0x26d   : > { %v2796_v41 = vadd.f32 %v2794_v28, %v8017_v52  ;;  %v8145_v34 = vmul.f32 %v2939_v17, %v9695_v44  ;;  %v8148_v55 = vadd.f32 %v2887_v5, %v7834_v23  ;;  %v8151_v0 = vmul.f32 %v2891_v51, %v7988_v60  ;;  %v9698_v5 = vld [vmem:[#allocation66_spill] sm:$0xff] }
 0x26e   : > { %v8154_v18 = vmul.f32 %v2945_v29, %v7988_v60  ;;  %v3001_v37 = vmul.f32 %v2999_v31, %v7988_v60  ;;  %v2940_v24 = vmul.f32 %v2939_v17, %v9696_v50  ;;  %v2997_v52 = vadd.f32 %v2995_v20, %v7843_v32 }
 0x26f   : > { %v2888_v23 = vadd.f32 %v2886_v36, %v7846_v33  ;;  %v2994_v9 = vmul.f32 %v2993_v16, %v9696_v50  ;;  %v2892_v59 = vmul.f32 %v2891_v51, %v8000_v35  ;;  %v2946_v30 = vmul.f32 %v2945_v29, %v8000_v35 }
 0x270   : > { %v2897_v12 = vstv %s8095_s24  ;;  %v2691_v54 = vstv %s8103_s26  ;;  %v2697_v60 = vstv %s8105_s29  ;;  %v2745_v13 = vstv %s8116_s21  ;;  %s8315_s24 = sld [smem:[#allocation4 + $0x143]]  ;;  %s8345_s26 = sld [smem:[#allocation9 + $0x1]] }
 0x271   : > { %v2693_v19 = vmul.f32 %v2691_v54, %v9697_v22  ;;  %v2751_v39 = vstv %s8118_s5  ;;  %v2747_v56 = vmul.f32 %v2745_v13, %v9697_v22  ;;  %v2799_v32 = vstv %s8128_s3  ;;  %s8349_s29 = sld [smem:[#allocation9 + $0x2]]  ;;  %s8351_s21 = sld [smem:[#allocation9 + $0x3]] }
 0x272   : > { %v2805_v40 = vstv %s8130_s15  ;;  %v2699_v33 = vmul.f32 %v2697_v60, %v2649_v14  ;;  %v2801_v1 = vmul.f32 %v2799_v32, %v9697_v22  ;;  %v2753_v53 = vmul.f32 %v2751_v39, %v2649_v14  ;;  %s8356_s5 = sld [smem:[#allocation9 + $0x4]]  ;;  %s8358_s3 = sld [smem:[#allocation9 + $0x6]] }
 0x273   : > { %v2695_v16 = vadd.f32 %v2693_v19, %v2689_v38  ;;  %v2807_v28 = vmul.f32 %v2805_v40, %v2649_v14  ;;  %v2749_v44 = vadd.f32 %v2747_v56, %v2743_v46  ;;  %v2692_v51 = vmul.f32 %v2691_v54, %v9698_v5  ;;  %s8360_s15 = sld [smem:[#allocation9 + $0x7]] }
 0x274   : > { %v2746_v17 = vmul.f32 %v2745_v13, %v9698_v5  ;;  %v2800_v29 = vmul.f32 %v2799_v32, %v9698_v5  ;;  %v2803_v50 = vadd.f32 %v2801_v1, %v2797_v42  ;;  %v2698_v36 = vmul.f32 %v2697_v60, %v2647_v58  ;;  %v8193_v13 = vpop.permute.xlu1 %3068 }
 0x275   : > { %v2701_v20 = vadd.f32 %v2699_v33, %v2695_v16  ;;  %v2752_v11 = vmul.f32 %v2751_v39, %v2647_v58  ;;  %v3005_v38 = vstv %s8158_s12  ;;  %v2755_v22 = vadd.f32 %v2753_v53, %v2749_v44  ;;  %v8208_v33 = vpop.permute.xlu0 %3066  ;;  %s8362_s12 = sld [smem:[#allocation9 + $0x5]] }
 0x276   : > { %v2694_v14 = vadd.f32 %v2692_v51, %v2688_v8  ;;  %v2748_v19 = vadd.f32 %v2746_v17, %v2742_v62  ;;  %v2809_v54 = vadd.f32 %v2807_v28, %v2803_v50  ;;  %v2802_v42 = vadd.f32 %v2800_v29, %v2796_v41  ;;  %v9701_v29 = vld [vmem:[#allocation79_spill] sm:$0xff] }
 0x277   : > { %v8191_v46 = vadd.f32 %v2701_v20, %v8059_v57  ;;  %v2806_v60 = vmul.f32 %v2805_v40, %v2647_v58  ;;  %v3000_v8 = vmul.f32 %v2999_v31, %v8000_v35  ;;  %v8201_v62 = vadd.f32 %v2755_v22, %v8065_v3 }
 0x278   : > { %v2700_v39 = vadd.f32 %v2698_v36, %v2694_v14  ;;  %v2754_v56 = vadd.f32 %v2752_v11, %v2748_v19  ;;  %v3007_v57 = vmul.f32 %v3005_v38, %v8061_v6  ;;  %v2898_v32 = vmul.f32 %v2897_v12, %v8083_v43 }
 0x279   : > { %v2811_v41 = vadd.f32 %v2809_v54, %v8068_v63  ;;  %v2808_v40 = vadd.f32 %v2806_v60, %v2802_v42  ;;  %v2942_v58 = vadd.f32 %v2940_v24, %v7849_v4  ;;  %v9699_v1 = vstv %s8097_s25  ;;  %v2859_v44 = vpop.permute.xlu0 %2858  ;;  %s8343_s25 = sld [smem:[#allocation9]] }
 0x27a   : > { %v2952_v35 = vmul.f32 %v9699_v1, %v8083_v43  ;;  %v2702_v3 = vadd.f32 %v2700_v39, %v8073_v61  ;;  %v8216_v31 = vadd.f32 %v2754_v56, %v8081_v7  ;;  %v3003_v11 = vadd.f32 %v3001_v37, %v2997_v52 }
 0x27b   : > { %v2996_v16 = vadd.f32 %v2994_v9, %v7854_v26  ;;  %v2894_v53 = vadd.f32 %v2892_v59, %v2888_v23  ;;  %v8224_v4 = vadd.f32 %v2808_v40, %v8093_v45  ;;  %v2895_v63 = vadd.f32 %v8151_v0, %v8148_v55  ;;  %v8238_v0 = vpop.permute.xlu1 %2860  ;;  %v9700_v59 = vld [vmem:[#allocation81_spill] sm:$0xff] }
 0x27c   : > { %v2943_v61 = vadd.f32 %v8145_v34, %v7840_v10  ;;  %v2948_v26 = vadd.f32 %v2946_v30, %v2942_v58  ;;  %v3006_v7 = vmul.f32 %v3005_v38, %v8083_v43  ;;  %v3009_v24 = vadd.f32 %v3007_v57, %v3003_v11 }
 0x27d   : > { %v3002_v37 = vadd.f32 %v3000_v8, %v2996_v16  ;;  %v2900_v45 = vadd.f32 %v2898_v32, %v2894_v53  ;;  %v2903_v55 = vstv %s8181_s27  ;;  %v3097_v34 = vstv %s8176_s23  ;;  %s8364_s23 = sld [smem:[#allocation9 + $0x8]] }
 0x27e   : > { %v2954_v10 = vadd.f32 %v2952_v35, %v2948_v26  ;;  %v2957_v43 = vstv %s8186_s2  ;;  %v3011_v52 = vstv %s8188_s16  ;;  %v2909_v23 = vstv %s8183_s14  ;;  %s9712_s14 = sld [smem:[#allocation20_spill]] }
 0x27f   : > { %v2963_v9 = vstv %s8195_s7  ;;  %v3013_v30 = vmul.f32 %v3011_v52, %v9700_v59  ;;  %v3017_v28 = vstv %s8197_s13  ;;  %v2899_v5 = vmul.f32 %v2897_v12, %v8061_v6  ;;  %v9703_v12 = vld [vmem:[#allocation65_spill] sm:$0xff] }
 0x280   : > { %v3008_v51 = vadd.f32 %v3006_v7, %v3002_v37  ;;  %v3019_v17 = vmul.f32 %v3017_v28, %v8238_v0  ;;  %v2904_v20 = vmul.f32 %v2903_v55, %v9701_v29  ;;  %v9702_v50 = vmov %v9699_v1 }
 0x281   : > { %v2953_v36 = vmul.f32 %v9702_v50, %v8061_v6  ;;  %v3015_v38 = vadd.f32 %v3013_v30, %v3009_v24  ;;  %v2958_v22 = vmul.f32 %v2957_v43, %v9701_v29  ;;  %v3012_v14 = vmul.f32 %v3011_v52, %v9701_v29  ;;  %v9704_v24 = vld [vmem:[#allocation110_spill] sm:$0xff] }
 0x282   : > { %v3099_v19 = vmul.f32 %v3097_v34, %v9703_v12  ;;  %v2906_v54 = vadd.f32 %v2904_v20, %v2900_v45  ;;  %v2910_v42 = vmul.f32 %v2909_v23, %v2859_v44  ;;  %v2964_v60 = vmul.f32 %v2963_v9, %v2859_v44 }
 0x283   : > { %v3151_v6 = vstv %s8219_s30  ;;  %v3205_v8 = vstv %s8221_s20  ;;  %v3021_v39 = vadd.f32 %v3019_v17, %v3015_v38  ;;  %v2960_v56 = vadd.f32 %v2958_v22, %v2954_v10  ;;  %v9705_v10 = vld [vmem:[#allocation69_spill] sm:$0xff]  ;;  %s9720_s30 = sld [smem:[#allocation201_spill]] }
 0x284   : > { %v3103_v57 = vstv %s8231_s18  ;;  %v3014_v32 = vadd.f32 %v3012_v14, %v3008_v51  ;;  %v2912_v40 = vadd.f32 %v2910_v42, %v2906_v54  ;;  %v3018_v58 = vmul.f32 %v3017_v28, %v2859_v44  ;;  %s4369_s2 = smul.u32 3072, %s9712_s14  ;;  %s9725_s18 = sld [smem:[#allocation27_spill]] }
 0x285   : > { %v3157_v1 = vstv %s8233_s9  ;;  %v3211_v35 = vstv %s8235_s22  ;;  %v8277_v11 = vadd.f32 %v3021_v39, %v2811_v41  ;;  %v2966_v16 = vadd.f32 %v2964_v60, %v2960_v56  ;;  %v9706_v56 = vld [vmem:[#allocation87_spill] sm:$0xff]  ;;  %s9727_s9 = sld [smem:[#allocation24_spill]] }
 0x286   : > { %v3153_v53 = vmul.f32 %v3151_v6, %v9703_v12  ;;  %v3207_v26 = vmul.f32 %v3205_v8, %v9703_v12  ;;  %v8281_v7 = vadd.f32 %v2912_v40, %v2702_v3  ;;  %v3020_v37 = vadd.f32 %v3018_v58, %v3014_v32 }
 0x287   : > { %v3202_v45 = vadd.f32 %v8077_v15, %v9704_v24  ;;  %v3105_v41 = vmul.f32 %v3103_v57, %v8114_v49  ;;  %v3098_v52 = vmul.f32 %v3097_v34, %v9705_v10  ;;  %v8292_v30 = vadd.f32 %v2966_v16, %v8216_v31  ;;  %v3073_v16 = vpop.permute.xlu1 %3072 }
 0x288   : > { %v2949_v3 = vadd.f32 %v8154_v18, %v2943_v61  ;;  %v2901_v28 = vadd.f32 %v2899_v5, %v2895_v63  ;;  %v3152_v44 = vmul.f32 %v3151_v6, %v9705_v10  ;;  %v8299_v51 = vadd.f32 %v3020_v37, %v8224_v4 }
 0x289   : > { %v3101_v15 = vadd.f32 %v3099_v19, %v8086_v21  ;;  %v3159_v17 = vmul.f32 %v3157_v1, %v8114_v49  ;;  %v3213_v34 = vmul.f32 %v3211_v35, %v8114_v49  ;;  %v3109_v29 = vstv %s8257_s0  ;;  %s8665_s20 = scalar_lea.hbm %s9720_s30, %s4369_s2 }
 0x28a   : > { %v2955_v31 = vadd.f32 %v2953_v36, %v2949_v3  ;;  %v3155_v20 = vadd.f32 %v3153_v53, %v8089_v47  ;;  %v3209_v50 = vadd.f32 %v3207_v26, %v8109_v25  ;;  %v3163_v18 = vstv %s8264_s6  ;;  %s3581_s0 = scalar_lea.sflag [#allocation12], %s9725_s18 }
 0x28b   : > { %v3107_v63 = vadd.f32 %v3105_v41, %v3101_v15  ;;  %v3100_v4 = vadd.f32 %v3098_v52, %v8121_v2  ;;  %v3206_v21 = vmul.f32 %v3205_v8, %v9705_v10  ;;  %v3217_v61 = vstv %s8272_s28  ;;  %p9728_p8 = scmp.ne.s32.totalorder %s9727_s9, 0  ;;  %s4736_s28 = smov [#allocation11]  }
 0x28c   : > { %v3154_v47 = vadd.f32 %v3152_v44, %v8124_v27  ;;  %v3104_v25 = vmul.f32 %v3103_v57, %v8140_v48  ;;  %v3158_v49 = vmul.f32 %v3157_v1, %v8140_v48  ;;  %v3111_v5 = vmul.f32 %v3109_v29, %v8193_v13 }
 0x28d   : > { %v3161_v2 = vadd.f32 %v3159_v17, %v3155_v20  ;;  %v3215_v36 = vadd.f32 %v3213_v34, %v3209_v50  ;;  %v3165_v38 = vmul.f32 %v3163_v18, %v8193_v13  ;;  %v2905_v22 = vmul.f32 %v2903_v55, %v9700_v59 }
 0x28e   : > { %v3219_v14 = vmul.f32 %v3217_v61, %v8193_v13  ;;  %v2959_v12 = vmul.f32 %v2957_v43, %v9700_v59  ;;  %v3115_v27 = vstv %s8283_s1  ;;  %v3169_v19 = vstv %s8285_s10  ;;  %s4595_s1 = sshll.u32 %s4736_s28, 4  ;;  %s4596_s1 = int_to_ptr.vmem [resolvable:$false] %s4595_s1 }
 0x28f   : > { %v3208_v54 = vadd.f32 %v3206_v21, %v3202_v45  ;;  %v3212_v42 = vmul.f32 %v3211_v35, %v8140_v48  ;;  %v2911_v60 = vmul.f32 %v2909_v23, %v8238_v0  ;;  %v3223_v6 = vstv %s8294_s19  ;;  %s4597_s10 = scalar_lea.vmem %s4596_s1, 6144 }
 0x290   : > { %v3113_v8 = vadd.f32 %v3111_v5, %v3107_v63  ;;  %v3110_v39 = vmul.f32 %v3109_v29, %v8208_v33  ;;  %v3164_v55 = vmul.f32 %v3163_v18, %v8208_v33  ;;  %v2965_v13 = vmul.f32 %v2963_v9, %v8238_v0  ;;  %v9707_v63 = vld [vmem:[#allocation86_spill] sm:$0xff] }
 0x291   : > { %v3167_v43 = vadd.f32 %v3165_v38, %v3161_v2  ;;  %v2907_v59 = vadd.f32 %v2905_v22, %v2901_v28  ;;  %v3117_v57 = vmul.f32 %v3115_v27, %v9706_v56  ;;  %v3171_v48 = vmul.f32 %v3169_v19, %v9706_v56 }
 0x292   : > { %v3221_v23 = vadd.f32 %v3219_v14, %v3215_v36  ;;  %v3218_v32 = vmul.f32 %v3217_v61, %v8208_v33  ;;  %v2961_v40 = vadd.f32 %v2959_v12, %v2955_v31  ;;  %v3225_v58 = vmul.f32 %v3223_v6, %v9706_v56 }
 0x293   : > { %v2913_v0 = vadd.f32 %v2911_v60, %v2907_v59  ;;  %v3121_v9 = vstv %s8308_s4  ;;  %v3175_v1 = vstv %s8313_s11  ;;  %v3229_v35 = vstv %s8315_s24  ;;  %v3071_v60 = vpop.permute.xlu0 %3070 }
 0x294   : > { %v3106_v53 = vadd.f32 %v3104_v25, %v3100_v4  ;;  %v2967_v26 = vadd.f32 %v2965_v13, %v2961_v40  ;;  %v3160_v33 = vadd.f32 %v3158_v49, %v3154_v47  ;;  %v3214_v37 = vadd.f32 %v3212_v42, %v3208_v54 }
 0x295   : > { %v3119_v24 = vadd.f32 %v3117_v57, %v3113_v8  ;;  %v3173_v45 = vadd.f32 %v3171_v48, %v3167_v43  ;;  %v3227_v41 = vadd.f32 %v3225_v58, %v3221_v23  ;;  %v3123_v10 = vmul.f32 %v3121_v9, %v3073_v16 }
 0x296   : > { %v3177_v52 = vmul.f32 %v3175_v1, %v3073_v16  ;;  %v3231_v3 = vmul.f32 %v3229_v35, %v3073_v16  ;;  %v3112_v28 = vadd.f32 %v3110_v39, %v3106_v53  ;;  %v3166_v44 = vadd.f32 %v3164_v55, %v3160_v33 }
 0x297   : > { %v3220_v15 = vadd.f32 %v3218_v32, %v3214_v37  ;;  %v2915_v17 = vadd.f32 %v2913_v0, %v8191_v46  ;;  %v2969_v34 = vadd.f32 %v2967_v26, %v8201_v62  ;;  %v3125_v29 = vadd.f32 %v3123_v10, %v3119_v24 }
 0x298   : > { %v3179_v31 = vadd.f32 %v3177_v52, %v3173_v45  ;;  %v3233_v20 = vadd.f32 %v3231_v3, %v3227_v41  ;;  %v3243_v50 = vstv %s8343_s25  ;;  %v3247_v18 = vstv %s8345_s26 }
 0x299   : > { %v3116_v4 = vmul.f32 %v3115_v27, %v9707_v63  ;;  %v3170_v21 = vmul.f32 %v3169_v19, %v9707_v63  ;;  %v3127_v61 = vadd.f32 %v3125_v29, %v2915_v17  ;;  %v3224_v46 = vmul.f32 %v3223_v6, %v9707_v63 }
 0x29a   : > { %v3181_v47 = vadd.f32 %v3179_v31, %v2969_v34  ;;  %v3235_v25 = vadd.f32 %v3233_v20, %v8277_v11  ;;  %v3253_v49 = vstv %s8349_s29  ;;  %v3273_v62 = vstv %s8351_s21 }
 0x29b   : > { %v3277_v5 = vstv %s8356_s5  ;;  %v3303_v2 = vstv %s8358_s3  ;;  %v3307_v36 = vstv %s8360_s15  ;;  %v3237_v38 = vmax.f32 %v3127_v61, 0.0 }
 0x29c   : > { %v3239_v22 = vmax.f32 %v3181_v47, 0.0  ;;  %v3241_v14 = vmax.f32 %v3235_v25, 0.0  ;;  %v3283_v12 = vstv %s8362_s12  ;;  %v3313_v54 = vstv %s8364_s23  ;;  %v8385_v47 = vld [vmem:[%s4964_s17 + $0x10] sm:$0xff]  ;;  %v8388_v25 = vld [vmem:[%s4964_s17 + $0x18] sm:$0xff] }
 0x29d   : > { %v3118_v42 = vadd.f32 %v3116_v4, %v3112_v28  ;;  %v3172_v27 = vadd.f32 %v3170_v21, %v3166_v44  ;;  %v3245_v19 = vmul.f32 %v3243_v50, %v3237_v38  ;;  %v3275_v39 = vmul.f32 %v3273_v62, %v3237_v38 }
 0x29e   : > { %v3249_v8 = vmul.f32 %v3247_v18, %v3239_v22  ;;  %v3226_v55 = vadd.f32 %v3224_v46, %v3220_v15  ;;  %v3255_v11 = vmul.f32 %v3253_v49, %v3241_v14  ;;  %v3279_v13 = vmul.f32 %v3277_v5, %v3239_v22 }
 0x29f   : > { %v3305_v6 = vmul.f32 %v3303_v2, %v3237_v38  ;;  %v3309_v43 = vmul.f32 %v3307_v36, %v3239_v22  ;;  %v3285_v56 = vmul.f32 %v3283_v12, %v3241_v14  ;;  %v3122_v57 = vmul.f32 %v3121_v9, %v3071_v60  ;;  %v8400_v38 = vld [vmem:[%s4964_s17 + $0x38] sm:$0xff] }
 0x2a0   : > { %v3251_v59 = vadd.f32 %v3249_v8, %v3245_v19  ;;  %v3176_v48 = vmul.f32 %v3175_v1, %v3071_v60  ;;  %v3281_v23 = vadd.f32 %v3279_v13, %v3275_v39  ;;  %v3315_v40 = vmul.f32 %v3313_v54, %v3241_v14 }
 0x2a1   : > { %v3311_v32 = vadd.f32 %v3309_v43, %v3305_v6  ;;  %v3230_v58 = vmul.f32 %v3229_v35, %v3071_v60  ;;  %v3124_v16 = vadd.f32 %v3122_v57, %v3118_v42  ;;  %v8405_v42 = vld [vmem:[%s4964_s17 + $0x40] sm:$0xff]  ;;  %v3390_v6 = vrot.slane %v8400_v38, 1  ;;  %v8415_v43 = vld [vmem:[%s4964_s17 + $0x50] sm:$0xff] }
 0x2a2   : > { %v3257_v0 = vadd.f32 %v3255_v11, %v3251_v59  ;;  %v3178_v53 = vadd.f32 %v3176_v48, %v3172_v27  ;;  %v3287_v26 = vadd.f32 %v3285_v56, %v3281_v23  ;;  %v8408_v27 = vld [vmem:[%s4964_s17 + $0x48] sm:$0xff]  ;;  %v8418_v59 = vld [vmem:[%s4964_s17 + $0x58] sm:$0xff]  ;;  %v3410_v48 = vrot.slane %v8405_v42, 1 }
 0x2a3   : > { %v3317_v33 = vadd.f32 %v3315_v40, %v3311_v32  ;;  %v3232_v37 = vadd.f32 %v3230_v58, %v3226_v55  ;;  %v3126_v45 = vadd.f32 %v3124_v16, %v8281_v7  ;;  %v3411_v23 = vrot.slane %v8408_v27, 1  ;;  %v8423_v32 = vld [vmem:[%s4964_s17 + $0x60] sm:$0xff]  ;;  %v8426_v40 = vld [vmem:[%s4964_s17 + $0x68] sm:$0xff]  ;;  %v8429_v58 = vld [vmem:[%s4964_s17 + $0x70] sm:$0xff] }
 0x2a4   : > { %v3259_v24 = vmax.f32 %v3257_v0, 0.0  ;;  %v3180_v41 = vadd.f32 %v3178_v53, %v8292_v30  ;;  %v3289_v10 = vmax.f32 %v3287_v26, 0.0  ;;  %v8432_v16 = vld [vmem:[%s4964_s17 + $0x78] sm:$0xff]  ;;  %v8435_v53 = vld [vmem:[%s4964_s17 + $0x80] sm:$0xff]  ;;  %v8438_v26 = vld [vmem:[%s4964_s17 + $0x88] sm:$0xff]  ;;  %v9717_v27 = vrot.slane %v8429_v58, 1 }
 0x2a5   : > { %v3319_v52 = vmax.f32 %v3317_v33, 0.0  ;;  %v3234_v9 = vadd.f32 %v3232_v37, %v8299_v51  ;;  %v3236_v3 = vmax.f32 %v3126_v45, 0.0  ;;  %v4275_v37 = vld [vmem:[%s9636_s8 + $0x8] ss:$0 sm:$0xff]  ;;  %v9716_v42 = vrot.slane %v8432_v16, 1 }
 0x2a6   : > { %v4261_v1 = vmul.f32 -1.442695, %v3259_v24  ;;  %v3238_v28 = vmax.f32 %v3180_v41, 0.0  ;;  %v4266_v44 = vmul.f32 -1.442695, %v3289_v10  ;;  %v9051_v10 = vrot.slane %v8415_v43, 1 }
 0x2a7   : > { %v4271_v35 = vmul.f32 -1.442695, %v3319_v52  ;;  %v3240_v15 = vmax.f32 %v3234_v9, 0.0  ;;  %v3244_v17 = vmul.f32 %v3243_v50, %v3236_v3  ;;  %v3274_v29 = vmul.f32 %v3273_v62, %v3236_v3  ;;  %v8391_v62 = vld [vmem:[%s4964_s17 + $0x20] sm:$0xff]  ;;  %v8455_v52 = vld [vmem:[%s4964_s17 + $0x90] sm:$0xff]  ;;  %v8458_v9 = vld [vmem:[%s4964_s17 + $0x98] sm:$0xff] }
 0x2a8   : > { %4498 = vpow2.f32 %v4261_v1  ;;  %v3248_v34 = vmul.f32 %v3247_v18, %v3238_v28  ;;  %v3278_v30 = vmul.f32 %v3277_v5, %v3238_v28  ;;  %v3304_v51 = vmul.f32 %v3303_v2, %v3236_v3  ;;  %v8394_v5 = vld [vmem:[%s4964_s17 + $0x28] sm:$0xff]  ;;  %v8461_v1 = vld [vmem:[%s4964_s17 + $0xa0] sm:$0xff] }
 0x2a9   : > { %4500 = vpow2.f32 %v4266_v44  ;;  %v3254_v7 = vmul.f32 %v3253_v49, %v3240_v15  ;;  %v3308_v20 = vmul.f32 %v3307_v36, %v3238_v28  ;;  %v3284_v4 = vmul.f32 %v3283_v12, %v3240_v15  ;;  %v8397_v36 = vld [vmem:[%s4964_s17 + $0x30] sm:$0xff] }
 0x2aa   : > { %4502 = vpow2.f32 %v4271_v35  ;;  %v3250_v31 = vadd.f32 %v3248_v34, %v3244_v17  ;;  %v3280_v63 = vadd.f32 %v3278_v30, %v3274_v29  ;;  %v3314_v50 = vmul.f32 %v3313_v54, %v3240_v15  ;;  %v8472_v35 = vld [vmem:[%s4964_s17 + $0xa8] sm:$0xff]  ;;  %v8475_v15 = vld [vmem:[%s4964_s17 + $0xb0] sm:$0xff]  ;;  %v8478_v17 = vld [vmem:[%s4964_s17 + $0xb8] sm:$0xff]  ;;  %s9710_s17 = sld [smem:[#allocation28_spill]] }
 0x2ab   : > { %v3310_v61 = vadd.f32 %v3308_v20, %v3304_v51  ;;  %v3347_v12 = vrot.slane %v8385_v47, 1  ;;  %v3348_v54 = vrot.slane %v8388_v25, 1  ;;  %v3368_v8 = vrot.slane %v8391_v62, 1  ;;  %v4283_v34 = vld [vmem:[%s9636_s8 + $0x10] ss:$0 sm:$0xff] }
 0x2ac   : > { %v3256_v21 = vadd.f32 %v3254_v7, %v3250_v31  ;;  %v3286_v18 = vadd.f32 %v3284_v4, %v3280_v63  ;;  %v3369_v39 = vrot.slane %v8394_v5, 1  ;;  %v3389_v13 = vrot.slane %v8397_v36, 1  ;;  %v4291_v51 = vld [vmem:[%s9636_s8 + $0x18] ss:$0 sm:$0xff] }
 0x2ad   : > { %v3316_v49 = vadd.f32 %v3314_v50, %v3310_v61  ;;  %v3350_v45 = vsel %vm699_vm0, %v3348_v54, %v3347_v12  ;;  %v3432_v28 = vrot.slane %v8418_v59, 1  ;;  %v9047_v44 = vrot.slane %v8423_v32, 1  ;;  %v4299_v61 = vld [vmem:[%s9636_s8 + $0x20] ss:$0 sm:$0xff] }
 0x2ae   : > { %v3258_v46 = vmax.f32 %v3256_v21, 0.0  ;;  %v3288_v2 = vmax.f32 %v3286_v18, 0.0  ;;  %v3371_v41 = vsel %vm699_vm0, %v3369_v39, %v3368_v8  ;;  %v3392_v3 = vsel %vm699_vm0, %v3390_v6, %v3389_v13 }
 0x2af   : > { %v3318_v14 = vmax.f32 %v3316_v49, 0.0  ;;  %v3413_v29 = vsel %vm699_vm0, %v3411_v23, %v3410_v48  ;;  %v9048_v7 = vrot.slane %v8426_v40, 1  ;;  %v9041_v30 = vrot.slane %v8429_v58, 1 }
 0x2b0   : > { %v4260_v22 = vmul.f32 -1.442695, %v3258_v46  ;;  %v4265_v60 = vmul.f32 -1.442695, %v3288_v2  ;;  %v9042_v31 = vrot.slane %v8432_v16, 1  ;;  %v9043_v20 = vrot.slane %v8435_v53, 1 }
 0x2b1   : > { %v4270_v55 = vmul.f32 -1.442695, %v3318_v14  ;;  %v9044_v63 = vrot.slane %v8438_v26, 1  ;;  %v9045_v4 = vrot.slane %v8455_v52, 1  ;;  %v9046_v21 = vrot.slane %v8458_v9, 1  ;;  %s8588_s27 = scalar_lea.vmem [#allocation10], %s9710_s17 }
 0x2b2   : > { %v4499_v19 = vpop.eup %4498  ;;  %4504 = vpow2.f32 %v4260_v22  ;;  %v9049_v50 = vrot.slane %v8461_v1, 1  ;;  %v9050_v18 = vrot.slane %v8472_v35, 1  ;;  %v3557_v46 = vrot.slane %v8475_v15, 1  ;;  %v4307_v14 = vld [vmem:[%s9636_s8 + $0x28] ss:$0 sm:$0xff]  ;;  %s3596_s22 = sshll.u32 %s8588_s27, 4  ;;  %s8742_s22 = int_to_ptr.vmem [resolvable:$true] %s3596_s22 }
 0x2b3   : > { %v4501_v11 = vpop.eup %4500  ;;  %v3267_v56 = vadd.f32 1.0, %v4499_v19  ;;  %4506 = vpow2.f32 %v4265_v60  ;;  %v3558_v49 = vrot.slane %v8478_v17, 1  ;;  %v3356_v22 = vsel %vm686_vm1, %v3350_v45, %v4275_v37 }
 0x2b4   : > { %v4503_v57 = vpop.eup %4502  ;;  %v3297_v0 = vadd.f32 1.0, %v4501_v11  ;;  %4508 = vpow2.f32 %v4270_v55  ;;  %v3434_v60 = vsel %vm699_vm0, %v3432_v28, %v9051_v10  ;;  %v3377_v55 = vsel %vm686_vm1, %v3371_v41, %v4283_v34  ;;  %v4331_v41 = vld [vmem:[%s9636_s8 + $0x40] ss:$0 sm:$0xff]  ;;  %v4339_v34 = vld [vmem:[%s9636_s8 + $0x48] ss:$0 sm:$0xff] }
 0x2b5   : > { %4510 = vrcp.f32 %v3267_v56  ;;  %v3327_v33 = vadd.f32 1.0, %v4503_v57  ;;  %v3398_v11 = vsel %vm686_vm1, %v3392_v3, %v4291_v51  ;;  %v4315_v56 = vld [vmem:[%s9636_s8 + $0x30] ss:$0 sm:$0xff]  ;;  %v3455_v57 = vsel %vm699_vm0, %v9048_v7, %v9047_v44 }
 0x2b6   : > { %4512 = vrcp.f32 %v3297_v0  ;;  %v4323_v0 = vld [vmem:[%s9636_s8 + $0x38] ss:$0 sm:$0xff]  ;;  %v3419_v45 = vsel %vm686_vm1, %v3413_v29, %v4299_v61  ;;  %v3497_v3 = vsel %vm699_vm0, %v9044_v63, %v9043_v20  ;;  %v3518_v51 = vsel %vm699_vm0, %v9046_v21, %v9045_v4  ;;  %v4347_v61 = vld [vmem:[%s9636_s8 + $0x50] ss:$0 sm:$0xff] }
 0x2b7   : > { %4514 = vrcp.f32 %v3327_v33  ;;  %v3476_v33 = vsel %vm699_vm0, %v9042_v31, %v9041_v30  ;;  %v3440_v29 = vsel %vm686_vm1, %v3434_v60, %v4307_v14  ;;  %v3539_v20 = vsel %vm699_vm0, %v9050_v18, %v9049_v50  ;;  %v4355_v63 = vld [vmem:[%s9636_s8 + $0x58] ss:$0 sm:$0xff]  ;;  %s8568_s8 = scalar_lea.vmem [#allocation11], %s9710_s17 }
 0x2b8   : > { %v3461_v14 = vsel %vm686_vm1, %v3455_v57, %v4315_v56  ;;  %v3482_v60 = vsel %vm686_vm1, %v3476_v33, %v4323_v0  ;;  %v3503_v50 = vsel %vm686_vm1, %v3497_v3, %v4331_v41  ;;  %v3524_v18 = vsel %vm686_vm1, %v3518_v51, %v4339_v34  ;;  %s3614_s16 = sshll.u32 %s8568_s8, 4  ;;  %s8667_s16 = int_to_ptr.vmem [resolvable:$true] %s3614_s16 }
 0x2b9   : > { %v3391_v25 = vsel %vm699_vm0, %v3389_v13, %v3390_v6  ;;  %v3412_v47 = vsel %vm699_vm0, %v3410_v48, %v3411_v23  ;;  %v9713_v62 = vrot.slane %v8415_v43, 1  ;;  %v9714_v36 = vrot.slane %v8426_v40, 1  ;;  %s4591_s6 = scalar_lea.vmem %s8667_s16, 3072  ;;  %p4598_p10 = scmp.lt.s32.totalorder %s8667_s16, %s4596_s1 }
 0x2ba   : > { %v9719_v13 = vrot.slane %v8435_v53, 1  ;;  %v9721_v48 = vrot.slane %v8458_v9, 1  ;;  %v9722_v23 = vrot.slane %v8455_v52, 1  ;;  %v9723_v40 = vrot.slane %v8472_v35, 1  ;;  %v9726_v9 = vld [vmem:[#allocation32_spill] sm:$0xff]  ;;  %p4592_p3 = scmp.ne.s32.totalorder %s8667_s16, %s4591_s6  ;;  %p4599_p0 = scmp.lt.s32.totalorder %s4597_s10, %s4591_s6 }
 0x2bb   : > { %v3433_v5 = vsel %vm699_vm0, %v9713_v62, %v3432_v28  ;;  %v9724_v58 = vrot.slane %v8461_v1, 1  ;;  %v3559_v53 = vsel %vm699_vm0, %v3557_v46, %v3558_v49 }
 0x2bc   : > { %v4505_v19 = vpop.eup %4504  ;;  %p4593_p7 = pnand %p4592_p3, %p9728_p8  ;;  %p4600_p11 = por %p4599_p0, %p4598_p10 }
 0x2bd   : > { %v4507_v37 = vpop.eup %4506  ;;  %v3266_v30 = vadd.f32 1.0, %v4505_v19  ;;  %v3560_v19 = vsel %vm699_vm0, %v3558_v49, %v3557_v46  ;;  %v3538_v16 = vsel %vm699_vm0, %v9724_v58, %v9723_v40 }
 0x2be   : > { %v4509_v31 = vpop.eup %4508  ;;  %v3296_v4 = vadd.f32 1.0, %v4507_v37  ;;  %v3566_v56 = vsel %vm686_vm1, %v3560_v19, %v4355_v63  ;;  %p4594_p9 = pneg %p4593_p7 }
 0x2bf   : > { %v4511_v21 = vpop.eup %4510  ;;  %4516 = vrcp.f32 %v3266_v30  ;;  %v3326_v44 = vadd.f32 1.0, %v4509_v31  ;;  %v3545_v31 = vsel %vm686_vm1, %v3539_v20, %v4347_v61 }
 0x2c0   : > { %v4513_v7 = vpop.eup %4512  ;;  %v3333_v10 = vadd.f32 1.0, %v4511_v21  ;;  %3339 = vst [vmem:[%s8568_s8 + $0x8] sm:$0xff] %v4511_v21  ;;  %4277 = vst [vmem:[%s8568_s8 + $0x18] sm:$0xff] %v4511_v21  ;;  %4518 = vrcp.f32 %v3296_v4  ;;  %p4601_p2 = pnand %p4600_p11, %p4594_p9 }
 0x2c1   : > { %4285 = vst [vmem:[%s8568_s8 + $0x28] sm:$0xff] %v4511_v21  ;;  %4293 = vst [vmem:[%s8568_s8 + $0x38] sm:$0xff] %v4511_v21  ;;  %v4515_v30 = vpop.eup %4514  ;;  %v3335_v57 = vadd.f32 1.0, %v4513_v7  ;;  %4520 = vrcp.f32 %v3326_v44  ;;  %v9711_v21 = vld [vmem:[#allocation33_spill] sm:$0xff] }
 0x2c2   : > { %4301 = vst [vmem:[%s8568_s8 + $0x48] sm:$0xff] %v4513_v7  ;;  %4309 = vst [vmem:[%s8568_s8 + $0x58] sm:$0xff] %v4513_v7  ;;  %v3337_v0 = vadd.f32 1.0, %v4515_v30  ;;  %v3341_v33 = vmul.f32 %v3333_v10, %v9711_v21  ;;  %v3361_v4 = vmul.f32 %v3356_v22, %v3333_v10  ;;  %v3382_v37 = vmul.f32 %v3377_v55, %v3333_v10 }
 0x2c3   : > { %4317 = vst [vmem:[%s8568_s8 + $0x68] sm:$0xff] %v4513_v7  ;;  %4325 = vst [vmem:[%s8568_s8 + $0x78] sm:$0xff] %v4513_v7  ;;  %v3403_v20 = vmul.f32 %v3398_v11, %v3333_v10  ;;  %v3424_v41 = vmul.f32 %v3419_v45, %v3335_v57  ;;  %v3445_v2 = vmul.f32 %v3440_v29, %v3335_v57 }
 0x2c4   : > { %4333 = vst [vmem:[%s8568_s8 + $0x88] sm:$0xff] %v4515_v30  ;;  %4341 = vst [vmem:[%s8568_s8 + $0x98] sm:$0xff] %v4515_v30  ;;  %v3466_v63 = vmul.f32 %v3461_v14, %v3335_v57  ;;  %v3487_v10 = vmul.f32 %v3482_v60, %v3335_v57  ;;  %v3508_v44 = vmul.f32 %v3503_v50, %v3337_v0 }
 0x2c5   : > { %4349 = vst [vmem:[%s8568_s8 + $0xa8] sm:$0xff] %v4515_v30  ;;  %4357 = vst [vmem:[%s8568_s8 + $0xb8] sm:$0xff] %v4515_v30  ;;  %v3529_v7 = vmul.f32 %v3524_v18, %v3337_v0  ;;  %v3550_v22 = vmul.f32 %v3545_v31, %v3337_v0  ;;  %v3571_v55 = vmul.f32 %v3566_v56, %v3337_v0 }
 0x2c6   : > { %3343 = vst [vmem:[%s8588_s27 + $0x8] sm:$0xff] %v3341_v33  ;;  %4279 = vst [vmem:[%s8588_s27 + $0x18] sm:$0xff] %v3361_v4  ;;  %v3349_v50 = vsel %vm699_vm0, %v3347_v12, %v3348_v54  ;;  %v3370_v11 = vsel %vm699_vm0, %v3368_v8, %v3369_v39  ;;  %v9715_v12 = vrot.slane %v8423_v32, 1  ;;  %v8646_v8 = vsel %vm699_vm0, %v9717_v27, %v9716_v42 }
 0x2c7   : > { %4287 = vst [vmem:[%s8588_s27 + $0x28] sm:$0xff] %v3382_v37  ;;  %4295 = vst [vmem:[%s8588_s27 + $0x38] sm:$0xff] %v3403_v20  ;;  %v9718_v39 = vrot.slane %v8438_v26, 1  ;;  %v3517_v32 = vsel %vm699_vm0, %v9722_v23, %v9721_v48 }
 0x2c8   : > { %4303 = vst [vmem:[%s8588_s27 + $0x48] sm:$0xff] %v3424_v41  ;;  %4311 = vst [vmem:[%s8588_s27 + $0x58] sm:$0xff] %v3445_v2  ;;  %v3454_v54 = vsel %vm699_vm0, %v9715_v12, %v9714_v36 }
 0x2c9   : > { %4319 = vst [vmem:[%s8588_s27 + $0x68] sm:$0xff] %v3466_v63  ;;  %4327 = vst [vmem:[%s8588_s27 + $0x78] sm:$0xff] %v3487_v10  ;;  %v4517_v18 = vpop.eup %4516  ;;  %v8654_v6 = vsel %vm699_vm0, %v9719_v13, %v9718_v39 }
 0x2ca   : > { %4335 = vst [vmem:[%s8588_s27 + $0x88] sm:$0xff] %v3508_v44  ;;  %4343 = vst [vmem:[%s8588_s27 + $0x98] sm:$0xff] %v3529_v7  ;;  %v4519_v38 = vpop.eup %4518  ;;  %v3332_v43 = vadd.f32 1.0, %v4517_v18 }
 0x2cb   : > { %4351 = vst [vmem:[%s8588_s27 + $0xa8] sm:$0xff] %v3550_v22  ;;  %4359 = vst [vmem:[%s8588_s27 + $0xb8] sm:$0xff] %v3571_v55  ;;  %v4521_v59 = vpop.eup %4520  ;;  %v3334_v26 = vadd.f32 1.0, %v4519_v38 }
 0x2cc   : > { %3338 = vst [vmem:[%s8568_s8] sm:$0xff] %v4517_v18  ;;  %4276 = vst [vmem:[%s8568_s8 + $0x10] sm:$0xff] %v4517_v18  ;;  %v3336_v52 = vadd.f32 1.0, %v4521_v59  ;;  %v3340_v1 = vmul.f32 %v3332_v43, %v9726_v9  ;;  %v3360_v28 = vmul.f32 %v3349_v50, %v3332_v43  ;;  %v3381_v35 = vmul.f32 %v3370_v11, %v3332_v43 }
 0x2cd   : > { %4284 = vst [vmem:[%s8568_s8 + $0x20] sm:$0xff] %v4517_v18  ;;  %4292 = vst [vmem:[%s8568_s8 + $0x30] sm:$0xff] %v4517_v18  ;;  %v3402_v24 = vmul.f32 %v3391_v25, %v3332_v43  ;;  %v3423_v15 = vmul.f32 %v3412_v47, %v3334_v26  ;;  %v3444_v17 = vmul.f32 %v3433_v5, %v3334_v26 }
 0x2ce   : > { %4300 = vst [vmem:[%s8568_s8 + $0x40] sm:$0xff] %v4519_v38  ;;  %4308 = vst [vmem:[%s8568_s8 + $0x50] sm:$0xff] %v4519_v38  ;;  %v3465_v46 = vmul.f32 %v3454_v54, %v3334_v26 }
 0x2cf   : > { %4316 = vst [vmem:[%s8568_s8 + $0x60] sm:$0xff] %v4519_v38  ;;  %4324 = vst [vmem:[%s8568_s8 + $0x70] sm:$0xff] %v4519_v38 }
 0x2d0   : > { %4332 = vst [vmem:[%s8568_s8 + $0x80] sm:$0xff] %v4521_v59  ;;  %4340 = vst [vmem:[%s8568_s8 + $0x90] sm:$0xff] %v4521_v59 }
 0x2d1   : > { %4348 = vst [vmem:[%s8568_s8 + $0xa0] sm:$0xff] %v4521_v59  ;;  %4356 = vst [vmem:[%s8568_s8 + $0xb0] sm:$0xff] %v4521_v59 }
 0x2d2   : > { %4604 = shalt.err (!%p4601_p2)
}
 0x2d3   : > { %s4605_s19 = scalar_lea.hbm %s8665_s20, 3072  ;;  %s4609_s24 = scalar_lea.hbm %s9720_s30, 6144 }
 0x2d4   : > { %p4606_p6 = scmp.ne.s32.totalorder %s8665_s20, %s4605_s19  ;;  %p4610_p13 = scmp.lt.u32.totalorder %s8665_s20, %s9720_s30 }
 0x2d5   : > { %p4611_p1 = scmp.lt.u32.totalorder %s4609_s24, %s4605_s19  ;;  %p4613_p7 = scmp.lt.u32.totalorder %s4605_s19, %s8665_s20 }
 0x2d6   : > { %p4607_p4 = pnand %p4606_p6, %p9728_p8 }
 0x2d7   : > { %p4612_p3 = por %p4611_p1, %p4610_p13 }
 0x2d8   : > { %p4608_p12 = pneg %p4607_p4 }
 0x2d9   : > { %p4614_p9 = por %p4613_p7, %p4612_p3 }
 0x2db   : > { %p4615_p10 = pnand %p4614_p9, %p4608_p12 }
 0x2dd   : > { %4618 = shalt.err (!%p4615_p10)
}
 0x2de   : > { %s4737_s29 = smov 128   ;;  %s4738_s21 = smov 8   ;;  %3342 = vst [vmem:[%s8588_s27] sm:$0xff] %v3340_v1  ;;  %4278 = vst [vmem:[%s8588_s27 + $0x10] sm:$0xff] %v3360_v28  ;;  %v3486_v49 = vmul.f32 %v8646_v8, %v3334_v26  ;;  %v3507_v45 = vmul.f32 %v8654_v6, %v3336_v52  ;;  %v3528_v3 = vmul.f32 %v3517_v32, %v3336_v52 }
 0x2df   : > { %4384 = dma.vmem_to_hbm [thread:$0]  (%p9728_p8), %s8667_s16, 3072, %s8665_s20, %s3581_s0, %s4737_s29, %s4737_s29, %s4738_s21   ;;  %v3549_v34 = vmul.f32 %v3538_v16, %v3336_v52  ;;  %v3570_v51 = vmul.f32 %v3559_v53, %v3336_v52 }
 0x2e0   : > { %4286 = vst [vmem:[%s8588_s27 + $0x20] sm:$0xff] %v3381_v35  ;;  %4294 = vst [vmem:[%s8588_s27 + $0x30] sm:$0xff] %v3402_v24  ;;  %s9729_s15 = sld [smem:[#allocation200_spill]]  ;;  %s3576_s23 = scalar_lea.sflag [#allocation5], %s9725_s18 }
 0x2e1   : > { %4302 = vst [vmem:[%s8588_s27 + $0x40] sm:$0xff] %v3423_v15  ;;  %4310 = vst [vmem:[%s8588_s27 + $0x50] sm:$0xff] %v3444_v17  ;;  %s4619_s17 = scalar_lea.vmem %s8742_s22, 3072  ;;  %s4739_s8 = smov [#allocation10]  }
 0x2e2   : > { %4318 = vst [vmem:[%s8588_s27 + $0x60] sm:$0xff] %v3465_v46  ;;  %4326 = vst [vmem:[%s8588_s27 + $0x70] sm:$0xff] %v3486_v49  ;;  %p4620_p0 = scmp.ne.s32.totalorder %s8742_s22, %s4619_s17  ;;  %s4623_s14 = sshll.u32 %s4739_s8, 4  ;;  %s4624_s14 = int_to_ptr.vmem [resolvable:$false] %s4623_s14 }
 0x2e3   : > { %4334 = vst [vmem:[%s8588_s27 + $0x80] sm:$0xff] %v3507_v45  ;;  %4342 = vst [vmem:[%s8588_s27 + $0x90] sm:$0xff] %v3528_v3  ;;  %p4626_p6 = scmp.lt.s32.totalorder %s8742_s22, %s4624_s14 }
 0x2e4   : > { %4350 = vst [vmem:[%s8588_s27 + $0xa0] sm:$0xff] %v3549_v34  ;;  %4358 = vst [vmem:[%s8588_s27 + $0xb0] sm:$0xff] %v3570_v51  ;;  %p4621_p11 = pnand %p4620_p0, %p9728_p8 }
 0x2e6   : > { %s8738_s12 = scalar_lea.hbm %s9729_s15, %s4369_s2  ;;  %p4622_p2 = pneg %p4621_p11 }
 0x2e7   : > { %s4625_s2 = scalar_lea.vmem %s4624_s14, 6144 }
 0x2e8   : > { %p4627_p4 = scmp.lt.s32.totalorder %s4625_s2, %s4619_s17 }
 0x2ea   : > { %p4628_p12 = por %p4627_p4, %p4626_p6 }
 0x2ec   : > { %p4629_p13 = pnand %p4628_p12, %p4622_p2 }
 0x2ee   : > { %4632 = shalt.err (!%p4629_p13)
}
 0x2ef   : > { %s4633_s27 = scalar_lea.hbm %s8738_s12, 3072  ;;  %s4637_s13 = scalar_lea.hbm %s9729_s15, 6144 }
 0x2f0   : > { %p4634_p1 = scmp.ne.s32.totalorder %s8738_s12, %s4633_s27  ;;  %p4638_p9 = scmp.lt.u32.totalorder %s8738_s12, %s9729_s15 }
 0x2f1   : > { %p4639_p10 = scmp.lt.u32.totalorder %s4637_s13, %s4633_s27  ;;  %p4641_p11 = scmp.lt.u32.totalorder %s4633_s27, %s8738_s12 }
 0x2f2   : > { %p4635_p3 = pnand %p4634_p1, %p9728_p8 }
 0x2f3   : > { %p4640_p0 = por %p4639_p10, %p4638_p9 }
 0x2f4   : > { %p4636_p7 = pneg %p4635_p3 }
 0x2f5   : > { %p4642_p2 = por %p4641_p11, %p4640_p0 }
 0x2f7   : > { %p4643_p6 = pnand %p4642_p2, %p4636_p7 }
 0x2f9   : > { %4646 = shalt.err (!%p4643_p6)
}
 0x2fa   : > { %4383 = dma.vmem_to_hbm [thread:$0]  (%p9728_p8), %s8742_s22, 3072, %s8738_s12, %s3576_s23, %s4737_s29, %s4737_s29, %s4738_s21  }
 0x2fb PF: > { %s9730_s6 = sld [smem:[#allocation17_spill]]  ;;  %s9731_s28 = sld [smem:[#allocation26_spill]] }
 0x2fc   : > { %s9732_s1 = sld [smem:[#allocation22_spill]] }
 0x301   : > { %s3629_s10 = sand.u32 1, %s9730_s6   ;;  %p9733_p4 = scmp.ne.s32.totalorder %s9731_s28, 0 }
 0x302   : > { %s3630_s19 = scalar_lea.sflag [#allocation5], %s3629_s10 }
 0x303   : > { %p4398_p12 = pnand %p3838_p5, %p9733_p4 }
 0x305   : > { %4696 = dma.done.wait (!%p4398_p12), %s3630_s19, 3072  }
 0x306   : > { %4698 = vsyncadd (!%p4398_p12), %s3630_s19, 4294964224  ;;  %s3639_s9 = scalar_lea.sflag [#allocation12], %s3629_s10 }
 0x307   : > { %4700 = dma.done.wait (!%p4398_p12), %s3639_s9, 3072  }
 0x308   : > { %4702 = vsyncadd (!%p4398_p12), %s3639_s9, 4294964224  ;;  %s25_s26 = sadd.s32 1, %s9732_s1   ;;  %s9734_s21 = sld [smem:[#allocation18_spill]] }
 0x309   : > { %p22_p13 = scmp.ge.s32.totalorder %s25_s26, 4   ;;  %s9735_s22 = sld [smem:[#allocation19_spill]] }
 0x30a   : > { %s9736_s23 = sld [smem:[#allocation25_spill]]  ;;  %s9737_s24 = sld [smem:[#allocation21_spill]] }
 0x30b   : > { %s9738_s25 = sld [smem:[#allocation23_spill]]  ;;  %24 = sbr.rel (!%p22_p13) target bundleno = 16 (0x10), region = 282 }
 0x312   :  { %3644 = vsyncpa [#allocation5], 1 }
 0x313   :  { %3646 = vsyncpa [#allocation5 + $0x1], 1 }
 0x314   :  { %3647 = vsyncpa [#allocation12], 1 }
 0x315   :  { %3649 = vsyncpa [#allocation12 + $0x1], 1 }
 0x316   :  { %3650 = vsyncpa [#allocation6], 1 }
 0x317   :  { %3652 = vsyncpa [#allocation6 + $0x1], 1 }
 0x318   :  { %3653 = vsyncpa [#allocation8], 1 }

</bundles_post_ra>
